<compile_context>
chip_gen: v7x
topology: tpu7x:2x2x1
jax: 0.10.0
libtpu: 0.0.40
codegen_flags: <defaults>
</compile_context>

<pallas_src>
import functools

import jax
import jax.numpy as jnp
from jax.experimental import pallas as pl
from jax.experimental.pallas import tpu as pltpu


def _unet_rec_kernel(x_ref, w_ref, b_ref, o_ref, pad_ref, *, rec_depth):
    """One batch image per grid step.

    x_ref:   (H, W, Cp)        input image, NHWC, channels padded to Cp (f32)
    w_ref:   (9*Cp, Cp)        folded conv*BN-scale weights, im2col layout (bf16)
    b_ref:   (1, Cp)           folded conv-bias + BN shift (f32)
    o_ref:   (H, W, Cp)        output image
    pad_ref: (H+2, W+2, Cp)    VMEM scratch holding the zero-padded activations
    """
    H, W, Cp = x_ref.shape
    x = x_ref[...]                      # (H, W, Cp) f32
    bias = b_ref[...]                   # (1, Cp)  broadcasts over the pixel rows
    w = w_ref[...]                      # (9*Cp, Cp) bf16, loaded once

    # Zero only the 1-pixel halo strips (not the whole slab); the interior is
    # overwritten every recurrent step, and the halo survives across steps.
    # (Re-done every grid step: with "parallel" semantics each core owns its
    #  own scratch, so a program_id==0 guard would be unsafe on megacore.)
    pad_ref[0:1, :, :] = jnp.zeros((1, W + 2, Cp), jnp.float32)
    pad_ref[H + 1:H + 2, :, :] = jnp.zeros((1, W + 2, Cp), jnp.float32)
    pad_ref[:, 0:1, :] = jnp.zeros((H + 2, 1, Cp), jnp.float32)
    pad_ref[:, W + 1:W + 2, :] = jnp.zeros((H + 2, 1, Cp), jnp.float32)

    def conv_bn_relu(inp):              # (H, W, Cp) f32 -> (H, W, Cp) f32
        # Write the interior of the padded slab, then read it back once.
        pad_ref[1:H + 1, 1:W + 1, :] = inp
        xp = pad_ref[...]               # (H+2, W+2, Cp), single VMEM load

        # im2col: stack the 9 shifted taps along the (lane) channel axis.
        # Each piece is Cp (a multiple of 128) wide, so the concat is
        # lane-tile aligned.  Tap order (dh, dw, ci) matches the weight
        # flattening done in the wrapper.
        taps = jnp.concatenate(
            [xp[dh:dh + H, dw:dw + W, :] for dh in range(3) for dw in range(3)],
            axis=-1)                    # (H, W, 9*Cp)

        # Single MXU matmul, K = 9*Cp, bf16 inputs, f32 accumulate.
        # (The reshape only collapses the leading dims; the lane dim is kept.)
        y = jnp.dot(taps.reshape(H * W, 9 * Cp).astype(jnp.bfloat16), w,
                    preferred_element_type=jnp.float32)      # (H*W, Cp) f32
        y = jnp.maximum(y + bias, 0.0)  # folded BN bias + ReLU, in f32
        return y.reshape(H, W, Cp)

    # Recurrence: X_1 = f(X);  X_{t+1} = f(X + X_t).
    cur = conv_bn_relu(x)
    if rec_depth <= 4:
        # Small static depth: a full unroll is exactly what
        # lax.fori_loop(..., unroll=True) would emit.
        for _ in range(rec_depth - 1):
            cur = conv_bn_relu(x + cur)
    else:
        # Large depth: bound vreg live ranges / code size with a real loop.
        cur = jax.lax.fori_loop(
            0, rec_depth - 1, lambda _, c: conv_bn_relu(x + c), cur)

    o_ref[...] = cur.astype(o_ref.dtype)


def unet_recurrent_block(x_nchw, w_oihw, conv_b, gamma, beta, run_mean, run_var,
                         rec_depth=3, eps=1e-5):
    """Eval-mode UNetRecurrentBlock. Accepts NCHW / OIHW (PyTorch conventions)."""
    N, C, H, W = x_nchw.shape

    # Lane-dense channels: round C up to a multiple of 128 (vreg lane width).
    # Padded input channels are zero and padded weight rows/cols + bias are
    # zero, so padded output channels stay exactly zero through the recurrence.
    Cp = ((C + 127) // 128) * 128

    x = jnp.transpose(x_nchw, (0, 2, 3, 1)).astype(jnp.float32)      # NHWC
    x = jnp.pad(x, ((0, 0), (0, 0), (0, 0), (0, Cp - C)))

    # Fold conv bias + BatchNorm (eval mode) into the weights / a bias:
    #   BN(conv_w(x) + b) = conv_{w*s}(x) + ((b - mean)*s + beta),
    #   s = gamma / sqrt(var + eps)  (scale applied on the Cout axis).
    scale = gamma / jnp.sqrt(run_var + eps)                          # (C,)
    w_hwio = jnp.transpose(w_oihw, (2, 3, 1, 0)).astype(jnp.float32) # (3,3,Ci,Co)
    w_hwio = w_hwio * scale[None, None, None, :]
    w_pad = jnp.pad(w_hwio, ((0, 0), (0, 0), (0, Cp - C), (0, Cp - C)))
    w_flat = w_pad.reshape(9 * Cp, Cp).astype(jnp.bfloat16)          # im2col rows

    bias = (conv_b - run_mean) * scale + beta                        # (C,)
    bias_p = jnp.pad(bias, (0, Cp - C)).reshape(1, Cp).astype(jnp.float32)

    kernel = functools.partial(_unet_rec_kernel, rec_depth=rec_depth)
    out = pl.pallas_call(
        kernel,
        out_shape=jax.ShapeDtypeStruct((N, H, W, Cp), jnp.float32),
        grid=(N,),                                                   # one image / step
        in_specs=[
            pl.BlockSpec((None, H, W, Cp), lambda n: (n, 0, 0, 0)),  # x (batch squeezed)
            pl.BlockSpec((9 * Cp, Cp), lambda n: (0, 0)),            # weights (resident)
            pl.BlockSpec((1, Cp), lambda n: (0, 0)),                 # bias
        ],
        out_specs=pl.BlockSpec((None, H, W, Cp), lambda n: (n, 0, 0, 0)),
        scratch_shapes=[pltpu.VMEM((H + 2, W + 2, Cp), jnp.float32)],
        compiler_params=pltpu.CompilerParams(
            # batch axis is independent -> shards across v7x's 2 TensorCores.
            dimension_semantics=("parallel",),
            # Explicit scoped-VMEM budget (re-derive per generation / tile size:
            # v7x has 64 MiB physical, v5e's scoped default is only 16 MiB).
            vmem_limit_bytes=32 * 1024 * 1024,
        ),
    )(x, w_flat, bias_p)

    out = out[..., :C]                                               # drop channel pad
    return jnp.transpose(out, (0, 3, 1, 2)).astype(x_nchw.dtype)     # back to NCHW


def _reference(x, w, conv_b, gamma, beta, mean, var, rec_depth=3, eps=1e-5):
    """Pure-JAX f32 reference (eval-mode semantics) for correctness checking."""
    def block(inp):
        y = jax.lax.conv_general_dilated(
            inp, w, window_strides=(1, 1), padding=((1, 1), (1, 1)),
            dimension_numbers=("NCHW", "OIHW", "NCHW"))
        y = y + conv_b[None, :, None, None]
        y = (y - mean[None, :, None, None]) * (
            gamma / jnp.sqrt(var + eps))[None, :, None, None]
        y = y + beta[None, :, None, None]
        return jnp.maximum(y, 0.0)

    cur = block(x)
    for _ in range(rec_depth - 1):
        cur = block(x + cur)
    return cur


if __name__ == "__main__":
    N, C, H, W = 2, 4, 16, 16
    rec_depth = 3

    key = jax.random.PRNGKey(0)
    kx, kw, kb, kg, kbeta, km, kv = jax.random.split(key, 7)

    x = jax.random.normal(kx, (N, C, H, W), jnp.float32)
    # Deterministic synthetic parameters (shapes from nn.Conv2d/BatchNorm2d).
    w_oihw = 0.1 * jax.random.normal(kw, (C, C, 3, 3), jnp.float32)
    conv_b = 0.05 * jax.random.normal(kb, (C,), jnp.float32)
    gamma = 1.0 + 0.1 * jax.random.normal(kg, (C,), jnp.float32)
    beta = 0.1 * jax.random.normal(kbeta, (C,), jnp.float32)
    run_mean = 0.05 * jax.random.normal(km, (C,), jnp.float32)
    run_var = 0.5 + jnp.abs(jax.random.normal(kv, (C,), jnp.float32)) * 0.5

    out = unet_recurrent_block(x, w_oihw, conv_b, gamma, beta, run_mean, run_var,
                               rec_depth=rec_depth)
    out = jax.block_until_ready(out)

    ref = _reference(x, w_oihw, conv_b, gamma, beta, run_mean, run_var,
                     rec_depth=rec_depth)
    assert out.shape == (N, C, H, W)
    # Tolerance loosened vs the f32 version: the conv matmuls use bf16 operands.
    assert jnp.allclose(out, ref, rtol=2e-2, atol=2e-2), "mismatch vs JAX reference"

    print("KERNEL_OK")
</pallas_src>

<mosaic_0001>
module attributes {stable_mosaic.version = 11 : i64} {
  func.func @_unet_rec_kernel(%arg0: i32, %arg1: memref<1x16x16x128xf32, #tpu.memory_space<vmem>>, %arg2: memref<1152x128xbf16, #tpu.memory_space<vmem>>, %arg3: memref<1x128xf32, #tpu.memory_space<vmem>>, %arg4: memref<1x16x16x128xf32, #tpu.memory_space<vmem>>, %arg5: memref<18x18x128xf32, #tpu.memory_space<vmem>>) attributes {dimension_semantics = [#tpu.dimension_semantics<parallel>], iteration_bounds = array<i64: 2>, scalar_prefetch = 0 : i64, scratch_operands = 1 : i64, tpu.core_type = #tpu.core_type<tc>, window_params = [{transform_indices = @transform_0, window_bounds = array<i64: 1, 16, 16, 128>}, {pipeline_mode = #tpu.pipeline_mode<synchronous>, transform_indices = @transform_1, window_bounds = array<i64: 1152, 128>}, {pipeline_mode = #tpu.pipeline_mode<synchronous>, transform_indices = @transform_2, window_bounds = array<i64: 1, 128>}, {transform_indices = @transform_3, window_bounds = array<i64: 1, 16, 16, 128>}]} {
    %c0 = arith.constant 0 : index
    %c0_0 = arith.constant 0 : index
    %c0_1 = arith.constant 0 : index
    %c0_2 = arith.constant 0 : index
    %0 = vector.load %arg1[%c0, %c0_0, %c0_1, %c0_2] : memref<1x16x16x128xf32, #tpu.memory_space<vmem>>, vector<1x16x16x128xf32>
    %1 = vector.shape_cast %0 : vector<1x16x16x128xf32> to vector<16x16x128xf32>
    %c0_3 = arith.constant 0 : index
    %c0_4 = arith.constant 0 : index
    %2 = vector.load %arg3[%c0_3, %c0_4] : memref<1x128xf32, #tpu.memory_space<vmem>>, vector<1x128xf32>
    %c0_5 = arith.constant 0 : index
    %c0_6 = arith.constant 0 : index
    %3 = vector.load %arg2[%c0_5, %c0_6] : memref<1152x128xbf16, #tpu.memory_space<vmem>>, vector<1152x128xbf16>
    %cst = arith.constant 0.000000e+00 : f32
    %4 = vector.broadcast %cst : f32 to vector<1x18x128xf32>
    %c0_7 = arith.constant 0 : index
    %c0_8 = arith.constant 0 : index
    %c0_9 = arith.constant 0 : index
    %5 = vector.load %arg5[%c0_7, %c0_8, %c0_9] : memref<18x18x128xf32, #tpu.memory_space<vmem>>, vector<1x18x128xf32>
    tpu.vector_store %arg5[%c0_7, %c0_8, %c0_9], %4 {strides = array<i32>} : memref<18x18x128xf32, #tpu.memory_space<vmem>>, vector<1x18x128xf32>,
    %cst_10 = arith.constant 0.000000e+00 : f32
    %6 = vector.broadcast %cst_10 : f32 to vector<1x18x128xf32>
    %c17 = arith.constant 17 : index
    %c0_11 = arith.constant 0 : index
    %c0_12 = arith.constant 0 : index
    %7 = vector.load %arg5[%c17, %c0_11, %c0_12] : memref<18x18x128xf32, #tpu.memory_space<vmem>>, vector<1x18x128xf32>
    tpu.vector_store %arg5[%c17, %c0_11, %c0_12], %6 {strides = array<i32>} : memref<18x18x128xf32, #tpu.memory_space<vmem>>, vector<1x18x128xf32>,
    %cst_13 = arith.constant 0.000000e+00 : f32
    %8 = vector.broadcast %cst_13 : f32 to vector<18x1x128xf32>
    %c0_14 = arith.constant 0 : index
    %c0_15 = arith.constant 0 : index
    %c0_16 = arith.constant 0 : index
    %9 = vector.load %arg5[%c0_14, %c0_15, %c0_16] : memref<18x18x128xf32, #tpu.memory_space<vmem>>, vector<18x1x128xf32>
    tpu.vector_store %arg5[%c0_14, %c0_15, %c0_16], %8 {strides = array<i32>} : memref<18x18x128xf32, #tpu.memory_space<vmem>>, vector<18x1x128xf32>,
    %cst_17 = arith.constant 0.000000e+00 : f32
    %10 = vector.broadcast %cst_17 : f32 to vector<18x1x128xf32>
    %c0_18 = arith.constant 0 : index
    %c17_19 = arith.constant 17 : index
    %c0_20 = arith.constant 0 : index
    %11 = vector.load %arg5[%c0_18, %c17_19, %c0_20] : memref<18x18x128xf32, #tpu.memory_space<vmem>>, vector<18x1x128xf32>
    tpu.vector_store %arg5[%c0_18, %c17_19, %c0_20], %10 {strides = array<i32>} : memref<18x18x128xf32, #tpu.memory_space<vmem>>, vector<18x1x128xf32>,
    %c1 = arith.constant 1 : index
    %c1_21 = arith.constant 1 : index
    %c0_22 = arith.constant 0 : index
    %12 = vector.load %arg5[%c1, %c1_21, %c0_22] : memref<18x18x128xf32, #tpu.memory_space<vmem>>, vector<16x16x128xf32>
    tpu.vector_store %arg5[%c1, %c1_21, %c0_22], %1 {strides = array<i32>} : memref<18x18x128xf32, #tpu.memory_space<vmem>>, vector<16x16x128xf32>,
    %c0_23 = arith.constant 0 : index
    %c0_24 = arith.constant 0 : index
    %c0_25 = arith.constant 0 : index
    %13 = vector.load %arg5[%c0_23, %c0_24, %c0_25] : memref<18x18x128xf32, #tpu.memory_space<vmem>>, vector<18x18x128xf32>
    %14 = vector.extract_strided_slice %13 {offsets = [0, 0, 0], sizes = [16, 16, 128], strides = [1, 1, 1]} : vector<18x18x128xf32> to vector<16x16x128xf32>
    %15 = vector.extract_strided_slice %13 {offsets = [0, 1, 0], sizes = [16, 16, 128], strides = [1, 1, 1]} : vector<18x18x128xf32> to vector<16x16x128xf32>
    %16 = vector.extract_strided_slice %13 {offsets = [0, 2, 0], sizes = [16, 16, 128], strides = [1, 1, 1]} : vector<18x18x128xf32> to vector<16x16x128xf32>
    %17 = vector.extract_strided_slice %13 {offsets = [1, 0, 0], sizes = [16, 16, 128], strides = [1, 1, 1]} : vector<18x18x128xf32> to vector<16x16x128xf32>
    %18 = vector.extract_strided_slice %13 {offsets = [1, 1, 0], sizes = [16, 16, 128], strides = [1, 1, 1]} : vector<18x18x128xf32> to vector<16x16x128xf32>
    %19 = vector.extract_strided_slice %13 {offsets = [1, 2, 0], sizes = [16, 16, 128], strides = [1, 1, 1]} : vector<18x18x128xf32> to vector<16x16x128xf32>
    %20 = vector.extract_strided_slice %13 {offsets = [2, 0, 0], sizes = [16, 16, 128], strides = [1, 1, 1]} : vector<18x18x128xf32> to vector<16x16x128xf32>
    %21 = vector.extract_strided_slice %13 {offsets = [2, 1, 0], sizes = [16, 16, 128], strides = [1, 1, 1]} : vector<18x18x128xf32> to vector<16x16x128xf32>
    %22 = vector.extract_strided_slice %13 {offsets = [2, 2, 0], sizes = [16, 16, 128], strides = [1, 1, 1]} : vector<18x18x128xf32> to vector<16x16x128xf32>
    %23 = tpu.concatenate %14, %15, %16, %17, %18, %19, %20, %21, %22 in 2 : vector<16x16x128xf32>, vector<16x16x128xf32>, vector<16x16x128xf32>, vector<16x16x128xf32>, vector<16x16x128xf32>, vector<16x16x128xf32>, vector<16x16x128xf32>, vector<16x16x128xf32>, vector<16x16x128xf32> -> vector<16x16x1152xf32>
    %24 = vector.shape_cast %23 : vector<16x16x1152xf32> to vector<256x1152xf32>
    %25 = arith.truncf %24 : vector<256x1152xf32> to vector<256x1152xbf16>
    %cst_26 = arith.constant dense<0.000000e+00> : vector<256x128xf32>
    %26 = tpu.matmul %25, %3, %cst_26 {dimension_numbers = #tpu.dot_dimension_numbers<[1], [0], [0], [1], [0, 0, 1, 1], [], []>} : vector<256x1152xbf16>, vector<1152x128xbf16>, vector<256x128xf32> -> vector<256x128xf32>
    %27 = vector.broadcast %2 : vector<1x128xf32> to vector<256x128xf32>
    %28 = arith.addf %26, %27 : vector<256x128xf32>
    %cst_27 = arith.constant 0.000000e+00 : f32
    %29 = vector.broadcast %cst_27 : f32 to vector<256x128xf32>
    %30 = arith.maximumf %28, %29 : vector<256x128xf32>
    %31 = vector.shape_cast %30 : vector<256x128xf32> to vector<16x16x128xf32>
    %32 = arith.addf %1, %31 : vector<16x16x128xf32>
    %c1_28 = arith.constant 1 : index
    %c1_29 = arith.constant 1 : index
    %c0_30 = arith.constant 0 : index
    %33 = vector.load %arg5[%c1_28, %c1_29, %c0_30] : memref<18x18x128xf32, #tpu.memory_space<vmem>>, vector<16x16x128xf32>
    tpu.vector_store %arg5[%c1_28, %c1_29, %c0_30], %32 {strides = array<i32>} : memref<18x18x128xf32, #tpu.memory_space<vmem>>, vector<16x16x128xf32>,
    %c0_31 = arith.constant 0 : index
    %c0_32 = arith.constant 0 : index
    %c0_33 = arith.constant 0 : index
    %34 = vector.load %arg5[%c0_31, %c0_32, %c0_33] : memref<18x18x128xf32, #tpu.memory_space<vmem>>, vector<18x18x128xf32>
    %35 = vector.extract_strided_slice %34 {offsets = [0, 0, 0], sizes = [16, 16, 128], strides = [1, 1, 1]} : vector<18x18x128xf32> to vector<16x16x128xf32>
    %36 = vector.extract_strided_slice %34 {offsets = [0, 1, 0], sizes = [16, 16, 128], strides = [1, 1, 1]} : vector<18x18x128xf32> to vector<16x16x128xf32>
    %37 = vector.extract_strided_slice %34 {offsets = [0, 2, 0], sizes = [16, 16, 128], strides = [1, 1, 1]} : vector<18x18x128xf32> to vector<16x16x128xf32>
    %38 = vector.extract_strided_slice %34 {offsets = [1, 0, 0], sizes = [16, 16, 128], strides = [1, 1, 1]} : vector<18x18x128xf32> to vector<16x16x128xf32>
    %39 = vector.extract_strided_slice %34 {offsets = [1, 1, 0], sizes = [16, 16, 128], strides = [1, 1, 1]} : vector<18x18x128xf32> to vector<16x16x128xf32>
    %40 = vector.extract_strided_slice %34 {offsets = [1, 2, 0], sizes = [16, 16, 128], strides = [1, 1, 1]} : vector<18x18x128xf32> to vector<16x16x128xf32>
    %41 = vector.extract_strided_slice %34 {offsets = [2, 0, 0], sizes = [16, 16, 128], strides = [1, 1, 1]} : vector<18x18x128xf32> to vector<16x16x128xf32>
    %42 = vector.extract_strided_slice %34 {offsets = [2, 1, 0], sizes = [16, 16, 128], strides = [1, 1, 1]} : vector<18x18x128xf32> to vector<16x16x128xf32>
    %43 = vector.extract_strided_slice %34 {offsets = [2, 2, 0], sizes = [16, 16, 128], strides = [1, 1, 1]} : vector<18x18x128xf32> to vector<16x16x128xf32>
    %44 = tpu.concatenate %35, %36, %37, %38, %39, %40, %41, %42, %43 in 2 : vector<16x16x128xf32>, vector<16x16x128xf32>, vector<16x16x128xf32>, vector<16x16x128xf32>, vector<16x16x128xf32>, vector<16x16x128xf32>, vector<16x16x128xf32>, vector<16x16x128xf32>, vector<16x16x128xf32> -> vector<16x16x1152xf32>
    %45 = vector.shape_cast %44 : vector<16x16x1152xf32> to vector<256x1152xf32>
    %46 = arith.truncf %45 : vector<256x1152xf32> to vector<256x1152xbf16>
    %cst_34 = arith.constant dense<0.000000e+00> : vector<256x128xf32>
    %47 = tpu.matmul %46, %3, %cst_34 {dimension_numbers = #tpu.dot_dimension_numbers<[1], [0], [0], [1], [0, 0, 1, 1], [], []>} : vector<256x1152xbf16>, vector<1152x128xbf16>, vector<256x128xf32> -> vector<256x128xf32>
    %48 = vector.broadcast %2 : vector<1x128xf32> to vector<256x128xf32>
    %49 = arith.addf %47, %48 : vector<256x128xf32>
    %cst_35 = arith.constant 0.000000e+00 : f32
    %50 = vector.broadcast %cst_35 : f32 to vector<256x128xf32>
    %51 = arith.maximumf %49, %50 : vector<256x128xf32>
    %52 = vector.shape_cast %51 : vector<256x128xf32> to vector<16x16x128xf32>
    %53 = arith.addf %1, %52 : vector<16x16x128xf32>
    %c1_36 = arith.constant 1 : index
    %c1_37 = arith.constant 1 : index
    %c0_38 = arith.constant 0 : index
    %54 = vector.load %arg5[%c1_36, %c1_37, %c0_38] : memref<18x18x128xf32, #tpu.memory_space<vmem>>, vector<16x16x128xf32>
    tpu.vector_store %arg5[%c1_36, %c1_37, %c0_38], %53 {strides = array<i32>} : memref<18x18x128xf32, #tpu.memory_space<vmem>>, vector<16x16x128xf32>,
    %c0_39 = arith.constant 0 : index
    %c0_40 = arith.constant 0 : index
    %c0_41 = arith.constant 0 : index
    %55 = vector.load %arg5[%c0_39, %c0_40, %c0_41] : memref<18x18x128xf32, #tpu.memory_space<vmem>>, vector<18x18x128xf32>
    %56 = vector.extract_strided_slice %55 {offsets = [0, 0, 0], sizes = [16, 16, 128], strides = [1, 1, 1]} : vector<18x18x128xf32> to vector<16x16x128xf32>
    %57 = vector.extract_strided_slice %55 {offsets = [0, 1, 0], sizes = [16, 16, 128], strides = [1, 1, 1]} : vector<18x18x128xf32> to vector<16x16x128xf32>
    %58 = vector.extract_strided_slice %55 {offsets = [0, 2, 0], sizes = [16, 16, 128], strides = [1, 1, 1]} : vector<18x18x128xf32> to vector<16x16x128xf32>
    %59 = vector.extract_strided_slice %55 {offsets = [1, 0, 0], sizes = [16, 16, 128], strides = [1, 1, 1]} : vector<18x18x128xf32> to vector<16x16x128xf32>
    %60 = vector.extract_strided_slice %55 {offsets = [1, 1, 0], sizes = [16, 16, 128], strides = [1, 1, 1]} : vector<18x18x128xf32> to vector<16x16x128xf32>
    %61 = vector.extract_strided_slice %55 {offsets = [1, 2, 0], sizes = [16, 16, 128], strides = [1, 1, 1]} : vector<18x18x128xf32> to vector<16x16x128xf32>
    %62 = vector.extract_strided_slice %55 {offsets = [2, 0, 0], sizes = [16, 16, 128], strides = [1, 1, 1]} : vector<18x18x128xf32> to vector<16x16x128xf32>
    %63 = vector.extract_strided_slice %55 {offsets = [2, 1, 0], sizes = [16, 16, 128], strides = [1, 1, 1]} : vector<18x18x128xf32> to vector<16x16x128xf32>
    %64 = vector.extract_strided_slice %55 {offsets = [2, 2, 0], sizes = [16, 16, 128], strides = [1, 1, 1]} : vector<18x18x128xf32> to vector<16x16x128xf32>
    %65 = tpu.concatenate %56, %57, %58, %59, %60, %61, %62, %63, %64 in 2 : vector<16x16x128xf32>, vector<16x16x128xf32>, vector<16x16x128xf32>, vector<16x16x128xf32>, vector<16x16x128xf32>, vector<16x16x128xf32>, vector<16x16x128xf32>, vector<16x16x128xf32>, vector<16x16x128xf32> -> vector<16x16x1152xf32>
    %66 = vector.shape_cast %65 : vector<16x16x1152xf32> to vector<256x1152xf32>
    %67 = arith.truncf %66 : vector<256x1152xf32> to vector<256x1152xbf16>
    %cst_42 = arith.constant dense<0.000000e+00> : vector<256x128xf32>
    %68 = tpu.matmul %67, %3, %cst_42 {dimension_numbers = #tpu.dot_dimension_numbers<[1], [0], [0], [1], [0, 0, 1, 1], [], []>} : vector<256x1152xbf16>, vector<1152x128xbf16>, vector<256x128xf32> -> vector<256x128xf32>
    %69 = vector.broadcast %2 : vector<1x128xf32> to vector<256x128xf32>
    %70 = arith.addf %68, %69 : vector<256x128xf32>
    %cst_43 = arith.constant 0.000000e+00 : f32
    %71 = vector.broadcast %cst_43 : f32 to vector<256x128xf32>
    %72 = arith.maximumf %70, %71 : vector<256x128xf32>
    %73 = vector.shape_cast %72 : vector<256x128xf32> to vector<16x16x128xf32>
    %c0_44 = arith.constant 0 : index
    %c0_45 = arith.constant 0 : index
    %c0_46 = arith.constant 0 : index
    %c0_47 = arith.constant 0 : index
    %74 = vector.load %arg4[%c0_44, %c0_45, %c0_46, %c0_47] : memref<1x16x16x128xf32, #tpu.memory_space<vmem>>, vector<1x16x16x128xf32>
    %75 = vector.shape_cast %74 : vector<1x16x16x128xf32> to vector<16x16x128xf32>
    %76 = vector.shape_cast %73 : vector<16x16x128xf32> to vector<1x16x16x128xf32>
    tpu.vector_store %arg4[%c0_44, %c0_45, %c0_46, %c0_47], %76 {strides = array<i32>} : memref<1x16x16x128xf32, #tpu.memory_space<vmem>>, vector<1x16x16x128xf32>,
    return
  }
  func.func @transform_0(%arg0: i32) -> (i32, i32, i32, i32) {
    %c0_i32 = arith.constant 0 : i32
    %c0_i32_0 = arith.constant 0 : i32
    %c0_i32_1 = arith.constant 0 : i32
    %c0_i32_2 = arith.constant 0 : i32
    return %arg0, %c0_i32, %c0_i32_0, %c0_i32_1 : i32, i32, i32, i32
  }
  func.func @transform_1(%arg0: i32) -> (i32, i32) {
    %c0_i32 = arith.constant 0 : i32
    %c0_i32_0 = arith.constant 0 : i32
    %c0_i32_1 = arith.constant 0 : i32
    return %c0_i32, %c0_i32_0 : i32, i32
  }
  func.func @transform_2(%arg0: i32) -> (i32, i32) {
    %c0_i32 = arith.constant 0 : i32
    %c0_i32_0 = arith.constant 0 : i32
    %c0_i32_1 = arith.constant 0 : i32
    return %c0_i32, %c0_i32_0 : i32, i32
  }
  func.func @transform_3(%arg0: i32) -> (i32, i32, i32, i32) {
    %c0_i32 = arith.constant 0 : i32
    %c0_i32_0 = arith.constant 0 : i32
    %c0_i32_1 = arith.constant 0 : i32
    %c0_i32_2 = arith.constant 0 : i32
    return %arg0, %c0_i32, %c0_i32_0, %c0_i32_1 : i32, i32, i32, i32
  }
}

</mosaic_0001>

<bundles_post_ra>
// kernel: tpu_custom_call.1
= control target key start
LH: loop header
LB: loop body
LE: loop exit
PB: predicated region body
PF: predicated region fallthrough
CT: control target
= control target key end

     0   :  { %8 = vsyncpa [#allocation4], 0  ;;  %s9789_s0 = inlined_call_operand.hbm [shape: f32[2,16,16,128], index: 0, kind: input, shape index: {}]   ;;  %s9790_s1 = inlined_call_operand.hbm [shape: bf16[1152,128], index: 1, kind: input, shape index: {}]   ;;  %s9791_s2 = inlined_call_operand.vmem [shape: f32[1,128], index: 2, kind: input, shape index: {}]   ;;  %s9792_s3 = inlined_call_operand.hbm [shape: f32[2,16,16,128], index: 3, kind: output, shape index: {}]  }
   0x1   :  { %10 = vsyncpa [#allocation4 + $0x1], 0 }
   0x2   :  { %11 = vsyncpa [#allocation7], 0 }
   0x3   :  { %12 = vsyncpa [#allocation5], 0 }
   0x4   :  { %14 = vsyncpa [#allocation5 + $0x1], 0  ;;  %s7059_s12 = smov 0   ;;  %s7061_s13 = smov 0  }
   0x5   :  { %s7063_s14 = smov 0   ;;  %s7065_s15 = smov 0  }
   0x6 LB: > { %s7080_s16 = sadd.s32 4294967295, %s7027_s15   ;;  %s4908_s17 = sadd.s32 4294967294, %s7027_s15   ;;  %s7027_s15 = sphi %s7065_s15, %s9923_s15   ;;  %s7023_s14 = sphi %s7063_s14, %s9922_s14   ;;  %s7019_s13 = sphi %s7061_s13, %s9921_s13   ;;  %s7015_s12 = sphi %s7059_s12, %s9920_s12  }
   0x7   : > { %p40_p0 = scmp.ne.s32.totalorder %s7019_s13, %s7015_s12  ;;  %p9793_p1 = scmp.eq.s32.totalorder %s7080_s16, 0 }
   0x8   : > { %p112_p3 = scmp.eq.s32.totalorder %s4908_s17, 1  ;;  %p4909_p5 = scmp.ge.s32.totalorder %s7027_s15, 1 }
   0x9   : > { %p7089_p4 = por %p9793_p1, %p40_p0  ;;  %p119_p7 = scmp.lt.s32.totalorder %s7027_s15, 3 }
   0xa   : > { %p7094_p6 = por %p112_p3, %p40_p0  ;;  %s7029_s21 = smov [#allocation6]  }
   0xb   : > { %s9835_s18 = scalar_select %p7089_p4, 1, 0 }
   0xc   : > { %s9836_s19 = scalar_select %p7094_p6, 1, 0 }
   0xd   : > { %p7099_p8 = pnand %p4909_p5, %p119_p7  ;;  %s131_s22 = sshll.u32 %s7029_s21, 4  ;;  %s7103_s22 = int_to_ptr.vmem [resolvable:$true] %s131_s22 }
   0xe   : > { %s7115_s24 = sadd.s32 1, %s7027_s15   ;;  %s27_s25 = sadd.s32 1, %s7023_s14 }
   0xf   : > { %s9837_s20 = scalar_select %p7099_p8, 1, 0 }
  0x10   : > { %p6583_p9 = pneg %p7099_p8  ;;  %s24_s26 = ssub.s32 %s7027_s15, %s7115_s24 }
  0x11   : > { %s6899_s29 = scalar_lea.hbm %s9790_s1, 9216 }
  0x12   : > { %p7110_p11 = pnand %p6583_p9, %p9793_p1  ;;  %p6900_p12 = scmp.ne.s32.totalorder %s9790_s1, %s6899_s29 }
  0x13   : > { %p6906_p5 = scmp.lt.u32.totalorder %s6899_s29, %s9790_s1 }
  0x14   : > { %p6901_p13 = pneg %p7110_p11 }
  0x16   : > { %p6902_p0 = pnand %p6901_p13, %p6900_p12 }
  0x18   : > { %p6903_p3 = pneg %p6902_p0 }
  0x1a   : > { %p6908_p7 = pnand %p6906_p5, %p6903_p3 }
  0x1c   : > { %6911 = shalt.err (!%p6908_p7)
}
  0x1d   : > { %s6912_s7 = scalar_lea.vmem %s7103_s22, 9216  ;;  %p6920_p2 = scmp.lt.s32.totalorder %s7103_s22, %s7103_s22 }
  0x1e   : > { %p6913_p9 = scmp.ne.s32.totalorder %s7103_s22, %s6912_s7  ;;  %p6921_p6 = scmp.lt.s32.totalorder %s6912_s7, %s6912_s7 }
  0x20   : > { %p6915_p10 = pnand %p6913_p9, %p6901_p13  ;;  %p6922_p4 = por %p6921_p6, %p6920_p2 }
  0x22   : > { %p6916_p1 = pneg %p6915_p10 }
  0x24   : > { %p6923_p8 = pnand %p6922_p4, %p6916_p1 }
  0x26   : > { %6926 = shalt.err (!%p6923_p8)
}
  0x27   : > { %s7030_s8 = smov 64   ;;  %s7031_s9 = smov 4  }
  0x28   : > { %6586 = dma.hbm_to_vmem [thread:$0]  (!%p7110_p11), %s9790_s1, 9216, %s7103_s22, [#allocation7], %s7030_s8, %s7030_s8, %s7031_s9  }
  0x29   : > { %p25_p2 = scmp.eq.s32.totalorder %s24_s26, 0  ;;  %p34_p1 = scmp.ne.s32.totalorder %s7023_s14, %s7019_s13 }
  0x2a   : > { %p35_p4 = scmp.eq.s32.totalorder %s7027_s15, 0  ;;  %p6596_p6 = scmp.lt.s32.totalorder %s7027_s15, 2 }
  0x2b   : > { %s7146_s17 = scalar_select %p25_p2, %s7023_s14, %s27_s25  }
  0x2c   : > { %p36_p8 = por %p35_p4, %p34_p1  ;;  %p9839_p10 = scmp.eq.s32.totalorder %s7080_s16, 1 }
  0x2d   : > { %s148_s27 = sand.u32 1, %s7023_s14   ;;  %s4997_s28 = sshll.u32 %s7027_s15, 12 }
  0x2e   : > { %p7150_p12 = por %p9839_p10, %p34_p1  ;;  %s4912_s29 = sshll.u32 %s148_s27, 8 }
  0x2f   : > { %s7159_s4 = scalar_lea.hbm %s9789_s0, %s4997_s28  ;;  %s152_s22 = scalar_lea.vmem [#allocation3], %s4912_s29 }
  0x30   : > { %s159_s25 = sshll.u32 %s152_s22, 4  ;;  %p7161_p11 = pnand %p6596_p6, %p36_p8  ;;  %s7165_s25 = int_to_ptr.vmem [resolvable:$true] %s159_s25 }
  0x31   : > { %s7167_s5 = scalar_lea.sflag [#allocation4], %s148_s27  ;;  %s6927_s6 = scalar_lea.hbm %s7159_s4, 4096 }
  0x32   : > { %p6928_p13 = scmp.ne.s32.totalorder %s7159_s4, %s6927_s6  ;;  %p6929_p0 = pneg %p7161_p11 }
  0x33   : > { %s6932_s9 = scalar_lea.hbm %s9789_s0, 8192  ;;  %p6933_p7 = scmp.lt.u32.totalorder %s7159_s4, %s9789_s0 }
  0x34   : > { %p6930_p3 = pnand %p6929_p0, %p6928_p13  ;;  %p6934_p9 = scmp.lt.u32.totalorder %s6932_s9, %s6927_s6 }
  0x35   : > { %p6936_p1 = scmp.lt.u32.totalorder %s6927_s6, %s7159_s4 }
  0x36   : > { %p6931_p5 = pneg %p6930_p3  ;;  %p6935_p2 = por %p6934_p9, %p6933_p7 }
  0x38   : > { %p6937_p4 = por %p6936_p1, %p6935_p2 }
  0x3a   : > { %p6938_p6 = pnand %p6937_p4, %p6931_p5 }
  0x3c   : > { %6941 = shalt.err (!%p6938_p6)
}
  0x3d   : > { %s6942_s27 = scalar_lea.vmem %s7165_s25, 4096  ;;  %s7032_s28 = smov [#allocation3]  }
  0x3e   : > { %p6943_p8 = scmp.ne.s32.totalorder %s7165_s25, %s6942_s27  ;;  %s6947_s29 = sshll.u32 %s7032_s28, 4  ;;  %s6948_s29 = int_to_ptr.vmem [resolvable:$false] %s6947_s29 }
  0x3f   : > { %s6949_s23 = scalar_lea.vmem %s6948_s29, 8192  ;;  %p6950_p3 = scmp.lt.s32.totalorder %s7165_s25, %s6948_s29 }
  0x40   : > { %p6945_p10 = pnand %p6943_p8, %p6929_p0  ;;  %p6951_p7 = scmp.lt.s32.totalorder %s6949_s23, %s6942_s27 }
  0x42   : > { %p6946_p13 = pneg %p6945_p10  ;;  %p6952_p9 = por %p6951_p7, %p6950_p3 }
  0x44   : > { %p6953_p2 = pnand %p6952_p9, %p6946_p13 }
  0x46   : > { %6956 = shalt.err (!%p6953_p2)
}
  0x47   : > { %s7033_s30 = smov 128   ;;  %s7034_s22 = smov 8  }
  0x48   : > { %6590 = dma.hbm_to_vmem [thread:$0]  (!%p7161_p11), %s7159_s4, 4096, %s7165_s25, %s7167_s5, %s7033_s30, %s7033_s30, %s7034_s22  }
  0x49   : > { %p9842_p0 = scmp.ne.s32.totalorder %s9837_s20, 0 }
  0x4b   : > { %171 = sbr.rel (%p9842_p0) target bundleno = 1606 (0x646), region = 32 }
  0x52   : > { %s7198_s6 = sand.u32 1, %s7019_s13   ;;  %p9843_p5 = scmp.ne.s32.totalorder %s9835_s18, 0 }
  0x53   : > { %s4916_s7 = sshll.u32 %s7198_s6, 8  ;;  %s174_s8 = scalar_lea.sflag [#allocation4], %s7198_s6 }
  0x54   : > { %s7204_s9 = scalar_lea.vmem [#allocation3], %s4916_s7 }
  0x55   : > { %7002 = dma.done.wait (%p9843_p5), %s174_s8, 4096  }
  0x56   : > { %7004 = vsyncadd (%p9843_p5), %s174_s8, 4294963200  ;;  %p9844_p11 = scmp.eq.s32.totalorder %s7080_s16, 0 }
  0x58   : > { %7006 = dma.done.wait (%p9844_p11), [#allocation7], 9216   ;;  %p9845_p1 = pmov %p9844_p11 }
  0x59   : > { %v7035_v0 = vmov 0.0   ;;  %v6639_v1 = vld [vmem:[#allocation6 + $0x40] sm:$0xff]   ;;  %v6641_v3 = vld [vmem:[#allocation6 + $0x48] sm:$0xff]   ;;  %v6643_v5 = vld [vmem:[#allocation6 + $0x50] sm:$0xff]   ;;  %vm560_vm0 = vcmask 1046528   ;;  %vm673_vm1 = vcmask 1045504  }
  0x5a   : > { %7008 = vsyncadd (%p9845_p1), [#allocation7], 4294958080  ;;  %382 = vst [vmem:[#allocation2] sm:$0xff] %v7035_v0  ;;  %v6640_v2 = vld [vmem:[#allocation6] sm:$0xff]   ;;  %4999 = vmatprep.subr.bf16.mxu0 %v6639_v1  ;;  %6559 = vmatprep.subr.bf16.mxu1 %v6639_v1  ;;  %v6642_v4 = vld [vmem:[#allocation6 + $0x8] sm:$0xff]   ;;  %v562_v12 = vrot.slane %v7035_v0, 1 }
  0x5b   : > { %383 = vst [vmem:[#allocation2 + $0x8] sm:$0xff] %v7035_v0  ;;  %384 = vst [vmem:[#allocation2 + $0x10] sm:$0x3] %v7035_v0  ;;  %5000 = vmatpush3.bf16.msra.mxu0 %v6640_v2  ;;  %6567 = vmatpush3.bf16.msra.mxu1 %v6640_v2  ;;  %v6644_v6 = vld [vmem:[#allocation6 + $0x10] sm:$0xff]   ;;  %v6645_v7 = vld [vmem:[#allocation6 + $0x58] sm:$0xff]   ;;  %s9676_s10 = scalar_lea.vmem [#allocation8], %s4916_s7 }
  0x5c   : > { %386 = vst [vmem:[#allocation2 + $0x198] sm:$0xff] %v7035_v0  ;;  %388 = vst [vmem:[#allocation2 + $0x1a8] sm:$0x3] %v7035_v0  ;;  %5001 = vmatprep.subr.bf16.mxu0 %v6641_v3  ;;  %6560 = vmatprep.subr.bf16.mxu1 %v6641_v3  ;;  %v6646_v8 = vld [vmem:[#allocation6 + $0x18] sm:$0xff]   ;;  %v6647_v9 = vld [vmem:[#allocation6 + $0x60] sm:$0xff]   ;;  %s4998_s11 = sshll.u32 %s7080_s16, 12 }
  0x5d   : > { %390 = vst [vmem:[#allocation2 + $0x18] sm:$0x1] %v7035_v0  ;;  %391 = vst [vmem:[#allocation2 + $0x30] sm:$0x1] %v7035_v0  ;;  %v6648_v10 = vld [vmem:[#allocation6 + $0x20] sm:$0xff]   ;;  %v6649_v11 = vld [vmem:[#allocation6 + $0x68] sm:$0xff]   ;;  %s9740_s23 = scalar_lea.hbm %s9792_s3, %s4998_s11 }
  0x5e   : > { %392 = vst [vmem:[#allocation2 + $0x48] sm:$0x1] %v7035_v0  ;;  %393 = vst [vmem:[#allocation2 + $0x60] sm:$0x1] %v7035_v0  ;;  %v227_v15 = vld [vmem:[%s7204_s9 + $0xb0] sm:$0xff]  ;;  %v228_v18 = vld [vmem:[%s7204_s9 + $0xb8] sm:$0xff] }
  0x5f   : > { %394 = vst [vmem:[#allocation2 + $0x78] sm:$0x1] %v7035_v0  ;;  %395 = vst [vmem:[#allocation2 + $0x90] sm:$0x1] %v7035_v0  ;;  %5002 = vmatpush3.bf16.msra.mxu0 %v6642_v4  ;;  %6568 = vmatpush3.bf16.msra.mxu1 %v6642_v4  ;;  %v6650_v19 = vld [vmem:[#allocation6 + $0x28] sm:$0xff]   ;;  %v6651_v22 = vld [vmem:[#allocation6 + $0x70] sm:$0xff]  }
  0x60   : > { %396 = vst [vmem:[#allocation2 + $0xa8] sm:$0x1] %v7035_v0  ;;  %397 = vst [vmem:[#allocation2 + $0xc0] sm:$0x1] %v7035_v0  ;;  %5003 = vmatprep.subr.bf16.mxu0 %v6643_v5  ;;  %6561 = vmatprep.subr.bf16.mxu1 %v6643_v5  ;;  %v6652_v24 = vld [vmem:[#allocation6 + $0x30] sm:$0xff]   ;;  %v6653_v25 = vld [vmem:[#allocation6 + $0x78] sm:$0xff]  }
  0x61   : > { %398 = vst [vmem:[#allocation2 + $0xd8] sm:$0x1] %v7035_v0  ;;  %399 = vst [vmem:[#allocation2 + $0xf0] sm:$0x1] %v7035_v0  ;;  %v205_v26 = vld [vmem:[%s7204_s9] sm:$0xff]  ;;  %v206_v28 = vld [vmem:[%s7204_s9 + $0x8] sm:$0xff] }
  0x62   : > { %400 = vst [vmem:[#allocation2 + $0x108] sm:$0x1] %v7035_v0  ;;  %401 = vst [vmem:[#allocation2 + $0x120] sm:$0x1] %v7035_v0  ;;  %v229_v29 = vld [vmem:[%s7204_s9 + $0xc0] sm:$0xff]  ;;  %v6654_v30 = vld [vmem:[#allocation6 + $0x38] sm:$0xff]  }
  0x63   : > { %402 = vst [vmem:[#allocation2 + $0x138] sm:$0x1] %v7035_v0  ;;  %403 = vst [vmem:[#allocation2 + $0x150] sm:$0x1] %v7035_v0  ;;  %5004 = vmatpush3.bf16.msra.mxu0 %v6644_v6  ;;  %6569 = vmatpush3.bf16.msra.mxu1 %v6644_v6  ;;  %v230_v34 = vld [vmem:[%s7204_s9 + $0xc8] sm:$0xff]  ;;  %v6655_v37 = vld [vmem:[#allocation6 + $0xc0] sm:$0xff]  }
  0x64   : > { %404 = vst [vmem:[#allocation2 + $0x168] sm:$0x1] %v7035_v0  ;;  %405 = vst [vmem:[#allocation2 + $0x180] sm:$0x1] %v7035_v0  ;;  %5005 = vmatprep.subr.bf16.mxu0 %v6645_v7  ;;  %6562 = vmatprep.subr.bf16.mxu1 %v6645_v7  ;;  %v6656_v40 = vld [vmem:[#allocation6 + $0x140] sm:$0xff]   ;;  %v6659_v46 = vld [vmem:[#allocation6 + $0xc8] sm:$0xff]  }
  0x65   : > { %408 = vst [vmem:[#allocation2 + $0x29] sm:$0x1] %v7035_v0  ;;  %409 = vst [vmem:[#allocation2 + $0x41] sm:$0x1] %v7035_v0  ;;  %v6657_v42 = vld [vmem:[#allocation6 + $0x80] sm:$0xff]   ;;  %v6664_v48 = vld [vmem:[#allocation6 + $0x148] sm:$0xff]  }
  0x66   : > { %410 = vst [vmem:[#allocation2 + $0x59] sm:$0x1] %v7035_v0  ;;  %411 = vst [vmem:[#allocation2 + $0x71] sm:$0x1] %v7035_v0  ;;  %v6658_v43 = vld [vmem:[#allocation6 + $0x100] sm:$0xff]   ;;  %v6660_v53 = vld [vmem:[#allocation6 + $0x88] sm:$0xff]  }
  0x67   : > { %412 = vst [vmem:[#allocation2 + $0x89] sm:$0x1] %v7035_v0  ;;  %413 = vst [vmem:[#allocation2 + $0xa1] sm:$0x1] %v7035_v0  ;;  %5006 = vmatpush3.bf16.msra.mxu0 %v6646_v8  ;;  %6570 = vmatpush3.bf16.msra.mxu1 %v6646_v8  ;;  %v6661_v61 = vld [vmem:[#allocation6 + $0xd0] sm:$0xff]   ;;  %v208_v2 = vld [vmem:[%s7204_s9 + $0x18] sm:$0xff] }
  0x68   : > { %414 = vst [vmem:[#allocation2 + $0xb9] sm:$0x1] %v7035_v0  ;;  %415 = vst [vmem:[#allocation2 + $0xd1] sm:$0x1] %v7035_v0  ;;  %5007 = vmatprep.subr.bf16.mxu0 %v6647_v9  ;;  %6563 = vmatprep.subr.bf16.mxu1 %v6647_v9  ;;  %v207_v62 = vld [vmem:[%s7204_s9 + $0x10] sm:$0xff]  ;;  %v232_v4 = vld [vmem:[%s7204_s9 + $0xd8] sm:$0xff] }
  0x69   : > { %416 = vst [vmem:[#allocation2 + $0xe9] sm:$0x1] %v7035_v0  ;;  %417 = vst [vmem:[#allocation2 + $0x101] sm:$0x1] %v7035_v0  ;;  %v231_v3 = vld [vmem:[%s7204_s9 + $0xd0] sm:$0xff]  ;;  %v6666_v8 = vld [vmem:[#allocation6 + $0x108] sm:$0xff]  }
  0x6a   : > { %418 = vst [vmem:[#allocation2 + $0x119] sm:$0x1] %v7035_v0  ;;  %419 = vst [vmem:[#allocation2 + $0x131] sm:$0x1] %v7035_v0  ;;  %s4825_s27 = sshll.u32 %s9676_s10, 4  ;;  %s4812_s16 = scalar_lea.sflag [#allocation5], %s7198_s6  ;;  %s9742_s27 = int_to_ptr.vmem [resolvable:$true] %s4825_s27 }
  0x6b   : > { %420 = vst [vmem:[#allocation2 + $0x149] sm:$0x1] %v7035_v0  ;;  %421 = vst [vmem:[#allocation2 + $0x161] sm:$0x1] %v7035_v0  ;;  %5008 = vmatpush3.bf16.msra.mxu0 %v6648_v10  ;;  %6571 = vmatpush3.bf16.msra.mxu1 %v6648_v10  ;;  %s6957_s30 = scalar_lea.vmem %s9742_s27, 4096  ;;  %s7036_s22 = smov [#allocation8]  }
  0x6c   : > { %422 = vst [vmem:[#allocation2 + $0x179] sm:$0x1] %v7035_v0  ;;  %423 = vst [vmem:[#allocation2 + $0x191] sm:$0x1] %v7035_v0  ;;  %5009 = vmatprep.subr.bf16.mxu0 %v6649_v11  ;;  %6564 = vmatprep.subr.bf16.mxu1 %v6649_v11  ;;  %p6958_p4 = scmp.ne.s32.totalorder %s9742_s27, %s6957_s30  ;;  %s6961_s7 = sshll.u32 %s7036_s22, 4  ;;  %s6962_s7 = int_to_ptr.vmem [resolvable:$false] %s6961_s7 }
  0x6d   : > { %389 = vst [vmem:[#allocation2] sm:$0x1] %v7035_v0  ;;  %407 = vst [vmem:[#allocation2 + $0x11] sm:$0x1] %v7035_v0  ;;  %s6963_s8 = scalar_lea.vmem %s6962_s7, 8192  ;;  %p6964_p10 = scmp.lt.s32.totalorder %s9742_s27, %s6962_s7 }
  0x6e   : > { %406 = vst [vmem:[#allocation2 + $0x198] sm:$0x1] %v7035_v0  ;;  %424 = vst [vmem:[#allocation2 + $0x1a9] sm:$0x1] %v7035_v0  ;;  %p6959_p6 = pnand %p6958_p4, %p7150_p12  ;;  %p6965_p13 = scmp.lt.s32.totalorder %s6963_s8, %s6957_s30 }
  0x6f   : > { %448 = vst [vmem:[#allocation2 + $0x121] sm:$0xff] %v227_v15  ;;  %449 = vst [vmem:[#allocation2 + $0x129] sm:$0xff] %v228_v18  ;;  %5010 = vmatpush3.bf16.msra.mxu0 %v6650_v19  ;;  %6572 = vmatpush3.bf16.msra.mxu1 %v6650_v19  ;;  %v6663_v15 = vld [vmem:[#allocation6 + $0xd8] sm:$0xff]   ;;  %v233_v18 = vld [vmem:[%s7204_s9 + $0xe0] sm:$0xff] }
  0x70   : > { %5011 = vmatprep.subr.bf16.mxu0 %v6651_v22  ;;  %6565 = vmatprep.subr.bf16.mxu1 %v6651_v22  ;;  %426 = vst [vmem:[#allocation2 + $0x19] sm:$0xff] %v205_v26  ;;  %427 = vst [vmem:[#allocation2 + $0x21] sm:$0xff] %v206_v28  ;;  %v6665_v19 = vld [vmem:[#allocation6 + $0x98] sm:$0xff]   ;;  %v6667_v22 = vld [vmem:[#allocation6 + $0xe0] sm:$0xff]   ;;  %p6960_p8 = pneg %p6959_p6  ;;  %p6966_p3 = por %p6965_p13, %p6964_p10 }
  0x71   : > { %450 = vst [vmem:[#allocation2 + $0x139] sm:$0xff] %v229_v29  ;;  %451 = vst [vmem:[#allocation2 + $0x141] sm:$0xff] %v230_v34  ;;  %v6672_v34 = vld [vmem:[#allocation6 + $0x150] sm:$0xff]  }
  0x72   : > { %428 = vst [vmem:[#allocation2 + $0x31] sm:$0xff] %v207_v62  ;;  %429 = vst [vmem:[#allocation2 + $0x39] sm:$0xff] %v208_v2  ;;  %p6967_p7 = pnand %p6966_p3, %p6960_p8 }
  0x73   : > { %5012 = vmatpush3.bf16.msra.mxu0 %v6652_v24  ;;  %6573 = vmatpush3.bf16.msra.mxu1 %v6652_v24  ;;  %452 = vst [vmem:[#allocation2 + $0x151] sm:$0xff] %v231_v3  ;;  %453 = vst [vmem:[#allocation2 + $0x159] sm:$0xff] %v232_v4  ;;  %v6671_v3 = vld [vmem:[#allocation6 + $0xf0] sm:$0xff]  }
  0x74   : > { %v7256_v13 = vld [vmem:[#allocation2] sm:$0xff]  ;;  %v7258_v14 = vld [vmem:[#allocation2 + $0x10] sm:$0x3]  ;;  %5013 = vmatprep.subr.bf16.mxu0 %v6653_v25  ;;  %6566 = vmatprep.subr.bf16.mxu1 %v6653_v25  ;;  %454 = vst [vmem:[#allocation2 + $0x169] sm:$0xff] %v233_v18 }
  0x75   : > { %v561_v16 = vrot.slane %v7256_v13, 1  ;;  %v564_v17 = vrot.slane %v7258_v14, 1  ;;  %v820_v44 = vpack.c.bf16 %v7035_v0, %v7256_v13  ;;  %v6673_v18 = vld [vmem:[#allocation6 + $0xb0] sm:$0xff]  }
  0x76   : > { %v494_v27 = vld [vmem:[#allocation2 + $0x120] sm:$0xff]  ;;  %v495_v31 = vld [vmem:[#allocation2 + $0x128] sm:$0xff]  ;;  %v496_v32 = vld [vmem:[#allocation2 + $0x130] sm:$0x3] }
  0x77   : > { %v563_v20 = vsel %vm560_vm0, %v561_v16, %v562_v12  ;;  %v565_v21 = vsel %vm560_vm0, %v562_v12, %v564_v17  ;;  %v621_v33 = vrot.slane %v494_v27, 1  ;;  %v622_v35 = vrot.slane %v495_v31, 1  ;;  %5014 = vmatpush3.bf16.msra.mxu0 %v6654_v30  ;;  %6574 = vmatpush3.bf16.msra.mxu1 %v6654_v30  ;;  %v7278_v47 = vld [vmem:[#allocation2 + $0x18] sm:$0xff]  ;;  %v7281_v49 = vld [vmem:[#allocation2 + $0x20] sm:$0xff]  ;;  %v7283_v50 = vld [vmem:[#allocation2 + $0x28] sm:$0x3] }
  0x78   : > { %v821_v23 = vpack.c.bf16 %v565_v21, %v563_v20  ;;  %v624_v36 = vrot.slane %v496_v32, 1  ;;  %v7276_v45 = vpack.c.bf16 %v495_v31, %v494_v27  ;;  %5111 = vmatprep.subr.bf16.mxu1 %v6655_v37  ;;  %v566_v51 = vrot.slane %v7278_v47, 1  ;;  %v497_v52 = vld [vmem:[#allocation2 + $0x138] sm:$0xff]  ;;  %5223 = vmatprep.subr.bf16.mxu0 %v6656_v40  ;;  %v498_v56 = vld [vmem:[#allocation2 + $0x140] sm:$0xff]  ;;  %v499_v57 = vld [vmem:[#allocation2 + $0x148] sm:$0x3] }
  0x79   : > { %v623_v38 = vsel %vm560_vm0, %v621_v33, %v622_v35  ;;  %v567_v54 = vrot.slane %v7281_v49, 1  ;;  %v569_v55 = vrot.slane %v7283_v50, 1  ;;  %v626_v58 = vrot.slane %v497_v52, 1  ;;  %v6662_v12 = vld [vmem:[#allocation6 + $0x90] sm:$0xff]   ;;  %v209_v16 = vld [vmem:[%s7204_s9 + $0x20] sm:$0xff]  ;;  %v210_v17 = vld [vmem:[%s7204_s9 + $0x28] sm:$0xff] }
  0x7a   : > { %1344 = vmatprep.mubr.bf16.mxu0 %v821_v23  ;;  %v625_v39 = vsel %vm560_vm0, %v622_v35, %v624_v36  ;;  %v627_v59 = vrot.slane %v498_v56, 1  ;;  %v629_v60 = vrot.slane %v499_v57, 1  ;;  %v7304_v10 = vpack.c.bf16 %v7281_v49, %v7278_v47  ;;  %430 = vst [vmem:[#allocation2 + $0x49] sm:$0xff] %v209_v16  ;;  %431 = vst [vmem:[#allocation2 + $0x51] sm:$0xff] %v210_v17  ;;  %v234_v20 = vld [vmem:[%s7204_s9 + $0xe8] sm:$0xff]  ;;  %v7315_v21 = vld [vmem:[#allocation2 + $0x30] sm:$0xff] }
  0x7b   : > { %v7272_v41 = vpack.c.bf16 %v625_v39, %v623_v38  ;;  %1345 = vmatmul.mubr.bf16.vlgmr.msra.gmra.mrb[0].mxu0 %v820_v44  ;;  %v568_v63 = vsel %vm560_vm0, %v566_v51, %v567_v54  ;;  %v570_v1 = vsel %vm560_vm0, %v567_v54, %v569_v55  ;;  %v7306_v11 = vpack.c.bf16 %v498_v56, %v497_v52  ;;  %v7317_v23 = vld [vmem:[#allocation2 + $0x38] sm:$0xff]  ;;  %v7319_v24 = vld [vmem:[#allocation2 + $0x40] sm:$0x3]  ;;  %v7322_v26 = vld [vmem:[#allocation2 + $0x150] sm:$0xff] }
  0x7c   : > { %5224 = vmatpush3.bf16.msra.mxu0 %v6658_v43  ;;  %v7295_v5 = vpack.c.bf16 %v570_v1, %v568_v63  ;;  %v628_v6 = vsel %vm560_vm0, %v626_v58, %v627_v59  ;;  %v630_v7 = vsel %vm560_vm0, %v627_v59, %v629_v60  ;;  %455 = vst [vmem:[#allocation2 + $0x171] sm:$0xff] %v234_v20  ;;  %v571_v25 = vrot.slane %v7315_v21, 1  ;;  %v7326_v29 = vld [vmem:[#allocation2 + $0x158] sm:$0xff]  ;;  %v7328_v30 = vld [vmem:[#allocation2 + $0x160] sm:$0x3]  ;;  %v6668_v39 = vld [vmem:[#allocation6 + $0xa0] sm:$0xff]  }
  0x7d   : > { %1440 = vmatprep.mubr.bf16.mxu1 %v7272_v41  ;;  %5225 = vmatprep.subr.bf16.mxu0 %v6664_v48  ;;  %v7299_v9 = vpack.c.bf16 %v630_v7, %v628_v6  ;;  %v572_v27 = vrot.slane %v7317_v23, 1  ;;  %v574_v28 = vrot.slane %v7319_v24, 1  ;;  %v631_v31 = vrot.slane %v7322_v26, 1  ;;  %v6674_v44 = vld [vmem:[#allocation6 + $0x110] sm:$0xff]   ;;  %v7359_v57 = vld [vmem:[#allocation2 + $0x168] sm:$0xff]  ;;  %v6670_v59 = vld [vmem:[#allocation6 + $0xa8] sm:$0xff]  }
  0x7e   : > { %1441 = vmatmul.mubr.bf16.vlgmr.msra.gmra.mrb[0].mxu1 %v7276_v45  ;;  %1352 = vmatprep.mubr.bf16.mxu0 %v7295_v5  ;;  %v632_v32 = vrot.slane %v7326_v29, 1  ;;  %v634_v33 = vrot.slane %v7328_v30, 1  ;;  %v7337_v37 = vpack.c.bf16 %v7317_v23, %v7315_v21  ;;  %v7341_v38 = vpack.c.bf16 %v7326_v29, %v7322_v26  ;;  %v211_v7 = vld [vmem:[%s7204_s9 + $0x30] sm:$0xff]  ;;  %v213_v20 = vld [vmem:[%s7204_s9 + $0x40] sm:$0xff] }
  0x7f   : > { %5112 = vmatpush3.bf16.msra.mxu1 %v6657_v42  ;;  %9846 = vst [vmem:[#allocation12_spill] sm:$0xff] %v7299_v9  ;;  %1448 = vmatprep.mubr.bf16.mxu1 %v7299_v9  ;;  %v573_v35 = vsel %vm560_vm0, %v571_v25, %v572_v27  ;;  %v575_v36 = vsel %vm560_vm0, %v572_v27, %v574_v28  ;;  %432 = vst [vmem:[#allocation2 + $0x61] sm:$0xff] %v211_v7  ;;  %v675_v25 = vrot.slane %v7035_v0, 2  ;;  %v6679_v0 = vld [vmem:[#allocation6 + $0x160] sm:$0xff]   ;;  %v236_v9 = vld [vmem:[%s7204_s9 + $0xf8] sm:$0xff] }
  0x80   : > { %5113 = vmatprep.subr.bf16.mxu1 %v6659_v46  ;;  %5226 = vmatpush3.bf16.msra.mxu0 %v6666_v8  ;;  %v7343_v40 = vpack.c.bf16 %v575_v36, %v573_v35  ;;  %v633_v42 = vsel %vm560_vm0, %v631_v31, %v632_v32  ;;  %v635_v43 = vsel %vm560_vm0, %v632_v32, %v634_v33  ;;  %v212_v8 = vld [vmem:[%s7204_s9 + $0x38] sm:$0xff]  ;;  %v677_v27 = vrot.slane %v7258_v14, 2  ;;  %v214_v32 = vld [vmem:[%s7204_s9 + $0x48] sm:$0xff]  ;;  %v215_v33 = vld [vmem:[%s7204_s9 + $0x50] sm:$0xff] }
  0x81   : > { %5227 = vmatprep.subr.bf16.mxu0 %v6672_v34  ;;  %v7347_v46 = vpack.c.bf16 %v635_v43, %v633_v42  ;;  %v7349_v48 = vld [vmem:[#allocation2 + $0x48] sm:$0xff]  ;;  %v7351_v51 = vld [vmem:[#allocation2 + $0x50] sm:$0xff]  ;;  %v7353_v52 = vld [vmem:[#allocation2 + $0x58] sm:$0x3]  ;;  %433 = vst [vmem:[#allocation2 + $0x69] sm:$0xff] %v212_v8 }
  0x82   : > { %v576_v54 = vrot.slane %v7349_v48, 1  ;;  %v577_v55 = vrot.slane %v7351_v51, 1  ;;  %v579_v56 = vrot.slane %v7353_v52, 1  ;;  %v7384_v17 = vpack.c.bf16 %v7351_v51, %v7349_v48  ;;  %v6675_v31 = vld [vmem:[#allocation6 + $0xf8] sm:$0xff]   ;;  %434 = vst [vmem:[#allocation2 + $0x79] sm:$0xff] %v213_v20  ;;  %435 = vst [vmem:[#allocation2 + $0x81] sm:$0xff] %v214_v32 }
  0x83   : > { %5114 = vmatpush3.bf16.msra.mxu1 %v6660_v53  ;;  %1353 = vmatmul.mubr.bf16.gmra.mrb[4].mxu0 %v7304_v10  ;;  %9847 = vst [vmem:[#allocation13_spill] sm:$0xff] %v7347_v46  ;;  %v6669_v53 = vld [vmem:[#allocation6 + $0xe8] sm:$0xff]   ;;  %v7361_v58 = vld [vmem:[#allocation2 + $0x170] sm:$0xff]  ;;  %v216_v34 = vld [vmem:[%s7204_s9 + $0x58] sm:$0xff] }
  0x84   : > { %5115 = vmatprep.subr.bf16.mxu1 %v6661_v61  ;;  %1360 = vmatprep.mubr.bf16.mxu0 %v7343_v40  ;;  %v7365_v60 = vld [vmem:[#allocation2 + $0x178] sm:$0x3]  ;;  %v636_v61 = vrot.slane %v7359_v57, 1  ;;  %v637_v62 = vrot.slane %v7361_v58, 1  ;;  %v578_v63 = vsel %vm560_vm0, %v576_v54, %v577_v55  ;;  %v580_v1 = vsel %vm560_vm0, %v577_v55, %v579_v56  ;;  %436 = vst [vmem:[#allocation2 + $0x91] sm:$0xff] %v215_v33  ;;  %v6676_v14 = vld [vmem:[#allocation6 + $0xb8] sm:$0xff]  }
  0x85   : > { %5228 = vmatpush3.bf16.msra.mxu0 %v6674_v44  ;;  %v639_v2 = vrot.slane %v7365_v60, 1  ;;  %v7373_v4 = vpack.c.bf16 %v580_v1, %v578_v63  ;;  %v7392_v28 = vpack.c.bf16 %v7361_v58, %v7359_v57  ;;  %437 = vst [vmem:[#allocation2 + $0x99] sm:$0xff] %v216_v34  ;;  %v217_v35 = vld [vmem:[%s7204_s9 + $0x60] sm:$0xff]  ;;  %v218_v36 = vld [vmem:[%s7204_s9 + $0x68] sm:$0xff]  ;;  %v679_v1 = vrot.slane %v7278_v47, 2  ;;  %457 = vst [vmem:[#allocation2 + $0x189] sm:$0xff] %v236_v9 }
  0x86   : > { %1449 = vmatmul.mubr.bf16.gmra.mrb[4].mxu1 %v7306_v11  ;;  %v638_v6 = vsel %vm560_vm0, %v636_v61, %v637_v62  ;;  %438 = vst [vmem:[#allocation2 + $0xa9] sm:$0xff] %v217_v35  ;;  %439 = vst [vmem:[#allocation2 + $0xb1] sm:$0xff] %v218_v36  ;;  %v6681_v43 = vld [vmem:[#allocation6 + $0x168] sm:$0xff]   ;;  %v7404_v44 = vld [vmem:[#allocation2 + $0x60] sm:$0xff] }
  0x87   : > { %5116 = vmatpush3.bf16.msra.mxu1 %v6662_v12  ;;  %1456 = vmatprep.mubr.bf16.mxu1 %v7347_v46  ;;  %v640_v12 = vsel %vm560_vm0, %v637_v62, %v639_v2  ;;  %v581_v55 = vrot.slane %v7404_v44, 1  ;;  %v6682_v61 = vld [vmem:[#allocation6 + $0x128] sm:$0xff]   ;;  %v680_v2 = vrot.slane %v7281_v49, 2  ;;  %v235_v46 = vld [vmem:[%s7204_s9 + $0xf0] sm:$0xff] }
  0x88   : > { %5117 = vmatprep.subr.bf16.mxu1 %v6663_v15  ;;  %v6677_v15 = vld [vmem:[#allocation6 + $0x158] sm:$0xff]   ;;  %v7380_v16 = vpack.c.bf16 %v640_v12, %v638_v6  ;;  %v7408_v54 = vld [vmem:[#allocation2 + $0x70] sm:$0x3]  ;;  %v222_v34 = vld [vmem:[%s7204_s9 + $0x88] sm:$0xff]  ;;  %456 = vst [vmem:[#allocation2 + $0x181] sm:$0xff] %v235_v46 }
  0x89   : > { %5229 = vmatprep.subr.bf16.mxu0 %v6677_v15  ;;  %v7414_v63 = vld [vmem:[#allocation2 + $0x78] sm:$0xff]  ;;  %v220_v6 = vld [vmem:[%s7204_s9 + $0x78] sm:$0xff]  ;;  %v7427_v15 = vld [vmem:[#allocation2 + $0x80] sm:$0xff]  ;;  %443 = vst [vmem:[#allocation2 + $0xe1] sm:$0xff] %v222_v34  ;;  %v681_v35 = vsel %vm673_vm1, %v679_v1, %v680_v2 }
  0x8a   : > { %9848 = vst [vmem:[#allocation14_spill] sm:$0xff] %v7380_v16  ;;  %v586_v47 = vrot.slane %v7414_v63, 1  ;;  %441 = vst [vmem:[#allocation2 + $0xc9] sm:$0xff] %v220_v6  ;;  %v685_v6 = vrot.slane %v7317_v23, 2  ;;  %v7489_v34 = vld [vmem:[#allocation6 + $0x1c0] sm:$0xff]  }
  0x8b   : > { %5118 = vmatpush3.bf16.msra.mxu1 %v6665_v19  ;;  %1361 = vmatmul.mubr.bf16.gmra.mrb[8].mxu0 %v7337_v37  ;;  %v6678_v19 = vld [vmem:[#allocation6 + $0x118] sm:$0xff]   ;;  %v7432_v49 = vld [vmem:[#allocation2 + $0x90] sm:$0xff]  ;;  %9850 = vst [vmem:[#allocation16_spill] sm:$0xff] %v7489_v34 }
  0x8c   : > { %5119 = vmatprep.subr.bf16.mxu1 %v6667_v22  ;;  %1368 = vmatprep.mubr.bf16.mxu0 %v7373_v4  ;;  %v674_v22 = vrot.slane %v7256_v13, 2  ;;  %v6680_v13 = vld [vmem:[#allocation6 + $0x120] sm:$0xff]  }
  0x8d   : > { %5230 = vmatpush3.bf16.msra.mxu0 %v6678_v19  ;;  %v587_v19 = vrot.slane %v7427_v15, 1  ;;  %v7465_v1 = vld [vmem:[#allocation2 + $0xb0] sm:$0xff] }
  0x8e   : > { %1457 = vmatmul.mubr.bf16.gmra.mrb[8].mxu1 %v7341_v38  ;;  %5231 = vmatprep.subr.bf16.mxu0 %v6679_v0  ;;  %v676_v42 = vsel %vm673_vm1, %v674_v22, %v675_v25  ;;  %v7438_v22 = vld [vmem:[#allocation2 + $0x98] sm:$0xff] }
  0x8f   : > { %5120 = vmatpush3.bf16.msra.mxu1 %v6668_v39  ;;  %1464 = vmatprep.mubr.bf16.mxu1 %v7380_v16  ;;  %v678_v39 = vsel %vm673_vm1, %v675_v25, %v677_v27  ;;  %v7440_v25 = vld [vmem:[#allocation2 + $0xa0] sm:$0x3]  ;;  %v221_v27 = vld [vmem:[%s7204_s9 + $0x80] sm:$0xff]  ;;  %v592_v32 = vrot.slane %v7438_v22, 1  ;;  %v588_v0 = vsel %vm560_vm0, %v586_v47, %v587_v19  ;;  %v6701_v16 = vld [vmem:[#allocation6 + $0x1e8] sm:$0xff]  }
  0x90   : > { %5121 = vmatprep.subr.bf16.mxu1 %v6669_v53  ;;  %v7406_v53 = vld [vmem:[#allocation2 + $0x68] sm:$0xff]  ;;  %v822_v62 = vpack.c.bf16 %v678_v39, %v676_v42  ;;  %v594_v33 = vrot.slane %v7440_v25, 1  ;;  %442 = vst [vmem:[#allocation2 + $0xd9] sm:$0xff] %v221_v27  ;;  %v6683_v39 = vld [vmem:[#allocation6 + $0x170] sm:$0xff]  }
  0x91   : > { %v582_v56 = vrot.slane %v7406_v53, 1  ;;  %5232 = vmatpush3.bf16.msra.mxu0 %v6680_v13  ;;  %v7425_v12 = vpack.c.bf16 %v7406_v53, %v7404_v44  ;;  %v6684_v42 = vld [vmem:[#allocation6 + $0x130] sm:$0xff]  }
  0x92   : > { %5233 = vmatprep.subr.bf16.mxu0 %v6681_v43  ;;  %v223_v43 = vld [vmem:[%s7204_s9 + $0x90] sm:$0xff] }
  0x93   : > { %5122 = vmatpush3.bf16.msra.mxu1 %v6670_v59  ;;  %1369 = vmatmul.mubr.bf16.gmra.mrb[12].mxu0 %v7384_v17  ;;  %v584_v59 = vrot.slane %v7408_v54, 1  ;;  %v583_v7 = vsel %vm560_vm0, %v581_v55, %v582_v56  ;;  %444 = vst [vmem:[#allocation2 + $0xf1] sm:$0xff] %v223_v43  ;;  %v689_v43 = vrot.slane %v7349_v48, 2 }
  0x94   : > { %5123 = vmatprep.subr.bf16.mxu1 %v6671_v3  ;;  %v682_v3 = vrot.slane %v7283_v50, 2 }
  0x95   : > { %v585_v8 = vsel %vm560_vm0, %v582_v56, %v584_v59  ;;  %5234 = vmatpush3.bf16.msra.mxu0 %v6682_v61  ;;  %v595_v56 = vsel %vm560_vm0, %v592_v32, %v594_v33  ;;  %v224_v59 = vld [vmem:[%s7204_s9 + $0x98] sm:$0xff]  ;;  %v226_v33 = vld [vmem:[%s7204_s9 + $0xa8] sm:$0xff] }
  0x96   : > { %1465 = vmatmul.mubr.bf16.gmra.mrb[12].mxu1 %v7392_v28  ;;  %v7434_v50 = vpack.c.bf16 %v585_v8, %v583_v7  ;;  %v683_v36 = vsel %vm673_vm1, %v680_v2, %v682_v3  ;;  %5235 = vmatprep.subr.bf16.mxu0 %v6683_v39  ;;  %v7467_v2 = vld [vmem:[#allocation2 + $0xb8] sm:$0x3]  ;;  %445 = vst [vmem:[#allocation2 + $0xf9] sm:$0xff] %v224_v59  ;;  %v687_v7 = vrot.slane %v7319_v24, 2  ;;  %v6685_v8 = vld [vmem:[#allocation6 + $0x178] sm:$0xff]   ;;  %447 = vst [vmem:[#allocation2 + $0x111] sm:$0xff] %v226_v33 }
  0x97   : > { %5124 = vmatpush3.bf16.msra.mxu1 %v6673_v18  ;;  %1505 = vmatprep.mubr.bf16.mxu1 %v7304_v10  ;;  %v219_v10 = vld [vmem:[%s7204_s9 + $0x70] sm:$0xff]  ;;  %v7429_v18 = vld [vmem:[#allocation2 + $0x88] sm:$0x3]  ;;  %v7461_v61 = vpack.c.bf16 %v683_v36, %v681_v35  ;;  %v7471_v3 = vpack.c.bf16 %v7427_v15, %v7414_v63  ;;  %v599_v27 = vrot.slane %v7467_v2, 1  ;;  %v7497_v36 = vld [vmem:[#allocation2 + $0xd0] sm:$0x3] }
  0x98   : > { %5125 = vmatprep.subr.bf16.mxu1 %v6675_v31  ;;  %440 = vst [vmem:[#allocation2 + $0xc1] sm:$0xff] %v219_v10  ;;  %v589_v20 = vrot.slane %v7429_v18, 1  ;;  %v591_v31 = vrot.slane %v7432_v49, 1  ;;  %1376 = vmatprep.mubr.bf16.mxu0 %v7434_v50  ;;  %v684_v10 = vrot.slane %v7315_v21, 2  ;;  %v688_v23 = vsel %vm673_vm1, %v685_v6, %v687_v7  ;;  %v6688_v39 = vld [vmem:[#allocation6 + $0x180] sm:$0xff]  }
  0x99   : > { %5236 = vmatpush3.bf16.msra.mxu0 %v6684_v42  ;;  %9849 = vst [vmem:[#allocation15_spill] sm:$0xff] %v7471_v3  ;;  %v692_v59 = vrot.slane %v7353_v52, 2  ;;  %v7511_v7 = vld [vmem:[#allocation6 + $0x200] sm:$0xff]   ;;  %v604_v48 = vrot.slane %v7497_v36, 1  ;;  %v7521_v52 = vld [vmem:[#allocation2 + $0xe0] sm:$0xff] }
  0x9a   : > { %v590_v13 = vsel %vm560_vm0, %v587_v19, %v589_v20  ;;  %v593_v55 = vsel %vm560_vm0, %v591_v31, %v592_v32  ;;  %v597_v20 = vrot.slane %v7465_v1, 1  ;;  %5237 = vmatprep.subr.bf16.mxu0 %v6685_v8  ;;  %v6686_v31 = vld [vmem:[#allocation6 + $0x138] sm:$0xff]   ;;  %v225_v32 = vld [vmem:[%s7204_s9 + $0xa0] sm:$0xff]  ;;  %v686_v21 = vsel %vm673_vm1, %v684_v10, %v685_v6  ;;  %v6690_v8 = vld [vmem:[#allocation6 + $0x1c8] sm:$0xff]  }
  0x9b   : > { %5126 = vmatpush3.bf16.msra.mxu1 %v6676_v14  ;;  %1377 = vmatmul.mubr.bf16.gmra.mrb[16].mxu0 %v7425_v12  ;;  %v7451_v14 = vpack.c.bf16 %v590_v13, %v588_v0  ;;  %v7476_v47 = vpack.c.bf16 %v595_v56, %v593_v55  ;;  %446 = vst [vmem:[#allocation2 + $0x109] sm:$0xff] %v225_v32  ;;  %v690_v55 = vrot.slane %v7351_v51, 2  ;;  %v7519_v51 = vld [vmem:[#allocation2 + $0xd8] sm:$0xff]  ;;  %v7527_v32 = vld [vmem:[#allocation2 + $0xe8] sm:$0x3] }
  0x9c   : > { %v600_v35 = vsel %vm560_vm0, %v597_v20, %v599_v27  ;;  %5335 = vmatprep.subr.bf16.mxu1 %v7489_v34  ;;  %v7500_v42 = vpack.c.bf16 %v688_v23, %v686_v21  ;;  %v7506_v56 = vpack.c.bf16 %v7438_v22, %v7432_v49  ;;  %v694_v23 = vrot.slane %v7404_v44, 2 }
  0x9d   : > { %1384 = vmatprep.mubr.bf16.mxu0 %v7451_v14  ;;  %5238 = vmatpush3.bf16.msra.mxu0 %v6686_v31  ;;  %v691_v27 = vsel %vm673_vm1, %v689_v43, %v690_v55  ;;  %v693_v31 = vsel %vm673_vm1, %v690_v55, %v692_v59  ;;  %v697_v55 = vrot.slane %v7408_v54, 2  ;;  %v606_v59 = vrot.slane %v7519_v51, 1  ;;  %v7547_v54 = vld [vmem:[#allocation2 + $0xf0] sm:$0xff] }
  0x9e   : > { %1506 = vmatmul.mubr.bf16.vlgmr.msra.gmra.mrb[16].mxu1 %v822_v62  ;;  %v7463_v62 = vld [vmem:[#allocation2 + $0xa8] sm:$0xff]  ;;  %9851 = vst [vmem:[#allocation17_spill] sm:$0xff] %v7506_v56  ;;  %6415 = vmatprep.subr.bf16.mxu0 %v7511_v7  ;;  %v7537_v43 = vpack.c.bf16 %v693_v31, %v691_v27  ;;  %v607_v44 = vrot.slane %v7521_v52, 1  ;;  %v7549_v27 = vld [vmem:[#allocation2 + $0xf8] sm:$0xff]  ;;  %v699_v34 = vrot.slane %v7414_v63, 2  ;;  %v611_v63 = vrot.slane %v7547_v54, 1 }
  0x9f   : > { %1513 = vmatprep.mubr.bf16.mxu1 %v7337_v37  ;;  %v596_v19 = vrot.slane %v7463_v62, 1  ;;  %v7487_v24 = vld [vmem:[#allocation2 + $0xc0] sm:$0xff]  ;;  %v7493_v0 = vld [vmem:[#allocation2 + $0xc8] sm:$0xff]  ;;  %5336 = vmatpush3.bf16.msra.mxu1 %v6688_v39 }
  0xa0   : > { %v601_v10 = vrot.slane %v7487_v24, 1  ;;  %v602_v6 = vrot.slane %v7493_v0, 1  ;;  %5337 = vmatprep.subr.bf16.mxu1 %v6690_v8  ;;  %v6694_v39 = vld [vmem:[#allocation6 + $0x190] sm:$0xff]   ;;  %v7535_v8 = vpack.c.bf16 %v7465_v1, %v7463_v62 }
  0xa1   : > { %v598_v13 = vsel %vm560_vm0, %v596_v19, %v597_v20  ;;  %v6691_v20 = vld [vmem:[#allocation6 + $0x188] sm:$0xff]  }
  0xa2   : > { %v7513_v19 = vpack.c.bf16 %v600_v35, %v598_v13  ;;  %v603_v33 = vsel %vm560_vm0, %v601_v10, %v602_v6  ;;  %v605_v21 = vsel %vm560_vm0, %v602_v6, %v604_v48  ;;  %v695_v13 = vrot.slane %v7406_v53, 2  ;;  %v6693_v35 = vld [vmem:[#allocation6 + $0x1d0] sm:$0xff]   ;;  %v6696_v6 = vld [vmem:[#allocation6 + $0x1d8] sm:$0xff]  }
  0xa3   : > { %1385 = vmatmul.mubr.bf16.gmra.mrb[20].mxu0 %v7471_v3  ;;  %5338 = vmatpush3.bf16.msra.mxu1 %v6691_v20  ;;  %v7541_v10 = vpack.c.bf16 %v605_v21, %v603_v33  ;;  %v609_v53 = vrot.slane %v7527_v32, 1  ;;  %v6697_v48 = vld [vmem:[#allocation6 + $0x198] sm:$0xff]   ;;  %v6698_v20 = vld [vmem:[#allocation6 + $0x1e0] sm:$0xff]   ;;  %v7555_v21 = vld [vmem:[#allocation2 + $0x100] sm:$0x3] }
  0xa4   : > { %1392 = vmatprep.mubr.bf16.mxu0 %v7476_v47  ;;  %5339 = vmatprep.subr.bf16.mxu1 %v6693_v35  ;;  %v696_v31 = vsel %vm673_vm1, %v694_v23, %v695_v13  ;;  %v698_v33 = vsel %vm673_vm1, %v695_v13, %v697_v55  ;;  %v608_v35 = vsel %vm560_vm0, %v606_v59, %v607_v44  ;;  %v700_v13 = vrot.slane %v7427_v15, 2  ;;  %v7581_v15 = vld [vmem:[#allocation2 + $0x108] sm:$0xff] }
  0xa5   : > { %v7566_v23 = vpack.c.bf16 %v698_v33, %v696_v31  ;;  %v702_v55 = vrot.slane %v7429_v18, 2  ;;  %v7583_v18 = vld [vmem:[#allocation2 + $0x110] sm:$0xff]  ;;  %v6704_v33 = vld [vmem:[#allocation6 + $0x1b0] sm:$0xff]  }
  0xa6   : > { %1514 = vmatmul.mubr.bf16.gmra.mrb[20].mxu1 %v7461_v61  ;;  %v701_v9 = vsel %vm673_vm1, %v699_v34, %v700_v13 }
  0xa7   : > { %1521 = vmatprep.mubr.bf16.mxu1 %v7384_v17  ;;  %5340 = vmatpush3.bf16.msra.mxu1 %v6694_v39  ;;  %v610_v39 = vsel %vm560_vm0, %v607_v44, %v609_v53  ;;  %v612_v44 = vrot.slane %v7549_v27, 1  ;;  %v614_v53 = vrot.slane %v7555_v21, 1  ;;  %v703_v46 = vsel %vm673_vm1, %v700_v13, %v702_v55 }
  0xa8   : > { %5341 = vmatprep.subr.bf16.mxu1 %v6696_v6  ;;  %v6700_v6 = vld [vmem:[#allocation6 + $0x1a0] sm:$0xff]   ;;  %v7570_v59 = vpack.c.bf16 %v610_v39, %v608_v35  ;;  %v7587_v35 = vld [vmem:[#allocation2 + $0x118] sm:$0x3]  ;;  %v6705_v39 = vld [vmem:[#allocation6 + $0x1f8] sm:$0xff]   ;;  %v7593_v34 = vpack.c.bf16 %v703_v46, %v701_v9  ;;  %v704_v55 = vrot.slane %v7432_v49, 2 }
  0xa9   : > { %v613_v31 = vsel %vm560_vm0, %v611_v63, %v612_v44  ;;  %v705_v63 = vrot.slane %v7438_v22, 2  ;;  %v6711_v46 = vld [vmem:[#allocation6 + $0x40] sm:$0xff]  }
  0xab   : > { %1393 = vmatmul.mubr.bf16.gmra.mrb[24].mxu0 %v7506_v56  ;;  %5342 = vmatpush3.bf16.msra.mxu1 %v6697_v48  ;;  %v6702_v48 = vld [vmem:[#allocation6 + $0x1a8] sm:$0xff]   ;;  %v706_v49 = vsel %vm673_vm1, %v704_v55, %v705_v63  ;;  %v710_v55 = vrot.slane %v7465_v1, 2  ;;  %v714_v1 = vrot.slane %v7487_v24, 2 }
  0xac   : > { %1400 = vmatprep.mubr.bf16.mxu0 %v7513_v19  ;;  %5343 = vmatprep.subr.bf16.mxu1 %v6698_v20  ;;  %v6703_v20 = vld [vmem:[#allocation6 + $0x1f0] sm:$0xff]  }
  0xae   : > { %1522 = vmatmul.mubr.bf16.gmra.mrb[24].mxu1 %v7500_v42 }
  0xaf   : > { %1529 = vmatprep.mubr.bf16.mxu1 %v7425_v12  ;;  %5344 = vmatpush3.bf16.msra.mxu1 %v6700_v6  ;;  %v7591_v6 = vpack.c.bf16 %v7521_v52, %v7519_v51 }
  0xb0   : > { %5345 = vmatprep.subr.bf16.mxu1 %v6701_v16  ;;  %v615_v16 = vsel %vm560_vm0, %v612_v44, %v614_v53  ;;  %v707_v44 = vrot.slane %v7440_v25, 2  ;;  %v616_v53 = vrot.slane %v7581_v15, 1 }
  0xb1   : > { %v7595_v13 = vpack.c.bf16 %v615_v16, %v613_v31  ;;  %v7613_v31 = vpack.c.bf16 %v7549_v27, %v7547_v54 }
  0xb2   : > { %v708_v22 = vsel %vm673_vm1, %v705_v63, %v707_v44  ;;  %v712_v63 = vrot.slane %v7467_v2, 2  ;;  %v715_v2 = vrot.slane %v7493_v0, 2 }
  0xb3   : > { %1401 = vmatmul.mubr.bf16.gmra.mrb[28].mxu0 %v7535_v8  ;;  %5346 = vmatpush3.bf16.msra.mxu1 %v6702_v48  ;;  %v617_v48 = vrot.slane %v7583_v18, 1  ;;  %v7615_v16 = vpack.c.bf16 %v708_v22, %v706_v49 }
  0xb4   : > { %1408 = vmatprep.mubr.bf16.mxu0 %v7541_v10  ;;  %5347 = vmatprep.subr.bf16.mxu1 %v6703_v20  ;;  %v619_v20 = vrot.slane %v7587_v35, 1  ;;  %v713_v44 = vsel %vm673_vm1, %v710_v55, %v712_v63  ;;  %v730_v63 = vrot.slane %v7583_v18, 2 }
  0xb5   : > { %v618_v25 = vsel %vm560_vm0, %v616_v53, %v617_v48  ;;  %v7630_v53 = vpack.c.bf16 %v7583_v18, %v7581_v15 }
  0xb6   : > { %1530 = vmatmul.mubr.bf16.gmra.mrb[28].mxu1 %v7537_v43  ;;  %v620_v9 = vsel %vm560_vm0, %v617_v48, %v619_v20  ;;  %v717_v48 = vrot.slane %v7497_v36, 2  ;;  %v716_v20 = vsel %vm673_vm1, %v714_v1, %v715_v2  ;;  %v722_v36 = vrot.slane %v7527_v32, 2 }
  0xb7   : > { %1537 = vmatprep.mubr.bf16.mxu1 %v7471_v3  ;;  %v7564_v3 = vpack.c.bf16 %v7493_v0, %v7487_v24  ;;  %5348 = vmatpush3.bf16.msra.mxu1 %v6704_v33  ;;  %v7617_v33 = vpack.c.bf16 %v620_v9, %v618_v25  ;;  %v719_v24 = vrot.slane %v7519_v51, 2  ;;  %v720_v0 = vrot.slane %v7521_v52, 2  ;;  %v6692_v25 = vld [vmem:[#allocation6 + $0x208] sm:$0xff]   ;;  %v6695_v51 = vld [vmem:[#allocation6 + $0x210] sm:$0xff]  }
  0xb8   : > { %5349 = vmatprep.subr.bf16.mxu1 %v6705_v39  ;;  %v709_v39 = vrot.slane %v7463_v62, 2  ;;  %v718_v49 = vsel %vm673_vm1, %v715_v2, %v717_v48  ;;  %v724_v32 = vrot.slane %v7547_v54, 2  ;;  %v6707_v54 = vld [vmem:[#allocation6 + $0x220] sm:$0xff]  }
  0xb9   : > { %v7643_v22 = vpack.c.bf16 %v718_v49, %v716_v20  ;;  %v723_v9 = vsel %vm673_vm1, %v720_v0, %v722_v36  ;;  %v6713_v20 = vld [vmem:[#allocation2 + $0x128] sm:$0xff] }
  0xba   : > { %v735_v49 = vrot.slane %v6713_v20, 2  ;;  %v6710_v36 = vld [vmem:[#allocation6 + $0x238] sm:$0xff]   ;;  %v750_v20 = vrot.slane %v7361_v58, 2  ;;  %v6720_v58 = vld [vmem:[#allocation6 + $0x48] sm:$0xff]  }
  0xbb   : > { %1409 = vmatmul.mubr.bf16.gmra.mrb[32].mxu0 %v7564_v3 }
  0xbc   : > { %1416 = vmatprep.mubr.bf16.mxu0 %v7570_v59 }
  0xbe   : > { %1538 = vmatmul.mubr.bf16.gmra.mrb[32].mxu1 %v7566_v23 }
  0xbf   : > { %1545 = vmatprep.mubr.bf16.mxu1 %v7506_v56  ;;  %v6706_v56 = vld [vmem:[#allocation6 + $0x1b8] sm:$0xff]  }
  0xc0   : > { %5350 = vmatpush3.bf16.msra.mxu1 %v6706_v56  ;;  %v711_v56 = vsel %vm673_vm1, %v709_v39, %v710_v55 }
  0xc1   : > { %5471 = vmatprep.subr.bf16.mxu1 %v6711_v46  ;;  %v7632_v62 = vpack.c.bf16 %v713_v44, %v711_v56  ;;  %v725_v46 = vrot.slane %v7549_v27, 2  ;;  %v732_v56 = vrot.slane %v7587_v35, 2  ;;  %v6708_v44 = vld [vmem:[#allocation6 + $0x228] sm:$0xff]   ;;  %v6712_v35 = vld [vmem:[#allocation2 + $0x120] sm:$0xff] }
  0xc2   : > { %v734_v48 = vrot.slane %v6712_v35, 2  ;;  %v7704_v35 = vld [vmem:[#allocation2 + $0x180] sm:$0xff] }
  0xc3   : > { %1417 = vmatmul.mubr.bf16.gmra.mrb[36].mxu0 %v7591_v6  ;;  %v726_v39 = vsel %vm673_vm1, %v724_v32, %v725_v46  ;;  %v733_v2 = vsel %vm673_vm1, %v730_v63, %v732_v56  ;;  %v744_v56 = vrot.slane %v7322_v26, 2 }
  0xc4   : > { %1424 = vmatprep.mubr.bf16.mxu0 %v7595_v13 }
  0xc6   : > { %1546 = vmatmul.mubr.bf16.gmra.mrb[36].mxu1 %v7593_v34 }
  0xc7   : > { %1553 = vmatprep.mubr.bf16.mxu1 %v7535_v8 }
  0xcb   : > { %1425 = vmatmul.mubr.bf16.gmra.mrb[40].mxu0 %v7613_v31 }
  0xcc   : > { %1432 = vmatprep.mubr.bf16.mxu0 %v7617_v33 }
  0xce   : > { %1554 = vmatmul.mubr.bf16.gmra.mrb[40].mxu1 %v7615_v16 }
  0xcf   : > { %1561 = vmatprep.mubr.bf16.mxu1 %v7564_v3 }
  0xd3   : > { %1433 = vmatmul.mubr.bf16.gmra.mrb[44].mxu0 %v7630_v53 }
  0xd4   : > { %1666 = vmatprep.mubr.bf16.mxu0 %v7461_v61  ;;  %v721_v61 = vsel %vm673_vm1, %v719_v24, %v720_v0  ;;  %v6714_v24 = vld [vmem:[#allocation2 + $0x130] sm:$0x3] }
  0xd5   : > { %v7655_v52 = vpack.c.bf16 %v723_v9, %v721_v61  ;;  %v737_v0 = vrot.slane %v6714_v24, 2 }
  0xd6   : > { %1562 = vmatmul.mubr.bf16.gmra.mrb[44].mxu1 %v7632_v62 }
  0xd7   : > { %1569 = vmatprep.mubr.bf16.mxu1 %v7591_v6  ;;  %v738_v61 = vsel %vm673_vm1, %v735_v49, %v737_v0 }
  0xdb   : > { %1667 = vmatmul.mubr.bf16.vlgmr.msra.gmra.mrb[48].mxu0 %v7295_v5  ;;  %v727_v5 = vrot.slane %v7555_v21, 2  ;;  %v729_v21 = vrot.slane %v7581_v15, 2  ;;  %v6709_v15 = vld [vmem:[#allocation6 + $0x230] sm:$0xff]  }
  0xdc   : > { %6416 = vmatpush3.bf16.msra.mxu0 %v7511_v7  ;;  %1674 = vmatprep.mubr.bf16.mxu0 %v7500_v42  ;;  %v6699_v7 = vld [vmem:[#allocation6 + $0x218] sm:$0xff]  }
  0xdd   : > { %6417 = vmatprep.subr.bf16.mxu0 %v6692_v25  ;;  %v728_v55 = vsel %vm673_vm1, %v725_v46, %v727_v5  ;;  %v731_v1 = vsel %vm673_vm1, %v729_v21, %v730_v63  ;;  %v6716_v46 = vld [vmem:[#allocation2 + $0x140] sm:$0xff] }
  0xde   : > { %1570 = vmatmul.mubr.bf16.gmra.mrb[48].mxu1 %v7643_v22  ;;  %v7666_v27 = vpack.c.bf16 %v728_v55, %v726_v39  ;;  %v7677_v18 = vpack.c.bf16 %v733_v2, %v731_v1  ;;  %v740_v5 = vrot.slane %v6716_v46, 2  ;;  %v6718_v55 = vld [vmem:[#allocation6 + $0xc0] sm:$0xff]   ;;  %v747_v1 = vrot.slane %v7328_v30, 2  ;;  %v9852_v46 = vld [vmem:[#allocation15_spill] sm:$0xff] }
  0xdf   : > { %1577 = vmatprep.mubr.bf16.mxu1 %v7613_v31  ;;  %v749_v30 = vrot.slane %v7359_v57, 2  ;;  %v6719_v57 = vld [vmem:[#allocation6] sm:$0xff]  }
  0xe0   : > { %6418 = vmatpush3.bf16.msra.mxu0 %v6692_v25  ;;  %v736_v25 = vsel %vm673_vm1, %v734_v48, %v735_v49  ;;  %v7706_v48 = vld [vmem:[#allocation2 + $0x188] sm:$0xff]  ;;  %v752_v49 = vrot.slane %v7365_v60, 2  ;;  %v6721_v60 = vld [vmem:[#allocation6 + $0x8] sm:$0xff]  }
  0xe1   : > { %6419 = vmatprep.subr.bf16.mxu0 %v6695_v51  ;;  %v7685_v9 = vpack.c.bf16 %v738_v61, %v736_v25  ;;  %v751_v24 = vsel %vm673_vm1, %v749_v30, %v750_v20  ;;  %v6722_v25 = vld [vmem:[#allocation6 + $0x50] sm:$0xff]   ;;  %v6726_v61 = vld [vmem:[#allocation6 + $0x60] sm:$0xff]   ;;  %v790_v30 = vrot.slane %v7706_v48, 1 }
  0xe2   : > { %v753_v0 = vsel %vm673_vm1, %v750_v20, %v752_v49  ;;  %v9856_v49 = vld [vmem:[#allocation14_spill] sm:$0xff] }
  0xe3   : > { %1675 = vmatmul.mubr.bf16.gmra.mrb[52].mxu0 %v7343_v40 }
  0xe4   : > { %1682 = vmatprep.mubr.bf16.mxu0 %v7537_v43  ;;  %6420 = vmatpush3.bf16.msra.mxu0 %v6695_v51  ;;  %v6715_v51 = vld [vmem:[#allocation2 + $0x138] sm:$0xff] }
  0xe5   : > { %6421 = vmatprep.subr.bf16.mxu0 %v6699_v7  ;;  %v739_v32 = vrot.slane %v6715_v51, 2  ;;  %v6728_v51 = vld [vmem:[#allocation6 + $0x68] sm:$0xff]  }
  0xe6   : > { %1578 = vmatmul.mubr.bf16.gmra.mrb[52].mxu1 %v7655_v52 }
  0xe7   : > { %1585 = vmatprep.mubr.bf16.mxu1 %v7630_v53 }
  0xe8   : > { %6422 = vmatpush3.bf16.msra.mxu0 %v6699_v7  ;;  %v6717_v7 = vld [vmem:[#allocation2 + $0x148] sm:$0x3] }
  0xe9   : > { %6423 = vmatprep.subr.bf16.mxu0 %v6707_v54  ;;  %v742_v39 = vrot.slane %v6717_v7, 2  ;;  %v6734_v7 = vld [vmem:[#allocation6 + $0x140] sm:$0xff]  }
  0xeb   : > { %1683 = vmatmul.mubr.bf16.gmra.mrb[56].mxu0 %v7373_v4  ;;  %v743_v21 = vsel %vm673_vm1, %v740_v5, %v742_v39  ;;  %v9853_v39 = vld [vmem:[#allocation12_spill] sm:$0xff] }
  0xec   : > { %1690 = vmatprep.mubr.bf16.mxu0 %v7566_v23  ;;  %6424 = vmatpush3.bf16.msra.mxu0 %v6707_v54  ;;  %v741_v54 = vsel %vm673_vm1, %v739_v32, %v740_v5  ;;  %v6730_v32 = vld [vmem:[#allocation6 + $0x70] sm:$0xff]   ;;  %v6732_v5 = vld [vmem:[#allocation6 + $0x78] sm:$0xff]  }
  0xed   : > { %6425 = vmatprep.subr.bf16.mxu0 %v6708_v44  ;;  %v7693_v63 = vpack.c.bf16 %v743_v21, %v741_v54  ;;  %v508_v54 = vld [vmem:[#allocation2 + $0x190] sm:$0x3]  ;;  %v796_v21 = vrot.slane %v7704_v35, 2 }
  0xee   : > { %1586 = vmatmul.mubr.bf16.gmra.mrb[56].mxu1 %v7666_v27  ;;  %v792_v20 = vrot.slane %v508_v54, 1 }
  0xef   : > { %1593 = vmatprep.mubr.bf16.mxu1 %v7276_v45 }
  0xf0   : > { %6426 = vmatpush3.bf16.msra.mxu0 %v6708_v44  ;;  %v745_v44 = vrot.slane %v7326_v29, 2  ;;  %v7712_v29 = vpack.c.bf16 %v7706_v48, %v7704_v35 }
  0xf1   : > { %6427 = vmatprep.subr.bf16.mxu0 %v6709_v15 }
  0xf2   : > { %v746_v2 = vsel %vm673_vm1, %v744_v56, %v745_v44  ;;  %v799_v56 = vrot.slane %v508_v54, 2 }
  0xf3   : > { %1691 = vmatmul.mubr.bf16.gmra.mrb[60].mxu0 %v7434_v50 }
  0xf4   : > { %1698 = vmatprep.mubr.bf16.mxu0 %v7593_v34  ;;  %6428 = vmatpush3.bf16.msra.mxu0 %v6709_v15  ;;  %v748_v15 = vsel %vm673_vm1, %v745_v44, %v747_v1  ;;  %v9855_v44 = vld [vmem:[#allocation13_spill] sm:$0xff] }
  0xf5   : > { %6429 = vmatprep.subr.bf16.mxu0 %v6710_v36  ;;  %v7708_v26 = vpack.c.bf16 %v748_v15, %v746_v2 }
  0xf6   : > { %1594 = vmatmul.mubr.bf16.gmra.mrb[60].mxu1 %v7677_v18 }
  0xf7   : > { %1601 = vmatprep.mubr.bf16.mxu1 %v7306_v11 }
  0xf8   : > { %6430 = vmatpush3.bf16.msra.mxu0 %v6710_v36  ;;  %v7723_v36 = vpack.c.bf16 %v753_v0, %v751_v24 }
  0xf9   : > { %5583 = vmatprep.subr.bf16.mxu0 %v6718_v55  ;;  %v9854_v55 = vld [vmem:[#allocation17_spill] sm:$0xff] }
  0xfb   : > { %1699 = vmatmul.mubr.bf16.gmra.mrb[64].mxu0 %v7451_v14 }
  0xfc   : > { %1706 = vmatprep.mubr.bf16.mxu0 %v7615_v16 }
  0xfe   : > { %1602 = vmatmul.mubr.bf16.gmra.mrb[64].mxu1 %v7685_v9 }
  0xff   : > { %1609 = vmatprep.mubr.bf16.mxu1 %v7341_v38 }
 0x103   : > { %1707 = vmatmul.mubr.bf16.gmra.mrb[68].mxu0 %v7476_v47 }
 0x104   : > { %1714 = vmatprep.mubr.bf16.mxu0 %v7632_v62 }
 0x106   : > { %1610 = vmatmul.mubr.bf16.gmra.mrb[68].mxu1 %v7693_v63 }
 0x107   : > { %1617 = vmatprep.mubr.bf16.mxu1 %v7392_v28 }
 0x10b   : > { %1715 = vmatmul.mubr.bf16.gmra.mrb[72].mxu0 %v7513_v19 }
 0x10c   : > { %1722 = vmatprep.mubr.bf16.mxu0 %v7643_v22 }
 0x10e   : > { %1618 = vmatmul.mubr.bf16.gmra.mrb[72].mxu1 %v7708_v26 }
 0x10f   : > { %1625 = vmatprep.mubr.bf16.mxu1 %v7712_v29 }
 0x113   : > { %1723 = vmatmul.mubr.bf16.gmra.mrb[76].mxu0 %v7541_v10 }
 0x114   : > { %1730 = vmatprep.mubr.bf16.mxu0 %v7655_v52 }
 0x116   : > { %1626 = vmatmul.mubr.bf16.gmra.mrb[76].mxu1 %v7723_v36 }
 0x117   : > { %1827 = vmatprep.mubr.bf16.mxu1 %v7343_v40  ;;  %v6724_v40 = vld [vmem:[#allocation6 + $0x58] sm:$0xff]  }
 0x11b   : > { %1731 = vmatmul.mubr.bf16.gmra.mrb[80].mxu0 %v7570_v59 }
 0x11c   : > { %1738 = vmatprep.mubr.bf16.mxu0 %v7666_v27 }
 0x11e   : > { %1828 = vmatmul.mubr.bf16.vlgmr.msra.gmra.mrb[80].mxu1 %v7337_v37  ;;  %v6723_v37 = vld [vmem:[#allocation6 + $0x10] sm:$0xff]  }
 0x11f   : > { %1835 = vmatprep.mubr.bf16.mxu1 %v7373_v4  ;;  %5472 = vmatpush3.bf16.msra.mxu1 %v6719_v57  ;;  %v6725_v4 = vld [vmem:[#allocation6 + $0x18] sm:$0xff]  }
 0x120   : > { %5473 = vmatprep.subr.bf16.mxu1 %v6720_v58 }
 0x123   : > { %5474 = vmatpush3.bf16.msra.mxu1 %v6721_v60  ;;  %1739 = vmatmul.mubr.bf16.gmra.mrb[84].mxu0 %v7595_v13 }
 0x124   : > { %5475 = vmatprep.subr.bf16.mxu1 %v6722_v25  ;;  %1746 = vmatprep.mubr.bf16.mxu0 %v7677_v18 }
 0x126   : > { %1836 = vmatmul.mubr.bf16.gmra.mrb[84].mxu1 %v7384_v17  ;;  %v6727_v17 = vld [vmem:[#allocation6 + $0x20] sm:$0xff]  }
 0x127   : > { %1843 = vmatprep.mubr.bf16.mxu1 %v7434_v50  ;;  %5476 = vmatpush3.bf16.msra.mxu1 %v6723_v37  ;;  %v6729_v50 = vld [vmem:[#allocation6 + $0x28] sm:$0xff]  }
 0x128   : > { %5477 = vmatprep.subr.bf16.mxu1 %v6724_v40 }
 0x12b   : > { %5478 = vmatpush3.bf16.msra.mxu1 %v6725_v4  ;;  %1747 = vmatmul.mubr.bf16.gmra.mrb[88].mxu0 %v7617_v33 }
 0x12c   : > { %5479 = vmatprep.subr.bf16.mxu1 %v6726_v61  ;;  %1754 = vmatprep.mubr.bf16.mxu0 %v7685_v9 }
 0x12e   : > { %1844 = vmatmul.mubr.bf16.gmra.mrb[88].mxu1 %v7425_v12  ;;  %v6731_v12 = vld [vmem:[#allocation6 + $0x30] sm:$0xff]  }
 0x12f   : > { %1851 = vmatprep.mubr.bf16.mxu1 %v7451_v14  ;;  %5480 = vmatpush3.bf16.msra.mxu1 %v6727_v17  ;;  %v6733_v14 = vld [vmem:[#allocation6 + $0x38] sm:$0xff]  }
 0x130   : > { %5481 = vmatprep.subr.bf16.mxu1 %v6728_v51 }
 0x133   : > { %5482 = vmatpush3.bf16.msra.mxu1 %v6729_v50  ;;  %1755 = vmatmul.mubr.bf16.gmra.mrb[92].mxu0 %v7272_v41 }
 0x134   : > { %5483 = vmatprep.subr.bf16.mxu1 %v6730_v32  ;;  %1762 = vmatprep.mubr.bf16.mxu0 %v7693_v63 }
 0x136   : > { %1852 = vmatmul.mubr.bf16.gmra.mrb[92].mxu1 %v9852_v46 }
 0x137   : > { %1859 = vmatprep.mubr.bf16.mxu1 %v7476_v47  ;;  %5484 = vmatpush3.bf16.msra.mxu1 %v6731_v12  ;;  %v797_v47 = vrot.slane %v7706_v48, 2 }
 0x138   : > { %5485 = vmatprep.subr.bf16.mxu1 %v6732_v5 }
 0x139   : > { %v798_v1 = vsel %vm673_vm1, %v796_v21, %v797_v47  ;;  %v800_v2 = vsel %vm673_vm1, %v797_v47, %v799_v56  ;;  %v6736_v47 = vld [vmem:[#allocation6 + $0xc8] sm:$0xff]  }
 0x13a   : > { %v7757_v15 = vpack.c.bf16 %v800_v2, %v798_v1 }
 0x13b   : > { %5486 = vmatpush3.bf16.msra.mxu1 %v6733_v14  ;;  %1763 = vmatmul.mubr.bf16.gmra.mrb[96].mxu0 %v9853_v39 }
 0x13c   : > { %5695 = vmatprep.subr.bf16.mxu1 %v6734_v7  ;;  %1770 = vmatprep.mubr.bf16.mxu0 %v7708_v26 }
 0x13e   : > { %1860 = vmatmul.mubr.bf16.gmra.mrb[96].mxu1 %v9854_v55 }
 0x13f   : > { %1867 = vmatprep.mubr.bf16.mxu1 %v7513_v19  ;;  %v789_v19 = vrot.slane %v7704_v35, 1 }
 0x143   : > { %1771 = vmatmul.mubr.bf16.gmra.mrb[100].mxu0 %v9855_v44 }
 0x144   : > { %1778 = vmatprep.mubr.bf16.mxu0 %v7723_v36 }
 0x146   : > { %1868 = vmatmul.mubr.bf16.gmra.mrb[100].mxu1 %v7535_v8  ;;  %v791_v8 = vsel %vm560_vm0, %v789_v19, %v790_v30 }
 0x147   : > { %1875 = vmatprep.mubr.bf16.mxu1 %v7541_v10  ;;  %v793_v10 = vsel %vm560_vm0, %v790_v30, %v792_v20  ;;  %v6737_v20 = vld [vmem:[#allocation6 + $0x88] sm:$0xff]  }
 0x148   : > { %v7769_v60 = vpack.c.bf16 %v793_v10, %v791_v8  ;;  %v6738_v8 = vld [vmem:[#allocation6 + $0xd0] sm:$0xff]  }
 0x14b   : > { %1779 = vmatmul.mubr.bf16.gmra.mrb[104].mxu0 %v9856_v49 }
 0x14c   : > { %1786 = vmatprep.mubr.bf16.mxu0 %v7757_v15 }
 0x14e   : > { %1876 = vmatmul.mubr.bf16.gmra.mrb[104].mxu1 %v7564_v3  ;;  %v5015_v24 = vpop.f32.mrb[0].mxu0 }
 0x14f   : > { %1883 = vmatprep.mubr.bf16.mxu1 %v7570_v59  ;;  %v5016_v57 = vpop.f32.mrb[1].mxu0 }
 0x150   : > { %v7767_v35 = vadd.f32 %v5016_v57, %v5015_v24  ;;  %v5018_v48 = vpop.f32.mrb[2].mxu0  ;;  %v6739_v24 = vld [vmem:[#allocation6 + $0x90] sm:$0xff]  }
 0x151   : > { %v5087_v0 = vpop.f32.mrb[0].mxu1  ;;  %v5019_v37 = vpop.f32.mrb[3].mxu0 }
 0x152   : > { %v5088_v58 = vpop.f32.mrb[1].mxu1  ;;  %v7773_v4 = vadd.f32 %v5019_v37, %v5018_v48 }
 0x153   : > { %v7771_v25 = vadd.f32 %v5088_v58, %v5087_v0  ;;  %v5090_v3 = vpop.f32.mrb[2].mxu1  ;;  %1787 = vmatmul.mubr.bf16.gmra.mrb[108].mxu0 %v7769_v60  ;;  %v6740_v58 = vld [vmem:[#allocation6 + $0xd8] sm:$0xff]  }
 0x154   : > { %v5091_v40 = vpop.f32.mrb[3].mxu1  ;;  %6431 = vmatprep.mubr.bf16.mxu0 %v7500_v42 }
 0x155   : > { %v7775_v59 = vadd.f32 %v5091_v40, %v5090_v3 }
 0x156   : > { %1884 = vmatmul.mubr.bf16.gmra.mrb[108].mxu1 %v7591_v6  ;;  %v5021_v61 = vpop.f32.mrb[4].mxu0  ;;  %v6735_v6 = vld [vmem:[#allocation6 + $0x80] sm:$0xff]  }
 0x157   : > { %1891 = vmatprep.mubr.bf16.mxu1 %v7595_v13  ;;  %v5022_v51 = vpop.f32.mrb[5].mxu0 }
 0x158   : > { %v7781_v32 = vadd.f32 %v5022_v51, %v5021_v61  ;;  %v5024_v46 = vpop.f32.mrb[6].mxu0  ;;  %v6742_v51 = vld [vmem:[#allocation6 + $0xe0] sm:$0xff]  }
 0x159   : > { %v5093_v17 = vpop.f32.mrb[4].mxu1  ;;  %v5025_v14 = vpop.f32.mrb[7].mxu0 }
 0x15a   : > { %v5094_v50 = vpop.f32.mrb[5].mxu1  ;;  %v7785_v55 = vadd.f32 %v5025_v14, %v5024_v46  ;;  %v6743_v46 = vld [vmem:[#allocation6 + $0xa0] sm:$0xff]  }
 0x15b   : > { %v7783_v12 = vadd.f32 %v5094_v50, %v5093_v17  ;;  %v5096_v5 = vpop.f32.mrb[6].mxu1  ;;  %6432 = vmatmul.mubr.bf16.vlgmr.msra.gmra.mrb[112].mxu0 %v7537_v43  ;;  %v6741_v17 = vld [vmem:[#allocation6 + $0x98] sm:$0xff]   ;;  %v7820_v50 = vld [vmem:[%s9791_s2] ss:$0 sm:$0xff] }
 0x15c   : > { %v5097_v7 = vpop.f32.mrb[7].mxu1  ;;  %6435 = vmatprep.mubr.bf16.mxu0 %v7566_v23  ;;  %5584 = vmatpush3.bf16.msra.mxu0 %v6735_v6 }
 0x15d   : > { %v7787_v54 = vadd.f32 %v5097_v7, %v5096_v5  ;;  %5585 = vmatprep.subr.bf16.mxu0 %v6736_v47  ;;  %v6744_v7 = vld [vmem:[#allocation6 + $0xe8] sm:$0xff]  }
 0x15e   : > { %1892 = vmatmul.mubr.bf16.gmra.mrb[112].mxu1 %v7613_v31  ;;  %v5027_v42 = vpop.f32.mrb[8].mxu0 }
 0x15f   : > { %1899 = vmatprep.mubr.bf16.mxu1 %v7617_v33  ;;  %v5028_v13 = vpop.f32.mrb[9].mxu0 }
 0x160   : > { %v7793_v56 = vadd.f32 %v5028_v13, %v5027_v42  ;;  %v5030_v1 = vpop.f32.mrb[10].mxu0  ;;  %5586 = vmatpush3.bf16.msra.mxu0 %v6737_v20  ;;  %v6746_v20 = vld [vmem:[#allocation6 + $0xf0] sm:$0xff]  }
 0x161   : > { %v5099_v21 = vpop.f32.mrb[8].mxu1  ;;  %v5031_v19 = vpop.f32.mrb[11].mxu0  ;;  %5587 = vmatprep.subr.bf16.mxu0 %v6738_v8  ;;  %v6747_v8 = vld [vmem:[#allocation6 + $0xb0] sm:$0xff]  }
 0x162   : > { %v5100_v2 = vpop.f32.mrb[9].mxu1  ;;  %v7797_v43 = vadd.f32 %v5031_v19, %v5030_v1  ;;  %v6745_v1 = vld [vmem:[#allocation6 + $0xa8] sm:$0xff]  }
 0x163   : > { %v7795_v30 = vadd.f32 %v5100_v2, %v5099_v21  ;;  %v5102_v31 = vpop.f32.mrb[10].mxu1  ;;  %6436 = vmatmul.mubr.bf16.gmra.mrb[116].mxu0 %v7593_v34  ;;  %v1350_v2 = vadd.f32 %v7773_v4, %v7820_v50 }
 0x164   : > { %v5103_v33 = vpop.f32.mrb[11].mxu1  ;;  %6439 = vmatprep.mubr.bf16.mxu0 %v7615_v16  ;;  %5588 = vmatpush3.bf16.msra.mxu0 %v6739_v24  ;;  %v6748_v24 = vld [vmem:[#allocation6 + $0xf8] sm:$0xff]  }
 0x165   : > { %v7799_v23 = vadd.f32 %v5103_v33, %v5102_v31  ;;  %5589 = vmatprep.subr.bf16.mxu0 %v6740_v58  ;;  %v1355_v58 = vadd.f32 %v7781_v32, %v7820_v50 }
 0x166   : > { %1900 = vmatmul.mubr.bf16.gmra.mrb[116].mxu1 %v7630_v53  ;;  %v5033_v10 = vpop.f32.mrb[12].mxu0 }
 0x167   : > { %1907 = vmatprep.mubr.bf16.mxu1 %v7272_v41  ;;  %v5034_v0 = vpop.f32.mrb[13].mxu0 }
 0x168   : > { %v7805_v48 = vadd.f32 %v5034_v0, %v5033_v10  ;;  %v5036_v3 = vpop.f32.mrb[14].mxu0  ;;  %5590 = vmatpush3.bf16.msra.mxu0 %v6741_v17 }
 0x169   : > { %v5105_v57 = vpop.f32.mrb[12].mxu1  ;;  %v5037_v40 = vpop.f32.mrb[15].mxu0  ;;  %5591 = vmatprep.subr.bf16.mxu0 %v6742_v51 }
 0x16a   : > { %v5106_v37 = vpop.f32.mrb[13].mxu1  ;;  %v7809_v34 = vadd.f32 %v5037_v40, %v5036_v3 }
 0x16b   : > { %v7807_v61 = vadd.f32 %v5106_v37, %v5105_v57  ;;  %v5108_v53 = vpop.f32.mrb[14].mxu1  ;;  %6440 = vmatmul.mubr.bf16.gmra.mrb[120].mxu0 %v7632_v62 }
 0x16c   : > { %v5109_v41 = vpop.f32.mrb[15].mxu1  ;;  %6443 = vmatprep.mubr.bf16.mxu0 %v7643_v22  ;;  %5592 = vmatpush3.bf16.msra.mxu0 %v6743_v46  ;;  %v9857_v46 = vld [vmem:[#allocation16_spill] sm:$0xff] }
 0x16d   : > { %v7811_v16 = vadd.f32 %v5109_v41, %v5108_v53  ;;  %5593 = vmatprep.subr.bf16.mxu0 %v6744_v7  ;;  %v6749_v53 = vld [vmem:[#allocation6 + $0xb8] sm:$0xff]  }
 0x16e   : > { %1908 = vmatmul.mubr.bf16.gmra.mrb[120].mxu1 %v7276_v45  ;;  %v5039_v5 = vpop.f32.mrb[16].mxu0  ;;  %v1347_v45 = vadd.f32 %v7767_v35, %v7820_v50  ;;  %v511_v7 = vld [vmem:[#allocation2 + $0x1a8] sm:$0x3] }
 0x16f   : > { %1915 = vmatprep.mubr.bf16.mxu1 %v9853_v39  ;;  %v5040_v42 = vpop.f32.mrb[17].mxu0 }
 0x170   : > { %v7824_v62 = vadd.f32 %v5040_v42, %v5039_v5  ;;  %v5042_v22 = vpop.f32.mrb[18].mxu0  ;;  %5594 = vmatpush3.bf16.msra.mxu0 %v6745_v1  ;;  %v809_v1 = vrot.slane %v511_v7, 1 }
 0x171   : > { %v5127_v14 = vpop.f32.mrb[16].mxu1  ;;  %v5043_v21 = vpop.f32.mrb[19].mxu0  ;;  %5595 = vmatprep.subr.bf16.mxu0 %v6746_v20 }
 0x172   : > { %v5128_v6 = vpop.f32.mrb[17].mxu1  ;;  %v7830_v31 = vadd.f32 %v5043_v21, %v5042_v22 }
 0x173   : > { %v5129_v39 = vadd.f32 %v5128_v6, %v5127_v14  ;;  %v5130_v13 = vpop.f32.mrb[18].mxu1  ;;  %6444 = vmatmul.mubr.bf16.gmra.mrb[124].mxu0 %v7655_v52 }
 0x174   : > { %v5131_v47 = vpop.f32.mrb[19].mxu1  ;;  %6447 = vmatprep.mubr.bf16.mxu0 %v7666_v27  ;;  %5596 = vmatpush3.bf16.msra.mxu0 %v6747_v8  ;;  %v1358_v27 = vadd.f32 %v7785_v55, %v7820_v50  ;;  %v7855_v55 = vld [vmem:[#allocation2 + $0x198] sm:$0xff] }
 0x175   : > { %v7828_v19 = vadd.f32 %v5129_v39, %v1347_v45  ;;  %v5132_v33 = vadd.f32 %v5131_v47, %v5130_v13  ;;  %5597 = vmatprep.subr.bf16.mxu0 %v6748_v24  ;;  %v1363_v45 = vadd.f32 %v7793_v56, %v7820_v50 }
 0x176   : > { %1916 = vmatmul.mubr.bf16.gmra.mrb[124].mxu1 %v7306_v11  ;;  %v5045_v4 = vpop.f32.mrb[20].mxu0 }
 0x177   : > { %v7834_v35 = vadd.f32 %v5132_v33, %v1350_v2  ;;  %1923 = vmatprep.mubr.bf16.mxu1 %v9855_v44  ;;  %v5046_v0 = vpop.f32.mrb[21].mxu0  ;;  %v1366_v2 = vadd.f32 %v7797_v43, %v7820_v50 }
 0x178   : > { %v7840_v11 = vadd.f32 %v5046_v0, %v5045_v4  ;;  %v5048_v3 = vpop.f32.mrb[22].mxu0  ;;  %5598 = vmatpush3.bf16.msra.mxu0 %v6749_v53 }
 0x179   : > { %v5133_v10 = vpop.f32.mrb[20].mxu1  ;;  %v5049_v40 = vpop.f32.mrb[23].mxu0  ;;  %5807 = vmatprep.subr.bf16.mxu0 %v9857_v46 }
 0x17a   : > { %v5134_v57 = vpop.f32.mrb[21].mxu1  ;;  %v7846_v17 = vadd.f32 %v5049_v40, %v5048_v3 }
 0x17b   : > { %v5135_v52 = vadd.f32 %v5134_v57, %v5133_v10  ;;  %v5136_v37 = vpop.f32.mrb[22].mxu1  ;;  %6448 = vmatmul.mubr.bf16.gmra.mrb[128].mxu0 %v7677_v18 }
 0x17c   : > { %v5137_v44 = vpop.f32.mrb[23].mxu1  ;;  %6451 = vmatprep.mubr.bf16.mxu0 %v7685_v9  ;;  %v7862_v9 = vld [vmem:[#allocation2 + $0x8] sm:$0xff] }
 0x17d   : > { %v7844_v41 = vadd.f32 %v5135_v52, %v1355_v58  ;;  %v5138_v51 = vadd.f32 %v5137_v44, %v5136_v37  ;;  %v7865_v47 = vrot.slane %v7862_v9, 1  ;;  %v816_v58 = vrot.slane %v511_v7, 2 }
 0x17e   : > { %1924 = vmatmul.mubr.bf16.gmra.mrb[128].mxu1 %v7341_v38  ;;  %v5051_v5 = vpop.f32.mrb[24].mxu0 }
 0x17f   : > { %v7851_v32 = vadd.f32 %v5138_v51, %v1358_v27  ;;  %1931 = vmatprep.mubr.bf16.mxu1 %v9856_v49  ;;  %v5052_v42 = vpop.f32.mrb[25].mxu0  ;;  %v806_v49 = vrot.slane %v7855_v55, 1  ;;  %v810_v43 = vsel %vm560_vm0, %v7865_v47, %v809_v1  ;;  %v1374_v27 = vadd.f32 %v7809_v34, %v7820_v50 }
 0x180   : > { %v7859_v39 = vadd.f32 %v5052_v42, %v5051_v5  ;;  %v5054_v18 = vpop.f32.mrb[26].mxu0  ;;  %v1382_v1 = vadd.f32 %v7830_v31, %v7820_v50 }
 0x181   : > { %v5139_v14 = vpop.f32.mrb[24].mxu1  ;;  %v5055_v13 = vpop.f32.mrb[27].mxu0  ;;  %v808_v4 = vsel %vm560_vm0, %v806_v49, %v7865_v47 }
 0x182   : > { %v5140_v6 = vpop.f32.mrb[25].mxu1  ;;  %v7871_v56 = vadd.f32 %v5055_v13, %v5054_v18  ;;  %v872_v40 = vpack.c.bf16 %v810_v43, %v808_v4 }
 0x183   : > { %v5141_v38 = vadd.f32 %v5140_v6, %v5139_v14  ;;  %v5142_v22 = vpop.f32.mrb[26].mxu1  ;;  %6452 = vmatmul.mubr.bf16.gmra.mrb[132].mxu0 %v7693_v63  ;;  %v7885_v63 = vrot.slane %v7862_v9, 2 }
 0x184   : > { %v5143_v21 = vpop.f32.mrb[27].mxu1  ;;  %6455 = vmatprep.mubr.bf16.mxu0 %v7708_v26 }
 0x185   : > { %v7869_v33 = vadd.f32 %v5141_v38, %v1363_v45  ;;  %v5144_v20 = vadd.f32 %v5143_v21, %v5142_v22  ;;  %v817_v34 = vsel %vm673_vm1, %v7885_v63, %v816_v58 }
 0x186   : > { %1932 = vmatmul.mubr.bf16.gmra.mrb[132].mxu1 %v7392_v28  ;;  %v5057_v10 = vpop.f32.mrb[28].mxu0  ;;  %v813_v28 = vrot.slane %v7855_v55, 2 }
 0x187   : > { %v7875_v8 = vadd.f32 %v5144_v20, %v1366_v2  ;;  %1939 = vmatprep.mubr.bf16.mxu1 %v7769_v60  ;;  %v5058_v0 = vpop.f32.mrb[29].mxu0  ;;  %v1371_v60 = vadd.f32 %v7805_v48, %v7820_v50 }
 0x188   : > { %v7889_v26 = vadd.f32 %v5058_v0, %v5057_v10  ;;  %v5060_v3 = vpop.f32.mrb[30].mxu0  ;;  %v815_v14 = vsel %vm673_vm1, %v813_v28, %v7885_v63  ;;  %v1387_v0 = vadd.f32 %v7840_v11, %v7820_v50 }
 0x189   : > { %v5145_v24 = vpop.f32.mrb[28].mxu1  ;;  %v5061_v44 = vpop.f32.mrb[31].mxu0  ;;  %v873_v38 = vpack.c.bf16 %v817_v34, %v815_v14  ;;  %v1395_v34 = vadd.f32 %v7859_v39, %v7820_v50 }
 0x18a   : > { %v5146_v57 = vpop.f32.mrb[29].mxu1  ;;  %v7895_v46 = vadd.f32 %v5061_v44, %v5060_v3  ;;  %v1390_v3 = vadd.f32 %v7846_v17, %v7820_v50 }
 0x18b   : > { %v5147_v52 = vadd.f32 %v5146_v57, %v5145_v24  ;;  %v5148_v37 = vpop.f32.mrb[30].mxu1  ;;  %6456 = vmatmul.mubr.bf16.gmra.mrb[136].mxu0 %v7723_v36  ;;  %v1379_v36 = vadd.f32 %v7824_v62, %v7820_v50 }
 0x18c   : > { %v5149_v53 = vpop.f32.mrb[31].mxu1  ;;  %6459 = vmatprep.mubr.bf16.mxu0 %v7757_v15 }
 0x18d   : > { %v7893_v51 = vadd.f32 %v5147_v52, %v1371_v60  ;;  %v5150_v5 = vadd.f32 %v5149_v53, %v5148_v37 }
 0x18e   : > { %1940 = vmatmul.mubr.bf16.gmra.mrb[136].mxu1 %v7712_v29  ;;  %v5063_v7 = vpop.f32.mrb[32].mxu0  ;;  %v871_v29 = vpack.c.bf16 %v7862_v9, %v7855_v55 }
 0x18f   : > { %v7899_v48 = vadd.f32 %v5150_v5, %v1374_v27  ;;  %1947 = vmatprep.mubr.bf16.mxu1 %v872_v40  ;;  %v5064_v6 = vpop.f32.mrb[33].mxu0 }
 0x190   : > { %v7910_v18 = vadd.f32 %v5064_v6, %v5063_v7  ;;  %v5066_v22 = vpop.f32.mrb[34].mxu0 }
 0x191   : > { %v5151_v42 = vpop.f32.mrb[32].mxu1  ;;  %v5067_v21 = vpop.f32.mrb[35].mxu0 }
 0x192   : > { %v5152_v45 = vpop.f32.mrb[33].mxu1  ;;  %v5068_v20 = vadd.f32 %v5067_v21, %v5066_v22 }
 0x193   : > { %v5153_v15 = vadd.f32 %v5152_v45, %v5151_v42  ;;  %v5154_v13 = vpop.f32.mrb[34].mxu1  ;;  %6460 = vmatmul.mubr.bf16.gmra.mrb[140].mxu0 %v873_v38  ;;  %v1398_v38 = vadd.f32 %v7871_v56, %v7820_v50 }
 0x194   : > { %v5155_v49 = vpop.f32.mrb[35].mxu1 }
 0x195   : > { %v7914_v2 = vadd.f32 %v5153_v15, %v1379_v36  ;;  %v5156_v4 = vadd.f32 %v5155_v49, %v5154_v13 }
 0x196   : > { %1948 = vmatmul.mubr.bf16.gmra.mrb[140].mxu1 %v871_v29  ;;  %v5069_v43 = vpop.f32.mrb[36].mxu0 }
 0x197   : > { %v7916_v55 = vadd.f32 %v5156_v4, %v1382_v1  ;;  %v5070_v10 = vpop.f32.mrb[37].mxu0  ;;  %v1403_v4 = vadd.f32 %v7889_v26, %v7820_v50 }
 0x198   : > { %v7920_v57 = vadd.f32 %v5070_v10, %v5069_v43  ;;  %v5072_v58 = vpop.f32.mrb[38].mxu0 }
 0x199   : > { %v5157_v62 = vpop.f32.mrb[36].mxu1  ;;  %v5073_v60 = vpop.f32.mrb[39].mxu0 }
 0x19a   : > { %v5158_v24 = vpop.f32.mrb[37].mxu1  ;;  %v7926_v40 = vadd.f32 %v5073_v60, %v5072_v58 }
 0x19b   : > { %v5159_v28 = vadd.f32 %v5158_v24, %v5157_v62  ;;  %v5160_v31 = vpop.f32.mrb[38].mxu1 }
 0x19c   : > { %v5161_v52 = vpop.f32.mrb[39].mxu1 }
 0x19d   : > { %v7924_v37 = vadd.f32 %v5159_v28, %v1387_v0  ;;  %v5162_v44 = vadd.f32 %v5161_v52, %v5160_v31  ;;  %v1406_v28 = vadd.f32 %v7895_v46, %v7820_v50  ;;  %v1414_v46 = vadd.f32 %v5068_v20, %v7820_v50 }
 0x19e   : > { %v5075_v27 = vpop.f32.mrb[40].mxu0 }
 0x19f   : > { %v7928_v53 = vadd.f32 %v5162_v44, %v1390_v3  ;;  %v5076_v11 = vpop.f32.mrb[41].mxu0 }
 0x1a0   : > { %v7932_v7 = vadd.f32 %v5076_v11, %v5075_v27  ;;  %v5078_v6 = vpop.f32.mrb[42].mxu0 }
 0x1a1   : > { %v5163_v5 = vpop.f32.mrb[40].mxu1  ;;  %v5079_v17 = vpop.f32.mrb[43].mxu0 }
 0x1a2   : > { %v5164_v14 = vpop.f32.mrb[41].mxu1  ;;  %v7938_v15 = vadd.f32 %v5079_v17, %v5078_v6 }
 0x1a3   : > { %v5165_v42 = vadd.f32 %v5164_v14, %v5163_v5  ;;  %v5166_v45 = vpop.f32.mrb[42].mxu1  ;;  %v1411_v5 = vadd.f32 %v7910_v18, %v7820_v50  ;;  %v2213_v18 = vld [vmem:[#allocation2] sm:$0xff] }
 0x1a4   : > { %v5167_v29 = vpop.f32.mrb[43].mxu1 }
 0x1a5   : > { %v7936_v36 = vadd.f32 %v5165_v42, %v1395_v34  ;;  %v5168_v22 = vadd.f32 %v5167_v29, %v5166_v45 }
 0x1a6   : > { %v5081_v21 = vpop.f32.mrb[44].mxu0 }
 0x1a7   : > { %v7940_v13 = vadd.f32 %v5168_v22, %v1398_v38  ;;  %v5082_v39 = vpop.f32.mrb[45].mxu0 }
 0x1a8   : > { %v7944_v43 = vadd.f32 %v5082_v39, %v5081_v21  ;;  %v5084_v10 = vpop.f32.mrb[46].mxu0  ;;  %v2215_v39 = vld [vmem:[#allocation2 + $0x10] sm:$0x3] }
 0x1a9   : > { %v5169_v49 = vpop.f32.mrb[44].mxu1  ;;  %v5085_v56 = vpop.f32.mrb[47].mxu0 }
 0x1aa   : > { %v5170_v1 = vpop.f32.mrb[45].mxu1  ;;  %v7950_v31 = vadd.f32 %v5085_v56, %v5084_v10 }
 0x1ab   : > { %v5171_v62 = vadd.f32 %v5170_v1, %v5169_v49  ;;  %v5172_v24 = vpop.f32.mrb[46].mxu1  ;;  %v2315_v1 = vrot.slane %v2213_v18, 1 }
 0x1ac   : > { %v5173_v0 = vpop.f32.mrb[47].mxu1 }
 0x1ad   : > { %v7948_v58 = vadd.f32 %v5171_v62, %v1403_v4  ;;  %v5174_v60 = vadd.f32 %v5173_v0, %v5172_v24  ;;  %v2318_v4 = vrot.slane %v2215_v39, 1  ;;  %v2317_v56 = vsel %vm560_vm0, %v2315_v1, %v7865_v47 }
 0x1ae   : > { %v5239_v44 = vpop.f32.mrb[48].mxu0  ;;  %v1419_v0 = vadd.f32 %v7920_v57, %v7820_v50 }
 0x1af   : > { %v7952_v52 = vadd.f32 %v5174_v60, %v1406_v28  ;;  %v5240_v27 = vpop.f32.mrb[49].mxu0 }
 0x1b0   : > { %v5241_v14 = vadd.f32 %v5240_v27, %v5239_v44  ;;  %v5242_v42 = vpop.f32.mrb[50].mxu0 }
 0x1b1   : > { %v5175_v3 = vpop.f32.mrb[48].mxu1  ;;  %v5243_v45 = vpop.f32.mrb[51].mxu0 }
 0x1b2   : > { %v5176_v26 = vpop.f32.mrb[49].mxu1  ;;  %v7960_v29 = vadd.f32 %v5241_v14, %v7828_v19  ;;  %v5244_v22 = vadd.f32 %v5243_v45, %v5242_v42  ;;  %v2319_v19 = vsel %vm560_vm0, %v7865_v47, %v2318_v4 }
 0x1b3   : > { %v5177_v11 = vadd.f32 %v5176_v26, %v5175_v3  ;;  %v5178_v34 = vpop.f32.mrb[50].mxu1  ;;  %v2574_v44 = vpack.c.bf16 %v2319_v19, %v2317_v56  ;;  %v1422_v26 = vadd.f32 %v7926_v40, %v7820_v50  ;;  %v6752_v40 = vld [vmem:[#allocation6 + $0x148] sm:$0xff]  }
 0x1b4   : > { %v5179_v6 = vpop.f32.mrb[51].mxu1  ;;  %v7965_v49 = vadd.f32 %v5244_v22, %v7834_v35  ;;  %v2430_v22 = vrot.slane %v2215_v39, 2  ;;  %v6753_v19 = vld [vmem:[#allocation6 + $0x108] sm:$0xff]  }
 0x1b5   : > { %v7957_v17 = vadd.f32 %v5177_v11, %v1411_v5  ;;  %v5180_v38 = vadd.f32 %v5179_v6, %v5178_v34  ;;  %v2573_v11 = vpack.c.bf16 %v7862_v9, %v2213_v18  ;;  %2659 = vmatprep.mubr.bf16.mxu1 %v2574_v44  ;;  %v6751_v6 = vld [vmem:[#allocation6 + $0x100] sm:$0xff]  }
 0x1b6   : > { %v5245_v20 = vpop.f32.mrb[52].mxu0  ;;  %v7994_v56 = vsel %vm673_vm1, %v7885_v63, %v2430_v22 }
 0x1b7   : > { %v7962_v21 = vadd.f32 %v5180_v38, %v1414_v46  ;;  %v5246_v24 = vpop.f32.mrb[53].mxu0  ;;  %2660 = vmatmul.mubr.bf16.vlgmr.msra.gmra.mrb[144].mxu1 %v2573_v11  ;;  %v2427_v38 = vrot.slane %v2213_v18, 2  ;;  %v1430_v18 = vadd.f32 %v7938_v15, %v7820_v50  ;;  %v6755_v15 = vld [vmem:[#allocation6 + $0x110] sm:$0xff]  }
 0x1b8   : > { %v5247_v35 = vadd.f32 %v5246_v24, %v5245_v20  ;;  %v5248_v3 = vpop.f32.mrb[54].mxu0  ;;  %5696 = vmatpush3.bf16.msra.mxu1 %v6751_v6  ;;  %v1435_v6 = vadd.f32 %v7944_v43, %v7820_v50 }
 0x1b9   : > { %v5181_v62 = vpop.f32.mrb[52].mxu1  ;;  %v5249_v5 = vpop.f32.mrb[55].mxu0  ;;  %5697 = vmatprep.subr.bf16.mxu1 %v6752_v40 }
 0x1ba   : > { %v5182_v10 = vpop.f32.mrb[53].mxu1  ;;  %v7979_v34 = vadd.f32 %v5247_v35, %v7844_v41  ;;  %v5250_v42 = vadd.f32 %v5249_v5, %v5248_v3  ;;  %v1427_v41 = vadd.f32 %v7932_v7, %v7820_v50 }
 0x1bb   : > { %v5183_v28 = vadd.f32 %v5182_v10, %v5181_v62  ;;  %v5184_v60 = vpop.f32.mrb[54].mxu1 }
 0x1bc   : > { %v5185_v27 = vpop.f32.mrb[55].mxu1  ;;  %v7984_v46 = vadd.f32 %v5250_v42, %v7851_v32  ;;  %v7990_v32 = vsel %vm673_vm1, %v2427_v38, %v7885_v63  ;;  %5698 = vmatpush3.bf16.msra.mxu1 %v6753_v19  ;;  %v6757_v38 = vld [vmem:[#allocation6 + $0x118] sm:$0xff]   ;;  %v6759_v19 = vld [vmem:[#allocation6 + $0x120] sm:$0xff]  }
 0x1bd   : > { %v7976_v14 = vadd.f32 %v5183_v28, %v1419_v0  ;;  %v5186_v47 = vadd.f32 %v5185_v27, %v5184_v60  ;;  %v2575_v0 = vpack.c.bf16 %v7994_v56, %v7990_v32  ;;  %v6754_v28 = vld [vmem:[#allocation6 + $0x150] sm:$0xff]   ;;  %v6756_v27 = vld [vmem:[#allocation6 + $0x158] sm:$0xff]  }
 0x1be   : > { %v5251_v9 = vpop.f32.mrb[56].mxu0  ;;  %5699 = vmatprep.subr.bf16.mxu1 %v6754_v28  ;;  %v8265_v32 = vld [vmem:[#allocation2 + $0x99] sm:$0xff] }
 0x1bf   : > { %v7981_v57 = vadd.f32 %v5186_v47, %v1422_v26  ;;  %v5252_v4 = vpop.f32.mrb[57].mxu0  ;;  %9865 = vst [vmem:[#allocation19_spill] sm:$0xff] %v8265_v32 }
 0x1c0   : > { %v5253_v20 = vadd.f32 %v5252_v4, %v5251_v9  ;;  %v5254_v24 = vpop.f32.mrb[58].mxu0  ;;  %5700 = vmatpush3.bf16.msra.mxu1 %v6755_v15 }
 0x1c1   : > { %v5187_v45 = vpop.f32.mrb[56].mxu1  ;;  %v5255_v39 = vpop.f32.mrb[59].mxu0  ;;  %5701 = vmatprep.subr.bf16.mxu1 %v6756_v27 }
 0x1c2   : > { %v5188_v1 = vpop.f32.mrb[57].mxu1  ;;  %v8003_v60 = vadd.f32 %v5253_v20, %v7869_v33  ;;  %v5256_v63 = vadd.f32 %v5255_v39, %v5254_v24 }
 0x1c3   : > { %v5189_v62 = vadd.f32 %v5188_v1, %v5187_v45  ;;  %v5190_v10 = vpop.f32.mrb[58].mxu1  ;;  %v6758_v1 = vld [vmem:[#allocation6 + $0x160] sm:$0xff]  }
 0x1c4   : > { %v5191_v7 = vpop.f32.mrb[59].mxu1  ;;  %v8008_v26 = vadd.f32 %v5256_v63, %v7875_v8  ;;  %5702 = vmatpush3.bf16.msra.mxu1 %v6757_v38  ;;  %v1438_v8 = vadd.f32 %v7950_v31, %v7820_v50  ;;  %v6763_v38 = vld [vmem:[#allocation6 + $0x130] sm:$0xff]  }
 0x1c5   : > { %v8000_v35 = vadd.f32 %v5189_v62, %v1427_v41  ;;  %v5192_v3 = vadd.f32 %v5191_v7, %v5190_v10  ;;  %5703 = vmatprep.subr.bf16.mxu1 %v6758_v1 }
 0x1c6   : > { %v5257_v11 = vpop.f32.mrb[60].mxu0 }
 0x1c7   : > { %v8005_v44 = vadd.f32 %v5192_v3, %v1430_v18  ;;  %v5258_v42 = vpop.f32.mrb[61].mxu0  ;;  %v6760_v18 = vld [vmem:[#allocation6 + $0x168] sm:$0xff]   ;;  %v1443_v3 = vadd.f32 %v7771_v25, %v7820_v50 }
 0x1c8   : > { %v5259_v40 = vadd.f32 %v5258_v42, %v5257_v11  ;;  %v5260_v9 = vpop.f32.mrb[62].mxu0  ;;  %5704 = vmatpush3.bf16.msra.mxu1 %v6759_v19  ;;  %v6762_v42 = vld [vmem:[#allocation6 + $0x170] sm:$0xff]  }
 0x1c9   : > { %v5193_v5 = vpop.f32.mrb[60].mxu1  ;;  %v5261_v41 = vpop.f32.mrb[63].mxu0  ;;  %5705 = vmatprep.subr.bf16.mxu1 %v6760_v18 }
 0x1ca   : > { %v5194_v47 = vpop.f32.mrb[61].mxu1  ;;  %v8017_v62 = vadd.f32 %v5259_v40, %v7893_v51  ;;  %v5262_v43 = vadd.f32 %v5261_v41, %v5260_v9 }
 0x1cb   : > { %v5195_v33 = vadd.f32 %v5194_v47, %v5193_v5  ;;  %v5196_v45 = vpop.f32.mrb[62].mxu1  ;;  %v6761_v5 = vld [vmem:[#allocation6 + $0x128] sm:$0xff]  }
 0x1cc   : > { %v5197_v22 = vpop.f32.mrb[63].mxu1  ;;  %v8022_v24 = vadd.f32 %v5262_v43, %v7899_v48  ;;  %5706 = vmatpush3.bf16.msra.mxu1 %v6761_v5  ;;  %v1446_v48 = vadd.f32 %v7775_v59, %v7820_v50 }
 0x1cd   : > { %v8014_v4 = vadd.f32 %v5195_v33, %v1435_v6  ;;  %v5198_v20 = vadd.f32 %v5197_v22, %v5196_v45  ;;  %5707 = vmatprep.subr.bf16.mxu1 %v6762_v42 }
 0x1ce   : > { %v5263_v7 = vpop.f32.mrb[64].mxu0 }
 0x1cf   : > { %v8019_v10 = vadd.f32 %v5198_v20, %v1438_v8  ;;  %v5264_v28 = vpop.f32.mrb[65].mxu0  ;;  %v6764_v8 = vld [vmem:[#allocation6 + $0x178] sm:$0xff]   ;;  %v1451_v20 = vadd.f32 %v7783_v12, %v7820_v50 }
 0x1d0   : > { %v5265_v63 = vadd.f32 %v5264_v28, %v5263_v7  ;;  %v5266_v27 = vpop.f32.mrb[66].mxu0  ;;  %5708 = vmatpush3.bf16.msra.mxu1 %v6763_v38  ;;  %v6766_v28 = vld [vmem:[#allocation6 + $0x200] sm:$0xff]  }
 0x1d1   : > { %v5199_v31 = vpop.f32.mrb[64].mxu1  ;;  %v5267_v47 = vpop.f32.mrb[67].mxu0  ;;  %5709 = vmatprep.subr.bf16.mxu1 %v6764_v8 }
 0x1d2   : > { %v5200_v39 = vpop.f32.mrb[65].mxu1  ;;  %v8031_v33 = vadd.f32 %v5265_v63, %v7914_v2  ;;  %v5268_v25 = vadd.f32 %v5267_v47, %v5266_v27  ;;  %v1459_v47 = vadd.f32 %v7795_v30, %v7820_v50 }
 0x1d3   : > { %v5201_v51 = vadd.f32 %v5200_v39, %v5199_v31  ;;  %v5202_v15 = vpop.f32.mrb[66].mxu1  ;;  %v6765_v31 = vld [vmem:[#allocation6 + $0x138] sm:$0xff]  }
 0x1d4   : > { %v5203_v11 = vpop.f32.mrb[67].mxu1  ;;  %v8036_v9 = vadd.f32 %v5268_v25, %v7916_v55  ;;  %5710 = vmatpush3.bf16.msra.mxu1 %v6765_v31  ;;  %v1454_v55 = vadd.f32 %v7787_v54, %v7820_v50 }
 0x1d5   : > { %v8028_v6 = vadd.f32 %v5201_v51, %v1443_v3  ;;  %v5204_v40 = vadd.f32 %v5203_v11, %v5202_v15  ;;  %6463 = vmatprep.subr.bf16.mxu1 %v6766_v28 }
 0x1d6   : > { %v5269_v22 = vpop.f32.mrb[68].mxu0 }
 0x1d7   : > { %v8033_v45 = vadd.f32 %v5204_v40, %v1446_v48  ;;  %v5270_v1 = vpop.f32.mrb[69].mxu0 }
 0x1d8   : > { %v5271_v43 = vadd.f32 %v5270_v1, %v5269_v22  ;;  %v5272_v18 = vpop.f32.mrb[70].mxu0 }
 0x1d9   : > { %v5205_v59 = vpop.f32.mrb[68].mxu1  ;;  %v5273_v39 = vpop.f32.mrb[71].mxu0 }
 0x1da   : > { %v5206_v41 = vpop.f32.mrb[69].mxu1  ;;  %v8045_v51 = vadd.f32 %v5271_v43, %v7924_v37  ;;  %v5274_v12 = vadd.f32 %v5273_v39, %v5272_v18  ;;  %v1462_v37 = vadd.f32 %v7799_v23, %v7820_v50  ;;  %v1467_v23 = vadd.f32 %v7807_v61, %v7820_v50 }
 0x1db   : > { %v5207_v2 = vadd.f32 %v5206_v41, %v5205_v59  ;;  %v5208_v19 = vpop.f32.mrb[70].mxu1 }
 0x1dc   : > { %v5209_v7 = vpop.f32.mrb[71].mxu1  ;;  %v8050_v27 = vadd.f32 %v5274_v12, %v7928_v53 }
 0x1dd   : > { %v8042_v3 = vadd.f32 %v5207_v2, %v1451_v20  ;;  %v5210_v63 = vadd.f32 %v5209_v7, %v5208_v19 }
 0x1de   : > { %v5275_v48 = vpop.f32.mrb[72].mxu0 }
 0x1df   : > { %v8047_v15 = vadd.f32 %v5210_v63, %v1454_v55  ;;  %v5276_v54 = vpop.f32.mrb[73].mxu0 }
 0x1e0   : > { %v5277_v40 = vadd.f32 %v5276_v54, %v5275_v48  ;;  %v5278_v38 = vpop.f32.mrb[74].mxu0 }
 0x1e1   : > { %v5211_v5 = vpop.f32.mrb[72].mxu1  ;;  %v5279_v59 = vpop.f32.mrb[75].mxu0 }
 0x1e2   : > { %v5212_v11 = vpop.f32.mrb[73].mxu1  ;;  %v8059_v53 = vadd.f32 %v5277_v40, %v7936_v36  ;;  %v5280_v1 = vadd.f32 %v5279_v59, %v5278_v38  ;;  %v1470_v36 = vadd.f32 %v7811_v16, %v7820_v50 }
 0x1e3   : > { %v5213_v42 = vadd.f32 %v5212_v11, %v5211_v5  ;;  %v5214_v25 = vpop.f32.mrb[74].mxu1 }
 0x1e4   : > { %v5215_v8 = vpop.f32.mrb[75].mxu1  ;;  %v8064_v30 = vadd.f32 %v5280_v1, %v7940_v13 }
 0x1e5   : > { %v8056_v22 = vadd.f32 %v5213_v42, %v1459_v47  ;;  %v5216_v41 = vadd.f32 %v5215_v8, %v5214_v25 }
 0x1e6   : > { %v5281_v43 = vpop.f32.mrb[76].mxu0 }
 0x1e7   : > { %v8061_v20 = vadd.f32 %v5216_v41, %v1462_v37  ;;  %v5282_v18 = vpop.f32.mrb[77].mxu0 }
 0x1e8   : > { %v5283_v55 = vadd.f32 %v5282_v18, %v5281_v43  ;;  %v5284_v39 = vpop.f32.mrb[78].mxu0 }
 0x1e9   : > { %v5217_v2 = vpop.f32.mrb[76].mxu1  ;;  %v5285_v63 = vpop.f32.mrb[79].mxu0 }
 0x1ea   : > { %v5218_v19 = vpop.f32.mrb[77].mxu1  ;;  %v8073_v13 = vadd.f32 %v5283_v55, %v7948_v58  ;;  %v5286_v48 = vadd.f32 %v5285_v63, %v5284_v39 }
 0x1eb   : > { %v5219_v31 = vadd.f32 %v5218_v19, %v5217_v2  ;;  %v5220_v7 = vpop.f32.mrb[78].mxu1 }
 0x1ec   : > { %v5221_v28 = vpop.f32.mrb[79].mxu1  ;;  %v8078_v61 = vadd.f32 %v5286_v48, %v7952_v52 }
 0x1ed   : > { %v8070_v12 = vadd.f32 %v5219_v31, %v1467_v23  ;;  %v5222_v5 = vadd.f32 %v5221_v28, %v5220_v7 }
 0x1ee   : > { %v5287_v54 = vpop.f32.mrb[80].mxu0 }
 0x1ef   : > { %v8075_v11 = vadd.f32 %v5222_v5, %v1470_v36  ;;  %v5288_v42 = vpop.f32.mrb[81].mxu0 }
 0x1f0   : > { %v5289_v25 = vadd.f32 %v5288_v42, %v5287_v54  ;;  %v5290_v50 = vpop.f32.mrb[82].mxu0 }
 0x1f1   : > { %v5351_v47 = vpop.f32.mrb[80].mxu1  ;;  %v5291_v37 = vpop.f32.mrb[83].mxu0 }
 0x1f2   : > { %v5352_v40 = vpop.f32.mrb[81].mxu1  ;;  %v8081_v58 = vadd.f32 %v5289_v25, %v7957_v17  ;;  %v5292_v59 = vadd.f32 %v5291_v37, %v5290_v50 }
 0x1f3   : > { %v5353_v16 = vadd.f32 %v5352_v40, %v5351_v47  ;;  %v5354_v38 = vpop.f32.mrb[82].mxu1 }
 0x1f4   : > { %v5355_v8 = vpop.f32.mrb[83].mxu1  ;;  %v8087_v52 = vadd.f32 %v5292_v59, %v7962_v21 }
 0x1f5   : > { %v5356_v41 = vadd.f32 %v5355_v8, %v5354_v38  ;;  %v8084_v1 = vadd.f32 %v5353_v16, %v7960_v29 }
 0x1f6   : > { %v5293_v43 = vpop.f32.mrb[84].mxu0 }
 0x1f7   : > { %v8090_v2 = vadd.f32 %v5356_v41, %v7965_v49  ;;  %v5294_v18 = vpop.f32.mrb[85].mxu0 }
 0x1f8   : > { %v5295_v31 = vadd.f32 %v5294_v18, %v5293_v43  ;;  %v5296_v7 = vpop.f32.mrb[86].mxu0 }
 0x1f9   : > { %v5357_v19 = vpop.f32.mrb[84].mxu1  ;;  %v5297_v39 = vpop.f32.mrb[87].mxu0 }
 0x1fa   : > { %v5358_v23 = vpop.f32.mrb[85].mxu1  ;;  %v8093_v28 = vadd.f32 %v5295_v31, %v7976_v14  ;;  %v5298_v29 = vadd.f32 %v5297_v39, %v5296_v7 }
 0x1fb   : > { %v5359_v55 = vadd.f32 %v5358_v23, %v5357_v19  ;;  %v5360_v17 = vpop.f32.mrb[86].mxu1 }
 0x1fc   : > { %v5361_v36 = vpop.f32.mrb[87].mxu1  ;;  %v8099_v49 = vadd.f32 %v5298_v29, %v7981_v57 }
 0x1fd   : > { %v5362_v63 = vadd.f32 %v5361_v36, %v5360_v17  ;;  %v8096_v21 = vadd.f32 %v5359_v55, %v7979_v34 }
 0x1fe   : > { %v5299_v48 = vpop.f32.mrb[88].mxu0 }
 0x1ff   : > { %v8102_v5 = vadd.f32 %v5362_v63, %v7984_v46  ;;  %v5300_v47 = vpop.f32.mrb[89].mxu0 }
 0x200   : > { %v5301_v40 = vadd.f32 %v5300_v47, %v5299_v48  ;;  %v5302_v16 = vpop.f32.mrb[90].mxu0 }
 0x201   : > { %v5363_v54 = vpop.f32.mrb[88].mxu1  ;;  %v5303_v50 = vpop.f32.mrb[91].mxu0 }
 0x202   : > { %v5364_v42 = vpop.f32.mrb[89].mxu1  ;;  %v8105_v37 = vadd.f32 %v5301_v40, %v8000_v35  ;;  %v5304_v34 = vadd.f32 %v5303_v50, %v5302_v16 }
 0x203   : > { %v5365_v25 = vadd.f32 %v5364_v42, %v5363_v54  ;;  %v5366_v14 = vpop.f32.mrb[90].mxu1 }
 0x204   : > { %v5367_v38 = vpop.f32.mrb[91].mxu1  ;;  %v8111_v46 = vadd.f32 %v5304_v34, %v8005_v44 }
 0x205   : > { %v5368_v8 = vadd.f32 %v5367_v38, %v5366_v14  ;;  %v8108_v57 = vadd.f32 %v5365_v25, %v8003_v60 }
 0x206   : > { %v5305_v41 = vpop.f32.mrb[92].mxu0 }
 0x207   : > { %v8114_v59 = vadd.f32 %v5368_v8, %v8008_v26  ;;  %v5306_v19 = vpop.f32.mrb[93].mxu0 }
 0x208   : > { %v5307_v23 = vadd.f32 %v5306_v19, %v5305_v41  ;;  %v5308_v55 = vpop.f32.mrb[94].mxu0 }
 0x209   : > { %v5369_v43 = vpop.f32.mrb[92].mxu1  ;;  %v5309_v7 = vpop.f32.mrb[95].mxu0 }
 0x20a   : > { %v5370_v18 = vpop.f32.mrb[93].mxu1  ;;  %v8117_v39 = vadd.f32 %v5307_v23, %v8014_v4  ;;  %v5310_v60 = vadd.f32 %v5309_v7, %v5308_v55 }
 0x20b   : > { %v5371_v31 = vadd.f32 %v5370_v18, %v5369_v43  ;;  %v5372_v35 = vpop.f32.mrb[94].mxu1 }
 0x20c   : > { %v5373_v17 = vpop.f32.mrb[95].mxu1  ;;  %v8123_v26 = vadd.f32 %v5310_v60, %v8019_v10 }
 0x20d   : > { %v5374_v36 = vadd.f32 %v5373_v17, %v5372_v35  ;;  %v8120_v44 = vadd.f32 %v5371_v31, %v8017_v62 }
 0x20e   : > { %v5311_v63 = vpop.f32.mrb[96].mxu0 }
 0x20f   : > { %v8126_v29 = vadd.f32 %v5374_v36, %v8022_v24  ;;  %v5312_v54 = vpop.f32.mrb[97].mxu0 }
 0x210   : > { %v5313_v42 = vadd.f32 %v5312_v54, %v5311_v63  ;;  %v5314_v25 = vpop.f32.mrb[98].mxu0 }
 0x211   : > { %v5375_v48 = vpop.f32.mrb[96].mxu1  ;;  %v5315_v16 = vpop.f32.mrb[99].mxu0 }
 0x212   : > { %v5376_v47 = vpop.f32.mrb[97].mxu1  ;;  %v8129_v50 = vadd.f32 %v5313_v42, %v8028_v6  ;;  %v5316_v62 = vadd.f32 %v5315_v16, %v5314_v25 }
 0x213   : > { %v5377_v40 = vadd.f32 %v5376_v47, %v5375_v48  ;;  %v5378_v4 = vpop.f32.mrb[98].mxu1 }
 0x214   : > { %v5379_v14 = vpop.f32.mrb[99].mxu1  ;;  %v8135_v24 = vadd.f32 %v5316_v62, %v8033_v45 }
 0x215   : > { %v5380_v38 = vadd.f32 %v5379_v14, %v5378_v4  ;;  %v8132_v10 = vadd.f32 %v5377_v40, %v8031_v33 }
 0x216   : > { %v5317_v8 = vpop.f32.mrb[100].mxu0 }
 0x217   : > { %v8138_v34 = vadd.f32 %v5380_v38, %v8036_v9  ;;  %v5318_v43 = vpop.f32.mrb[101].mxu0 }
 0x218   : > { %v5319_v18 = vadd.f32 %v5318_v43, %v5317_v8  ;;  %v5320_v31 = vpop.f32.mrb[102].mxu0 }
 0x219   : > { %v5381_v41 = vpop.f32.mrb[100].mxu1  ;;  %v5321_v55 = vpop.f32.mrb[103].mxu0 }
 0x21a   : > { %v5382_v19 = vpop.f32.mrb[101].mxu1  ;;  %v8141_v7 = vadd.f32 %v5319_v18, %v8042_v3  ;;  %v5322_v33 = vadd.f32 %v5321_v55, %v5320_v31 }
 0x21b   : > { %v5383_v23 = vadd.f32 %v5382_v19, %v5381_v41  ;;  %v5384_v6 = vpop.f32.mrb[102].mxu1 }
 0x21c   : > { %v5385_v35 = vpop.f32.mrb[103].mxu1  ;;  %v8147_v9 = vadd.f32 %v5322_v33, %v8047_v15 }
 0x21d   : > { %v5386_v17 = vadd.f32 %v5385_v35, %v5384_v6  ;;  %v8144_v45 = vadd.f32 %v5383_v23, %v8045_v51 }
 0x21e   : > { %v5323_v36 = vpop.f32.mrb[104].mxu0 }
 0x21f   : > { %v8150_v60 = vadd.f32 %v5386_v17, %v8050_v27  ;;  %v5324_v48 = vpop.f32.mrb[105].mxu0 }
 0x220   : > { %v5325_v47 = vadd.f32 %v5324_v48, %v5323_v36  ;;  %v5326_v40 = vpop.f32.mrb[106].mxu0 }
 0x221   : > { %v5387_v63 = vpop.f32.mrb[104].mxu1  ;;  %v5327_v25 = vpop.f32.mrb[107].mxu0 }
 0x222   : > { %v5388_v54 = vpop.f32.mrb[105].mxu1  ;;  %v8153_v16 = vadd.f32 %v5325_v47, %v8056_v22  ;;  %v5328_v51 = vadd.f32 %v5327_v25, %v5326_v40 }
 0x223   : > { %v5389_v42 = vadd.f32 %v5388_v54, %v5387_v63  ;;  %v5390_v3 = vpop.f32.mrb[106].mxu1 }
 0x224   : > { %v5391_v4 = vpop.f32.mrb[107].mxu1  ;;  %v8159_v27 = vadd.f32 %v5328_v51, %v8061_v20 }
 0x225   : > { %v5392_v14 = vadd.f32 %v5391_v4, %v5390_v3  ;;  %v8156_v15 = vadd.f32 %v5389_v42, %v8059_v53 }
 0x226   : > { %v5329_v38 = vpop.f32.mrb[108].mxu0 }
 0x227   : > { %v8162_v62 = vadd.f32 %v5392_v14, %v8064_v30  ;;  %v5330_v41 = vpop.f32.mrb[109].mxu0 }
 0x228   : > { %v5331_v19 = vadd.f32 %v5330_v41, %v5329_v38  ;;  %v5332_v23 = vpop.f32.mrb[110].mxu0 }
 0x229   : > { %v5393_v8 = vpop.f32.mrb[108].mxu1  ;;  %v5333_v31 = vpop.f32.mrb[111].mxu0 }
 0x22a   : > { %v5394_v43 = vpop.f32.mrb[109].mxu1  ;;  %v8165_v55 = vadd.f32 %v5331_v19, %v8070_v12  ;;  %v5334_v53 = vadd.f32 %v5333_v31, %v5332_v23  ;;  %v8192_v19 = vld [vmem:[#allocation2 + $0x39] sm:$0xff] }
 0x22b   : > { %v5395_v18 = vadd.f32 %v5394_v43, %v5393_v8  ;;  %v5396_v22 = vpop.f32.mrb[110].mxu1 }
 0x22c   : > { %v5397_v6 = vpop.f32.mrb[111].mxu1  ;;  %v8171_v30 = vadd.f32 %v5334_v53, %v8075_v11 }
 0x22d   : > { %v5398_v35 = vadd.f32 %v5397_v6, %v5396_v22  ;;  %v8168_v20 = vadd.f32 %v5395_v18, %v8073_v13 }
 0x22e   : > { %v6433_v36 = vpop.f32.mrb[112].mxu0 }
 0x22f   : > { %v8174_v33 = vadd.f32 %v5398_v35, %v8078_v61  ;;  %v1999_v63 = vadd.f32 %v6433_v36, %v8096_v21  ;;  %v1990_v54 = vpop.f32.mrb[113].mxu0  ;;  %v8183_v21 = vld [vmem:[#allocation2 + $0x31] sm:$0xff] }
 0x230   : > { %v1991_v12 = vadd.f32 %v1990_v54, %v8084_v1  ;;  %v6434_v40 = vpop.f32.mrb[114].mxu0  ;;  %v8186_v1 = vld [vmem:[#allocation2 + $0x19] sm:$0xff] }
 0x231   : > { %v5399_v17 = vpop.f32.mrb[112].mxu1  ;;  %v2119_v3 = vmax.f32 %v1999_v63, 0.0  ;;  %v2002_v13 = vadd.f32 %v6434_v40, %v8102_v5  ;;  %v1993_v11 = vpop.f32.mrb[115].mxu0 }
 0x232   : > { %v5400_v48 = vpop.f32.mrb[113].mxu1  ;;  %v2117_v4 = vmax.f32 %v1991_v12, 0.0  ;;  %v1994_v61 = vadd.f32 %v1993_v11, %v8090_v2 }
 0x233   : > { %v5401_v47 = vadd.f32 %v5400_v48, %v5399_v17  ;;  %v5402_v42 = vpop.f32.mrb[114].mxu1  ;;  %v2151_v38 = vadd.f32 %v8183_v21, %v2119_v3  ;;  %v2120_v8 = vmax.f32 %v2002_v13, 0.0 }
 0x234   : > { %v5403_v25 = vpop.f32.mrb[115].mxu1  ;;  %v2149_v41 = vadd.f32 %v8186_v1, %v2117_v4  ;;  %v2118_v43 = vmax.f32 %v1994_v61, 0.0 }
 0x235   : > { %v5404_v51 = vadd.f32 %v5403_v25, %v5402_v42  ;;  %v8181_v14 = vadd.f32 %v5401_v47, %v8081_v58  ;;  %2183 = vst [vmem:[#allocation2 + $0x31] sm:$0xff] %v2151_v38  ;;  %v2152_v2 = vadd.f32 %v8192_v19, %v2120_v8  ;;  %v8195_v58 = vld [vmem:[#allocation2 + $0x21] sm:$0xff]  ;;  %v8221_v38 = vld [vmem:[#allocation2 + $0x51] sm:$0xff] }
 0x236   : > { %2181 = vst [vmem:[#allocation2 + $0x19] sm:$0xff] %v2149_v41  ;;  %9858 = vst [vmem:[#allocation15_spill] sm:$0xff] %v8195_v58  ;;  %v2150_v18 = vadd.f32 %v8195_v58, %v2118_v43  ;;  %v6437_v22 = vpop.f32.mrb[116].mxu0 }
 0x237   : > { %v8190_v5 = vadd.f32 %v5404_v51, %v8087_v52  ;;  %2184 = vst [vmem:[#allocation2 + $0x39] sm:$0xff] %v2152_v2  ;;  %v2015_v31 = vadd.f32 %v6437_v22, %v8120_v44  ;;  %v2006_v53 = vpop.f32.mrb[117].mxu0  ;;  %v8205_v44 = vld [vmem:[#allocation2 + $0x61] sm:$0xff]  ;;  %9862 = vst [vmem:[#allocation14_spill] sm:$0xff] %v8221_v38 }
 0x238   : > { %2182 = vst [vmem:[#allocation2 + $0x21] sm:$0xff] %v2150_v18  ;;  %v2007_v35 = vadd.f32 %v2006_v53, %v8108_v57  ;;  %v6438_v36 = vpop.f32.mrb[118].mxu0  ;;  %9859 = vst [vmem:[#allocation12_spill] sm:$0xff] %v8205_v44  ;;  %v8208_v57 = vld [vmem:[#allocation2 + $0x49] sm:$0xff] }
 0x239   : > { %v5405_v23 = vpop.f32.mrb[116].mxu1  ;;  %v2123_v63 = vmax.f32 %v2015_v31, 0.0  ;;  %v2018_v48 = vadd.f32 %v6438_v36, %v8126_v29  ;;  %v2009_v47 = vpop.f32.mrb[119].mxu0  ;;  %9860 = vst [vmem:[#allocation17_spill] sm:$0xff] %v8208_v57 }
 0x23a   : > { %v5406_v6 = vpop.f32.mrb[117].mxu1  ;;  %v2121_v12 = vmax.f32 %v2007_v35, 0.0  ;;  %v2010_v40 = vadd.f32 %v2009_v47, %v8114_v59  ;;  %v8216_v59 = vld [vmem:[#allocation2 + $0x69] sm:$0xff] }
 0x23b   : > { %v5407_v52 = vadd.f32 %v5406_v6, %v5405_v23  ;;  %v5408_v17 = vpop.f32.mrb[118].mxu1  ;;  %v2155_v13 = vadd.f32 %v8205_v44, %v2123_v63  ;;  %v2124_v25 = vmax.f32 %v2018_v48, 0.0  ;;  %9861 = vst [vmem:[#allocation13_spill] sm:$0xff] %v8216_v59 }
 0x23c   : > { %v5409_v54 = vpop.f32.mrb[119].mxu1  ;;  %v2153_v11 = vadd.f32 %v8208_v57, %v2121_v12  ;;  %v2122_v4 = vmax.f32 %v2010_v40, 0.0  ;;  %v8211_v29 = vld [vmem:[#allocation2 + $0x30] sm:$0xff] }
 0x23d   : > { %v5410_v42 = vadd.f32 %v5409_v54, %v5408_v17  ;;  %v8203_v3 = vadd.f32 %v5407_v52, %v8093_v28  ;;  %2187 = vst [vmem:[#allocation2 + $0x61] sm:$0xff] %v2155_v13  ;;  %v2156_v28 = vadd.f32 %v8216_v59, %v2124_v25  ;;  %v8219_v61 = vld [vmem:[#allocation2 + $0x18] sm:$0xff] }
 0x23e   : > { %2185 = vst [vmem:[#allocation2 + $0x49] sm:$0xff] %v2153_v11  ;;  %v2154_v8 = vadd.f32 %v8221_v38, %v2122_v4  ;;  %v6441_v43 = vpop.f32.mrb[120].mxu0  ;;  %v8224_v2 = vld [vmem:[#allocation2 + $0x38] sm:$0xff]  ;;  %v2320_v18 = vrot.slane %v8219_v61, 1  ;;  %v8242_v47 = vld [vmem:[#allocation2 + $0x40] sm:$0x3] }
 0x23f   : > { %v8214_v51 = vadd.f32 %v5410_v42, %v8099_v49  ;;  %v2325_v49 = vrot.slane %v8211_v29, 1  ;;  %2188 = vst [vmem:[#allocation2 + $0x69] sm:$0xff] %v2156_v28  ;;  %v2031_v23 = vadd.f32 %v6441_v43, %v8144_v45  ;;  %v2022_v31 = vpop.f32.mrb[121].mxu0  ;;  %v8229_v6 = vld [vmem:[#allocation2 + $0x20] sm:$0xff]  ;;  %v8233_v53 = vpack.c.bf16 %v8224_v2, %v8211_v29  ;;  %v2218_v52 = vld [vmem:[#allocation2 + $0x28] sm:$0x3] }
 0x240   : > { %v2326_v35 = vrot.slane %v8224_v2, 1  ;;  %2186 = vst [vmem:[#allocation2 + $0x51] sm:$0xff] %v2154_v8  ;;  %v2023_v36 = vadd.f32 %v2022_v31, %v8132_v10  ;;  %v6442_v48 = vpop.f32.mrb[122].mxu0  ;;  %v2576_v45 = vpack.c.bf16 %v8229_v6, %v8219_v61  ;;  %v2321_v54 = vrot.slane %v8229_v6, 1 }
 0x241   : > { %v5411_v41 = vpop.f32.mrb[120].mxu1  ;;  %v2127_v12 = vmax.f32 %v2031_v23, 0.0  ;;  %v2034_v42 = vadd.f32 %v6442_v48, %v8150_v60  ;;  %v2025_v13 = vpop.f32.mrb[123].mxu0  ;;  %v2323_v25 = vrot.slane %v2218_v52, 1  ;;  %v2433_v48 = vrot.slane %v8229_v6, 2 }
 0x242   : > { %v5412_v22 = vpop.f32.mrb[121].mxu1  ;;  %v2327_v11 = vsel %vm560_vm0, %v2325_v49, %v2326_v35  ;;  %v2125_v4 = vmax.f32 %v2023_v36, 0.0  ;;  %v2026_v10 = vadd.f32 %v2025_v13, %v8138_v34  ;;  %2820 = vmatprep.mubr.bf16.mxu0 %v2576_v45  ;;  %v2322_v8 = vsel %vm560_vm0, %v2320_v18, %v2321_v54 }
 0x243   : > { %v8236_v17 = vadd.f32 %v5412_v22, %v5411_v41  ;;  %v5414_v63 = vpop.f32.mrb[122].mxu1  ;;  %v8250_v41 = vld [vmem:[#allocation2 + $0x91] sm:$0xff]  ;;  %v2128_v23 = vmax.f32 %v2034_v42, 0.0  ;;  %2821 = vmatmul.mubr.bf16.vlgmr.msra.gmra.mrb[144].mxu0 %v2575_v0  ;;  %v2324_v60 = vsel %vm560_vm0, %v2321_v54, %v2323_v25  ;;  %v2328_v49 = vrot.slane %v8242_v47, 1  ;;  %v8258_v22 = vld [vmem:[#allocation2 + $0x79] sm:$0xff] }
 0x244   : > { %v5415_v40 = vpop.f32.mrb[123].mxu1  ;;  %9863 = vst [vmem:[#allocation16_spill] sm:$0xff] %v8250_v41  ;;  %v2159_v43 = vadd.f32 %v8250_v41, %v2127_v12  ;;  %9864 = vst [vmem:[#allocation18_spill] sm:$0xff] %v8258_v22  ;;  %v2157_v34 = vadd.f32 %v8258_v22, %v2125_v4  ;;  %v2126_v31 = vmax.f32 %v2026_v10, 0.0  ;;  %2828 = vmatprep.mubr.bf16.mxu0 %v8233_v53  ;;  %v2432_v36 = vrot.slane %v8219_v61, 2  ;;  %v6779_v42 = vld [vmem:[#allocation6 + $0x1c8] sm:$0xff]  }
 0x245   : > { %v8246_v28 = vadd.f32 %v5415_v40, %v5414_v63  ;;  %v8262_v18 = vpack.c.bf16 %v2324_v60, %v2322_v8  ;;  %v6777_v63 = vld [vmem:[#allocation6 + $0x180] sm:$0xff]   ;;  %v2160_v56 = vadd.f32 %v8265_v32, %v2128_v23  ;;  %v2329_v0 = vsel %vm560_vm0, %v2326_v35, %v2328_v49  ;;  %v8270_v12 = vld [vmem:[#allocation2 + $0x48] sm:$0xff] }
 0x246   : > { %5808 = vmatpush3.bf16.msra.mxu0 %v6777_v63  ;;  %2191 = vst [vmem:[#allocation2 + $0x91] sm:$0xff] %v2159_v43  ;;  %v2435_v54 = vrot.slane %v2218_v52, 2  ;;  %2189 = vst [vmem:[#allocation2 + $0x79] sm:$0xff] %v2157_v34  ;;  %v8272_v40 = vld [vmem:[#allocation2 + $0x81] sm:$0xff]  ;;  %v6445_v25 = vpop.f32.mrb[124].mxu0  ;;  %v8276_v4 = vpack.c.bf16 %v2329_v0, %v2327_v11  ;;  %v2330_v35 = vrot.slane %v8270_v12, 1  ;;  %v2434_v43 = vsel %vm673_vm1, %v2432_v36, %v2433_v48 }
 0x247   : > { %5809 = vmatprep.subr.bf16.mxu0 %v6779_v42  ;;  %9866 = vst [vmem:[#allocation20_spill] sm:$0xff] %v8272_v40  ;;  %v2158_v61 = vadd.f32 %v8272_v40, %v2126_v31  ;;  %2667 = vmatprep.mubr.bf16.mxu1 %v8262_v18  ;;  %v2437_v6 = vrot.slane %v8211_v29, 2  ;;  %2192 = vst [vmem:[#allocation2 + $0x99] sm:$0xff] %v2160_v56  ;;  %v2047_v52 = vadd.f32 %v6445_v25, %v8168_v20  ;;  %v2038_v8 = vpop.f32.mrb[125].mxu0  ;;  %v8283_v60 = vld [vmem:[#allocation2 + $0x50] sm:$0xff]  ;;  %v6781_v42 = vld [vmem:[#allocation6 + $0x188] sm:$0xff]  }
 0x248   : > { %2668 = vmatmul.mubr.bf16.gmra.mrb[148].mxu1 %v2576_v45  ;;  %v2436_v23 = vsel %vm673_vm1, %v2433_v48, %v2435_v54  ;;  %v8285_v49 = vld [vmem:[#allocation2 + $0x58] sm:$0x3]  ;;  %v2438_v11 = vrot.slane %v8224_v2, 2  ;;  %v2039_v29 = vadd.f32 %v2038_v8, %v8156_v15  ;;  %v6446_v45 = vpop.f32.mrb[126].mxu0  ;;  %v2440_v36 = vrot.slane %v8242_v47, 2  ;;  %v6782_v47 = vld [vmem:[#allocation6 + $0x1d0] sm:$0xff]  }
 0x249   : > { %v5417_v13 = vpop.f32.mrb[124].mxu1  ;;  %2190 = vst [vmem:[#allocation2 + $0x81] sm:$0xff] %v2158_v61  ;;  %2675 = vmatprep.mubr.bf16.mxu1 %v8276_v4  ;;  %v8290_v31 = vpack.c.bf16 %v2436_v23, %v2434_v43  ;;  %v2131_v63 = vmax.f32 %v2047_v52, 0.0  ;;  %v2050_v56 = vadd.f32 %v6446_v45, %v8174_v33  ;;  %v2041_v48 = vpop.f32.mrb[127].mxu0  ;;  %v2331_v54 = vrot.slane %v8283_v60, 1  ;;  %v8301_v52 = vld [vmem:[#allocation2 + $0xc1] sm:$0xff] }
 0x24a   : > { %v5418_v10 = vpop.f32.mrb[125].mxu1  ;;  %v2333_v2 = vrot.slane %v8285_v49, 1  ;;  %5810 = vmatpush3.bf16.msra.mxu0 %v6781_v42  ;;  %v2129_v15 = vmax.f32 %v2039_v29, 0.0  ;;  %v8299_v25 = vpack.c.bf16 %v8283_v60, %v8270_v12  ;;  %9867 = vst [vmem:[#allocation21_spill] sm:$0xff] %v8301_v52  ;;  %v8307_v23 = vld [vmem:[#allocation2 + $0x60] sm:$0xff]  ;;  %v8311_v29 = vld [vmem:[#allocation2 + $0xa9] sm:$0xff] }
 0x24b   : > { %v5419_v34 = vadd.f32 %v5418_v10, %v5417_v13  ;;  %v5420_v20 = vpop.f32.mrb[126].mxu1  ;;  %v2042_v13 = vadd.f32 %v2041_v48, %v8162_v62  ;;  %5811 = vmatprep.subr.bf16.mxu0 %v6782_v47  ;;  %v2163_v33 = vadd.f32 %v8301_v52, %v2131_v63  ;;  %v2132_v10 = vmax.f32 %v2050_v56, 0.0  ;;  %2829 = vmatmul.mubr.bf16.gmra.mrb[148].mxu0 %v8290_v31  ;;  %v8309_v62 = vld [vmem:[#allocation2 + $0x68] sm:$0xff]  ;;  %v8316_v56 = vld [vmem:[#allocation2 + $0x70] sm:$0x3]  ;;  %v6786_v42 = vld [vmem:[#allocation6 + $0x190] sm:$0xff]  }
 0x24c   : > { %v5421_v0 = vpop.f32.mrb[127].mxu1  ;;  %v2332_v8 = vsel %vm560_vm0, %v2330_v35, %v2331_v54  ;;  %v2334_v43 = vsel %vm560_vm0, %v2331_v54, %v2333_v2  ;;  %9868 = vst [vmem:[#allocation22_spill] sm:$0xff] %v8311_v29  ;;  %2836 = vmatprep.mubr.bf16.mxu0 %v8299_v25  ;;  %v2439_v63 = vsel %vm673_vm1, %v2437_v6, %v2438_v11 }
 0x24d   : > { %v5422_v61 = vadd.f32 %v5421_v0, %v5420_v20  ;;  %v2161_v20 = vadd.f32 %v8311_v29, %v2129_v15  ;;  %v2130_v45 = vmax.f32 %v2042_v13, 0.0  ;;  %2195 = vst [vmem:[#allocation2 + $0xc1] sm:$0xff] %v2163_v33  ;;  %v8318_v0 = vld [vmem:[#allocation2 + $0xc9] sm:$0xff]  ;;  %v8321_v48 = vpack.c.bf16 %v2334_v43, %v2332_v8  ;;  %v8327_v15 = vld [vmem:[#allocation2 + $0xb1] sm:$0xff] }
 0x24e   : > { %9869 = vst [vmem:[#allocation23_spill] sm:$0xff] %v8318_v0  ;;  %v2164_v35 = vadd.f32 %v8318_v0, %v2132_v10  ;;  %v2441_v54 = vsel %vm673_vm1, %v2438_v11, %v2440_v36  ;;  %v8325_v2 = vadd.f32 %v5419_v34, %v8117_v39  ;;  %5812 = vmatpush3.bf16.msra.mxu0 %v6786_v42  ;;  %9870 = vst [vmem:[#allocation24_spill] sm:$0xff] %v8327_v15  ;;  %v6449_v47 = vpop.f32.mrb[128].mxu0  ;;  %v6788_v36 = vld [vmem:[#allocation6 + $0x1d8] sm:$0xff]  }
 0x24f   : > { %2193 = vst [vmem:[#allocation2 + $0xa9] sm:$0xff] %v2161_v20  ;;  %v2162_v6 = vadd.f32 %v8327_v15, %v2130_v45  ;;  %v8332_v33 = vadd.f32 %v8236_v17, %v8105_v37  ;;  %v2335_v10 = vrot.slane %v8307_v23, 1  ;;  %v2336_v11 = vrot.slane %v8309_v62, 1  ;;  %5813 = vmatprep.subr.bf16.mxu0 %v6788_v36  ;;  %v2054_v8 = vpop.f32.mrb[129].mxu0  ;;  %v6790_v15 = vld [vmem:[#allocation6 + $0x1e0] sm:$0xff]  }
 0x250   : > { %2196 = vst [vmem:[#allocation2 + $0xc9] sm:$0xff] %v2164_v35  ;;  %v2063_v39 = vadd.f32 %v6449_v47, %v8203_v3  ;;  %2676 = vmatmul.mubr.bf16.gmra.mrb[152].mxu1 %v8233_v53  ;;  %v2338_v43 = vrot.slane %v8316_v56, 1  ;;  %v8340_v20 = vadd.f32 %v5422_v61, %v8123_v26  ;;  %v8344_v37 = vadd.f32 %v8246_v28, %v8111_v46  ;;  %v6450_v35 = vpop.f32.mrb[130].mxu0 }
 0x251   : > { %v5423_v13 = vpop.f32.mrb[128].mxu1  ;;  %2194 = vst [vmem:[#allocation2 + $0xb1] sm:$0xff] %v2162_v6  ;;  %v2055_v45 = vadd.f32 %v2054_v8, %v8181_v14  ;;  %2683 = vmatprep.mubr.bf16.mxu1 %v8321_v48  ;;  %v8348_v42 = vpack.c.bf16 %v2441_v54, %v2439_v63  ;;  %v8352_v47 = vpack.c.bf16 %v8309_v62, %v8307_v23  ;;  %v2057_v46 = vpop.f32.mrb[131].mxu0  ;;  %v2443_v6 = vrot.slane %v8283_v60, 2  ;;  %v6789_v14 = vld [vmem:[#allocation6 + $0x198] sm:$0xff]   ;;  %v8359_v8 = vld [vmem:[#allocation2 + $0x80] sm:$0xff] }
 0x252   : > { %v5424_v34 = vpop.f32.mrb[129].mxu1  ;;  %v2135_v26 = vmax.f32 %v2063_v39, 0.0  ;;  %v2066_v61 = vadd.f32 %v6450_v35, %v8214_v51  ;;  %v2337_v28 = vsel %vm560_vm0, %v2335_v10, %v2336_v11  ;;  %5814 = vmatpush3.bf16.msra.mxu0 %v6789_v14  ;;  %v2058_v63 = vadd.f32 %v2057_v46, %v8190_v5  ;;  %v8361_v39 = vld [vmem:[#allocation2 + $0xf1] sm:$0xff]  ;;  %v8384_v14 = vld [vmem:[#allocation2 + $0xe1] sm:$0xff] }
 0x253   : > { %v5425_v17 = vadd.f32 %v5424_v34, %v5423_v13  ;;  %v5426_v3 = vpop.f32.mrb[130].mxu1  ;;  %v2133_v13 = vmax.f32 %v2055_v45, 0.0  ;;  %v2442_v54 = vrot.slane %v8270_v12, 2  ;;  %5815 = vmatprep.subr.bf16.mxu0 %v6790_v15  ;;  %9871 = vst [vmem:[#allocation25_spill] sm:$0xff] %v8361_v39  ;;  %2837 = vmatmul.mubr.bf16.gmra.mrb[152].mxu0 %v8348_v42  ;;  %v2339_v60 = vsel %vm560_vm0, %v2336_v11, %v2338_v43  ;;  %v8367_v45 = vld [vmem:[#allocation2 + $0xd9] sm:$0xff]  ;;  %v6794_v46 = vld [vmem:[#allocation6 + $0x1a0] sm:$0xff]  }
 0x254   : > { %v5427_v36 = vpop.f32.mrb[131].mxu1  ;;  %v2167_v51 = vadd.f32 %v8361_v39, %v2135_v26  ;;  %v2136_v35 = vmax.f32 %v2066_v61, 0.0  ;;  %v2445_v10 = vrot.slane %v8285_v49, 2  ;;  %9872 = vst [vmem:[#allocation26_spill] sm:$0xff] %v8367_v45  ;;  %v2134_v12 = vmax.f32 %v2058_v63, 0.0  ;;  %2844 = vmatprep.mubr.bf16.mxu0 %v8352_v47  ;;  %v8378_v61 = vld [vmem:[#allocation2 + $0xf9] sm:$0xff] }
 0x255   : > { %v5428_v34 = vadd.f32 %v5427_v36, %v5426_v3  ;;  %v2165_v5 = vadd.f32 %v8367_v45, %v2133_v13  ;;  %v8371_v3 = vld [vmem:[#allocation2 + $0x78] sm:$0xff]  ;;  %v8374_v15 = vadd.f32 %v5425_v17, %v8129_v50  ;;  %v8376_v26 = vld [vmem:[#allocation2 + $0x88] sm:$0x3]  ;;  %9873 = vst [vmem:[#allocation27_spill] sm:$0xff] %v8378_v61  ;;  %v2444_v49 = vsel %vm673_vm1, %v2442_v54, %v2443_v6 }
 0x256   : > { %2199 = vst [vmem:[#allocation2 + $0xf1] sm:$0xff] %v2167_v51  ;;  %v2168_v11 = vadd.f32 %v8378_v61, %v2136_v35  ;;  %v2446_v43 = vsel %vm673_vm1, %v2443_v6, %v2445_v10  ;;  %v2341_v36 = vrot.slane %v8359_v8, 1  ;;  %5816 = vmatpush3.bf16.msra.mxu0 %v6794_v46  ;;  %9874 = vst [vmem:[#allocation28_spill] sm:$0xff] %v8384_v14  ;;  %v6453_v13 = vpop.f32.mrb[132].mxu0  ;;  %v6796_v6 = vld [vmem:[#allocation6 + $0x1e8] sm:$0xff]  }
 0x257   : > { %2197 = vst [vmem:[#allocation2 + $0xd9] sm:$0xff] %v2165_v5  ;;  %v2166_v50 = vadd.f32 %v8384_v14, %v2134_v12  ;;  %v8387_v63 = vpack.c.bf16 %v2339_v60, %v2337_v28  ;;  %v8391_v51 = vpack.c.bf16 %v8359_v8, %v8371_v3  ;;  %v8394_v54 = vadd.f32 %v5428_v34, %v8135_v24  ;;  %v2070_v5 = vpop.f32.mrb[133].mxu0 }
 0x258   : > { %5817 = vmatprep.subr.bf16.mxu0 %v6796_v6  ;;  %2200 = vst [vmem:[#allocation2 + $0xf9] sm:$0xff] %v2168_v11  ;;  %v2079_v35 = vadd.f32 %v6453_v13, %v8325_v2  ;;  %2684 = vmatmul.mubr.bf16.gmra.mrb[156].mxu1 %v8299_v25  ;;  %v2340_v12 = vrot.slane %v8371_v3, 1  ;;  %v2343_v28 = vrot.slane %v8376_v26, 1  ;;  %v2448_v60 = vrot.slane %v8309_v62, 2  ;;  %v6454_v11 = vpop.f32.mrb[134].mxu0 }
 0x259   : > { %v5429_v17 = vpop.f32.mrb[132].mxu1  ;;  %2198 = vst [vmem:[#allocation2 + $0xe1] sm:$0xff] %v2166_v50  ;;  %v2071_v24 = vadd.f32 %v2070_v5, %v8332_v33  ;;  %2691 = vmatprep.mubr.bf16.mxu1 %v8387_v63  ;;  %v8403_v6 = vpack.c.bf16 %v2446_v43, %v2444_v49  ;;  %v2450_v2 = vrot.slane %v8316_v56, 2  ;;  %v2082_v14 = vadd.f32 %v6454_v11, %v8340_v20  ;;  %v2073_v45 = vpop.f32.mrb[135].mxu0  ;;  %v6797_v50 = vld [vmem:[#allocation6 + $0x1a8] sm:$0xff]   ;;  %v6798_v43 = vld [vmem:[#allocation6 + $0x1f0] sm:$0xff]  }
 0x25a   : > { %v5430_v10 = vpop.f32.mrb[133].mxu1  ;;  %v2139_v13 = vmax.f32 %v2079_v35, 0.0  ;;  %v2342_v39 = vsel %vm560_vm0, %v2340_v12, %v2341_v36  ;;  %v2447_v62 = vrot.slane %v8307_v23, 2  ;;  %5818 = vmatpush3.bf16.msra.mxu0 %v6797_v50  ;;  %v8411_v56 = vld [vmem:[#allocation2 + $0x121] sm:$0xff]  ;;  %v2344_v5 = vsel %vm560_vm0, %v2341_v36, %v2343_v28  ;;  %v8417_v12 = vld [vmem:[#allocation2 + $0x98] sm:$0xff]  ;;  %v8430_v28 = vld [vmem:[#allocation2 + $0x90] sm:$0xff] }
 0x25b   : > { %v5431_v46 = vadd.f32 %v5430_v10, %v5429_v17  ;;  %v5432_v34 = vpop.f32.mrb[134].mxu1  ;;  %v2137_v33 = vmax.f32 %v2071_v24, 0.0  ;;  %v2074_v10 = vadd.f32 %v2073_v45, %v8344_v37  ;;  %5819 = vmatprep.subr.bf16.mxu0 %v6798_v43  ;;  %9875 = vst [vmem:[#allocation29_spill] sm:$0xff] %v8411_v56  ;;  %v2140_v35 = vmax.f32 %v2082_v14, 0.0  ;;  %2845 = vmatmul.mubr.bf16.gmra.mrb[156].mxu0 %v8403_v6  ;;  %v8425_v14 = vld [vmem:[#allocation2 + $0xa0] sm:$0x3] }
 0x25c   : > { %v5433_v61 = vpop.f32.mrb[135].mxu1  ;;  %v2171_v20 = vadd.f32 %v8411_v56, %v2139_v13  ;;  %v2449_v23 = vsel %vm673_vm1, %v2447_v62, %v2448_v60  ;;  %2852 = vmatprep.mubr.bf16.mxu0 %v8391_v51  ;;  %v8427_v24 = vld [vmem:[#allocation2 + $0x129] sm:$0xff]  ;;  %v8432_v11 = vld [vmem:[#allocation2 + $0x111] sm:$0xff]  ;;  %v8435_v50 = vpack.c.bf16 %v2344_v5, %v2342_v39 }
 0x25d   : > { %v5434_v17 = vadd.f32 %v5433_v61, %v5432_v34  ;;  %v1934_v49 = vadd.f32 %v5431_v46, %v8141_v7  ;;  %v8419_v61 = vld [vmem:[#allocation2 + $0x109] sm:$0xff]  ;;  %v2138_v7 = vmax.f32 %v2074_v10, 0.0  ;;  %v2451_v46 = vsel %vm673_vm1, %v2448_v60, %v2450_v2  ;;  %9877 = vst [vmem:[#allocation31_spill] sm:$0xff] %v8427_v24  ;;  %v6802_v34 = vld [vmem:[#allocation6 + $0x1b0] sm:$0xff]   ;;  %9878 = vst [vmem:[#allocation32_spill] sm:$0xff] %v8432_v11 }
 0x25e   : > { %9876 = vst [vmem:[#allocation30_spill] sm:$0xff] %v8419_v61  ;;  %v2169_v37 = vadd.f32 %v8419_v61, %v2137_v33  ;;  %2203 = vst [vmem:[#allocation2 + $0x121] sm:$0xff] %v2171_v20  ;;  %v2172_v36 = vadd.f32 %v8427_v24, %v2140_v35  ;;  %5820 = vmatpush3.bf16.msra.mxu0 %v6802_v34  ;;  %v8439_v60 = vpack.c.bf16 %v8417_v12, %v8430_v28  ;;  %v6804_v2 = vld [vmem:[#allocation6 + $0x1f8] sm:$0xff]   ;;  %v8454_v24 = vld [vmem:[#allocation2 + $0xb0] sm:$0xff] }
 0x25f   : > { %v1937_v45 = vadd.f32 %v5434_v17, %v8147_v9  ;;  %v2170_v13 = vadd.f32 %v8432_v11, %v2138_v7  ;;  %v6457_v9 = vpop.f32.mrb[136].mxu0  ;;  %5821 = vmatprep.subr.bf16.mxu0 %v6804_v2  ;;  %v8442_v43 = vpack.c.bf16 %v2451_v46, %v2449_v23  ;;  %v2346_v20 = vrot.slane %v8417_v12, 1  ;;  %v8456_v61 = vld [vmem:[#allocation2 + $0xb8] sm:$0x3] }
 0x260   : > { %2201 = vst [vmem:[#allocation2 + $0x109] sm:$0xff] %v2169_v37  ;;  %2204 = vst [vmem:[#allocation2 + $0x129] sm:$0xff] %v2172_v36  ;;  %v2095_v33 = vadd.f32 %v6457_v9, %v1934_v49  ;;  %2692 = vmatmul.mubr.bf16.gmra.mrb[160].mxu1 %v8352_v47  ;;  %v2086_v10 = vpop.f32.mrb[137].mxu0  ;;  %v2348_v35 = vrot.slane %v8425_v14, 1  ;;  %v2345_v49 = vrot.slane %v8430_v28, 1  ;;  %v2453_v36 = vrot.slane %v8359_v8, 2 }
 0x261   : > { %v5435_v62 = vpop.f32.mrb[136].mxu1  ;;  %2202 = vst [vmem:[#allocation2 + $0x111] sm:$0xff] %v2170_v13  ;;  %v2087_v5 = vadd.f32 %v2086_v10, %v8374_v15  ;;  %2699 = vmatprep.mubr.bf16.mxu1 %v8435_v50  ;;  %v6458_v7 = vpop.f32.mrb[138].mxu0  ;;  %v2452_v2 = vrot.slane %v8371_v3, 2  ;;  %v2455_v11 = vrot.slane %v8376_v26, 2  ;;  %v6805_v13 = vld [vmem:[#allocation6 + $0x1b8] sm:$0xff]  }
 0x262   : > { %v5436_v17 = vpop.f32.mrb[137].mxu1  ;;  %v2143_v34 = vmax.f32 %v2095_v33, 0.0  ;;  %v2098_v9 = vadd.f32 %v6458_v7, %v1937_v45  ;;  %v2089_v46 = vpop.f32.mrb[139].mxu0  ;;  %5822 = vmatpush3.bf16.msra.mxu0 %v6805_v13  ;;  %v6806_v8 = vld [vmem:[#allocation6 + $0x40] sm:$0xff]   ;;  %v2347_v26 = vsel %vm560_vm0, %v2345_v49, %v2346_v20 }
 0x263   : > { %v5437_v39 = vadd.f32 %v5436_v17, %v5435_v62  ;;  %v5438_v37 = vpop.f32.mrb[138].mxu1  ;;  %v2141_v62 = vmax.f32 %v2087_v5, 0.0  ;;  %v2090_v17 = vadd.f32 %v2089_v46, %v8394_v54  ;;  %5943 = vmatprep.subr.bf16.mxu0 %v6806_v8  ;;  %v8458_v45 = vld [vmem:[#allocation2 + $0x151] sm:$0xff]  ;;  %2853 = vmatmul.mubr.bf16.gmra.mrb[160].mxu0 %v8442_v43  ;;  %v2349_v5 = vsel %vm560_vm0, %v2346_v20, %v2348_v35  ;;  %v8464_v54 = vld [vmem:[#allocation2 + $0x139] sm:$0xff]  ;;  %v8478_v46 = vld [vmem:[#allocation2 + $0x141] sm:$0xff] }
 0x264   : > { %v5439_v23 = vpop.f32.mrb[139].mxu1  ;;  %9879 = vst [vmem:[#allocation33_spill] sm:$0xff] %v8458_v45  ;;  %v2175_v3 = vadd.f32 %v8458_v45, %v2143_v34  ;;  %v2144_v33 = vmax.f32 %v2098_v9, 0.0  ;;  %9880 = vst [vmem:[#allocation34_spill] sm:$0xff] %v8464_v54  ;;  %2860 = vmatprep.mubr.bf16.mxu0 %v8439_v60  ;;  %v2454_v7 = vsel %vm673_vm1, %v2452_v2, %v2453_v36  ;;  %v8472_v34 = vld [vmem:[#allocation2 + $0x159] sm:$0xff]  ;;  %v2351_v35 = vrot.slane %v8454_v24, 1 }
 0x265   : > { %v5440_v15 = vadd.f32 %v5439_v23, %v5438_v37  ;;  %v1942_v10 = vadd.f32 %v5437_v39, %v8153_v16  ;;  %v2173_v16 = vadd.f32 %v8464_v54, %v2141_v62  ;;  %v2142_v39 = vmax.f32 %v2090_v17, 0.0  ;;  %v8470_v23 = vld [vmem:[#allocation2 + $0xa8] sm:$0xff]  ;;  %9881 = vst [vmem:[#allocation35_spill] sm:$0xff] %v8472_v34  ;;  %9882 = vst [vmem:[#allocation36_spill] sm:$0xff] %v8478_v46  ;;  %v2249_v56 = vld [vmem:[#allocation2 + $0x120] sm:$0xff] }
 0x266   : > { %2207 = vst [vmem:[#allocation2 + $0x151] sm:$0xff] %v2175_v3  ;;  %v2176_v49 = vadd.f32 %v8472_v34, %v2144_v33  ;;  %v2456_v20 = vsel %vm673_vm1, %v2453_v36, %v2455_v11  ;;  %v2353_v9 = vrot.slane %v8456_v61, 1  ;;  %v6461_v2 = vpop.f32.mrb[140].mxu0  ;;  %v8481_v62 = vpack.c.bf16 %v2349_v5, %v2347_v26  ;;  %v8499_v54 = vld [vmem:[#allocation2 + $0x169] sm:$0xff] }
 0x267   : > { %v1945_v37 = vadd.f32 %v5440_v15, %v8159_v27  ;;  %2205 = vst [vmem:[#allocation2 + $0x139] sm:$0xff] %v2173_v16  ;;  %v2174_v27 = vadd.f32 %v8478_v46, %v2142_v39  ;;  %v2102_v17 = vpop.f32.mrb[141].mxu0  ;;  %v2350_v11 = vrot.slane %v8470_v23, 1  ;;  %v8486_v16 = vpack.c.bf16 %v2456_v20, %v2454_v7  ;;  %9883 = vst [vmem:[#allocation37_spill] sm:$0xff] %v8499_v54 }
 0x268   : > { %2208 = vst [vmem:[#allocation2 + $0x159] sm:$0xff] %v2176_v49  ;;  %2700 = vmatmul.mubr.bf16.gmra.mrb[164].mxu1 %v8391_v51  ;;  %v2103_v8 = vadd.f32 %v2102_v17, %v1942_v10  ;;  %v6462_v33 = vpop.f32.mrb[142].mxu0  ;;  %v8490_v26 = vpack.c.bf16 %v8454_v24, %v8470_v23  ;;  %v2354_v46 = vsel %vm560_vm0, %v2351_v35, %v2353_v9  ;;  %v2460_v10 = vrot.slane %v8425_v14, 2  ;;  %v2239_v14 = vld [vmem:[#allocation2 + $0xd0] sm:$0x3] }
 0x269   : > { %v5441_v13 = vpop.f32.mrb[140].mxu1  ;;  %2206 = vst [vmem:[#allocation2 + $0x141] sm:$0xff] %v2174_v27  ;;  %2707 = vmatprep.mubr.bf16.mxu1 %v8481_v62  ;;  %v2105_v39 = vpop.f32.mrb[143].mxu0  ;;  %v2352_v49 = vsel %vm560_vm0, %v2350_v11, %v2351_v35  ;;  %v2458_v27 = vrot.slane %v8417_v12, 2  ;;  %v2457_v20 = vrot.slane %v8430_v28, 2  ;;  %v2238_v12 = vld [vmem:[#allocation2 + $0xc8] sm:$0xff] }
 0x26a   : > { %v5442_v15 = vpop.f32.mrb[141].mxu1  ;;  %v2106_v7 = vadd.f32 %v2105_v39, %v1945_v37  ;;  %v8507_v28 = vld [vmem:[#allocation2 + $0x171] sm:$0xff]  ;;  %v2358_v39 = vrot.slane %v2239_v14, 1 }
 0x26b   : > { %v5443_v36 = vadd.f32 %v5442_v15, %v5441_v13  ;;  %v5444_v3 = vpop.f32.mrb[142].mxu1  ;;  %v2145_v15 = vmax.f32 %v2103_v8, 0.0  ;;  %2861 = vmatmul.mubr.bf16.gmra.mrb[164].mxu0 %v8486_v16  ;;  %v2459_v37 = vsel %vm673_vm1, %v2457_v20, %v2458_v27  ;;  %9884 = vst [vmem:[#allocation38_spill] sm:$0xff] %v8507_v28 }
 0x26c   : > { %v5445_v5 = vpop.f32.mrb[143].mxu1  ;;  %v2146_v9 = vmax.f32 %v2106_v7, 0.0  ;;  %2868 = vmatprep.mubr.bf16.mxu0 %v8490_v26  ;;  %v2465_v7 = vrot.slane %v8456_v61, 2  ;;  %v2240_v61 = vld [vmem:[#allocation2 + $0xd8] sm:$0xff] }
 0x26d   : > { %v1950_v13 = vadd.f32 %v5443_v36, %v8165_v55  ;;  %v5446_v17 = vadd.f32 %v5445_v5, %v5444_v3  ;;  %v2177_v11 = vadd.f32 %v8499_v54, %v2145_v15  ;;  %v8504_v55 = vpack.c.bf16 %v2354_v46, %v2352_v49  ;;  %v2237_v5 = vld [vmem:[#allocation2 + $0xc0] sm:$0xff]  ;;  %v8518_v15 = vld [vmem:[#allocation2 + $0x189] sm:$0xff] }
 0x26e   : > { %v2461_v3 = vsel %vm673_vm1, %v2458_v27, %v2460_v10  ;;  %9886 = vst [vmem:[#allocation40_spill] sm:$0xff] %v8518_v15  ;;  %v8521_v10 = vpack.c.bf16 %v2238_v12, %v2237_v5  ;;  %v2246_v54 = vld [vmem:[#allocation2 + $0x108] sm:$0xff]  ;;  %v2255_v38 = vld [vmem:[#allocation2 + $0x150] sm:$0xff] }
 0x26f   : > { %v2111_v34 = vadd.f32 %v6461_v2, %v1950_v13  ;;  %v1953_v35 = vadd.f32 %v5446_v17, %v8171_v30  ;;  %2209 = vst [vmem:[#allocation2 + $0x169] sm:$0xff] %v2177_v11  ;;  %v2178_v2 = vadd.f32 %v8507_v28, %v2146_v9  ;;  %v2356_v30 = vrot.slane %v2238_v12, 1  ;;  %v8512_v13 = vld [vmem:[#allocation2 + $0x181] sm:$0xff] }
 0x270   : > { %2708 = vmatmul.mubr.bf16.gmra.mrb[168].mxu1 %v8439_v60  ;;  %9885 = vst [vmem:[#allocation39_spill] sm:$0xff] %v8512_v13  ;;  %v2463_v17 = vrot.slane %v8454_v24, 2  ;;  %v2241_v9 = vld [vmem:[#allocation2 + $0xe0] sm:$0xff] }
 0x271   : > { %v2147_v36 = vmax.f32 %v2111_v34, 0.0  ;;  %v2114_v8 = vadd.f32 %v6462_v33, %v1953_v35  ;;  %2210 = vst [vmem:[#allocation2 + $0x171] sm:$0xff] %v2178_v2  ;;  %2715 = vmatprep.mubr.bf16.mxu1 %v8504_v55  ;;  %v8516_v34 = vpack.c.bf16 %v2461_v3, %v2459_v37  ;;  %v2355_v33 = vrot.slane %v2237_v5, 1  ;;  %v2242_v37 = vld [vmem:[#allocation2 + $0xe8] sm:$0x3] }
 0x272   : > { %v2359_v11 = vsel %vm560_vm0, %v2356_v30, %v2358_v39  ;;  %v2462_v35 = vrot.slane %v8470_v23, 2  ;;  %v2466_v24 = vsel %vm673_vm1, %v2463_v17, %v2465_v7  ;;  %v2361_v2 = vrot.slane %v2241_v9, 1  ;;  %v2244_v7 = vld [vmem:[#allocation2 + $0xf8] sm:$0xff] }
 0x273   : > { %v2179_v46 = vadd.f32 %v8512_v13, %v2147_v36  ;;  %v2148_v49 = vmax.f32 %v2114_v8, 0.0  ;;  %2869 = vmatmul.mubr.bf16.gmra.mrb[168].mxu0 %v8516_v34  ;;  %v2357_v20 = vsel %vm560_vm0, %v2355_v33, %v2356_v30  ;;  %v2363_v3 = vrot.slane %v2242_v37, 1 }
 0x274   : > { %2876 = vmatprep.mubr.bf16.mxu0 %v8521_v10  ;;  %v8530_v36 = vpack.c.bf16 %v2359_v11, %v2357_v20  ;;  %v2464_v8 = vsel %vm673_vm1, %v2462_v35, %v2463_v17  ;;  %v2360_v39 = vrot.slane %v2240_v61, 1  ;;  %v2468_v23 = vrot.slane %v2238_v12, 2  ;;  %v2245_v20 = vld [vmem:[#allocation2 + $0x100] sm:$0x3] }
 0x275   : > { %2211 = vst [vmem:[#allocation2 + $0x181] sm:$0xff] %v2179_v46  ;;  %v2180_v27 = vadd.f32 %v8518_v15, %v2148_v49  ;;  %v8536_v30 = vpack.c.bf16 %v2466_v24, %v2464_v8  ;;  %v8538_v46 = vpack.c.bf16 %v2241_v9, %v2240_v61  ;;  %v2470_v49 = vrot.slane %v2239_v14, 2  ;;  %v2243_v24 = vld [vmem:[#allocation2 + $0xf0] sm:$0xff] }
 0x276   : > { %v2362_v33 = vsel %vm560_vm0, %v2360_v39, %v2361_v2  ;;  %v2467_v17 = vrot.slane %v2237_v5, 2  ;;  %v2366_v12 = vrot.slane %v2244_v7, 1  ;;  %v2368_v14 = vrot.slane %v2245_v20, 1  ;;  %v2258_v44 = vld [vmem:[#allocation2 + $0x168] sm:$0xff] }
 0x277   : > { %2212 = vst [vmem:[#allocation2 + $0x189] sm:$0xff] %v2180_v27  ;;  %v2364_v27 = vsel %vm560_vm0, %v2361_v2, %v2363_v3  ;;  %v2471_v8 = vsel %vm673_vm1, %v2468_v23, %v2470_v49  ;;  %v2365_v2 = vrot.slane %v2243_v24, 1  ;;  %v8552_v3 = vpack.c.bf16 %v2244_v7, %v2243_v24 }
 0x278   : > { %2716 = vmatmul.mubr.bf16.gmra.mrb[172].mxu1 %v8490_v26  ;;  %v8544_v11 = vpack.c.bf16 %v2364_v27, %v2362_v33  ;;  %v2469_v35 = vsel %vm673_vm1, %v2467_v17, %v2468_v23  ;;  %v2473_v5 = vrot.slane %v2241_v9, 2  ;;  %v2475_v28 = vrot.slane %v2242_v37, 2  ;;  %v2247_v27 = vld [vmem:[#allocation2 + $0x110] sm:$0xff]  ;;  %v2248_v17 = vld [vmem:[#allocation2 + $0x118] sm:$0x3] }
 0x279   : > { %2723 = vmatprep.mubr.bf16.mxu1 %v8530_v36  ;;  %v8550_v39 = vpack.c.bf16 %v2471_v8, %v2469_v35  ;;  %v2367_v33 = vsel %vm560_vm0, %v2365_v2, %v2366_v12  ;;  %v2369_v23 = vsel %vm560_vm0, %v2366_v12, %v2368_v14  ;;  %v2472_v49 = vrot.slane %v2240_v61, 2 }
 0x27a   : > { %v8558_v15 = vpack.c.bf16 %v2369_v23, %v2367_v33  ;;  %v2476_v8 = vsel %vm673_vm1, %v2473_v5, %v2475_v28  ;;  %v2371_v9 = vrot.slane %v2247_v27, 1  ;;  %v2373_v37 = vrot.slane %v2248_v17, 1  ;;  %v2250_v23 = vld [vmem:[#allocation2 + $0x128] sm:$0xff] }
 0x27b   : > { %2877 = vmatmul.mubr.bf16.gmra.mrb[172].mxu0 %v8536_v30  ;;  %v2474_v35 = vsel %vm673_vm1, %v2472_v49, %v2473_v5  ;;  %v2370_v12 = vrot.slane %v2246_v54, 1  ;;  %v8566_v14 = vpack.c.bf16 %v2247_v27, %v2246_v54  ;;  %v2478_v61 = vrot.slane %v2244_v7, 2  ;;  %v2251_v49 = vld [vmem:[#allocation2 + $0x130] sm:$0x3] }
 0x27c   : > { %2884 = vmatprep.mubr.bf16.mxu0 %v8538_v46  ;;  %v8564_v2 = vpack.c.bf16 %v2476_v8, %v2474_v35  ;;  %v2480_v13 = vrot.slane %v2245_v20, 2  ;;  %v2374_v28 = vsel %vm560_vm0, %v2371_v9, %v2373_v37  ;;  %v2477_v5 = vrot.slane %v2243_v24, 2 }
 0x27d   : > { %v2372_v33 = vsel %vm560_vm0, %v2370_v12, %v2371_v9  ;;  %v2376_v7 = vrot.slane %v2250_v23, 1  ;;  %v2378_v20 = vrot.slane %v2251_v49, 1  ;;  %v2375_v24 = vrot.slane %v2249_v56, 1 }
 0x27e   : > { %v8572_v45 = vpack.c.bf16 %v2374_v28, %v2372_v33  ;;  %v2479_v35 = vsel %vm673_vm1, %v2477_v5, %v2478_v61  ;;  %v2481_v8 = vsel %vm673_vm1, %v2478_v61, %v2480_v13  ;;  %v8582_v28 = vpack.c.bf16 %v2250_v23, %v2249_v56 }
 0x27f   : > { %v8578_v37 = vpack.c.bf16 %v2481_v8, %v2479_v35  ;;  %v2483_v5 = vrot.slane %v2247_v27, 2  ;;  %v2485_v29 = vrot.slane %v2248_v17, 2  ;;  %v2377_v61 = vsel %vm560_vm0, %v2375_v24, %v2376_v7  ;;  %v2253_v8 = vld [vmem:[#allocation2 + $0x140] sm:$0xff]  ;;  %v2252_v17 = vld [vmem:[#allocation2 + $0x138] sm:$0xff] }
 0x280   : > { %2724 = vmatmul.mubr.bf16.gmra.mrb[176].mxu1 %v8521_v10  ;;  %v2379_v52 = vsel %vm560_vm0, %v2376_v7, %v2378_v20  ;;  %v2482_v35 = vrot.slane %v2246_v54, 2  ;;  %v2381_v22 = vrot.slane %v2253_v8, 1  ;;  %v2380_v20 = vrot.slane %v2252_v17, 1 }
 0x281   : > { %2731 = vmatprep.mubr.bf16.mxu1 %v8544_v11  ;;  %v2486_v27 = vsel %vm673_vm1, %v2483_v5, %v2485_v29  ;;  %v2488_v54 = vrot.slane %v2250_v23, 2 }
 0x282   : > { %v2484_v32 = vsel %vm673_vm1, %v2482_v35, %v2483_v5  ;;  %v2487_v5 = vrot.slane %v2249_v56, 2  ;;  %v2257_v35 = vld [vmem:[#allocation2 + $0x160] sm:$0x3]  ;;  %v2493_v56 = vrot.slane %v2253_v8, 2 }
 0x283   : > { %2885 = vmatmul.mubr.bf16.gmra.mrb[176].mxu0 %v8550_v39  ;;  %v8596_v7 = vpack.c.bf16 %v2486_v27, %v2484_v32  ;;  %v2500_v58 = vrot.slane %v2257_v35, 2 }
 0x284   : > { %2892 = vmatprep.mubr.bf16.mxu0 %v8552_v3  ;;  %v2489_v32 = vsel %vm673_vm1, %v2487_v5, %v2488_v54  ;;  %v2260_v5 = vld [vmem:[#allocation2 + $0x178] sm:$0x3] }
 0x288   : > { %2732 = vmatmul.mubr.bf16.gmra.mrb[180].mxu1 %v8538_v46 }
 0x289   : > { %2739 = vmatprep.mubr.bf16.mxu1 %v8558_v15 }
 0x28a   : > { %v5487_v0 = vpop.f32.mrb[144].mxu1 }
 0x28b   : > { %2893 = vmatmul.mubr.bf16.gmra.mrb[180].mxu0 %v8564_v2  ;;  %v5488_v9 = vpop.f32.mrb[145].mxu1 }
 0x28c   : > { %2900 = vmatprep.mubr.bf16.mxu0 %v8566_v14  ;;  %v8580_v12 = vadd.f32 %v5488_v9, %v5487_v0  ;;  %v5490_v33 = vpop.f32.mrb[146].mxu1  ;;  %v2254_v0 = vld [vmem:[#allocation2 + $0x148] sm:$0x3]  ;;  %v8590_v9 = vpack.c.bf16 %v2379_v52, %v2377_v61  ;;  %v2382_v52 = vsel %vm560_vm0, %v2380_v20, %v2381_v22  ;;  %v2256_v61 = vld [vmem:[#allocation2 + $0x158] sm:$0xff] }
 0x28d   : > { %v5491_v13 = vpop.f32.mrb[147].mxu1  ;;  %v2383_v24 = vrot.slane %v2254_v0, 1  ;;  %v2386_v23 = vrot.slane %v2256_v61, 1  ;;  %v2495_v59 = vrot.slane %v2254_v0, 2  ;;  %v2393_v0 = vrot.slane %v2260_v5, 1 }
 0x28e   : > { %v8587_v40 = vadd.f32 %v5491_v13, %v5490_v33  ;;  %v8598_v33 = vpack.c.bf16 %v2253_v8, %v2252_v17  ;;  %v2490_v13 = vrot.slane %v2251_v49, 2  ;;  %v2388_v49 = vrot.slane %v2257_v35, 1  ;;  %v8642_v35 = vld [vmem:[#allocation2 + $0x180] sm:$0xff] }
 0x28f   : > { %v2384_v29 = vsel %vm560_vm0, %v2381_v22, %v2383_v24  ;;  %v2385_v22 = vrot.slane %v2255_v38, 1  ;;  %v8612_v24 = vpack.c.bf16 %v2256_v61, %v2255_v38 }
 0x290   : > { %2740 = vmatmul.mubr.bf16.gmra.mrb[184].mxu1 %v8552_v3  ;;  %v8604_v41 = vpack.c.bf16 %v2384_v29, %v2382_v52  ;;  %v2491_v27 = vsel %vm673_vm1, %v2488_v54, %v2490_v13  ;;  %v2389_v54 = vsel %vm560_vm0, %v2386_v23, %v2388_v49  ;;  %v2492_v13 = vrot.slane %v2252_v17, 2  ;;  %v2259_v29 = vld [vmem:[#allocation2 + $0x170] sm:$0xff] }
 0x291   : > { %2747 = vmatprep.mubr.bf16.mxu1 %v8572_v45  ;;  %v8610_v20 = vpack.c.bf16 %v2491_v27, %v2489_v32  ;;  %v2387_v52 = vsel %vm560_vm0, %v2385_v22, %v2386_v23  ;;  %v2496_v27 = vsel %vm673_vm1, %v2493_v56, %v2495_v59  ;;  %v2391_v8 = vrot.slane %v2259_v29, 1 }
 0x292   : > { %v8618_v57 = vpack.c.bf16 %v2389_v54, %v2387_v52  ;;  %v2494_v32 = vsel %vm673_vm1, %v2492_v13, %v2493_v56  ;;  %v2390_v23 = vrot.slane %v2258_v44, 1  ;;  %v8626_v49 = vpack.c.bf16 %v2259_v29, %v2258_v44 }
 0x293   : > { %2901 = vmatmul.mubr.bf16.gmra.mrb[184].mxu0 %v8578_v37  ;;  %v8624_v22 = vpack.c.bf16 %v2496_v27, %v2494_v32  ;;  %v2498_v17 = vrot.slane %v2256_v61, 2  ;;  %v2394_v59 = vsel %vm560_vm0, %v2391_v8, %v2393_v0  ;;  %v2497_v56 = vrot.slane %v2255_v38, 2  ;;  %v8637_v27 = vld [vmem:[#allocation2 + $0x188] sm:$0xff] }
 0x294   : > { %2908 = vmatprep.mubr.bf16.mxu0 %v8582_v28  ;;  %v2392_v52 = vsel %vm560_vm0, %v2390_v23, %v2391_v8  ;;  %v8646_v8 = vpack.c.bf16 %v8637_v27, %v8642_v35  ;;  %v2503_v38 = vrot.slane %v2259_v29, 2  ;;  %v2505_v0 = vrot.slane %v2260_v5, 2  ;;  %v8658_v29 = vld [vmem:[#allocation2 + $0x198] sm:$0xff]  ;;  %v8660_v5 = vld [vmem:[#allocation2 + $0x1a8] sm:$0x3] }
 0x295   : > { %v8632_v54 = vpack.c.bf16 %v2394_v59, %v2392_v52  ;;  %v2499_v13 = vsel %vm673_vm1, %v2497_v56, %v2498_v17  ;;  %v2501_v32 = vsel %vm673_vm1, %v2498_v17, %v2500_v58  ;;  %v2502_v58 = vrot.slane %v2258_v44, 2  ;;  %v8662_v59 = vld [vmem:[#allocation2 + $0x8] sm:$0xff] }
 0x296   : > { %v8640_v61 = vpack.c.bf16 %v2501_v32, %v2499_v13  ;;  %v2506_v17 = vsel %vm673_vm1, %v2503_v38, %v2505_v0  ;;  %v8665_v44 = vrot.slane %v8662_v59, 2  ;;  %v2566_v56 = vrot.slane %v8658_v29, 2  ;;  %v6816_v13 = vld [vmem:[#allocation6 + $0x200] sm:$0xff]   ;;  %v6817_v32 = vld [vmem:[#allocation6 + $0x208] sm:$0xff]  }
 0x297   : > { %v2504_v23 = vsel %vm673_vm1, %v2502_v58, %v2503_v38  ;;  %v6818_v58 = vld [vmem:[#allocation6 + $0x210] sm:$0xff]  }
 0x298   : > { %2748 = vmatmul.mubr.bf16.gmra.mrb[188].mxu1 %v8566_v14  ;;  %v8654_v52 = vpack.c.bf16 %v2506_v17, %v2504_v23  ;;  %v8673_v38 = vsel %vm673_vm1, %v2566_v56, %v8665_v44  ;;  %v6819_v23 = vld [vmem:[#allocation6] sm:$0xff]   ;;  %v6820_v17 = vld [vmem:[#allocation6 + $0x48] sm:$0xff]   ;;  %v6821_v56 = vld [vmem:[#allocation6 + $0x218] sm:$0xff]  }
 0x299   : > { %2755 = vmatprep.mubr.bf16.mxu1 %v8590_v9 }
 0x29b   : > { %2909 = vmatmul.mubr.bf16.gmra.mrb[188].mxu0 %v8596_v7 }
 0x29c   : > { %2916 = vmatprep.mubr.bf16.mxu0 %v8598_v33 }
 0x2a0   : > { %2756 = vmatmul.mubr.bf16.gmra.mrb[192].mxu1 %v8582_v28 }
 0x2a1   : > { %2763 = vmatprep.mubr.bf16.mxu1 %v8604_v41 }
 0x2a3   : > { %2917 = vmatmul.mubr.bf16.gmra.mrb[192].mxu0 %v8610_v20 }
 0x2a4   : > { %2924 = vmatprep.mubr.bf16.mxu0 %v8612_v24 }
 0x2a8   : > { %2764 = vmatmul.mubr.bf16.gmra.mrb[196].mxu1 %v8598_v33 }
 0x2a9   : > { %2771 = vmatprep.mubr.bf16.mxu1 %v8618_v57 }
 0x2ab   : > { %2925 = vmatmul.mubr.bf16.gmra.mrb[196].mxu0 %v8624_v22 }
 0x2ac   : > { %2932 = vmatprep.mubr.bf16.mxu0 %v8626_v49 }
 0x2b0   : > { %2772 = vmatmul.mubr.bf16.gmra.mrb[200].mxu1 %v8612_v24 }
 0x2b1   : > { %2779 = vmatprep.mubr.bf16.mxu1 %v8632_v54 }
 0x2b3   : > { %2933 = vmatmul.mubr.bf16.gmra.mrb[200].mxu0 %v8640_v61 }
 0x2b4   : > { %2940 = vmatprep.mubr.bf16.mxu0 %v8646_v8 }
 0x2b8   : > { %2780 = vmatmul.mubr.bf16.gmra.mrb[204].mxu1 %v8626_v49 }
 0x2b9   : > { %2981 = vmatprep.mubr.bf16.mxu1 %v8290_v31  ;;  %v2569_v31 = vrot.slane %v8660_v5, 2 }
 0x2bb   : > { %2941 = vmatmul.mubr.bf16.gmra.mrb[204].mxu0 %v8654_v52  ;;  %v8677_v0 = vsel %vm673_vm1, %v8665_v44, %v2569_v31  ;;  %v6822_v31 = vld [vmem:[#allocation6 + $0x8] sm:$0xff]  }
 0x2bc   : > { %3142 = vmatprep.mubr.bf16.mxu0 %v8276_v4 }
 0x2c0   : > { %2982 = vmatmul.mubr.bf16.vlgmr.msra.gmra.mrb[208].mxu1 %v8262_v18  ;;  %v2626_v18 = vpack.c.bf16 %v8677_v0, %v8673_v38 }
 0x2c1   : > { %2989 = vmatprep.mubr.bf16.mxu1 %v8348_v42  ;;  %6464 = vmatpush3.bf16.msra.mxu1 %v6816_v13  ;;  %v6823_v13 = vld [vmem:[#allocation6 + $0x50] sm:$0xff]  }
 0x2c2   : > { %6465 = vmatprep.subr.bf16.mxu1 %v6817_v32 }
 0x2c3   : > { %3143 = vmatmul.mubr.bf16.vlgmr.msra.gmra.mrb[208].mxu0 %v8233_v53  ;;  %v6824_v53 = vld [vmem:[#allocation6 + $0x220] sm:$0xff]  }
 0x2c4   : > { %3150 = vmatprep.mubr.bf16.mxu0 %v8321_v48  ;;  %5944 = vmatpush3.bf16.msra.mxu0 %v6819_v23  ;;  %v6826_v23 = vld [vmem:[#allocation6 + $0x58] sm:$0xff]  }
 0x2c5   : > { %6466 = vmatpush3.bf16.msra.mxu1 %v6817_v32  ;;  %5945 = vmatprep.subr.bf16.mxu0 %v6820_v17  ;;  %v6825_v32 = vld [vmem:[#allocation6 + $0x10] sm:$0xff]   ;;  %v6829_v17 = vld [vmem:[#allocation6 + $0x60] sm:$0xff]  }
 0x2c6   : > { %6467 = vmatprep.subr.bf16.mxu1 %v6818_v58 }
 0x2c8   : > { %2990 = vmatmul.mubr.bf16.gmra.mrb[212].mxu1 %v8276_v4  ;;  %5946 = vmatpush3.bf16.msra.mxu0 %v6822_v31  ;;  %v6827_v4 = vld [vmem:[#allocation6 + $0x228] sm:$0xff]  }
 0x2c9   : > { %2997 = vmatprep.mubr.bf16.mxu1 %v8403_v6  ;;  %6468 = vmatpush3.bf16.msra.mxu1 %v6818_v58  ;;  %v6828_v58 = vld [vmem:[#allocation6 + $0x18] sm:$0xff]   ;;  %v6832_v31 = vld [vmem:[#allocation6 + $0x68] sm:$0xff]  }
 0x2ca   : > { %6469 = vmatprep.subr.bf16.mxu1 %v6821_v56  ;;  %5947 = vmatprep.subr.bf16.mxu0 %v6823_v13  ;;  %v6834_v13 = vld [vmem:[#allocation6 + $0x28] sm:$0xff]  }
 0x2cb   : > { %3151 = vmatmul.mubr.bf16.gmra.mrb[212].mxu0 %v8299_v25  ;;  %v6830_v25 = vld [vmem:[#allocation6 + $0x230] sm:$0xff]  }
 0x2cc   : > { %3158 = vmatprep.mubr.bf16.mxu0 %v8387_v63  ;;  %5948 = vmatpush3.bf16.msra.mxu0 %v6825_v32  ;;  %v6837_v32 = vld [vmem:[#allocation6 + $0xc0] sm:$0xff]  }
 0x2cd   : > { %6470 = vmatpush3.bf16.msra.mxu1 %v6821_v56  ;;  %5949 = vmatprep.subr.bf16.mxu0 %v6826_v23  ;;  %v6831_v56 = vld [vmem:[#allocation6 + $0x20] sm:$0xff]   ;;  %v6838_v23 = vld [vmem:[#allocation6 + $0x78] sm:$0xff]  }
 0x2ce   : > { %6471 = vmatprep.subr.bf16.mxu1 %v6824_v53 }
 0x2d0   : > { %2998 = vmatmul.mubr.bf16.gmra.mrb[216].mxu1 %v8321_v48  ;;  %5950 = vmatpush3.bf16.msra.mxu0 %v6828_v58  ;;  %v6833_v48 = vld [vmem:[#allocation6 + $0x238] sm:$0xff]  }
 0x2d1   : > { %3005 = vmatprep.mubr.bf16.mxu1 %v8442_v43  ;;  %6472 = vmatpush3.bf16.msra.mxu1 %v6824_v53  ;;  %v6835_v53 = vld [vmem:[#allocation6 + $0x70] sm:$0xff]  }
 0x2d2   : > { %6473 = vmatprep.subr.bf16.mxu1 %v6827_v4  ;;  %5951 = vmatprep.subr.bf16.mxu0 %v6829_v17 }
 0x2d3   : > { %3159 = vmatmul.mubr.bf16.gmra.mrb[216].mxu0 %v8352_v47  ;;  %v6836_v47 = vld [vmem:[#allocation6 + $0x30] sm:$0xff]  }
 0x2d4   : > { %3166 = vmatprep.mubr.bf16.mxu0 %v8435_v50  ;;  %5952 = vmatpush3.bf16.msra.mxu0 %v6831_v56 }
 0x2d5   : > { %6474 = vmatpush3.bf16.msra.mxu1 %v6827_v4  ;;  %5953 = vmatprep.subr.bf16.mxu0 %v6832_v31  ;;  %v6840_v4 = vld [vmem:[#allocation6 + $0x140] sm:$0xff]  }
 0x2d6   : > { %6475 = vmatprep.subr.bf16.mxu1 %v6830_v25  ;;  %v2263_v31 = vld [vmem:[#allocation2 + $0x190] sm:$0x3] }
 0x2d8   : > { %3006 = vmatmul.mubr.bf16.gmra.mrb[220].mxu1 %v8387_v63  ;;  %5954 = vmatpush3.bf16.msra.mxu0 %v6834_v13  ;;  %v6839_v63 = vld [vmem:[#allocation6 + $0x38] sm:$0xff]  }
 0x2d9   : > { %3013 = vmatprep.mubr.bf16.mxu1 %v8486_v16  ;;  %6476 = vmatpush3.bf16.msra.mxu1 %v6830_v25 }
 0x2da   : > { %6477 = vmatprep.subr.bf16.mxu1 %v6833_v48  ;;  %5955 = vmatprep.subr.bf16.mxu0 %v6835_v53 }
 0x2db   : > { %3167 = vmatmul.mubr.bf16.gmra.mrb[220].mxu0 %v8391_v51 }
 0x2dc   : > { %3174 = vmatprep.mubr.bf16.mxu0 %v8481_v62  ;;  %5956 = vmatpush3.bf16.msra.mxu0 %v6836_v47 }
 0x2dd   : > { %6478 = vmatpush3.bf16.msra.mxu1 %v6833_v48  ;;  %5957 = vmatprep.subr.bf16.mxu0 %v6838_v23  ;;  %v2545_v23 = vrot.slane %v2263_v31, 1 }
 0x2de   : > { %6055 = vmatprep.subr.bf16.mxu1 %v6837_v32 }
 0x2e0   : > { %3014 = vmatmul.mubr.bf16.gmra.mrb[224].mxu1 %v8435_v50  ;;  %5958 = vmatpush3.bf16.msra.mxu0 %v6839_v63 }
 0x2e1   : > { %3021 = vmatprep.mubr.bf16.mxu1 %v8516_v34  ;;  %6167 = vmatprep.subr.bf16.mxu0 %v6840_v4 }
 0x2e3   : > { %3175 = vmatmul.mubr.bf16.gmra.mrb[224].mxu0 %v8439_v60  ;;  %v8727_v60 = vld [vmem:[%s9791_s2] ss:$0 sm:$0xff] }
 0x2e4   : > { %3182 = vmatprep.mubr.bf16.mxu0 %v8504_v55 }
 0x2e8   : > { %3022 = vmatmul.mubr.bf16.gmra.mrb[228].mxu1 %v8481_v62  ;;  %v2662_v62 = vadd.f32 %v8727_v60, %v8580_v12 }
 0x2e9   : > { %3029 = vmatprep.mubr.bf16.mxu1 %v8536_v30 }
 0x2eb   : > { %3183 = vmatmul.mubr.bf16.gmra.mrb[228].mxu0 %v8490_v26 }
 0x2ec   : > { %3190 = vmatprep.mubr.bf16.mxu0 %v8530_v36 }
 0x2f0   : > { %3030 = vmatmul.mubr.bf16.gmra.mrb[232].mxu1 %v8504_v55 }
 0x2f1   : > { %3037 = vmatprep.mubr.bf16.mxu1 %v8550_v39 }
 0x2f3   : > { %3191 = vmatmul.mubr.bf16.gmra.mrb[232].mxu0 %v8521_v10 }
 0x2f4   : > { %3198 = vmatprep.mubr.bf16.mxu0 %v8544_v11 }
 0x2f8   : > { %3038 = vmatmul.mubr.bf16.gmra.mrb[236].mxu1 %v8530_v36 }
 0x2f9   : > { %3045 = vmatprep.mubr.bf16.mxu1 %v8564_v2 }
 0x2fb   : > { %3199 = vmatmul.mubr.bf16.gmra.mrb[236].mxu0 %v8538_v46 }
 0x2fc   : > { %3206 = vmatprep.mubr.bf16.mxu0 %v8558_v15 }
 0x300   : > { %3046 = vmatmul.mubr.bf16.gmra.mrb[240].mxu1 %v8544_v11 }
 0x301   : > { %3053 = vmatprep.mubr.bf16.mxu1 %v8578_v37 }
 0x303   : > { %3207 = vmatmul.mubr.bf16.gmra.mrb[240].mxu0 %v8552_v3 }
 0x304   : > { %3214 = vmatprep.mubr.bf16.mxu0 %v8572_v45 }
 0x308   : > { %3054 = vmatmul.mubr.bf16.gmra.mrb[244].mxu1 %v8558_v15  ;;  %v2665_v15 = vadd.f32 %v8727_v60, %v8587_v40 }
 0x309   : > { %3061 = vmatprep.mubr.bf16.mxu1 %v8596_v7 }
 0x30b   : > { %3215 = vmatmul.mubr.bf16.gmra.mrb[244].mxu0 %v8566_v14 }
 0x30c   : > { %3222 = vmatprep.mubr.bf16.mxu0 %v8590_v9 }
 0x310   : > { %3062 = vmatmul.mubr.bf16.gmra.mrb[248].mxu1 %v8572_v45 }
 0x311   : > { %3069 = vmatprep.mubr.bf16.mxu1 %v8610_v20 }
 0x313   : > { %3223 = vmatmul.mubr.bf16.gmra.mrb[248].mxu0 %v8582_v28 }
 0x314   : > { %3230 = vmatprep.mubr.bf16.mxu0 %v8604_v41 }
 0x316   : > { %v5599_v51 = vpop.f32.mrb[144].mxu0 }
 0x317   : > { %v5600_v50 = vpop.f32.mrb[145].mxu0 }
 0x318   : > { %3070 = vmatmul.mubr.bf16.gmra.mrb[252].mxu1 %v8590_v9  ;;  %v5601_v26 = vadd.f32 %v5600_v50, %v5599_v51  ;;  %v5602_v45 = vpop.f32.mrb[146].mxu0 }
 0x319   : > { %3077 = vmatprep.mubr.bf16.mxu1 %v8624_v22  ;;  %v5603_v55 = vpop.f32.mrb[147].mxu0 }
 0x31a   : > { %v5604_v36 = vadd.f32 %v5603_v55, %v5602_v45  ;;  %v8734_v46 = vadd.f32 %v5601_v26, %v2662_v62  ;;  %v2542_v62 = vrot.slane %v8642_v35, 1 }
 0x31b   : > { %v5493_v10 = vpop.f32.mrb[148].mxu1  ;;  %3231 = vmatmul.mubr.bf16.gmra.mrb[252].mxu0 %v8598_v33 }
 0x31c   : > { %v5494_v11 = vpop.f32.mrb[149].mxu1  ;;  %3238 = vmatprep.mubr.bf16.mxu0 %v8618_v57  ;;  %v8738_v12 = vadd.f32 %v5604_v36, %v2665_v15  ;;  %v2552_v36 = vrot.slane %v2263_v31, 2 }
 0x31d   : > { %v5495_v3 = vadd.f32 %v5494_v11, %v5493_v10  ;;  %v5496_v14 = vpop.f32.mrb[150].mxu1  ;;  %v2550_v10 = vrot.slane %v8637_v27, 2 }
 0x31e   : > { %v5497_v28 = vpop.f32.mrb[151].mxu1  ;;  %v5605_v58 = vpop.f32.mrb[148].mxu0 }
 0x31f   : > { %v5498_v9 = vadd.f32 %v5497_v28, %v5496_v14  ;;  %v5606_v17 = vpop.f32.mrb[149].mxu0  ;;  %v2670_v40 = vadd.f32 %v8727_v60, %v5495_v3 }
 0x320   : > { %3078 = vmatmul.mubr.bf16.gmra.mrb[0].mxu1 %v8604_v41  ;;  %v5607_v25 = vadd.f32 %v5606_v17, %v5605_v58  ;;  %v5608_v56 = vpop.f32.mrb[150].mxu0  ;;  %v2543_v41 = vrot.slane %v8637_v27, 1  ;;  %v2559_v58 = vrot.slane %v8658_v29, 1  ;;  %v2562_v17 = vrot.slane %v8660_v5, 1 }
 0x321   : > { %3085 = vmatprep.mubr.bf16.mxu1 %v8640_v61  ;;  %v5609_v33 = vpop.f32.mrb[151].mxu0  ;;  %v2673_v48 = vadd.f32 %v8727_v60, %v5498_v9  ;;  %v2549_v9 = vrot.slane %v8642_v35, 2  ;;  %v2553_v35 = vsel %vm673_vm1, %v2550_v10, %v2552_v36 }
 0x322   : > { %v5610_v53 = vadd.f32 %v5609_v33, %v5608_v56  ;;  %v8744_v47 = vadd.f32 %v5607_v25, %v2670_v40  ;;  %v2544_v15 = vsel %vm560_vm0, %v2542_v62, %v2543_v41 }
 0x323   : > { %v5499_v13 = vpop.f32.mrb[152].mxu1  ;;  %3239 = vmatmul.mubr.bf16.gmra.mrb[0].mxu0 %v8612_v24  ;;  %v2546_v24 = vsel %vm560_vm0, %v2543_v41, %v2545_v23 }
 0x324   : > { %v5500_v32 = vpop.f32.mrb[153].mxu1  ;;  %3246 = vmatprep.mubr.bf16.mxu0 %v8632_v54  ;;  %v8749_v51 = vadd.f32 %v5610_v53, %v2673_v48  ;;  %v2622_v56 = vpack.c.bf16 %v2546_v24, %v2544_v15  ;;  %v2551_v48 = vsel %vm673_vm1, %v2549_v9, %v2550_v10 }
 0x325   : > { %v5501_v63 = vadd.f32 %v5500_v32, %v5499_v13  ;;  %v5502_v4 = vpop.f32.mrb[154].mxu1 }
 0x326   : > { %v5503_v50 = vpop.f32.mrb[155].mxu1  ;;  %v5611_v45 = vpop.f32.mrb[152].mxu0 }
 0x327   : > { %v5504_v26 = vadd.f32 %v5503_v50, %v5502_v4  ;;  %v5612_v55 = vpop.f32.mrb[153].mxu0  ;;  %v2678_v11 = vadd.f32 %v8727_v60, %v5501_v63  ;;  %v8776_v50 = vpack.c.bf16 %v2553_v35, %v2551_v48 }
 0x328   : > { %3086 = vmatmul.mubr.bf16.gmra.mrb[4].mxu1 %v8618_v57  ;;  %v5613_v3 = vadd.f32 %v5612_v55, %v5611_v45  ;;  %v5614_v14 = vpop.f32.mrb[154].mxu0  ;;  %v8761_v57 = vrot.slane %v8662_v59, 1 }
 0x329   : > { %3093 = vmatprep.mubr.bf16.mxu1 %v8654_v52  ;;  %v5615_v28 = vpop.f32.mrb[155].mxu0  ;;  %v2681_v40 = vadd.f32 %v8727_v60, %v5504_v26 }
 0x32a   : > { %v5616_v25 = vadd.f32 %v5615_v28, %v5614_v14  ;;  %v8765_v31 = vadd.f32 %v5613_v3, %v2678_v11  ;;  %v2561_v41 = vsel %vm560_vm0, %v2559_v58, %v8761_v57  ;;  %v2563_v23 = vsel %vm560_vm0, %v8761_v57, %v2562_v17 }
 0x32b   : > { %v5505_v27 = vpop.f32.mrb[156].mxu1  ;;  %3247 = vmatmul.mubr.bf16.gmra.mrb[4].mxu0 %v8626_v49  ;;  %v2625_v55 = vpack.c.bf16 %v2563_v23, %v2561_v41 }
 0x32c   : > { %v5506_v33 = vpop.f32.mrb[157].mxu1  ;;  %3254 = vmatprep.mubr.bf16.mxu0 %v2622_v56  ;;  %v8770_v32 = vadd.f32 %v5616_v25, %v2681_v40 }
 0x32d   : > { %v5507_v13 = vadd.f32 %v5506_v33, %v5505_v27  ;;  %v5508_v53 = vpop.f32.mrb[158].mxu1  ;;  %v2624_v27 = vpack.c.bf16 %v8662_v59, %v8658_v29 }
 0x32e   : > { %v5509_v5 = vpop.f32.mrb[159].mxu1  ;;  %v5617_v4 = vpop.f32.mrb[156].mxu0 }
 0x32f   : > { %v5510_v63 = vadd.f32 %v5509_v5, %v5508_v53  ;;  %v5618_v49 = vpop.f32.mrb[157].mxu0  ;;  %v2686_v62 = vadd.f32 %v8727_v60, %v5507_v13 }
 0x330   : > { %3094 = vmatmul.mubr.bf16.gmra.mrb[8].mxu1 %v8632_v54  ;;  %v5619_v26 = vadd.f32 %v5618_v49, %v5617_v4  ;;  %v5620_v45 = vpop.f32.mrb[158].mxu0 }
 0x331   : > { %3101 = vmatprep.mubr.bf16.mxu1 %v8776_v50  ;;  %v5621_v15 = vpop.f32.mrb[159].mxu0  ;;  %v2689_v24 = vadd.f32 %v8727_v60, %v5510_v63 }
 0x332   : > { %v5622_v36 = vadd.f32 %v5621_v15, %v5620_v45  ;;  %v8782_v11 = vadd.f32 %v5619_v26, %v2686_v62 }
 0x333   : > { %v5511_v10 = vpop.f32.mrb[160].mxu1  ;;  %3255 = vmatmul.mubr.bf16.gmra.mrb[8].mxu0 %v8646_v8 }
 0x334   : > { %v5512_v3 = vpop.f32.mrb[161].mxu1  ;;  %3262 = vmatprep.mubr.bf16.mxu0 %v2625_v55  ;;  %v8785_v28 = vadd.f32 %v5622_v36, %v2689_v24  ;;  %v6842_v55 = vld [vmem:[#allocation6 + $0x80] sm:$0xff]   ;;  %v6843_v24 = vld [vmem:[#allocation6 + $0xc8] sm:$0xff]  }
 0x335   : > { %v5513_v14 = vadd.f32 %v5512_v3, %v5511_v10  ;;  %v5514_v54 = vpop.f32.mrb[162].mxu1 }
 0x336   : > { %v5515_v9 = vpop.f32.mrb[163].mxu1  ;;  %v5623_v17 = vpop.f32.mrb[160].mxu0 }
 0x337   : > { %v5516_v58 = vadd.f32 %v5515_v9, %v5514_v54  ;;  %v5624_v40 = vpop.f32.mrb[161].mxu0  ;;  %v2694_v25 = vadd.f32 %v8727_v60, %v5513_v14 }
 0x338   : > { %3102 = vmatmul.mubr.bf16.gmra.mrb[12].mxu1 %v2622_v56  ;;  %v5625_v33 = vadd.f32 %v5624_v40, %v5623_v17  ;;  %v5626_v48 = vpop.f32.mrb[162].mxu0  ;;  %v6844_v17 = vld [vmem:[#allocation6 + $0x88] sm:$0xff]   ;;  %v6845_v40 = vld [vmem:[#allocation6 + $0xd0] sm:$0xff]  }
 0x339   : > { %6479 = vmatprep.mubr.bf16.mxu1 %v8348_v42  ;;  %v5627_v8 = vpop.f32.mrb[163].mxu0  ;;  %v2697_v35 = vadd.f32 %v8727_v60, %v5516_v58 }
 0x33a   : > { %v5628_v53 = vadd.f32 %v5627_v8, %v5626_v48  ;;  %v8792_v5 = vadd.f32 %v5625_v33, %v2694_v25 }
 0x33b   : > { %v5517_v13 = vpop.f32.mrb[164].mxu1  ;;  %3263 = vmatmul.mubr.bf16.gmra.mrb[12].mxu0 %v2624_v27 }
 0x33c   : > { %v5518_v41 = vpop.f32.mrb[165].mxu1  ;;  %v8794_v63 = vadd.f32 %v5628_v53, %v2697_v35 }
 0x33d   : > { %v5519_v56 = vadd.f32 %v5518_v41, %v5517_v13  ;;  %v5520_v23 = vpop.f32.mrb[166].mxu1  ;;  %v6846_v13 = vld [vmem:[#allocation6 + $0x90] sm:$0xff]   ;;  %v6847_v41 = vld [vmem:[#allocation6 + $0xd8] sm:$0xff]  }
 0x33e   : > { %v5521_v29 = vpop.f32.mrb[167].mxu1  ;;  %v5629_v49 = vpop.f32.mrb[164].mxu0 }
 0x33f   : > { %v5522_v4 = vadd.f32 %v5521_v29, %v5520_v23  ;;  %v5630_v42 = vpop.f32.mrb[165].mxu0  ;;  %v2702_v62 = vadd.f32 %v8727_v60, %v5519_v56 }
 0x340   : > { %6480 = vmatmul.mubr.bf16.vlgmr.msra.gmra.mrb[16].mxu1 %v8403_v6  ;;  %v5631_v26 = vadd.f32 %v5630_v42, %v5629_v49  ;;  %v5632_v45 = vpop.f32.mrb[166].mxu0 }
 0x341   : > { %6483 = vmatprep.mubr.bf16.mxu1 %v8442_v43  ;;  %6056 = vmatpush3.bf16.msra.mxu1 %v6842_v55  ;;  %v5633_v15 = vpop.f32.mrb[167].mxu0  ;;  %v2705_v10 = vadd.f32 %v8727_v60, %v5522_v4 }
 0x342   : > { %6057 = vmatprep.subr.bf16.mxu1 %v6843_v24  ;;  %v5634_v3 = vadd.f32 %v5633_v15, %v5632_v45  ;;  %v8800_v14 = vadd.f32 %v5631_v26, %v2702_v62  ;;  %v6848_v26 = vld [vmem:[#allocation6 + $0x98] sm:$0xff]   ;;  %v6849_v45 = vld [vmem:[#allocation6 + $0xe0] sm:$0xff]  }
 0x343   : > { %v5523_v36 = vpop.f32.mrb[168].mxu1 }
 0x344   : > { %v5524_v54 = vpop.f32.mrb[169].mxu1  ;;  %v8802_v58 = vadd.f32 %v5634_v3, %v2705_v10 }
 0x345   : > { %v5525_v6 = vadd.f32 %v5524_v54, %v5523_v36  ;;  %v5526_v9 = vpop.f32.mrb[170].mxu1  ;;  %6058 = vmatpush3.bf16.msra.mxu1 %v6844_v17  ;;  %v6850_v54 = vld [vmem:[#allocation6 + $0xa0] sm:$0xff]  }
 0x346   : > { %v5527_v43 = vpop.f32.mrb[171].mxu1  ;;  %6059 = vmatprep.subr.bf16.mxu1 %v6845_v40  ;;  %v5635_v25 = vpop.f32.mrb[168].mxu0 }
 0x347   : > { %v5528_v27 = vadd.f32 %v5527_v43, %v5526_v9  ;;  %v5636_v33 = vpop.f32.mrb[169].mxu0  ;;  %v2710_v48 = vadd.f32 %v8727_v60, %v5525_v6  ;;  %v6851_v9 = vld [vmem:[#allocation6 + $0xe8] sm:$0xff]  }
 0x348   : > { %6484 = vmatmul.mubr.bf16.gmra.mrb[20].mxu1 %v8486_v16  ;;  %v5637_v8 = vadd.f32 %v5636_v33, %v5635_v25  ;;  %v5638_v35 = vpop.f32.mrb[170].mxu0 }
 0x349   : > { %6487 = vmatprep.mubr.bf16.mxu1 %v8516_v34  ;;  %6060 = vmatpush3.bf16.msra.mxu1 %v6846_v13  ;;  %v5639_v53 = vpop.f32.mrb[171].mxu0  ;;  %v2713_v56 = vadd.f32 %v8727_v60, %v5528_v27 }
 0x34a   : > { %6061 = vmatprep.subr.bf16.mxu1 %v6847_v41  ;;  %v5640_v29 = vadd.f32 %v5639_v53, %v5638_v35  ;;  %v8808_v4 = vadd.f32 %v5637_v8, %v2710_v48  ;;  %v6852_v8 = vld [vmem:[#allocation6 + $0xa8] sm:$0xff]   ;;  %v6853_v35 = vld [vmem:[#allocation6 + $0xf0] sm:$0xff]  }
 0x34b   : > { %v5529_v23 = vpop.f32.mrb[172].mxu1 }
 0x34c   : > { %v5530_v49 = vpop.f32.mrb[173].mxu1  ;;  %v8810_v62 = vadd.f32 %v5640_v29, %v2713_v56 }
 0x34d   : > { %v5531_v16 = vadd.f32 %v5530_v49, %v5529_v23  ;;  %v5532_v42 = vpop.f32.mrb[174].mxu1  ;;  %6062 = vmatpush3.bf16.msra.mxu1 %v6848_v26  ;;  %v6854_v49 = vld [vmem:[#allocation6 + $0xb0] sm:$0xff]  }
 0x34e   : > { %v5533_v34 = vpop.f32.mrb[175].mxu1  ;;  %6063 = vmatprep.subr.bf16.mxu1 %v6849_v45  ;;  %v5641_v15 = vpop.f32.mrb[172].mxu0 }
 0x34f   : > { %v5534_v55 = vadd.f32 %v5533_v34, %v5532_v42  ;;  %v5642_v24 = vpop.f32.mrb[173].mxu0  ;;  %v2718_v10 = vadd.f32 %v8727_v60, %v5531_v16  ;;  %v6855_v42 = vld [vmem:[#allocation6 + $0xf8] sm:$0xff]  }
 0x350   : > { %6488 = vmatmul.mubr.bf16.gmra.mrb[24].mxu1 %v8536_v30  ;;  %v5643_v36 = vadd.f32 %v5642_v24, %v5641_v15  ;;  %v5644_v3 = vpop.f32.mrb[174].mxu0 }
 0x351   : > { %6491 = vmatprep.mubr.bf16.mxu1 %v8550_v39  ;;  %6064 = vmatpush3.bf16.msra.mxu1 %v6850_v54  ;;  %v5645_v6 = vpop.f32.mrb[175].mxu0  ;;  %v2721_v17 = vadd.f32 %v8727_v60, %v5534_v55 }
 0x352   : > { %6065 = vmatprep.subr.bf16.mxu1 %v6851_v9  ;;  %v5646_v40 = vadd.f32 %v5645_v6, %v5644_v3  ;;  %v8816_v27 = vadd.f32 %v5643_v36, %v2718_v10  ;;  %v6856_v36 = vld [vmem:[#allocation6 + $0xb8] sm:$0xff]   ;;  %v6857_v3 = vld [vmem:[#allocation6 + $0x1c0] sm:$0xff]  }
 0x353   : > { %v5535_v43 = vpop.f32.mrb[176].mxu1 }
 0x354   : > { %v5536_v25 = vpop.f32.mrb[177].mxu1  ;;  %v8818_v48 = vadd.f32 %v5646_v40, %v2721_v17 }
 0x355   : > { %v5537_v30 = vadd.f32 %v5536_v25, %v5535_v43  ;;  %v5538_v33 = vpop.f32.mrb[178].mxu1  ;;  %6066 = vmatpush3.bf16.msra.mxu1 %v6852_v8 }
 0x356   : > { %v5539_v39 = vpop.f32.mrb[179].mxu1  ;;  %6067 = vmatprep.subr.bf16.mxu1 %v6853_v35  ;;  %v5647_v53 = vpop.f32.mrb[176].mxu0 }
 0x357   : > { %v5540_v13 = vadd.f32 %v5539_v39, %v5538_v33  ;;  %v5648_v41 = vpop.f32.mrb[177].mxu0  ;;  %v2726_v56 = vadd.f32 %v8727_v60, %v5537_v30 }
 0x358   : > { %6492 = vmatmul.mubr.bf16.gmra.mrb[28].mxu1 %v8564_v2  ;;  %v5649_v23 = vadd.f32 %v5648_v41, %v5647_v53  ;;  %v5650_v29 = vpop.f32.mrb[178].mxu0 }
 0x359   : > { %6495 = vmatprep.mubr.bf16.mxu1 %v8578_v37  ;;  %6068 = vmatpush3.bf16.msra.mxu1 %v6854_v49  ;;  %v5651_v16 = vpop.f32.mrb[179].mxu0  ;;  %v2729_v26 = vadd.f32 %v8727_v60, %v5540_v13 }
 0x35a   : > { %6069 = vmatprep.subr.bf16.mxu1 %v6855_v42  ;;  %v8824_v34 = vadd.f32 %v5649_v23, %v2726_v56  ;;  %v5652_v55 = vadd.f32 %v5651_v16, %v5650_v29 }
 0x35b   : > { %v5541_v45 = vpop.f32.mrb[180].mxu1 }
 0x35c   : > { %v5542_v15 = vpop.f32.mrb[181].mxu1  ;;  %v8826_v2 = vadd.f32 %v5652_v55, %v2729_v26 }
 0x35d   : > { %v5543_v24 = vadd.f32 %v5542_v15, %v5541_v45  ;;  %v5544_v10 = vpop.f32.mrb[182].mxu1  ;;  %6070 = vmatpush3.bf16.msra.mxu1 %v6856_v36 }
 0x35e   : > { %v5545_v37 = vpop.f32.mrb[183].mxu1  ;;  %6279 = vmatprep.subr.bf16.mxu1 %v6857_v3  ;;  %v5653_v6 = vpop.f32.mrb[180].mxu0 }
 0x35f   : > { %v5546_v54 = vadd.f32 %v5545_v37, %v5544_v10  ;;  %v5654_v9 = vpop.f32.mrb[181].mxu0  ;;  %v2734_v17 = vadd.f32 %v8727_v60, %v5543_v24 }
 0x360   : > { %6496 = vmatmul.mubr.bf16.gmra.mrb[32].mxu1 %v8596_v7  ;;  %v5655_v43 = vadd.f32 %v5654_v9, %v5653_v6  ;;  %v5656_v40 = vpop.f32.mrb[182].mxu0 }
 0x361   : > { %6499 = vmatprep.mubr.bf16.mxu1 %v8610_v20  ;;  %v5657_v25 = vpop.f32.mrb[183].mxu0  ;;  %v2737_v30 = vadd.f32 %v8727_v60, %v5546_v54 }
 0x362   : > { %v8832_v33 = vadd.f32 %v5655_v43, %v2734_v17  ;;  %v5658_v39 = vadd.f32 %v5657_v25, %v5656_v40 }
 0x363   : > { %v5547_v8 = vpop.f32.mrb[184].mxu1 }
 0x364   : > { %v5548_v35 = vpop.f32.mrb[185].mxu1  ;;  %v8834_v13 = vadd.f32 %v5658_v39, %v2737_v30 }
 0x365   : > { %v5549_v53 = vadd.f32 %v5548_v35, %v5547_v8  ;;  %v5550_v41 = vpop.f32.mrb[186].mxu1 }
 0x366   : > { %v5551_v7 = vpop.f32.mrb[187].mxu1  ;;  %v5659_v23 = vpop.f32.mrb[184].mxu0 }
 0x367   : > { %v5552_v56 = vadd.f32 %v5551_v7, %v5550_v41  ;;  %v5660_v29 = vpop.f32.mrb[185].mxu0  ;;  %v2742_v20 = vadd.f32 %v8727_v60, %v5549_v53 }
 0x368   : > { %6500 = vmatmul.mubr.bf16.gmra.mrb[36].mxu1 %v8624_v22  ;;  %v5661_v49 = vadd.f32 %v5660_v29, %v5659_v23  ;;  %v5662_v16 = vpop.f32.mrb[186].mxu0 }
 0x369   : > { %6503 = vmatprep.mubr.bf16.mxu1 %v8640_v61  ;;  %v5663_v42 = vpop.f32.mrb[187].mxu0  ;;  %v2745_v26 = vadd.f32 %v8727_v60, %v5552_v56 }
 0x36a   : > { %v8840_v45 = vadd.f32 %v5661_v49, %v2742_v20  ;;  %v5664_v15 = vadd.f32 %v5663_v42, %v5662_v16 }
 0x36b   : > { %v5553_v55 = vpop.f32.mrb[188].mxu1 }
 0x36c   : > { %v5554_v24 = vpop.f32.mrb[189].mxu1  ;;  %v8842_v10 = vadd.f32 %v5664_v15, %v2745_v26 }
 0x36d   : > { %v5555_v36 = vadd.f32 %v5554_v24, %v5553_v55  ;;  %v5556_v37 = vpop.f32.mrb[190].mxu1 }
 0x36e   : > { %v5557_v22 = vpop.f32.mrb[191].mxu1  ;;  %v5665_v54 = vpop.f32.mrb[188].mxu0 }
 0x36f   : > { %v5558_v3 = vadd.f32 %v5557_v22, %v5556_v37  ;;  %v5666_v6 = vpop.f32.mrb[189].mxu0  ;;  %v2750_v61 = vadd.f32 %v8727_v60, %v5555_v36 }
 0x370   : > { %6504 = vmatmul.mubr.bf16.gmra.mrb[40].mxu1 %v8654_v52  ;;  %v5667_v9 = vadd.f32 %v5666_v6, %v5665_v54  ;;  %v5668_v17 = vpop.f32.mrb[190].mxu0 }
 0x371   : > { %6507 = vmatprep.mubr.bf16.mxu1 %v8776_v50  ;;  %v5669_v43 = vpop.f32.mrb[191].mxu0  ;;  %v2753_v40 = vadd.f32 %v8727_v60, %v5558_v3 }
 0x372   : > { %v8848_v25 = vadd.f32 %v5667_v9, %v2750_v61  ;;  %v5670_v8 = vadd.f32 %v5669_v43, %v5668_v17 }
 0x373   : > { %v5559_v30 = vpop.f32.mrb[192].mxu1 }
 0x374   : > { %v5560_v39 = vpop.f32.mrb[193].mxu1  ;;  %v8850_v35 = vadd.f32 %v5670_v8, %v2753_v40 }
 0x375   : > { %v5561_v53 = vadd.f32 %v5560_v39, %v5559_v30  ;;  %v5562_v41 = vpop.f32.mrb[194].mxu1 }
 0x376   : > { %v5563_v52 = vpop.f32.mrb[195].mxu1  ;;  %v5671_v56 = vpop.f32.mrb[192].mxu0 }
 0x377   : > { %v5564_v7 = vadd.f32 %v5563_v52, %v5562_v41  ;;  %v5672_v50 = vpop.f32.mrb[193].mxu0  ;;  %v2758_v23 = vadd.f32 %v8727_v60, %v5561_v53 }
 0x378   : > { %6508 = vmatmul.mubr.bf16.gmra.mrb[44].mxu1 %v2626_v18  ;;  %v5673_v29 = vadd.f32 %v5672_v50, %v5671_v56  ;;  %v5674_v20 = vpop.f32.mrb[194].mxu0 }
 0x379   : > { %v5675_v49 = vpop.f32.mrb[195].mxu0  ;;  %v2761_v16 = vadd.f32 %v8727_v60, %v5564_v7 }
 0x37a   : > { %v8857_v42 = vadd.f32 %v5673_v29, %v2758_v23  ;;  %v5676_v55 = vadd.f32 %v5675_v49, %v5674_v20 }
 0x37b   : > { %v5565_v26 = vpop.f32.mrb[196].mxu1 }
 0x37c   : > { %v5566_v15 = vpop.f32.mrb[197].mxu1  ;;  %v8859_v24 = vadd.f32 %v5676_v55, %v2761_v16 }
 0x37d   : > { %v5567_v36 = vadd.f32 %v5566_v15, %v5565_v26  ;;  %v5568_v37 = vpop.f32.mrb[198].mxu1 }
 0x37e   : > { %v5569_v22 = vpop.f32.mrb[199].mxu1  ;;  %v5677_v0 = vpop.f32.mrb[196].mxu0 }
 0x37f   : > { %v5570_v38 = vadd.f32 %v5569_v22, %v5568_v37  ;;  %v5678_v18 = vpop.f32.mrb[197].mxu0  ;;  %v2766_v3 = vadd.f32 %v8727_v60, %v5567_v36 }
 0x380   : > { %v5679_v54 = vadd.f32 %v5678_v18, %v5677_v0  ;;  %v5680_v6 = vpop.f32.mrb[198].mxu0 }
 0x381   : > { %v5681_v61 = vpop.f32.mrb[199].mxu0  ;;  %v2769_v9 = vadd.f32 %v8727_v60, %v5570_v38 }
 0x382   : > { %v8863_v17 = vadd.f32 %v5679_v54, %v2766_v3  ;;  %v5682_v40 = vadd.f32 %v5681_v61, %v5680_v6 }
 0x383   : > { %v5571_v43 = vpop.f32.mrb[200].mxu1 }
 0x384   : > { %v5572_v30 = vpop.f32.mrb[201].mxu1  ;;  %v8865_v8 = vadd.f32 %v5682_v40, %v2769_v9 }
 0x385   : > { %v5573_v39 = vadd.f32 %v5572_v30, %v5571_v43  ;;  %v5574_v53 = vpop.f32.mrb[202].mxu1 }
 0x386   : > { %v5575_v41 = vpop.f32.mrb[203].mxu1  ;;  %v5683_v7 = vpop.f32.mrb[200].mxu0 }
 0x387   : > { %v5576_v52 = vadd.f32 %v5575_v41, %v5574_v53  ;;  %v5684_v56 = vpop.f32.mrb[201].mxu0  ;;  %v2774_v50 = vadd.f32 %v8727_v60, %v5573_v39 }
 0x388   : > { %v5685_v23 = vadd.f32 %v5684_v56, %v5683_v7  ;;  %v5686_v29 = vpop.f32.mrb[202].mxu0 }
 0x389   : > { %v5687_v20 = vpop.f32.mrb[203].mxu0  ;;  %v2777_v49 = vadd.f32 %v8727_v60, %v5576_v52 }
 0x38a   : > { %v8869_v16 = vadd.f32 %v5685_v23, %v2774_v50  ;;  %v5688_v55 = vadd.f32 %v5687_v20, %v5686_v29 }
 0x38b   : > { %v5577_v26 = vpop.f32.mrb[204].mxu1 }
 0x38c   : > { %v5578_v15 = vpop.f32.mrb[205].mxu1  ;;  %v8871_v36 = vadd.f32 %v5688_v55, %v2777_v49 }
 0x38d   : > { %v5579_v37 = vadd.f32 %v5578_v15, %v5577_v26  ;;  %v5580_v22 = vpop.f32.mrb[206].mxu1 }
 0x38e   : > { %v5581_v38 = vpop.f32.mrb[207].mxu1  ;;  %v5689_v18 = vpop.f32.mrb[204].mxu0 }
 0x38f   : > { %v5582_v0 = vadd.f32 %v5581_v38, %v5580_v22  ;;  %v5690_v3 = vpop.f32.mrb[205].mxu0  ;;  %v2782_v54 = vadd.f32 %v8727_v60, %v5579_v37 }
 0x390   : > { %v5691_v6 = vadd.f32 %v5690_v3, %v5689_v18  ;;  %v5692_v61 = vpop.f32.mrb[206].mxu0 }
 0x391   : > { %v5693_v9 = vpop.f32.mrb[207].mxu0  ;;  %v2785_v43 = vadd.f32 %v8727_v60, %v5582_v0 }
 0x392   : > { %v8875_v40 = vadd.f32 %v5691_v6, %v2782_v54  ;;  %v5694_v30 = vadd.f32 %v5693_v9, %v5692_v61 }
 0x393   : > { %v5711_v39 = vpop.f32.mrb[208].mxu1 }
 0x394   : > { %v5712_v53 = vpop.f32.mrb[209].mxu1  ;;  %v8877_v41 = vadd.f32 %v5694_v30, %v2785_v43 }
 0x395   : > { %v5713_v52 = vadd.f32 %v5712_v53, %v5711_v39  ;;  %v5714_v7 = vpop.f32.mrb[210].mxu1 }
 0x396   : > { %v5715_v56 = vpop.f32.mrb[211].mxu1  ;;  %v5823_v29 = vpop.f32.mrb[208].mxu0 }
 0x397   : > { %v2984_v50 = vadd.f32 %v5713_v52, %v8734_v46  ;;  %v5716_v23 = vadd.f32 %v5715_v56, %v5714_v7  ;;  %v5824_v20 = vpop.f32.mrb[209].mxu0 }
 0x398   : > { %v5825_v26 = vadd.f32 %v5824_v20, %v5823_v29  ;;  %v5826_v55 = vpop.f32.mrb[210].mxu0  ;;  %v3528_v20 = vld [vmem:[#allocation2] sm:$0xff] }
 0x399   : > { %v2987_v49 = vadd.f32 %v5716_v23, %v8738_v12  ;;  %v5827_v60 = vpop.f32.mrb[211].mxu0 }
 0x39a   : > { %v5828_v37 = vadd.f32 %v5827_v60, %v5826_v55  ;;  %v8881_v22 = vadd.f32 %v5825_v26, %v2984_v50  ;;  %v3630_v26 = vrot.slane %v3528_v20, 1  ;;  %v3742_v60 = vrot.slane %v3528_v20, 2 }
 0x39b   : > { %v5717_v15 = vpop.f32.mrb[212].mxu1 }
 0x39c   : > { %v5718_v38 = vpop.f32.mrb[213].mxu1  ;;  %v8883_v3 = vadd.f32 %v5828_v37, %v2987_v49  ;;  %v3530_v49 = vld [vmem:[#allocation2 + $0x10] sm:$0x3] }
 0x39d   : > { %v5719_v0 = vadd.f32 %v5718_v38, %v5717_v15  ;;  %v5720_v18 = vpop.f32.mrb[214].mxu1  ;;  %v3633_v55 = vrot.slane %v3530_v49, 1  ;;  %v3745_v15 = vrot.slane %v3530_v49, 2 }
 0x39e   : > { %v5721_v54 = vpop.f32.mrb[215].mxu1  ;;  %v5829_v61 = vpop.f32.mrb[212].mxu0 }
 0x39f   : > { %v2992_v46 = vadd.f32 %v5719_v0, %v8744_v47  ;;  %v5722_v6 = vadd.f32 %v5721_v54, %v5720_v18  ;;  %v5830_v9 = vpop.f32.mrb[213].mxu0  ;;  %v3888_v0 = vpack.c.bf16 %v8662_v59, %v3528_v20  ;;  %v3632_v54 = vsel %vm560_vm0, %v3630_v26, %v8761_v57  ;;  %v6859_v20 = vld [vmem:[#allocation6 + $0x148] sm:$0xff]  }
 0x3a0   : > { %v5831_v43 = vadd.f32 %v5830_v9, %v5829_v61  ;;  %v5832_v30 = vpop.f32.mrb[214].mxu0  ;;  %v8903_v61 = vsel %vm673_vm1, %v8665_v44, %v3745_v15 }
 0x3a1   : > { %v2995_v12 = vadd.f32 %v5722_v6, %v8749_v51  ;;  %v5833_v39 = vpop.f32.mrb[215].mxu0  ;;  %v8899_v6 = vsel %vm673_vm1, %v3742_v60, %v8665_v44 }
 0x3a2   : > { %v5834_v52 = vadd.f32 %v5833_v39, %v5832_v30  ;;  %v8887_v7 = vadd.f32 %v5831_v43, %v2992_v46  ;;  %v3634_v46 = vsel %vm560_vm0, %v8761_v57, %v3633_v55  ;;  %v3890_v43 = vpack.c.bf16 %v8903_v61, %v8899_v6  ;;  %v6875_v61 = vld [vmem:[#allocation6 + $0x1c8] sm:$0xff]  }
 0x3a3   : > { %v5723_v53 = vpop.f32.mrb[216].mxu1  ;;  %v3889_v59 = vpack.c.bf16 %v3634_v46, %v3632_v54 }
 0x3a4   : > { %v5724_v56 = vpop.f32.mrb[217].mxu1  ;;  %v8889_v29 = vadd.f32 %v5834_v52, %v2995_v12 }
 0x3a5   : > { %v5725_v50 = vadd.f32 %v5724_v56, %v5723_v53  ;;  %v5726_v23 = vpop.f32.mrb[218].mxu1  ;;  %3974 = vmatprep.mubr.bf16.mxu0 %v3889_v59  ;;  %v6862_v59 = vld [vmem:[#allocation6 + $0x110] sm:$0xff]  }
 0x3a6   : > { %v5727_v47 = vpop.f32.mrb[219].mxu1  ;;  %v5835_v38 = vpop.f32.mrb[216].mxu0  ;;  %3975 = vmatmul.mubr.bf16.vlgmr.msra.gmra.mrb[16].mxu0 %v3888_v0  ;;  %v6861_v0 = vld [vmem:[#allocation6 + $0x150] sm:$0xff]  }
 0x3a7   : > { %v3000_v51 = vadd.f32 %v5725_v50, %v8765_v31  ;;  %v5728_v37 = vadd.f32 %v5727_v47, %v5726_v23  ;;  %v5836_v18 = vpop.f32.mrb[217].mxu0  ;;  %v6858_v23 = vld [vmem:[#allocation6 + $0x100] sm:$0xff]  }
 0x3a8   : > { %v5837_v9 = vadd.f32 %v5836_v18, %v5835_v38  ;;  %v5838_v12 = vpop.f32.mrb[218].mxu0  ;;  %6168 = vmatpush3.bf16.msra.mxu0 %v6858_v23 }
 0x3a9   : > { %v3003_v31 = vadd.f32 %v5728_v37, %v8770_v32  ;;  %v5839_v30 = vpop.f32.mrb[219].mxu0  ;;  %6169 = vmatprep.subr.bf16.mxu0 %v6859_v20  ;;  %v6860_v37 = vld [vmem:[#allocation6 + $0x108] sm:$0xff]   ;;  %v6864_v20 = vld [vmem:[#allocation6 + $0x118] sm:$0xff]  }
 0x3aa   : > { %v5840_v53 = vadd.f32 %v5839_v30, %v5838_v12  ;;  %v8908_v57 = vadd.f32 %v5837_v9, %v3000_v51 }
 0x3ab   : > { %v5729_v39 = vpop.f32.mrb[220].mxu1 }
 0x3ac   : > { %v5730_v52 = vpop.f32.mrb[221].mxu1  ;;  %v8910_v44 = vadd.f32 %v5840_v53, %v3003_v31  ;;  %6170 = vmatpush3.bf16.msra.mxu0 %v6860_v37 }
 0x3ad   : > { %v5731_v56 = vadd.f32 %v5730_v52, %v5729_v39  ;;  %v5732_v50 = vpop.f32.mrb[222].mxu1  ;;  %6171 = vmatprep.subr.bf16.mxu0 %v6861_v0 }
 0x3ae   : > { %v5733_v32 = vpop.f32.mrb[223].mxu1  ;;  %v5841_v26 = vpop.f32.mrb[220].mxu0 }
 0x3af   : > { %v3008_v49 = vadd.f32 %v5731_v56, %v8782_v11  ;;  %v5734_v47 = vadd.f32 %v5733_v32, %v5732_v50  ;;  %v5842_v55 = vpop.f32.mrb[221].mxu0 }
 0x3b0   : > { %v5843_v15 = vadd.f32 %v5842_v55, %v5841_v26  ;;  %v5844_v51 = vpop.f32.mrb[222].mxu0  ;;  %6172 = vmatpush3.bf16.msra.mxu0 %v6862_v59 }
 0x3b1   : > { %v3011_v60 = vadd.f32 %v5734_v47, %v8785_v28  ;;  %v5845_v38 = vpop.f32.mrb[223].mxu0  ;;  %v6863_v28 = vld [vmem:[#allocation6 + $0x158] sm:$0xff]   ;;  %v6865_v47 = vld [vmem:[#allocation6 + $0x160] sm:$0xff]  }
 0x3b2   : > { %v5846_v54 = vadd.f32 %v5845_v38, %v5844_v51  ;;  %v8914_v46 = vadd.f32 %v5843_v15, %v3008_v49  ;;  %6173 = vmatprep.subr.bf16.mxu0 %v6863_v28  ;;  %v6866_v38 = vld [vmem:[#allocation6 + $0x120] sm:$0xff]   ;;  %v6868_v28 = vld [vmem:[#allocation6 + $0x128] sm:$0xff]  }
 0x3b3   : > { %v5735_v18 = vpop.f32.mrb[224].mxu1 }
 0x3b4   : > { %v5736_v31 = vpop.f32.mrb[225].mxu1  ;;  %v8916_v11 = vadd.f32 %v5846_v54, %v3011_v60  ;;  %6174 = vmatpush3.bf16.msra.mxu0 %v6864_v20 }
 0x3b5   : > { %v5737_v9 = vadd.f32 %v5736_v31, %v5735_v18  ;;  %v5738_v12 = vpop.f32.mrb[226].mxu1  ;;  %6175 = vmatprep.subr.bf16.mxu0 %v6865_v47 }
 0x3b6   : > { %v5739_v30 = vpop.f32.mrb[227].mxu1  ;;  %v5847_v52 = vpop.f32.mrb[224].mxu0 }
 0x3b7   : > { %v3016_v39 = vadd.f32 %v5737_v9, %v8792_v5  ;;  %v5740_v53 = vadd.f32 %v5739_v30, %v5738_v12  ;;  %v5848_v56 = vpop.f32.mrb[225].mxu0 }
 0x3b8   : > { %v5849_v23 = vadd.f32 %v5848_v56, %v5847_v52  ;;  %v5850_v32 = vpop.f32.mrb[226].mxu0  ;;  %6176 = vmatpush3.bf16.msra.mxu0 %v6866_v38 }
 0x3b9   : > { %v3019_v50 = vadd.f32 %v5740_v53, %v8794_v63  ;;  %v5851_v49 = vpop.f32.mrb[227].mxu0  ;;  %v6867_v63 = vld [vmem:[#allocation6 + $0x168] sm:$0xff]   ;;  %v6869_v53 = vld [vmem:[#allocation6 + $0x170] sm:$0xff]  }
 0x3ba   : > { %v5852_v55 = vadd.f32 %v5851_v49, %v5850_v32  ;;  %v8920_v60 = vadd.f32 %v5849_v23, %v3016_v39  ;;  %6177 = vmatprep.subr.bf16.mxu0 %v6867_v63  ;;  %v6870_v49 = vld [vmem:[#allocation6 + $0x130] sm:$0xff]   ;;  %v6872_v63 = vld [vmem:[#allocation6 + $0x138] sm:$0xff]  }
 0x3bb   : > { %v5741_v26 = vpop.f32.mrb[228].mxu1 }
 0x3bc   : > { %v5742_v15 = vpop.f32.mrb[229].mxu1  ;;  %v8922_v5 = vadd.f32 %v5852_v55, %v3019_v50  ;;  %6178 = vmatpush3.bf16.msra.mxu0 %v6868_v28 }
 0x3bd   : > { %v5743_v51 = vadd.f32 %v5742_v15, %v5741_v26  ;;  %v5744_v37 = vpop.f32.mrb[230].mxu1  ;;  %6179 = vmatprep.subr.bf16.mxu0 %v6869_v53 }
 0x3be   : > { %v5745_v0 = vpop.f32.mrb[231].mxu1  ;;  %v5853_v31 = vpop.f32.mrb[228].mxu0 }
 0x3bf   : > { %v3024_v18 = vadd.f32 %v5743_v51, %v8800_v14  ;;  %v5746_v54 = vadd.f32 %v5745_v0, %v5744_v37  ;;  %v5854_v9 = vpop.f32.mrb[229].mxu0 }
 0x3c0   : > { %v5855_v59 = vadd.f32 %v5854_v9, %v5853_v31  ;;  %v5856_v30 = vpop.f32.mrb[230].mxu0  ;;  %6180 = vmatpush3.bf16.msra.mxu0 %v6870_v49 }
 0x3c1   : > { %v3027_v12 = vadd.f32 %v5746_v54, %v8802_v58  ;;  %v5857_v39 = vpop.f32.mrb[231].mxu0  ;;  %v6871_v58 = vld [vmem:[#allocation6 + $0x178] sm:$0xff]   ;;  %v6873_v54 = vld [vmem:[#allocation6 + $0x200] sm:$0xff]  }
 0x3c2   : > { %v5858_v56 = vadd.f32 %v5857_v39, %v5856_v30  ;;  %v8926_v50 = vadd.f32 %v5855_v59, %v3024_v18  ;;  %6181 = vmatprep.subr.bf16.mxu0 %v6871_v58 }
 0x3c3   : > { %v5747_v52 = vpop.f32.mrb[232].mxu1 }
 0x3c4   : > { %v5748_v23 = vpop.f32.mrb[233].mxu1  ;;  %v8928_v14 = vadd.f32 %v5858_v56, %v3027_v12  ;;  %6182 = vmatpush3.bf16.msra.mxu0 %v6872_v63 }
 0x3c5   : > { %v5749_v32 = vadd.f32 %v5748_v23, %v5747_v52  ;;  %v5750_v20 = vpop.f32.mrb[234].mxu1  ;;  %6511 = vmatprep.subr.bf16.mxu0 %v6873_v54 }
 0x3c6   : > { %v5751_v47 = vpop.f32.mrb[235].mxu1  ;;  %v5859_v15 = vpop.f32.mrb[232].mxu0 }
 0x3c7   : > { %v3032_v26 = vadd.f32 %v5749_v32, %v8808_v4  ;;  %v5752_v55 = vadd.f32 %v5751_v47, %v5750_v20  ;;  %v5860_v51 = vpop.f32.mrb[233].mxu0 }
 0x3c8   : > { %v5861_v38 = vadd.f32 %v5860_v51, %v5859_v15  ;;  %v5862_v0 = vpop.f32.mrb[234].mxu0 }
 0x3c9   : > { %v3035_v37 = vadd.f32 %v5752_v55, %v8810_v62  ;;  %v5863_v18 = vpop.f32.mrb[235].mxu0 }
 0x3ca   : > { %v5864_v9 = vadd.f32 %v5863_v18, %v5862_v0  ;;  %v8932_v12 = vadd.f32 %v5861_v38, %v3032_v26 }
 0x3cb   : > { %v5753_v31 = vpop.f32.mrb[236].mxu1 }
 0x3cc   : > { %v5754_v59 = vpop.f32.mrb[237].mxu1  ;;  %v8934_v4 = vadd.f32 %v5864_v9, %v3035_v37 }
 0x3cd   : > { %v5755_v30 = vadd.f32 %v5754_v59, %v5753_v31  ;;  %v5756_v28 = vpop.f32.mrb[238].mxu1 }
 0x3ce   : > { %v5757_v39 = vpop.f32.mrb[239].mxu1  ;;  %v5865_v52 = vpop.f32.mrb[236].mxu0 }
 0x3cf   : > { %v3040_v53 = vadd.f32 %v5755_v30, %v8816_v27  ;;  %v5758_v62 = vadd.f32 %v5757_v39, %v5756_v28  ;;  %v5866_v56 = vpop.f32.mrb[237].mxu0 }
 0x3d0   : > { %v5867_v32 = vadd.f32 %v5866_v56, %v5865_v52  ;;  %v5868_v20 = vpop.f32.mrb[238].mxu0 }
 0x3d1   : > { %v3043_v23 = vadd.f32 %v5758_v62, %v8818_v48  ;;  %v5869_v49 = vpop.f32.mrb[239].mxu0 }
 0x3d2   : > { %v5870_v58 = vadd.f32 %v5869_v49, %v5868_v20  ;;  %v8938_v26 = vadd.f32 %v5867_v32, %v3040_v53 }
 0x3d3   : > { %v5759_v47 = vpop.f32.mrb[240].mxu1 }
 0x3d4   : > { %v5760_v55 = vpop.f32.mrb[241].mxu1  ;;  %v8940_v37 = vadd.f32 %v5870_v58, %v3043_v23 }
 0x3d5   : > { %v5761_v15 = vadd.f32 %v5760_v55, %v5759_v47  ;;  %v5762_v51 = vpop.f32.mrb[242].mxu1 }
 0x3d6   : > { %v5763_v38 = vpop.f32.mrb[243].mxu1  ;;  %v5871_v63 = vpop.f32.mrb[240].mxu0 }
 0x3d7   : > { %v3048_v27 = vadd.f32 %v5761_v15, %v8824_v34  ;;  %v5764_v0 = vadd.f32 %v5763_v38, %v5762_v51  ;;  %v5872_v18 = vpop.f32.mrb[241].mxu0 }
 0x3d8   : > { %v5873_v54 = vadd.f32 %v5872_v18, %v5871_v63  ;;  %v5874_v31 = vpop.f32.mrb[242].mxu0 }
 0x3d9   : > { %v3051_v48 = vadd.f32 %v5764_v0, %v8826_v2  ;;  %v5875_v9 = vpop.f32.mrb[243].mxu0 }
 0x3da   : > { %v5876_v30 = vadd.f32 %v5875_v9, %v5874_v31  ;;  %v8944_v28 = vadd.f32 %v5873_v54, %v3048_v27 }
 0x3db   : > { %v5765_v59 = vpop.f32.mrb[244].mxu1 }
 0x3dc   : > { %v5766_v39 = vpop.f32.mrb[245].mxu1  ;;  %v8946_v52 = vadd.f32 %v5876_v30, %v3051_v48 }
 0x3dd   : > { %v5767_v53 = vadd.f32 %v5766_v39, %v5765_v59  ;;  %v5768_v62 = vpop.f32.mrb[246].mxu1 }
 0x3de   : > { %v5769_v56 = vpop.f32.mrb[247].mxu1  ;;  %v5877_v32 = vpop.f32.mrb[244].mxu0 }
 0x3df   : > { %v3056_v34 = vadd.f32 %v5767_v53, %v8832_v33  ;;  %v5770_v23 = vadd.f32 %v5769_v56, %v5768_v62  ;;  %v5878_v20 = vpop.f32.mrb[245].mxu0 }
 0x3e0   : > { %v5879_v49 = vadd.f32 %v5878_v20, %v5877_v32  ;;  %v5880_v47 = vpop.f32.mrb[246].mxu0 }
 0x3e1   : > { %v3059_v2 = vadd.f32 %v5770_v23, %v8834_v13  ;;  %v5881_v58 = vpop.f32.mrb[247].mxu0 }
 0x3e2   : > { %v5882_v15 = vadd.f32 %v5881_v58, %v5880_v47  ;;  %v8950_v51 = vadd.f32 %v5879_v49, %v3056_v34 }
 0x3e3   : > { %v5771_v55 = vpop.f32.mrb[248].mxu1 }
 0x3e4   : > { %v5772_v38 = vpop.f32.mrb[249].mxu1  ;;  %v8952_v63 = vadd.f32 %v5882_v15, %v3059_v2 }
 0x3e5   : > { %v5773_v27 = vadd.f32 %v5772_v38, %v5771_v55  ;;  %v5774_v0 = vpop.f32.mrb[250].mxu1 }
 0x3e6   : > { %v5775_v18 = vpop.f32.mrb[251].mxu1  ;;  %v5883_v54 = vpop.f32.mrb[248].mxu0 }
 0x3e7   : > { %v3064_v33 = vadd.f32 %v5773_v27, %v8840_v45  ;;  %v5776_v48 = vadd.f32 %v5775_v18, %v5774_v0  ;;  %v5884_v31 = vpop.f32.mrb[249].mxu0 }
 0x3e8   : > { %v5885_v9 = vadd.f32 %v5884_v31, %v5883_v54  ;;  %v5886_v59 = vpop.f32.mrb[250].mxu0 }
 0x3e9   : > { %v3067_v13 = vadd.f32 %v5776_v48, %v8842_v10  ;;  %v5887_v30 = vpop.f32.mrb[251].mxu0 }
 0x3ea   : > { %v5888_v53 = vadd.f32 %v5887_v30, %v5886_v59  ;;  %v8956_v62 = vadd.f32 %v5885_v9, %v3064_v33 }
 0x3eb   : > { %v5777_v39 = vpop.f32.mrb[252].mxu1 }
 0x3ec   : > { %v5778_v56 = vpop.f32.mrb[253].mxu1  ;;  %v8958_v32 = vadd.f32 %v5888_v53, %v3067_v13 }
 0x3ed   : > { %v5779_v34 = vadd.f32 %v5778_v56, %v5777_v39  ;;  %v5780_v23 = vpop.f32.mrb[254].mxu1 }
 0x3ee   : > { %v5781_v20 = vpop.f32.mrb[255].mxu1  ;;  %v5889_v49 = vpop.f32.mrb[252].mxu0 }
 0x3ef   : > { %v3072_v45 = vadd.f32 %v5779_v34, %v8848_v25  ;;  %v5782_v2 = vadd.f32 %v5781_v20, %v5780_v23  ;;  %v5890_v47 = vpop.f32.mrb[253].mxu0 }
 0x3f0   : > { %v5891_v58 = vadd.f32 %v5890_v47, %v5889_v49  ;;  %v5892_v55 = vpop.f32.mrb[254].mxu0 }
 0x3f1   : > { %v3075_v10 = vadd.f32 %v5782_v2, %v8850_v35  ;;  %v5893_v15 = vpop.f32.mrb[255].mxu0 }
 0x3f2   : > { %v5894_v27 = vadd.f32 %v5893_v15, %v5892_v55  ;;  %v8962_v0 = vadd.f32 %v5891_v58, %v3072_v45 }
 0x3f3   : > { %v5783_v38 = vpop.f32.mrb[0].mxu1 }
 0x3f4   : > { %v5784_v18 = vpop.f32.mrb[1].mxu1  ;;  %v8964_v54 = vadd.f32 %v5894_v27, %v3075_v10 }
 0x3f5   : > { %v5785_v33 = vadd.f32 %v5784_v18, %v5783_v38  ;;  %v5786_v48 = vpop.f32.mrb[2].mxu1 }
 0x3f6   : > { %v5787_v31 = vpop.f32.mrb[3].mxu1  ;;  %v5895_v9 = vpop.f32.mrb[0].mxu0 }
 0x3f7   : > { %v3080_v25 = vadd.f32 %v5785_v33, %v8857_v42  ;;  %v5788_v13 = vadd.f32 %v5787_v31, %v5786_v48  ;;  %v5896_v59 = vpop.f32.mrb[1].mxu0 }
 0x3f8   : > { %v5897_v30 = vadd.f32 %v5896_v59, %v5895_v9  ;;  %v5898_v39 = vpop.f32.mrb[2].mxu0 }
 0x3f9   : > { %v3083_v35 = vadd.f32 %v5788_v13, %v8859_v24  ;;  %v5899_v53 = vpop.f32.mrb[3].mxu0 }
 0x3fa   : > { %v5900_v34 = vadd.f32 %v5899_v53, %v5898_v39  ;;  %v8968_v23 = vadd.f32 %v5897_v30, %v3080_v25 }
 0x3fb   : > { %v5789_v56 = vpop.f32.mrb[4].mxu1 }
 0x3fc   : > { %v5790_v20 = vpop.f32.mrb[5].mxu1  ;;  %v8970_v49 = vadd.f32 %v5900_v34, %v3083_v35 }
 0x3fd   : > { %v5791_v45 = vadd.f32 %v5790_v20, %v5789_v56  ;;  %v5792_v2 = vpop.f32.mrb[6].mxu1 }
 0x3fe   : > { %v5793_v47 = vpop.f32.mrb[7].mxu1  ;;  %v5901_v58 = vpop.f32.mrb[4].mxu0 }
 0x3ff   : > { %v3088_v42 = vadd.f32 %v5791_v45, %v8863_v17  ;;  %v5794_v10 = vadd.f32 %v5793_v47, %v5792_v2  ;;  %v5902_v55 = vpop.f32.mrb[5].mxu0 }
 0x400   : > { %v5903_v15 = vadd.f32 %v5902_v55, %v5901_v58  ;;  %v5904_v38 = vpop.f32.mrb[6].mxu0 }
 0x401   : > { %v3091_v24 = vadd.f32 %v5794_v10, %v8865_v8  ;;  %v5905_v27 = vpop.f32.mrb[7].mxu0 }
 0x402   : > { %v5906_v33 = vadd.f32 %v5905_v27, %v5904_v38  ;;  %v8974_v48 = vadd.f32 %v5903_v15, %v3088_v42 }
 0x403   : > { %v5795_v18 = vpop.f32.mrb[8].mxu1 }
 0x404   : > { %v5796_v31 = vpop.f32.mrb[9].mxu1  ;;  %v8976_v9 = vadd.f32 %v5906_v33, %v3091_v24 }
 0x405   : > { %v5797_v25 = vadd.f32 %v5796_v31, %v5795_v18  ;;  %v5798_v13 = vpop.f32.mrb[10].mxu1 }
 0x406   : > { %v5799_v59 = vpop.f32.mrb[11].mxu1  ;;  %v5907_v30 = vpop.f32.mrb[8].mxu0 }
 0x407   : > { %v3096_v17 = vadd.f32 %v5797_v25, %v8869_v16  ;;  %v5800_v35 = vadd.f32 %v5799_v59, %v5798_v13  ;;  %v5908_v39 = vpop.f32.mrb[9].mxu0 }
 0x408   : > { %v5909_v53 = vadd.f32 %v5908_v39, %v5907_v30  ;;  %v5910_v56 = vpop.f32.mrb[10].mxu0 }
 0x409   : > { %v3099_v8 = vadd.f32 %v5800_v35, %v8871_v36  ;;  %v5911_v34 = vpop.f32.mrb[11].mxu0 }
 0x40a   : > { %v5912_v45 = vadd.f32 %v5911_v34, %v5910_v56  ;;  %v8980_v2 = vadd.f32 %v5909_v53, %v3096_v17 }
 0x40b   : > { %v5801_v20 = vpop.f32.mrb[12].mxu1 }
 0x40c   : > { %v5802_v47 = vpop.f32.mrb[13].mxu1  ;;  %v8982_v58 = vadd.f32 %v5912_v45, %v3099_v8 }
 0x40d   : > { %v5803_v42 = vadd.f32 %v5802_v47, %v5801_v20  ;;  %v5804_v10 = vpop.f32.mrb[14].mxu1 }
 0x40e   : > { %v5805_v55 = vpop.f32.mrb[15].mxu1  ;;  %v5913_v15 = vpop.f32.mrb[12].mxu0 }
 0x40f   : > { %v3104_v16 = vadd.f32 %v5803_v42, %v8875_v40  ;;  %v5806_v24 = vadd.f32 %v5805_v55, %v5804_v10  ;;  %v5914_v38 = vpop.f32.mrb[13].mxu0 }
 0x410   : > { %v5915_v27 = vadd.f32 %v5914_v38, %v5913_v15  ;;  %v5916_v18 = vpop.f32.mrb[14].mxu0 }
 0x411   : > { %v3107_v36 = vadd.f32 %v5806_v24, %v8877_v41  ;;  %v5917_v33 = vpop.f32.mrb[15].mxu0 }
 0x412   : > { %v5918_v31 = vadd.f32 %v5917_v33, %v5916_v18  ;;  %v8986_v13 = vadd.f32 %v5915_v27, %v3104_v16  ;;  %v9889_v18 = vld [vmem:[#allocation17_spill] sm:$0xff] }
 0x413   : > { %v6481_v25 = vpop.f32.mrb[16].mxu1 }
 0x414   : > { %v3314_v59 = vadd.f32 %v6481_v25, %v8887_v7  ;;  %v3305_v17 = vpop.f32.mrb[17].mxu1  ;;  %v8990_v39 = vadd.f32 %v5918_v31, %v3107_v36 }
 0x415   : > { %v3306_v35 = vadd.f32 %v3305_v17, %v8881_v22  ;;  %v6482_v30 = vpop.f32.mrb[18].mxu1  ;;  %v9887_v22 = vld [vmem:[#allocation15_spill] sm:$0xff]  ;;  %v9891_v17 = vld [vmem:[#allocation14_spill] sm:$0xff] }
 0x416   : > { %v3434_v40 = vmax.f32 %v3314_v59, 0.0  ;;  %v3317_v8 = vadd.f32 %v6482_v30, %v8889_v29  ;;  %v3308_v53 = vpop.f32.mrb[19].mxu1 }
 0x417   : > { %v3432_v41 = vmax.f32 %v3306_v35, 0.0  ;;  %v3309_v56 = vadd.f32 %v3308_v53, %v8883_v3 }
 0x418   : > { %v3466_v34 = vadd.f32 %v8183_v21, %v3434_v40  ;;  %v3435_v20 = vmax.f32 %v3317_v8, 0.0 }
 0x419   : > { %v3464_v45 = vadd.f32 %v8186_v1, %v3432_v41  ;;  %v3433_v47 = vmax.f32 %v3309_v56, 0.0 }
 0x41a   : > { %3498 = vst [vmem:[#allocation2 + $0x31] sm:$0xff] %v3466_v34  ;;  %v3467_v7 = vadd.f32 %v8192_v19, %v3435_v20  ;;  %v9888_v19 = vld [vmem:[#allocation12_spill] sm:$0xff] }
 0x41b   : > { %3496 = vst [vmem:[#allocation2 + $0x19] sm:$0xff] %v3464_v45  ;;  %v3465_v42 = vadd.f32 %v9887_v22, %v3433_v47  ;;  %v6485_v10 = vpop.f32.mrb[20].mxu1 }
 0x41c   : > { %3499 = vst [vmem:[#allocation2 + $0x39] sm:$0xff] %v3467_v7  ;;  %v3330_v29 = vadd.f32 %v6485_v10, %v8914_v46  ;;  %v3321_v55 = vpop.f32.mrb[21].mxu1  ;;  %v9890_v46 = vld [vmem:[#allocation13_spill] sm:$0xff] }
 0x41d   : > { %3497 = vst [vmem:[#allocation2 + $0x21] sm:$0xff] %v3465_v42  ;;  %v3322_v3 = vadd.f32 %v3321_v55, %v8908_v57  ;;  %v6486_v16 = vpop.f32.mrb[22].mxu1 }
 0x41e   : > { %v3438_v21 = vmax.f32 %v3330_v29, 0.0  ;;  %v3333_v24 = vadd.f32 %v6486_v16, %v8916_v11  ;;  %v3324_v1 = vpop.f32.mrb[23].mxu1 }
 0x41f   : > { %v3436_v15 = vmax.f32 %v3322_v3, 0.0  ;;  %v3325_v38 = vadd.f32 %v3324_v1, %v8910_v44 }
 0x420   : > { %v3470_v36 = vadd.f32 %v9888_v19, %v3438_v21  ;;  %v3439_v27 = vmax.f32 %v3333_v24, 0.0  ;;  %v9892_v24 = vld [vmem:[#allocation16_spill] sm:$0xff]  ;;  %v9893_v19 = vld [vmem:[#allocation18_spill] sm:$0xff] }
 0x421   : > { %v3468_v33 = vadd.f32 %v9889_v18, %v3436_v15  ;;  %v3437_v31 = vmax.f32 %v3325_v38, 0.0  ;;  %v9004_v25 = vld [vmem:[#allocation2 + $0x30] sm:$0xff] }
 0x422   : > { %3502 = vst [vmem:[#allocation2 + $0x61] sm:$0xff] %v3470_v36  ;;  %v3471_v59 = vadd.f32 %v9890_v46, %v3439_v27  ;;  %v3531_v57 = vld [vmem:[#allocation2 + $0x18] sm:$0xff]  ;;  %v3640_v41 = vrot.slane %v9004_v25, 1 }
 0x423   : > { %3500 = vst [vmem:[#allocation2 + $0x49] sm:$0xff] %v3468_v33  ;;  %v3469_v35 = vadd.f32 %v9891_v17, %v3437_v31  ;;  %v6489_v11 = vpop.f32.mrb[24].mxu1  ;;  %v9008_v30 = vld [vmem:[#allocation2 + $0x38] sm:$0xff]  ;;  %v3635_v53 = vrot.slane %v3531_v57, 1  ;;  %v9021_v21 = vld [vmem:[#allocation2 + $0x40] sm:$0x3] }
 0x424   : > { %3503 = vst [vmem:[#allocation2 + $0x69] sm:$0xff] %v3471_v59  ;;  %v3346_v44 = vadd.f32 %v6489_v11, %v8926_v50  ;;  %v3337_v40 = vpop.f32.mrb[25].mxu1  ;;  %v3532_v8 = vld [vmem:[#allocation2 + $0x20] sm:$0xff]  ;;  %v3533_v56 = vld [vmem:[#allocation2 + $0x28] sm:$0x3]  ;;  %v3641_v7 = vrot.slane %v9008_v30, 1  ;;  %v9017_v50 = vpack.c.bf16 %v9008_v30, %v9004_v25 }
 0x425   : > { %3501 = vst [vmem:[#allocation2 + $0x51] sm:$0xff] %v3469_v35  ;;  %v3338_v34 = vadd.f32 %v3337_v40, %v8920_v60  ;;  %v6490_v20 = vpop.f32.mrb[26].mxu1  ;;  %v3636_v45 = vrot.slane %v3532_v8, 1  ;;  %v3891_v47 = vpack.c.bf16 %v3532_v8, %v3531_v57  ;;  %v3638_v29 = vrot.slane %v3533_v56, 1  ;;  %v6874_v33 = vld [vmem:[#allocation6 + $0x180] sm:$0xff]   ;;  %v9894_v31 = vld [vmem:[#allocation19_spill] sm:$0xff] }
 0x426   : > { %v3442_v22 = vmax.f32 %v3346_v44, 0.0  ;;  %v3349_v42 = vadd.f32 %v6490_v20, %v8928_v14  ;;  %v3340_v10 = vpop.f32.mrb[27].mxu1  ;;  %v3748_v16 = vrot.slane %v3532_v8, 2  ;;  %v3750_v38 = vrot.slane %v3533_v56, 2 }
 0x427   : > { %v3440_v55 = vmax.f32 %v3338_v34, 0.0  ;;  %v3341_v3 = vadd.f32 %v3340_v10, %v8922_v5  ;;  %4135 = vmatprep.mubr.bf16.mxu1 %v3891_v47  ;;  %v3637_v60 = vsel %vm560_vm0, %v3635_v53, %v3636_v45  ;;  %v3639_v14 = vsel %vm560_vm0, %v3636_v45, %v3638_v29  ;;  %v6876_v10 = vld [vmem:[#allocation6 + $0x188] sm:$0xff]  }
 0x428   : > { %v3474_v1 = vadd.f32 %v9892_v24, %v3442_v22  ;;  %v3443_v15 = vmax.f32 %v3349_v42, 0.0  ;;  %4136 = vmatmul.mubr.bf16.vlgmr.msra.gmra.mrb[48].mxu1 %v3890_v43  ;;  %v3747_v5 = vrot.slane %v3531_v57, 2  ;;  %v9030_v18 = vpack.c.bf16 %v3639_v14, %v3637_v60  ;;  %v9895_v43 = vld [vmem:[#allocation20_spill] sm:$0xff] }
 0x429   : > { %v3472_v36 = vadd.f32 %v9893_v19, %v3440_v55  ;;  %v3441_v27 = vmax.f32 %v3341_v3, 0.0  ;;  %4143 = vmatprep.mubr.bf16.mxu1 %v9017_v50  ;;  %6280 = vmatpush3.bf16.msra.mxu1 %v6874_v33  ;;  %v3642_v59 = vsel %vm560_vm0, %v3640_v41, %v3641_v7  ;;  %v3643_v6 = vrot.slane %v9021_v21, 1  ;;  %v6877_v3 = vld [vmem:[#allocation6 + $0x1d0] sm:$0xff]  }
 0x42a   : > { %3506 = vst [vmem:[#allocation2 + $0x91] sm:$0xff] %v3474_v1  ;;  %v3475_v46 = vadd.f32 %v9894_v31, %v3443_v15  ;;  %6281 = vmatprep.subr.bf16.mxu1 %v6875_v61  ;;  %v3749_v57 = vsel %vm673_vm1, %v3747_v5, %v3748_v16  ;;  %v3751_v35 = vsel %vm673_vm1, %v3748_v16, %v3750_v38  ;;  %v9039_v44 = vld [vmem:[#allocation2 + $0x48] sm:$0xff]  ;;  %v3753_v40 = vrot.slane %v9008_v30, 2  ;;  %v9896_v1 = vld [vmem:[#allocation21_spill] sm:$0xff]  ;;  %v9897_v38 = vld [vmem:[#allocation22_spill] sm:$0xff] }
 0x42b   : > { %3504 = vst [vmem:[#allocation2 + $0x79] sm:$0xff] %v3472_v36  ;;  %v3473_v17 = vadd.f32 %v9895_v43, %v3441_v27  ;;  %3982 = vmatprep.mubr.bf16.mxu0 %v9030_v18  ;;  %v6493_v11 = vpop.f32.mrb[28].mxu1  ;;  %v3644_v41 = vsel %vm560_vm0, %v3641_v7, %v3643_v6  ;;  %v3755_v45 = vrot.slane %v9021_v21, 2  ;;  %v3645_v55 = vrot.slane %v9039_v44, 1  ;;  %v9071_v27 = vld [vmem:[#allocation2 + $0x68] sm:$0xff]  ;;  %v6878_v33 = vld [vmem:[#allocation6 + $0x190] sm:$0xff]  }
 0x42c   : > { %3507 = vst [vmem:[#allocation2 + $0x99] sm:$0xff] %v3475_v46  ;;  %v3362_v8 = vadd.f32 %v6493_v11, %v8938_v26  ;;  %3983 = vmatmul.mubr.bf16.gmra.mrb[20].mxu0 %v3891_v47  ;;  %v3353_v53 = vpop.f32.mrb[29].mxu1  ;;  %v9044_v56 = vld [vmem:[#allocation2 + $0x50] sm:$0xff]  ;;  %v9046_v34 = vld [vmem:[#allocation2 + $0x58] sm:$0x3]  ;;  %v9050_v22 = vpack.c.bf16 %v3644_v41, %v3642_v59  ;;  %v9053_v26 = vpack.c.bf16 %v3751_v35, %v3749_v57  ;;  %v3752_v24 = vrot.slane %v9004_v25, 2 }
 0x42d   : > { %3505 = vst [vmem:[#allocation2 + $0x81] sm:$0xff] %v3473_v17  ;;  %v3354_v20 = vadd.f32 %v3353_v53, %v8932_v12  ;;  %v6494_v42 = vpop.f32.mrb[30].mxu1  ;;  %v3646_v30 = vrot.slane %v9044_v56, 1  ;;  %6282 = vmatpush3.bf16.msra.mxu1 %v6876_v10  ;;  %v9061_v60 = vpack.c.bf16 %v9044_v56, %v9039_v44  ;;  %v3648_v21 = vrot.slane %v9046_v34, 1  ;;  %v9073_v5 = vld [vmem:[#allocation2 + $0x70] sm:$0x3] }
 0x42e   : > { %v3446_v47 = vmax.f32 %v3362_v8, 0.0  ;;  %v3365_v7 = vadd.f32 %v6494_v42, %v8940_v37  ;;  %v3356_v29 = vpop.f32.mrb[31].mxu1  ;;  %6283 = vmatprep.subr.bf16.mxu1 %v6877_v3  ;;  %3990 = vmatprep.mubr.bf16.mxu0 %v9050_v22  ;;  %v3754_v25 = vsel %vm673_vm1, %v3752_v24, %v3753_v40  ;;  %v3756_v31 = vsel %vm673_vm1, %v3753_v40, %v3755_v45  ;;  %v9898_v46 = vld [vmem:[#allocation23_spill] sm:$0xff]  ;;  %v9078_v6 = vld [vmem:[#allocation2 + $0x60] sm:$0xff]  ;;  %v9899_v43 = vld [vmem:[#allocation24_spill] sm:$0xff] }
 0x42f   : > { %v3444_v12 = vmax.f32 %v3354_v20, 0.0  ;;  %v3357_v16 = vadd.f32 %v3356_v29, %v8934_v4  ;;  %v3647_v14 = vsel %vm560_vm0, %v3645_v55, %v3646_v30  ;;  %v3649_v4 = vsel %vm560_vm0, %v3646_v30, %v3648_v21  ;;  %v6879_v61 = vld [vmem:[#allocation6 + $0x1d8] sm:$0xff]   ;;  %v6881_v55 = vld [vmem:[#allocation6 + $0x1e0] sm:$0xff]   ;;  %v9900_v21 = vld [vmem:[#allocation25_spill] sm:$0xff] }
 0x430   : > { %v3478_v37 = vadd.f32 %v9896_v1, %v3446_v47  ;;  %v3447_v15 = vmax.f32 %v3365_v7, 0.0  ;;  %4144 = vmatmul.mubr.bf16.gmra.mrb[52].mxu1 %v9053_v26  ;;  %v9081_v35 = vpack.c.bf16 %v3649_v4, %v3647_v14  ;;  %v3651_v40 = vrot.slane %v9071_v27, 1  ;;  %v6880_v30 = vld [vmem:[#allocation6 + $0x198] sm:$0xff]   ;;  %v9901_v1 = vld [vmem:[#allocation26_spill] sm:$0xff]  ;;  %v6882_v14 = vld [vmem:[#allocation6 + $0x1a0] sm:$0xff]  }
 0x431   : > { %v3476_v19 = vadd.f32 %v9897_v38, %v3444_v12  ;;  %v3445_v36 = vmax.f32 %v3357_v16, 0.0  ;;  %4151 = vmatprep.mubr.bf16.mxu1 %v9061_v60  ;;  %6284 = vmatpush3.bf16.msra.mxu1 %v6878_v33  ;;  %v3653_v53 = vrot.slane %v9073_v5, 1  ;;  %v9087_v41 = vpack.c.bf16 %v3756_v31, %v3754_v25  ;;  %v6883_v33 = vld [vmem:[#allocation6 + $0x1e8] sm:$0xff]   ;;  %v9903_v25 = vld [vmem:[#allocation28_spill] sm:$0xff] }
 0x432   : > { %3510 = vst [vmem:[#allocation2 + $0xc1] sm:$0xff] %v3478_v37  ;;  %v3479_v59 = vadd.f32 %v9898_v46, %v3447_v15  ;;  %6285 = vmatprep.subr.bf16.mxu1 %v6879_v61  ;;  %v3650_v42 = vrot.slane %v9078_v6, 1  ;;  %v3760_v47 = vrot.slane %v9046_v34, 2  ;;  %v3757_v3 = vrot.slane %v9039_v44, 2  ;;  %v9117_v61 = vld [vmem:[#allocation2 + $0x78] sm:$0xff] }
 0x433   : > { %3508 = vst [vmem:[#allocation2 + $0xa9] sm:$0xff] %v3476_v19  ;;  %v3477_v17 = vadd.f32 %v9899_v43, %v3445_v36  ;;  %v6497_v57 = vpop.f32.mrb[32].mxu1  ;;  %v9099_v16 = vpack.c.bf16 %v9071_v27, %v9078_v6  ;;  %v9902_v36 = vld [vmem:[#allocation27_spill] sm:$0xff] }
 0x434   : > { %3511 = vst [vmem:[#allocation2 + $0xc9] sm:$0xff] %v3479_v59  ;;  %v3378_v11 = vadd.f32 %v6497_v57, %v8950_v51  ;;  %3991 = vmatmul.mubr.bf16.gmra.mrb[24].mxu0 %v9017_v50  ;;  %v3369_v8 = vpop.f32.mrb[33].mxu1  ;;  %v3758_v51 = vrot.slane %v9044_v56, 2  ;;  %v3652_v34 = vsel %vm560_vm0, %v3650_v42, %v3651_v40  ;;  %v9107_v44 = vld [vmem:[#allocation2 + $0x80] sm:$0xff] }
 0x435   : > { %3509 = vst [vmem:[#allocation2 + $0xb1] sm:$0xff] %v3477_v17  ;;  %v3370_v20 = vadd.f32 %v3369_v8, %v8944_v28  ;;  %3998 = vmatprep.mubr.bf16.mxu0 %v9081_v35  ;;  %v6498_v45 = vpop.f32.mrb[34].mxu1  ;;  %6286 = vmatpush3.bf16.msra.mxu1 %v6880_v30  ;;  %v3656_v57 = vrot.slane %v9107_v44, 1 }
 0x436   : > { %v3450_v10 = vmax.f32 %v3378_v11, 0.0  ;;  %v3381_v7 = vadd.f32 %v6498_v45, %v8952_v63  ;;  %v3372_v29 = vpop.f32.mrb[35].mxu1  ;;  %6287 = vmatprep.subr.bf16.mxu1 %v6881_v55  ;;  %v3654_v63 = vsel %vm560_vm0, %v3651_v40, %v3653_v53  ;;  %v3759_v38 = vsel %vm673_vm1, %v3757_v3, %v3758_v51  ;;  %v9904_v55 = vld [vmem:[#allocation29_spill] sm:$0xff] }
 0x437   : > { %v3448_v28 = vmax.f32 %v3370_v20, 0.0  ;;  %v3373_v12 = vadd.f32 %v3372_v29, %v8946_v52  ;;  %v9109_v52 = vld [vmem:[#allocation2 + $0x88] sm:$0x3]  ;;  %v3761_v19 = vsel %vm673_vm1, %v3758_v51, %v3760_v47  ;;  %v9115_v59 = vpack.c.bf16 %v3654_v63, %v3652_v34  ;;  %v6885_v29 = vld [vmem:[#allocation6 + $0x1f0] sm:$0xff]  }
 0x438   : > { %v3482_v24 = vadd.f32 %v9900_v21, %v3450_v10  ;;  %v3451_v56 = vmax.f32 %v3381_v7, 0.0  ;;  %4152 = vmatmul.mubr.bf16.gmra.mrb[56].mxu1 %v9087_v41  ;;  %v3658_v11 = vrot.slane %v9109_v52, 1  ;;  %v9123_v8 = vpack.c.bf16 %v3761_v19, %v3759_v38  ;;  %v6884_v10 = vld [vmem:[#allocation6 + $0x1a8] sm:$0xff]   ;;  %v9906_v63 = vld [vmem:[#allocation31_spill] sm:$0xff] }
 0x439   : > { %v3480_v37 = vadd.f32 %v9901_v1, %v3448_v28  ;;  %v3449_v15 = vmax.f32 %v3373_v12, 0.0  ;;  %4159 = vmatprep.mubr.bf16.mxu1 %v9099_v16  ;;  %6288 = vmatpush3.bf16.msra.mxu1 %v6882_v14  ;;  %v3763_v40 = vrot.slane %v9071_v27, 2  ;;  %v3655_v51 = vrot.slane %v9117_v61, 1  ;;  %v9905_v12 = vld [vmem:[#allocation30_spill] sm:$0xff] }
 0x43a   : > { %3514 = vst [vmem:[#allocation2 + $0xf1] sm:$0xff] %v3482_v24  ;;  %v3483_v4 = vadd.f32 %v9902_v36, %v3451_v56  ;;  %6289 = vmatprep.subr.bf16.mxu1 %v6883_v33  ;;  %v3762_v47 = vrot.slane %v9078_v6, 2  ;;  %v3659_v28 = vsel %vm560_vm0, %v3656_v57, %v3658_v11  ;;  %v9145_v24 = vld [vmem:[#allocation2 + $0xa0] sm:$0x3]  ;;  %v9153_v36 = vld [vmem:[#allocation2 + $0x90] sm:$0xff]  ;;  %v3768_v11 = vrot.slane %v9107_v44, 2 }
 0x43b   : > { %3512 = vst [vmem:[#allocation2 + $0xd9] sm:$0xff] %v3480_v37  ;;  %v3481_v31 = vadd.f32 %v9903_v25, %v3449_v15  ;;  %v6501_v46 = vpop.f32.mrb[36].mxu1  ;;  %v6886_v37 = vld [vmem:[#allocation6 + $0x1b0] sm:$0xff]   ;;  %v9907_v15 = vld [vmem:[#allocation32_spill] sm:$0xff] }
 0x43c   : > { %3515 = vst [vmem:[#allocation2 + $0xf9] sm:$0xff] %v3483_v4  ;;  %v3394_v43 = vadd.f32 %v6501_v46, %v8962_v0  ;;  %3999 = vmatmul.mubr.bf16.gmra.mrb[28].mxu0 %v9061_v60  ;;  %v3385_v17 = vpop.f32.mrb[37].mxu1  ;;  %v3765_v0 = vrot.slane %v9073_v5, 2  ;;  %v3764_v56 = vsel %vm673_vm1, %v3762_v47, %v3763_v40  ;;  %v6887_v4 = vld [vmem:[#allocation6 + $0x1f8] sm:$0xff]   ;;  %v3663_v46 = vrot.slane %v9145_v24, 1 }
 0x43d   : > { %3513 = vst [vmem:[#allocation2 + $0xe1] sm:$0xff] %v3481_v31  ;;  %v3386_v53 = vadd.f32 %v3385_v17, %v8956_v62  ;;  %4006 = vmatprep.mubr.bf16.mxu0 %v9115_v59  ;;  %v6502_v20 = vpop.f32.mrb[38].mxu1  ;;  %6290 = vmatpush3.bf16.msra.mxu1 %v6884_v10  ;;  %v9135_v62 = vpack.c.bf16 %v9107_v44, %v9117_v61 }
 0x43e   : > { %v3454_v45 = vmax.f32 %v3394_v43, 0.0  ;;  %v3397_v42 = vadd.f32 %v6502_v20, %v8964_v54  ;;  %v3388_v30 = vpop.f32.mrb[39].mxu1  ;;  %6291 = vmatprep.subr.bf16.mxu1 %v6885_v29  ;;  %v3657_v54 = vsel %vm560_vm0, %v3655_v51, %v3656_v57  ;;  %v3766_v34 = vsel %vm673_vm1, %v3763_v40, %v3765_v0  ;;  %v9908_v51 = vld [vmem:[#allocation33_spill] sm:$0xff] }
 0x43f   : > { %v3452_v7 = vmax.f32 %v3386_v53, 0.0  ;;  %v3389_v27 = vadd.f32 %v3388_v30, %v8958_v32  ;;  %v9143_v32 = vld [vmem:[#allocation2 + $0x98] sm:$0xff]  ;;  %v9151_v19 = vpack.c.bf16 %v3659_v28, %v3657_v54  ;;  %v9159_v43 = vpack.c.bf16 %v3766_v34, %v3764_v56  ;;  %v3549_v56 = vld [vmem:[#allocation2 + $0xa8] sm:$0xff] }
 0x440   : > { %v3486_v5 = vadd.f32 %v9904_v55, %v3454_v45  ;;  %v3455_v3 = vmax.f32 %v3397_v42, 0.0  ;;  %4160 = vmatmul.mubr.bf16.gmra.mrb[60].mxu1 %v9123_v8  ;;  %v3661_v31 = vrot.slane %v9143_v32, 1  ;;  %v3660_v20 = vrot.slane %v9153_v36, 1  ;;  %v6888_v45 = vld [vmem:[#allocation6 + $0x1b8] sm:$0xff]   ;;  %v9181_v55 = vld [vmem:[#allocation2 + $0xb8] sm:$0x3] }
 0x441   : > { %v3484_v6 = vadd.f32 %v9905_v12, %v3452_v7  ;;  %v3453_v21 = vmax.f32 %v3389_v27, 0.0  ;;  %4167 = vmatprep.mubr.bf16.mxu1 %v9135_v62  ;;  %6292 = vmatpush3.bf16.msra.mxu1 %v6886_v37  ;;  %v3770_v42 = vrot.slane %v9109_v52, 2  ;;  %v3767_v7 = vrot.slane %v9117_v61, 2  ;;  %v9909_v27 = vld [vmem:[#allocation34_spill] sm:$0xff]  ;;  %v9911_v12 = vld [vmem:[#allocation36_spill] sm:$0xff] }
 0x442   : > { %3518 = vst [vmem:[#allocation2 + $0x121] sm:$0xff] %v3486_v5  ;;  %v3487_v1 = vadd.f32 %v9906_v63, %v3455_v3  ;;  %6293 = vmatprep.subr.bf16.mxu1 %v6887_v4  ;;  %v3664_v47 = vsel %vm560_vm0, %v3661_v31, %v3663_v46  ;;  %v9910_v5 = vld [vmem:[#allocation35_spill] sm:$0xff]  ;;  %v3668_v37 = vrot.slane %v9181_v55, 1 }
 0x443   : > { %3516 = vst [vmem:[#allocation2 + $0x109] sm:$0xff] %v3484_v6  ;;  %v3485_v14 = vadd.f32 %v9907_v15, %v3453_v21  ;;  %v6505_v38 = vpop.f32.mrb[40].mxu1  ;;  %v3769_v54 = vsel %vm673_vm1, %v3767_v7, %v3768_v11  ;;  %v3771_v28 = vsel %vm673_vm1, %v3768_v11, %v3770_v42  ;;  %v3773_v15 = vrot.slane %v9143_v32, 2  ;;  %v9914_v42 = vld [vmem:[#allocation40_spill] sm:$0xff] }
 0x444   : > { %3519 = vst [vmem:[#allocation2 + $0x129] sm:$0xff] %v3487_v1  ;;  %v3410_v33 = vadd.f32 %v6505_v38, %v8974_v48  ;;  %4007 = vmatmul.mubr.bf16.gmra.mrb[32].mxu0 %v9099_v16  ;;  %v3401_v25 = vpop.f32.mrb[41].mxu1  ;;  %v9196_v4 = vpack.c.bf16 %v3771_v28, %v3769_v54 }
 0x445   : > { %3517 = vst [vmem:[#allocation2 + $0x111] sm:$0xff] %v3485_v14  ;;  %v3402_v17 = vadd.f32 %v3401_v25, %v8968_v23  ;;  %4014 = vmatprep.mubr.bf16.mxu0 %v9151_v19  ;;  %v6506_v57 = vpop.f32.mrb[42].mxu1  ;;  %6294 = vmatpush3.bf16.msra.mxu1 %v6888_v45  ;;  %v9170_v23 = vpack.c.bf16 %v9143_v32, %v9153_v36  ;;  %v9912_v32 = vld [vmem:[#allocation39_spill] sm:$0xff] }
 0x446   : > { %v3458_v40 = vmax.f32 %v3410_v33, 0.0  ;;  %v3413_v48 = vadd.f32 %v6506_v57, %v8976_v9  ;;  %v3404_v53 = vpop.f32.mrb[43].mxu1  ;;  %v3662_v9 = vsel %vm560_vm0, %v3660_v20, %v3661_v31  ;;  %v3665_v31 = vrot.slane %v3549_v56, 1  ;;  %v9913_v20 = vld [vmem:[#allocation37_spill] sm:$0xff] }
 0x447   : > { %v3456_v0 = vmax.f32 %v3402_v17, 0.0  ;;  %v3405_v30 = vadd.f32 %v3404_v53, %v8970_v49  ;;  %v9179_v49 = vld [vmem:[#allocation2 + $0xb0] sm:$0xff]  ;;  %v9187_v21 = vpack.c.bf16 %v3664_v47, %v3662_v9  ;;  %v3775_v17 = vrot.slane %v9145_v24, 2 }
 0x448   : > { %v3490_v10 = vadd.f32 %v9908_v51, %v3458_v40  ;;  %v3459_v44 = vmax.f32 %v3413_v48, 0.0  ;;  %4168 = vmatmul.mubr.bf16.gmra.mrb[64].mxu1 %v9159_v43  ;;  %v3666_v1 = vrot.slane %v9179_v49, 1  ;;  %v9202_v11 = vpack.c.bf16 %v9179_v49, %v3549_v56  ;;  %v3554_v24 = vld [vmem:[#allocation2 + $0xd0] sm:$0x3] }
 0x449   : > { %v3488_v29 = vadd.f32 %v9909_v27, %v3456_v0  ;;  %v3457_v52 = vmax.f32 %v3405_v30, 0.0  ;;  %4175 = vmatprep.mubr.bf16.mxu1 %v9170_v23  ;;  %v3673_v27 = vrot.slane %v3554_v24, 1 }
 0x44a   : > { %3522 = vst [vmem:[#allocation2 + $0x151] sm:$0xff] %v3490_v10  ;;  %v3491_v3 = vadd.f32 %v9910_v5, %v3459_v44  ;;  %v3667_v48 = vsel %vm560_vm0, %v3665_v31, %v3666_v1  ;;  %v3669_v53 = vsel %vm560_vm0, %v3666_v1, %v3668_v37  ;;  %v3776_v10 = vsel %vm673_vm1, %v3773_v15, %v3775_v17  ;;  %v9915_v44 = vld [vmem:[#allocation38_spill] sm:$0xff]  ;;  %v3559_v17 = vld [vmem:[#allocation2 + $0xf8] sm:$0xff] }
 0x44b   : > { %3520 = vst [vmem:[#allocation2 + $0x139] sm:$0xff] %v3488_v29  ;;  %v3489_v6 = vadd.f32 %v9911_v12, %v3457_v52  ;;  %v6509_v61 = vpop.f32.mrb[44].mxu1  ;;  %v9215_v47 = vpack.c.bf16 %v3669_v53, %v3667_v48  ;;  %v3778_v5 = vrot.slane %v9179_v49, 2 }
 0x44c   : > { %3523 = vst [vmem:[#allocation2 + $0x159] sm:$0xff] %v3491_v3  ;;  %v3426_v34 = vadd.f32 %v6509_v61, %v8986_v13  ;;  %4015 = vmatmul.mubr.bf16.gmra.mrb[36].mxu0 %v9135_v62  ;;  %v3417_v63 = vpop.f32.mrb[45].mxu1  ;;  %v3780_v3 = vrot.slane %v9181_v55, 2  ;;  %v3556_v61 = vld [vmem:[#allocation2 + $0xe0] sm:$0xff]  ;;  %v3555_v55 = vld [vmem:[#allocation2 + $0xd8] sm:$0xff] }
 0x44d   : > { %3521 = vst [vmem:[#allocation2 + $0x141] sm:$0xff] %v3489_v6  ;;  %v3418_v14 = vadd.f32 %v3417_v63, %v8980_v2  ;;  %4022 = vmatprep.mubr.bf16.mxu0 %v9187_v21  ;;  %v6510_v38 = vpop.f32.mrb[46].mxu1  ;;  %v3777_v6 = vrot.slane %v3549_v56, 2  ;;  %v3676_v37 = vrot.slane %v3556_v61, 1  ;;  %v3675_v56 = vrot.slane %v3555_v55, 1 }
 0x44e   : > { %v3462_v33 = vmax.f32 %v3426_v34, 0.0  ;;  %v3429_v13 = vadd.f32 %v6510_v38, %v8990_v39  ;;  %v3420_v25 = vpop.f32.mrb[47].mxu1  ;;  %v3772_v39 = vrot.slane %v9153_v36, 2  ;;  %v3552_v36 = vld [vmem:[#allocation2 + $0xc0] sm:$0xff]  ;;  %v3557_v34 = vld [vmem:[#allocation2 + $0xe8] sm:$0x3]  ;;  %v3781_v1 = vsel %vm673_vm1, %v3778_v5, %v3780_v3 }
 0x44f   : > { %v3460_v46 = vmax.f32 %v3418_v14, 0.0  ;;  %v3421_v57 = vadd.f32 %v3420_v25, %v8982_v58  ;;  %v3553_v58 = vld [vmem:[#allocation2 + $0xc8] sm:$0xff]  ;;  %v3670_v52 = vrot.slane %v3552_v36, 1  ;;  %v3779_v63 = vsel %vm673_vm1, %v3777_v6, %v3778_v5 }
 0x450   : > { %v3494_v2 = vadd.f32 %v9912_v32, %v3462_v33  ;;  %v3463_v40 = vmax.f32 %v3429_v13, 0.0  ;;  %4176 = vmatmul.mubr.bf16.gmra.mrb[68].mxu1 %v9196_v4  ;;  %v3774_v51 = vsel %vm673_vm1, %v3772_v39, %v3773_v15  ;;  %v3671_v7 = vrot.slane %v3553_v58, 1  ;;  %v3558_v39 = vld [vmem:[#allocation2 + $0xf0] sm:$0xff] }
 0x451   : > { %v3492_v45 = vadd.f32 %v9913_v20, %v3460_v46  ;;  %v3461_v0 = vmax.f32 %v3421_v57, 0.0  ;;  %4183 = vmatprep.mubr.bf16.mxu1 %v9202_v11  ;;  %v9219_v29 = vpack.c.bf16 %v3776_v10, %v3774_v51  ;;  %v9223_v54 = vpack.c.bf16 %v3553_v58, %v3552_v36  ;;  %v3560_v57 = vld [vmem:[#allocation2 + $0x100] sm:$0x3] }
 0x452   : > { %3526 = vst [vmem:[#allocation2 + $0x181] sm:$0xff] %v3494_v2  ;;  %v3495_v30 = vadd.f32 %v9914_v42, %v3463_v40  ;;  %v3672_v28 = vsel %vm560_vm0, %v3670_v52, %v3671_v7  ;;  %v3674_v12 = vsel %vm560_vm0, %v3671_v7, %v3673_v27  ;;  %v3678_v15 = vrot.slane %v3557_v34, 1 }
 0x453   : > { %3524 = vst [vmem:[#allocation2 + $0x169] sm:$0xff] %v3492_v45  ;;  %v3493_v9 = vadd.f32 %v9915_v44, %v3461_v0  ;;  %v9231_v49 = vpack.c.bf16 %v3674_v12, %v3672_v28  ;;  %v9235_v14 = vpack.c.bf16 %v3781_v1, %v3779_v63  ;;  %v3783_v38 = vrot.slane %v3553_v58, 2 }
 0x454   : > { %3527 = vst [vmem:[#allocation2 + $0x189] sm:$0xff] %v3495_v30  ;;  %4023 = vmatmul.mubr.bf16.gmra.mrb[40].mxu0 %v9170_v23  ;;  %v3785_v33 = vrot.slane %v3554_v24, 2  ;;  %v9237_v13 = vpack.c.bf16 %v3556_v61, %v3555_v55  ;;  %v3677_v25 = vsel %vm560_vm0, %v3675_v56, %v3676_v37  ;;  %v3679_v31 = vsel %vm560_vm0, %v3676_v37, %v3678_v15 }
 0x455   : > { %3525 = vst [vmem:[#allocation2 + $0x171] sm:$0xff] %v3493_v9  ;;  %4030 = vmatprep.mubr.bf16.mxu0 %v9215_v47  ;;  %v3782_v46 = vrot.slane %v3552_v36, 2  ;;  %v9249_v53 = vpack.c.bf16 %v3679_v31, %v3677_v25  ;;  %v3788_v45 = vrot.slane %v3556_v61, 2  ;;  %v3681_v0 = vrot.slane %v3559_v17, 1  ;;  %v3562_v61 = vld [vmem:[#allocation2 + $0x110] sm:$0xff] }
 0x456   : > { %v3786_v48 = vsel %vm673_vm1, %v3783_v38, %v3785_v33  ;;  %v3683_v58 = vrot.slane %v3560_v57, 1  ;;  %v3790_v44 = vrot.slane %v3557_v34, 2  ;;  %v3680_v9 = vrot.slane %v3558_v39, 1  ;;  %v3563_v34 = vld [vmem:[#allocation2 + $0x118] sm:$0x3]  ;;  %v3561_v33 = vld [vmem:[#allocation2 + $0x108] sm:$0xff] }
 0x457   : > { %v3784_v40 = vsel %vm673_vm1, %v3782_v46, %v3783_v38  ;;  %v9259_v7 = vpack.c.bf16 %v3559_v17, %v3558_v39  ;;  %v3787_v6 = vrot.slane %v3555_v55, 2  ;;  %v3686_v55 = vrot.slane %v3562_v61, 1 }
 0x458   : > { %4184 = vmatmul.mubr.bf16.gmra.mrb[72].mxu1 %v9219_v29  ;;  %v9257_v10 = vpack.c.bf16 %v3786_v48, %v3784_v40  ;;  %v3682_v3 = vsel %vm560_vm0, %v3680_v9, %v3681_v0  ;;  %v3684_v28 = vsel %vm560_vm0, %v3681_v0, %v3683_v58  ;;  %v3791_v56 = vsel %vm673_vm1, %v3788_v45, %v3790_v44 }
 0x459   : > { %4191 = vmatprep.mubr.bf16.mxu1 %v9223_v54  ;;  %v9243_v32 = vld [vmem:[#allocation2 + $0x180] sm:$0xff]  ;;  %v3789_v15 = vsel %vm673_vm1, %v3787_v6, %v3788_v45  ;;  %v9275_v38 = vpack.c.bf16 %v3684_v28, %v3682_v3  ;;  %v3688_v25 = vrot.slane %v3563_v34, 1  ;;  %v3685_v46 = vrot.slane %v3561_v33, 1 }
 0x45a   : > { %v3857_v24 = vrot.slane %v9243_v32, 1  ;;  %v3864_v30 = vrot.slane %v9243_v32, 2  ;;  %v9279_v31 = vpack.c.bf16 %v3791_v56, %v3789_v15  ;;  %v3793_v40 = vrot.slane %v3559_v17, 2  ;;  %v3564_v17 = vld [vmem:[#allocation2 + $0x120] sm:$0xff] }
 0x45b   : > { %v9245_v2 = vld [vmem:[#allocation2 + $0x188] sm:$0xff]  ;;  %v3578_v20 = vld [vmem:[#allocation2 + $0x190] sm:$0x3]  ;;  %v3795_v48 = vrot.slane %v3560_v57, 2  ;;  %v3687_v45 = vsel %vm560_vm0, %v3685_v46, %v3686_v55  ;;  %v3689_v0 = vsel %vm560_vm0, %v3686_v55, %v3688_v25  ;;  %v3792_v58 = vrot.slane %v3558_v39, 2  ;;  %v3568_v6 = vld [vmem:[#allocation2 + $0x140] sm:$0xff] }
 0x45c   : > { %4031 = vmatmul.mubr.bf16.gmra.mrb[44].mxu0 %v9202_v11  ;;  %v3858_v42 = vrot.slane %v9245_v2, 1  ;;  %v3865_v51 = vrot.slane %v9245_v2, 2  ;;  %v3860_v36 = vrot.slane %v3578_v20, 1  ;;  %v3867_v5 = vrot.slane %v3578_v20, 2 }
 0x45d   : > { %4038 = vmatprep.mubr.bf16.mxu0 %v9231_v49  ;;  %v9281_v20 = vpack.c.bf16 %v3562_v61, %v3561_v33  ;;  %v9289_v44 = vpack.c.bf16 %v3689_v0, %v3687_v45  ;;  %v3690_v39 = vrot.slane %v3564_v17, 1 }
 0x45e   : > { %v3859_v27 = vsel %vm560_vm0, %v3857_v24, %v3858_v42  ;;  %v3866_v52 = vsel %vm673_vm1, %v3864_v30, %v3865_v51  ;;  %v3861_v12 = vsel %vm560_vm0, %v3858_v42, %v3860_v36  ;;  %v3868_v1 = vsel %vm673_vm1, %v3865_v51, %v3867_v5  ;;  %v3565_v24 = vld [vmem:[#allocation2 + $0x128] sm:$0xff]  ;;  %v3566_v42 = vld [vmem:[#allocation2 + $0x130] sm:$0x3] }
 0x45f   : > { %v9268_v63 = vpack.c.bf16 %v3861_v12, %v3859_v27  ;;  %v9271_v37 = vpack.c.bf16 %v3868_v1, %v3866_v52  ;;  %v3794_v30 = vsel %vm673_vm1, %v3792_v58, %v3793_v40  ;;  %v3796_v51 = vsel %vm673_vm1, %v3793_v40, %v3795_v48  ;;  %v3569_v1 = vld [vmem:[#allocation2 + $0x148] sm:$0x3] }
 0x460   : > { %4192 = vmatmul.mubr.bf16.gmra.mrb[76].mxu1 %v9235_v14  ;;  %v3691_v57 = vrot.slane %v3565_v24, 1  ;;  %v3693_v9 = vrot.slane %v3566_v42, 1  ;;  %v9293_v36 = vpack.c.bf16 %v3796_v51, %v3794_v30  ;;  %v3798_v27 = vrot.slane %v3562_v61, 2  ;;  %v3567_v61 = vld [vmem:[#allocation2 + $0x138] sm:$0xff] }
 0x461   : > { %4199 = vmatprep.mubr.bf16.mxu1 %v9237_v13  ;;  %9916 = vst [vmem:[#allocation15_spill] sm:$0xff] %v9271_v37  ;;  %v3800_v52 = vrot.slane %v3563_v34, 2  ;;  %v9295_v5 = vpack.c.bf16 %v3565_v24, %v3564_v17  ;;  %v3797_v12 = vrot.slane %v3561_v33, 2  ;;  %v3696_v34 = vrot.slane %v3568_v6, 1 }
 0x462   : > { %v3692_v3 = vsel %vm560_vm0, %v3690_v39, %v3691_v57  ;;  %v3694_v28 = vsel %vm560_vm0, %v3691_v57, %v3693_v9  ;;  %v3698_v25 = vrot.slane %v3569_v1, 1  ;;  %v3695_v33 = vrot.slane %v3567_v61, 1  ;;  %v3571_v9 = vld [vmem:[#allocation2 + $0x158] sm:$0xff]  ;;  %v3572_v39 = vld [vmem:[#allocation2 + $0x160] sm:$0x3] }
 0x463   : > { %v3799_v15 = vsel %vm673_vm1, %v3797_v12, %v3798_v27  ;;  %v3801_v56 = vsel %vm673_vm1, %v3798_v27, %v3800_v52  ;;  %v9303_v55 = vpack.c.bf16 %v3694_v28, %v3692_v3  ;;  %v3803_v40 = vrot.slane %v3565_v24, 2  ;;  %v3570_v12 = vld [vmem:[#allocation2 + $0x150] sm:$0xff] }
 0x464   : > { %4039 = vmatmul.mubr.bf16.gmra.mrb[48].mxu0 %v9223_v54  ;;  %v9307_v46 = vpack.c.bf16 %v3801_v56, %v3799_v15  ;;  %v3805_v48 = vrot.slane %v3566_v42, 2  ;;  %v9309_v45 = vpack.c.bf16 %v3568_v6, %v3567_v61  ;;  %v3697_v58 = vsel %vm560_vm0, %v3695_v33, %v3696_v34 }
 0x465   : > { %4046 = vmatprep.mubr.bf16.mxu0 %v9249_v53  ;;  %v3699_v30 = vsel %vm560_vm0, %v3696_v34, %v3698_v25  ;;  %v3802_v57 = vrot.slane %v3564_v17, 2  ;;  %v3701_v17 = vrot.slane %v3571_v9, 1  ;;  %v3703_v56 = vrot.slane %v3572_v39, 1 }
 0x466   : > { %v3806_v3 = vsel %vm673_vm1, %v3803_v40, %v3805_v48  ;;  %v9319_v28 = vpack.c.bf16 %v3699_v30, %v3697_v58  ;;  %v3700_v25 = vrot.slane %v3570_v12, 1  ;;  %v3808_v33 = vrot.slane %v3568_v6, 2  ;;  %v3574_v30 = vld [vmem:[#allocation2 + $0x170] sm:$0xff]  ;;  %v3573_v6 = vld [vmem:[#allocation2 + $0x168] sm:$0xff] }
 0x467   : > { %v3804_v42 = vsel %vm673_vm1, %v3802_v57, %v3803_v40  ;;  %v3704_v48 = vsel %vm560_vm0, %v3701_v17, %v3703_v56  ;;  %v3807_v58 = vrot.slane %v3567_v61, 2  ;;  %v3575_v57 = vld [vmem:[#allocation2 + $0x178] sm:$0x3]  ;;  %v3705_v61 = vrot.slane %v3573_v6, 1 }
 0x468   : > { %4200 = vmatmul.mubr.bf16.gmra.mrb[80].mxu1 %v9257_v10  ;;  %v9325_v34 = vpack.c.bf16 %v3806_v3, %v3804_v42  ;;  %v3702_v40 = vsel %vm560_vm0, %v3700_v25, %v3701_v17  ;;  %v3708_v3 = vrot.slane %v3575_v57, 1  ;;  %v3813_v17 = vrot.slane %v3571_v9, 2 }
 0x469   : > { %4207 = vmatprep.mubr.bf16.mxu1 %v9259_v7  ;;  %v9335_v42 = vpack.c.bf16 %v3704_v48, %v3702_v40  ;;  %v3815_v56 = vrot.slane %v3572_v39, 2  ;;  %v9341_v37 = vpack.c.bf16 %v3574_v30, %v3573_v6  ;;  %v3812_v40 = vrot.slane %v3570_v12, 2 }
 0x46a   : > { %v3818_v39 = vrot.slane %v3574_v30, 2 }
 0x46b   : > { %v3814_v48 = vsel %vm673_vm1, %v3812_v40, %v3813_v17 }
 0x46c   : > { %4047 = vmatmul.mubr.bf16.gmra.mrb[52].mxu0 %v9237_v13 }
 0x46d   : > { %4054 = vmatprep.mubr.bf16.mxu0 %v9275_v38 }
 0x470   : > { %4208 = vmatmul.mubr.bf16.gmra.mrb[84].mxu1 %v9279_v31 }
 0x471   : > { %4215 = vmatprep.mubr.bf16.mxu1 %v9281_v20 }
 0x474   : > { %4055 = vmatmul.mubr.bf16.gmra.mrb[56].mxu0 %v9259_v7 }
 0x475   : > { %4062 = vmatprep.mubr.bf16.mxu0 %v9289_v44 }
 0x478   : > { %4216 = vmatmul.mubr.bf16.gmra.mrb[88].mxu1 %v9293_v36 }
 0x479   : > { %4223 = vmatprep.mubr.bf16.mxu1 %v9295_v5  ;;  %v5959_v0 = vpop.f32.mrb[16].mxu0 }
 0x47a   : > { %v5960_v51 = vpop.f32.mrb[17].mxu0 }
 0x47b   : > { %v9315_v27 = vadd.f32 %v5960_v51, %v5959_v0  ;;  %v5962_v52 = vpop.f32.mrb[18].mxu0  ;;  %v3810_v0 = vrot.slane %v3569_v1, 2  ;;  %v9327_v51 = vpack.c.bf16 %v3571_v9, %v3570_v12  ;;  %v3706_v1 = vrot.slane %v3574_v30, 1  ;;  %v9373_v30 = vld [vmem:[#allocation2 + $0x8] sm:$0xff] }
 0x47c   : > { %4063 = vmatmul.mubr.bf16.gmra.mrb[60].mxu0 %v9281_v20  ;;  %v5963_v24 = vpop.f32.mrb[19].mxu0  ;;  %v3817_v12 = vrot.slane %v3573_v6, 2 }
 0x47d   : > { %4070 = vmatprep.mubr.bf16.mxu0 %v9303_v55  ;;  %v9321_v15 = vadd.f32 %v5963_v24, %v5962_v52  ;;  %v3809_v52 = vsel %vm673_vm1, %v3807_v58, %v3808_v33  ;;  %v3811_v24 = vsel %vm673_vm1, %v3808_v33, %v3810_v0  ;;  %v3707_v33 = vsel %vm560_vm0, %v3705_v61, %v3706_v1 }
 0x47e   : > { %v9339_v25 = vpack.c.bf16 %v3811_v24, %v3809_v52  ;;  %v3709_v0 = vsel %vm560_vm0, %v3706_v1, %v3708_v3  ;;  %v3816_v58 = vsel %vm673_vm1, %v3813_v17, %v3815_v56  ;;  %v3820_v24 = vrot.slane %v3575_v57, 2  ;;  %v6890_v56 = vld [vmem:[#allocation6 + $0x200] sm:$0xff]  }
 0x47f   : > { %v9349_v52 = vpack.c.bf16 %v3709_v0, %v3707_v33  ;;  %v9353_v9 = vpack.c.bf16 %v3816_v58, %v3814_v48  ;;  %v9357_v1 = vpack.c.bf16 %v9245_v2, %v9243_v32  ;;  %v3819_v3 = vsel %vm673_vm1, %v3817_v12, %v3818_v39  ;;  %v9369_v32 = vld [vmem:[#allocation2 + $0x198] sm:$0xff]  ;;  %v9371_v2 = vld [vmem:[#allocation2 + $0x1a8] sm:$0x3] }
 0x480   : > { %4224 = vmatmul.mubr.bf16.gmra.mrb[92].mxu1 %v9307_v46  ;;  %v3821_v61 = vsel %vm673_vm1, %v3818_v39, %v3820_v24  ;;  %v3882_v57 = vrot.slane %v9373_v30, 2  ;;  %v3881_v6 = vrot.slane %v9369_v32, 2  ;;  %v6891_v33 = vld [vmem:[#allocation6 + $0x208] sm:$0xff]   ;;  %v6893_v58 = vld [vmem:[#allocation6 + $0x218] sm:$0xff]   ;;  %v6894_v39 = vld [vmem:[#allocation6 + $0x220] sm:$0xff]  }
 0x481   : > { %4231 = vmatprep.mubr.bf16.mxu1 %v9309_v45  ;;  %v9365_v17 = vpack.c.bf16 %v3821_v61, %v3819_v3 }
 0x482   : > { %v9381_v0 = vsel %vm673_vm1, %v3881_v6, %v3882_v57 }
 0x484   : > { %4071 = vmatmul.mubr.bf16.gmra.mrb[64].mxu0 %v9295_v5 }
 0x485   : > { %4078 = vmatprep.mubr.bf16.mxu0 %v9319_v28 }
 0x488   : > { %4232 = vmatmul.mubr.bf16.gmra.mrb[96].mxu1 %v9325_v34 }
 0x489   : > { %4239 = vmatprep.mubr.bf16.mxu1 %v9327_v51 }
 0x48c   : > { %4079 = vmatmul.mubr.bf16.gmra.mrb[68].mxu0 %v9309_v45 }
 0x48d   : > { %4086 = vmatprep.mubr.bf16.mxu0 %v9335_v42 }
 0x490   : > { %4240 = vmatmul.mubr.bf16.gmra.mrb[100].mxu1 %v9339_v25 }
 0x491   : > { %4247 = vmatprep.mubr.bf16.mxu1 %v9341_v37 }
 0x494   : > { %4087 = vmatmul.mubr.bf16.gmra.mrb[72].mxu0 %v9327_v51 }
 0x495   : > { %4094 = vmatprep.mubr.bf16.mxu0 %v9349_v52 }
 0x498   : > { %4248 = vmatmul.mubr.bf16.gmra.mrb[104].mxu1 %v9353_v9 }
 0x499   : > { %4255 = vmatprep.mubr.bf16.mxu1 %v9357_v1 }
 0x49c   : > { %4095 = vmatmul.mubr.bf16.gmra.mrb[76].mxu0 %v9341_v37 }
 0x49d   : > { %4296 = vmatprep.mubr.bf16.mxu0 %v9053_v26  ;;  %v3884_v26 = vrot.slane %v9371_v2, 2 }
 0x49f   : > { %v9384_v40 = vsel %vm673_vm1, %v3882_v57, %v3884_v26 }
 0x4a0   : > { %4256 = vmatmul.mubr.bf16.gmra.mrb[108].mxu1 %v9365_v17  ;;  %v3941_v48 = vpack.c.bf16 %v9384_v40, %v9381_v0 }
 0x4a1   : > { %4457 = vmatprep.mubr.bf16.mxu1 %v9050_v22 }
 0x4a4   : > { %4297 = vmatmul.mubr.bf16.vlgmr.msra.gmra.mrb[80].mxu0 %v9030_v18  ;;  %v6892_v18 = vld [vmem:[#allocation6 + $0x210] sm:$0xff]  }
 0x4a5   : > { %4304 = vmatprep.mubr.bf16.mxu0 %v9087_v41  ;;  %6512 = vmatpush3.bf16.msra.mxu0 %v6890_v56 }
 0x4a6   : > { %6513 = vmatprep.subr.bf16.mxu0 %v6891_v33 }
 0x4a8   : > { %4458 = vmatmul.mubr.bf16.vlgmr.msra.gmra.mrb[112].mxu1 %v9017_v50  ;;  %v6895_v50 = vld [vmem:[#allocation6 + $0x228] sm:$0xff]  }
 0x4a9   : > { %4465 = vmatprep.mubr.bf16.mxu1 %v9081_v35  ;;  %6514 = vmatpush3.bf16.msra.mxu0 %v6891_v33 }
 0x4aa   : > { %6515 = vmatprep.subr.bf16.mxu0 %v6892_v18 }
 0x4ac   : > { %4305 = vmatmul.mubr.bf16.gmra.mrb[84].mxu0 %v9050_v22  ;;  %v6896_v22 = vld [vmem:[#allocation6 + $0x230] sm:$0xff]  }
 0x4ad   : > { %4312 = vmatprep.mubr.bf16.mxu0 %v9123_v8  ;;  %6516 = vmatpush3.bf16.msra.mxu0 %v6892_v18 }
 0x4ae   : > { %6517 = vmatprep.subr.bf16.mxu0 %v6893_v58 }
 0x4b0   : > { %4466 = vmatmul.mubr.bf16.gmra.mrb[116].mxu1 %v9061_v60  ;;  %v6897_v60 = vld [vmem:[#allocation6 + $0x238] sm:$0xff]  }
 0x4b1   : > { %4473 = vmatprep.mubr.bf16.mxu1 %v9115_v59  ;;  %6518 = vmatpush3.bf16.msra.mxu0 %v6893_v58 }
 0x4b2   : > { %6519 = vmatprep.subr.bf16.mxu0 %v6894_v39 }
 0x4b4   : > { %4313 = vmatmul.mubr.bf16.gmra.mrb[88].mxu0 %v9081_v35 }
 0x4b5   : > { %4320 = vmatprep.mubr.bf16.mxu0 %v9159_v43  ;;  %6520 = vmatpush3.bf16.msra.mxu0 %v6894_v39 }
 0x4b6   : > { %6521 = vmatprep.subr.bf16.mxu0 %v6895_v50 }
 0x4b8   : > { %4474 = vmatmul.mubr.bf16.gmra.mrb[120].mxu1 %v9099_v16 }
 0x4b9   : > { %4481 = vmatprep.mubr.bf16.mxu1 %v9151_v19  ;;  %6522 = vmatpush3.bf16.msra.mxu0 %v6895_v50 }
 0x4ba   : > { %6523 = vmatprep.subr.bf16.mxu0 %v6896_v22 }
 0x4bc   : > { %4321 = vmatmul.mubr.bf16.gmra.mrb[92].mxu0 %v9115_v59  ;;  %v9434_v59 = vld [vmem:[%s9791_s2] ss:$0 sm:$0xff] }
 0x4bd   : > { %4328 = vmatprep.mubr.bf16.mxu0 %v9196_v4  ;;  %6524 = vmatpush3.bf16.msra.mxu0 %v6896_v22 }
 0x4be   : > { %6525 = vmatprep.subr.bf16.mxu0 %v6897_v60 }
 0x4c0   : > { %4482 = vmatmul.mubr.bf16.gmra.mrb[124].mxu1 %v9135_v62  ;;  %v3977_v62 = vadd.f32 %v9434_v59, %v9315_v27 }
 0x4c1   : > { %4489 = vmatprep.mubr.bf16.mxu1 %v9187_v21  ;;  %6526 = vmatpush3.bf16.msra.mxu0 %v6897_v60 }
 0x4c4   : > { %4329 = vmatmul.mubr.bf16.gmra.mrb[96].mxu0 %v9151_v19 }
 0x4c5   : > { %4336 = vmatprep.mubr.bf16.mxu0 %v9219_v29 }
 0x4c8   : > { %4490 = vmatmul.mubr.bf16.gmra.mrb[128].mxu1 %v9170_v23 }
 0x4c9   : > { %4497 = vmatprep.mubr.bf16.mxu1 %v9215_v47 }
 0x4cc   : > { %4337 = vmatmul.mubr.bf16.gmra.mrb[100].mxu0 %v9187_v21 }
 0x4cd   : > { %4344 = vmatprep.mubr.bf16.mxu0 %v9235_v14 }
 0x4d0   : > { %4498 = vmatmul.mubr.bf16.gmra.mrb[132].mxu1 %v9202_v11  ;;  %v3980_v11 = vadd.f32 %v9434_v59, %v9321_v15 }
 0x4d1   : > { %4505 = vmatprep.mubr.bf16.mxu1 %v9231_v49 }
 0x4d4   : > { %4345 = vmatmul.mubr.bf16.gmra.mrb[104].mxu0 %v9215_v47 }
 0x4d5   : > { %4352 = vmatprep.mubr.bf16.mxu0 %v9257_v10 }
 0x4d8   : > { %4506 = vmatmul.mubr.bf16.gmra.mrb[136].mxu1 %v9223_v54 }
 0x4d9   : > { %4513 = vmatprep.mubr.bf16.mxu1 %v9249_v53 }
 0x4dc   : > { %4353 = vmatmul.mubr.bf16.gmra.mrb[108].mxu0 %v9231_v49 }
 0x4dd   : > { %4360 = vmatprep.mubr.bf16.mxu0 %v9279_v31 }
 0x4e0   : > { %4514 = vmatmul.mubr.bf16.gmra.mrb[140].mxu1 %v9237_v13 }
 0x4e1   : > { %4521 = vmatprep.mubr.bf16.mxu1 %v9275_v38 }
 0x4e4   : > { %4361 = vmatmul.mubr.bf16.gmra.mrb[112].mxu0 %v9249_v53 }
 0x4e5   : > { %4368 = vmatprep.mubr.bf16.mxu0 %v9293_v36 }
 0x4e8   : > { %4522 = vmatmul.mubr.bf16.gmra.mrb[144].mxu1 %v9259_v7 }
 0x4e9   : > { %4529 = vmatprep.mubr.bf16.mxu1 %v9289_v44 }
 0x4ec   : > { %4369 = vmatmul.mubr.bf16.gmra.mrb[116].mxu0 %v9275_v38 }
 0x4ed   : > { %4376 = vmatprep.mubr.bf16.mxu0 %v9307_v46 }
 0x4f0   : > { %4530 = vmatmul.mubr.bf16.gmra.mrb[148].mxu1 %v9281_v20 }
 0x4f1   : > { %4537 = vmatprep.mubr.bf16.mxu1 %v9303_v55 }
 0x4f4   : > { %4377 = vmatmul.mubr.bf16.gmra.mrb[120].mxu0 %v9289_v44 }
 0x4f5   : > { %4384 = vmatprep.mubr.bf16.mxu0 %v9325_v34 }
 0x4f8   : > { %4538 = vmatmul.mubr.bf16.gmra.mrb[152].mxu1 %v9295_v5 }
 0x4f9   : > { %4545 = vmatprep.mubr.bf16.mxu1 %v9319_v28 }
 0x4fb   : > { %v6071_v35 = vpop.f32.mrb[48].mxu1 }
 0x4fc   : > { %4385 = vmatmul.mubr.bf16.gmra.mrb[124].mxu0 %v9303_v55  ;;  %v6072_v16 = vpop.f32.mrb[49].mxu1 }
 0x4fd   : > { %v6073_v19 = vadd.f32 %v6072_v16, %v6071_v35  ;;  %4392 = vmatprep.mubr.bf16.mxu0 %v9339_v25  ;;  %v6074_v23 = vpop.f32.mrb[50].mxu1  ;;  %v3875_v16 = vrot.slane %v9373_v30, 1 }
 0x4fe   : > { %v6075_v21 = vpop.f32.mrb[51].mxu1 }
 0x4ff   : > { %v9441_v47 = vadd.f32 %v6073_v19, %v3977_v62  ;;  %v5965_v54 = vpop.f32.mrb[20].mxu0  ;;  %v6076_v49 = vadd.f32 %v6075_v21, %v6074_v23  ;;  %v3877_v62 = vrot.slane %v9371_v2, 1 }
 0x500   : > { %v5966_v13 = vpop.f32.mrb[21].mxu0  ;;  %4546 = vmatmul.mubr.bf16.gmra.mrb[156].mxu1 %v9309_v45 }
 0x501   : > { %v9444_v53 = vadd.f32 %v6076_v49, %v3980_v11  ;;  %v5967_v7 = vadd.f32 %v5966_v13, %v5965_v54  ;;  %v5968_v38 = vpop.f32.mrb[22].mxu0  ;;  %4553 = vmatprep.mubr.bf16.mxu1 %v9335_v42  ;;  %v3878_v2 = vsel %vm560_vm0, %v3875_v16, %v3877_v62 }
 0x502   : > { %v5969_v20 = vpop.f32.mrb[23].mxu0 }
 0x503   : > { %v5970_v44 = vadd.f32 %v5969_v20, %v5968_v38  ;;  %v6077_v5 = vpop.f32.mrb[52].mxu1  ;;  %v3985_v27 = vadd.f32 %v9434_v59, %v5967_v7 }
 0x504   : > { %4393 = vmatmul.mubr.bf16.gmra.mrb[128].mxu0 %v9319_v28  ;;  %v6078_v55 = vpop.f32.mrb[53].mxu1 }
 0x505   : > { %v6079_v15 = vadd.f32 %v6078_v55, %v6077_v5  ;;  %4400 = vmatprep.mubr.bf16.mxu0 %v9353_v9  ;;  %v6080_v24 = vpop.f32.mrb[54].mxu1  ;;  %v3988_v45 = vadd.f32 %v9434_v59, %v5970_v44 }
 0x506   : > { %v6081_v12 = vpop.f32.mrb[55].mxu1 }
 0x507   : > { %v9451_v3 = vadd.f32 %v6079_v15, %v3985_v27  ;;  %v5971_v61 = vpop.f32.mrb[24].mxu0  ;;  %v6082_v57 = vadd.f32 %v6081_v12, %v6080_v24 }
 0x508   : > { %v5972_v6 = vpop.f32.mrb[25].mxu0  ;;  %4554 = vmatmul.mubr.bf16.gmra.mrb[160].mxu1 %v9327_v51  ;;  %v3874_v51 = vrot.slane %v9369_v32, 1 }
 0x509   : > { %v9454_v26 = vadd.f32 %v6082_v57, %v3988_v45  ;;  %v5973_v28 = vadd.f32 %v5972_v6, %v5971_v61  ;;  %v5974_v56 = vpop.f32.mrb[26].mxu0  ;;  %4561 = vmatprep.mubr.bf16.mxu1 %v9349_v52 }
 0x50a   : > { %v5975_v33 = vpop.f32.mrb[27].mxu0  ;;  %v3876_v38 = vsel %vm560_vm0, %v3874_v51, %v3875_v16 }
 0x50b   : > { %v5976_v18 = vadd.f32 %v5975_v33, %v5974_v56  ;;  %v6083_v58 = vpop.f32.mrb[56].mxu1  ;;  %v3993_v50 = vadd.f32 %v9434_v59, %v5973_v28  ;;  %v3940_v24 = vpack.c.bf16 %v3878_v2, %v3876_v38 }
 0x50c   : > { %4401 = vmatmul.mubr.bf16.gmra.mrb[132].mxu0 %v9335_v42  ;;  %v6084_v39 = vpop.f32.mrb[57].mxu1 }
 0x50d   : > { %v6085_v22 = vadd.f32 %v6084_v39, %v6083_v58  ;;  %4408 = vmatprep.mubr.bf16.mxu0 %v9365_v17  ;;  %v6086_v60 = vpop.f32.mrb[58].mxu1  ;;  %v3996_v19 = vadd.f32 %v9434_v59, %v5976_v18 }
 0x50e   : > { %v6087_v35 = vpop.f32.mrb[59].mxu1 }
 0x50f   : > { %v9464_v23 = vadd.f32 %v6085_v22, %v3993_v50  ;;  %v5977_v21 = vpop.f32.mrb[28].mxu0  ;;  %v6088_v42 = vadd.f32 %v6087_v35, %v6086_v60  ;;  %v3939_v22 = vpack.c.bf16 %v9373_v30, %v9369_v32 }
 0x510   : > { %v5978_v11 = vpop.f32.mrb[29].mxu0  ;;  %4562 = vmatmul.mubr.bf16.gmra.mrb[164].mxu1 %v9341_v37  ;;  %v9917_v37 = vld [vmem:[#allocation15_spill] sm:$0xff] }
 0x511   : > { %v9467_v54 = vadd.f32 %v6088_v42, %v3996_v19  ;;  %v5979_v49 = vadd.f32 %v5978_v11, %v5977_v21  ;;  %v5980_v13 = vpop.f32.mrb[30].mxu0  ;;  %4569 = vmatprep.mubr.bf16.mxu1 %v9268_v63 }
 0x512   : > { %v5981_v7 = vpop.f32.mrb[31].mxu0 }
 0x513   : > { %v5982_v20 = vadd.f32 %v5981_v7, %v5980_v13  ;;  %v6089_v44 = vpop.f32.mrb[60].mxu1  ;;  %v4001_v55 = vadd.f32 %v9434_v59, %v5979_v49 }
 0x514   : > { %4409 = vmatmul.mubr.bf16.gmra.mrb[136].mxu0 %v9349_v52  ;;  %v6090_v5 = vpop.f32.mrb[61].mxu1 }
 0x515   : > { %v6091_v27 = vadd.f32 %v6090_v5, %v6089_v44  ;;  %4416 = vmatprep.mubr.bf16.mxu0 %v9917_v37  ;;  %v6092_v15 = vpop.f32.mrb[62].mxu1  ;;  %v4004_v45 = vadd.f32 %v9434_v59, %v5982_v20 }
 0x516   : > { %v6093_v12 = vpop.f32.mrb[63].mxu1 }
 0x517   : > { %v9476_v61 = vadd.f32 %v6091_v27, %v4001_v55  ;;  %v5983_v57 = vpop.f32.mrb[32].mxu0  ;;  %v6094_v6 = vadd.f32 %v6093_v12, %v6092_v15 }
 0x518   : > { %v5984_v28 = vpop.f32.mrb[33].mxu0  ;;  %4570 = vmatmul.mubr.bf16.gmra.mrb[168].mxu1 %v9357_v1 }
 0x519   : > { %v9479_v56 = vadd.f32 %v6094_v6, %v4004_v45  ;;  %v5985_v52 = vadd.f32 %v5984_v28, %v5983_v57  ;;  %v5986_v33 = vpop.f32.mrb[34].mxu0  ;;  %4577 = vmatprep.mubr.bf16.mxu1 %v3940_v24 }
 0x51a   : > { %v5987_v18 = vpop.f32.mrb[35].mxu0 }
 0x51b   : > { %v5988_v58 = vadd.f32 %v5987_v18, %v5986_v33  ;;  %v6095_v39 = vpop.f32.mrb[64].mxu1  ;;  %v4009_v60 = vadd.f32 %v9434_v59, %v5985_v52 }
 0x51c   : > { %4417 = vmatmul.mubr.bf16.gmra.mrb[140].mxu0 %v9268_v63  ;;  %v6096_v50 = vpop.f32.mrb[65].mxu1 }
 0x51d   : > { %v6097_v35 = vadd.f32 %v6096_v50, %v6095_v39  ;;  %6527 = vmatprep.mubr.bf16.mxu0 %v9087_v41  ;;  %v6098_v1 = vpop.f32.mrb[66].mxu1  ;;  %v4012_v16 = vadd.f32 %v9434_v59, %v5988_v58 }
 0x51e   : > { %v6099_v51 = vpop.f32.mrb[67].mxu1 }
 0x51f   : > { %v9487_v62 = vadd.f32 %v6097_v35, %v4009_v60  ;;  %v5989_v19 = vpop.f32.mrb[36].mxu0  ;;  %v6100_v21 = vadd.f32 %v6099_v51, %v6098_v1 }
 0x520   : > { %v5990_v42 = vpop.f32.mrb[37].mxu0  ;;  %4578 = vmatmul.mubr.bf16.gmra.mrb[172].mxu1 %v3939_v22 }
 0x521   : > { %v9489_v63 = vadd.f32 %v6100_v21, %v4012_v16  ;;  %v5991_v11 = vadd.f32 %v5990_v42, %v5989_v19  ;;  %v5992_v49 = vpop.f32.mrb[38].mxu0 }
 0x522   : > { %v5993_v32 = vpop.f32.mrb[39].mxu0 }
 0x523   : > { %v5994_v30 = vadd.f32 %v5993_v32, %v5992_v49  ;;  %v6101_v13 = vpop.f32.mrb[68].mxu1  ;;  %v4017_v7 = vadd.f32 %v9434_v59, %v5991_v11 }
 0x524   : > { %6528 = vmatmul.mubr.bf16.vlgmr.msra.gmra.mrb[144].mxu0 %v9123_v8  ;;  %v6102_v41 = vpop.f32.mrb[69].mxu1 }
 0x525   : > { %v6103_v38 = vadd.f32 %v6102_v41, %v6101_v13  ;;  %6531 = vmatprep.mubr.bf16.mxu0 %v9159_v43  ;;  %v6104_v2 = vpop.f32.mrb[70].mxu1  ;;  %v4020_v44 = vadd.f32 %v9434_v59, %v5994_v30 }
 0x526   : > { %v6105_v20 = vpop.f32.mrb[71].mxu1 }
 0x527   : > { %v9495_v5 = vadd.f32 %v6103_v38, %v4017_v7  ;;  %v5995_v55 = vpop.f32.mrb[40].mxu0  ;;  %v6106_v27 = vadd.f32 %v6105_v20, %v6104_v2 }
 0x528   : > { %v5996_v15 = vpop.f32.mrb[41].mxu0 }
 0x529   : > { %v9497_v24 = vadd.f32 %v6106_v27, %v4020_v44  ;;  %v5997_v12 = vadd.f32 %v5996_v15, %v5995_v55  ;;  %v5998_v45 = vpop.f32.mrb[42].mxu0 }
 0x52a   : > { %v5999_v8 = vpop.f32.mrb[43].mxu0 }
 0x52b   : > { %v6000_v57 = vadd.f32 %v5999_v8, %v5998_v45  ;;  %v6107_v6 = vpop.f32.mrb[72].mxu1  ;;  %v4025_v43 = vadd.f32 %v9434_v59, %v5997_v12 }
 0x52c   : > { %6532 = vmatmul.mubr.bf16.gmra.mrb[148].mxu0 %v9196_v4  ;;  %v6108_v28 = vpop.f32.mrb[73].mxu1 }
 0x52d   : > { %v6109_v52 = vadd.f32 %v6108_v28, %v6107_v6  ;;  %6535 = vmatprep.mubr.bf16.mxu0 %v9219_v29  ;;  %v6110_v33 = vpop.f32.mrb[74].mxu1  ;;  %v4028_v58 = vadd.f32 %v9434_v59, %v6000_v57 }
 0x52e   : > { %v6111_v18 = vpop.f32.mrb[75].mxu1 }
 0x52f   : > { %v9503_v39 = vadd.f32 %v6109_v52, %v4025_v43  ;;  %v6001_v50 = vpop.f32.mrb[44].mxu0  ;;  %v6112_v22 = vadd.f32 %v6111_v18, %v6110_v33 }
 0x530   : > { %v6002_v60 = vpop.f32.mrb[45].mxu0 }
 0x531   : > { %v9505_v35 = vadd.f32 %v6112_v22, %v4028_v58  ;;  %v6003_v1 = vadd.f32 %v6002_v60, %v6001_v50  ;;  %v6004_v51 = vpop.f32.mrb[46].mxu0 }
 0x532   : > { %v6005_v4 = vpop.f32.mrb[47].mxu0 }
 0x533   : > { %v6006_v16 = vadd.f32 %v6005_v4, %v6004_v51  ;;  %v6113_v19 = vpop.f32.mrb[76].mxu1  ;;  %v4033_v29 = vadd.f32 %v9434_v59, %v6003_v1 }
 0x534   : > { %6536 = vmatmul.mubr.bf16.gmra.mrb[152].mxu0 %v9235_v14  ;;  %v6114_v21 = vpop.f32.mrb[77].mxu1 }
 0x535   : > { %v6115_v42 = vadd.f32 %v6114_v21, %v6113_v19  ;;  %6539 = vmatprep.mubr.bf16.mxu0 %v9257_v10  ;;  %v6116_v11 = vpop.f32.mrb[78].mxu1  ;;  %v4036_v32 = vadd.f32 %v9434_v59, %v6006_v16 }
 0x536   : > { %v6117_v49 = vpop.f32.mrb[79].mxu1 }
 0x537   : > { %v9511_v30 = vadd.f32 %v6115_v42, %v4033_v29  ;;  %v6007_v13 = vpop.f32.mrb[48].mxu0  ;;  %v6118_v41 = vadd.f32 %v6117_v49, %v6116_v11 }
 0x538   : > { %v6008_v7 = vpop.f32.mrb[49].mxu0 }
 0x539   : > { %v9513_v38 = vadd.f32 %v6118_v41, %v4036_v32  ;;  %v6009_v2 = vadd.f32 %v6008_v7, %v6007_v13  ;;  %v6010_v20 = vpop.f32.mrb[50].mxu0 }
 0x53a   : > { %v6011_v14 = vpop.f32.mrb[51].mxu0 }
 0x53b   : > { %v6012_v44 = vadd.f32 %v6011_v14, %v6010_v20  ;;  %v6119_v55 = vpop.f32.mrb[80].mxu1  ;;  %v4041_v10 = vadd.f32 %v9434_v59, %v6009_v2 }
 0x53c   : > { %6540 = vmatmul.mubr.bf16.gmra.mrb[156].mxu0 %v9279_v31  ;;  %v6120_v27 = vpop.f32.mrb[81].mxu1 }
 0x53d   : > { %v6121_v15 = vadd.f32 %v6120_v27, %v6119_v55  ;;  %6543 = vmatprep.mubr.bf16.mxu0 %v9293_v36  ;;  %v6122_v12 = vpop.f32.mrb[82].mxu1  ;;  %v4044_v8 = vadd.f32 %v9434_v59, %v6012_v44 }
 0x53e   : > { %v6123_v45 = vpop.f32.mrb[83].mxu1 }
 0x53f   : > { %v9519_v57 = vadd.f32 %v6121_v15, %v4041_v10  ;;  %v6013_v6 = vpop.f32.mrb[52].mxu0  ;;  %v6124_v28 = vadd.f32 %v6123_v45, %v6122_v12 }
 0x540   : > { %v6014_v43 = vpop.f32.mrb[53].mxu0 }
 0x541   : > { %v9521_v52 = vadd.f32 %v6124_v28, %v4044_v8  ;;  %v6015_v33 = vadd.f32 %v6014_v43, %v6013_v6  ;;  %v6016_v18 = vpop.f32.mrb[54].mxu0 }
 0x542   : > { %v6017_v31 = vpop.f32.mrb[55].mxu0 }
 0x543   : > { %v6018_v58 = vadd.f32 %v6017_v31, %v6016_v18  ;;  %v6125_v50 = vpop.f32.mrb[84].mxu1  ;;  %v4049_v36 = vadd.f32 %v9434_v59, %v6015_v33 }
 0x544   : > { %6544 = vmatmul.mubr.bf16.gmra.mrb[160].mxu0 %v9307_v46  ;;  %v6126_v22 = vpop.f32.mrb[85].mxu1 }
 0x545   : > { %v6127_v60 = vadd.f32 %v6126_v22, %v6125_v50  ;;  %6547 = vmatprep.mubr.bf16.mxu0 %v9325_v34  ;;  %v6128_v1 = vpop.f32.mrb[86].mxu1  ;;  %v4052_v4 = vadd.f32 %v9434_v59, %v6018_v58 }
 0x546   : > { %v6129_v51 = vpop.f32.mrb[87].mxu1 }
 0x547   : > { %v9527_v16 = vadd.f32 %v6127_v60, %v4049_v36  ;;  %v6019_v19 = vpop.f32.mrb[56].mxu0  ;;  %v6130_v21 = vadd.f32 %v6129_v51, %v6128_v1 }
 0x548   : > { %v6020_v29 = vpop.f32.mrb[57].mxu0 }
 0x549   : > { %v9529_v42 = vadd.f32 %v6130_v21, %v4052_v4  ;;  %v6021_v11 = vadd.f32 %v6020_v29, %v6019_v19  ;;  %v6022_v49 = vpop.f32.mrb[58].mxu0 }
 0x54a   : > { %v6023_v46 = vpop.f32.mrb[59].mxu0 }
 0x54b   : > { %v6024_v32 = vadd.f32 %v6023_v46, %v6022_v49  ;;  %v6131_v13 = vpop.f32.mrb[88].mxu1  ;;  %v4057_v34 = vadd.f32 %v9434_v59, %v6021_v11 }
 0x54c   : > { %6548 = vmatmul.mubr.bf16.gmra.mrb[164].mxu0 %v9339_v25  ;;  %v6132_v41 = vpop.f32.mrb[89].mxu1 }
 0x54d   : > { %v6133_v7 = vadd.f32 %v6132_v41, %v6131_v13  ;;  %6551 = vmatprep.mubr.bf16.mxu0 %v9353_v9  ;;  %v6134_v2 = vpop.f32.mrb[90].mxu1  ;;  %v4060_v14 = vadd.f32 %v9434_v59, %v6024_v32 }
 0x54e   : > { %v6135_v20 = vpop.f32.mrb[91].mxu1 }
 0x54f   : > { %v9535_v44 = vadd.f32 %v6133_v7, %v4057_v34  ;;  %v6025_v55 = vpop.f32.mrb[60].mxu0  ;;  %v6136_v27 = vadd.f32 %v6135_v20, %v6134_v2 }
 0x550   : > { %v6026_v10 = vpop.f32.mrb[61].mxu0 }
 0x551   : > { %v9537_v15 = vadd.f32 %v6136_v27, %v4060_v14  ;;  %v6027_v12 = vadd.f32 %v6026_v10, %v6025_v55  ;;  %v6028_v45 = vpop.f32.mrb[62].mxu0 }
 0x552   : > { %v6029_v25 = vpop.f32.mrb[63].mxu0 }
 0x553   : > { %v6030_v8 = vadd.f32 %v6029_v25, %v6028_v45  ;;  %v6137_v6 = vpop.f32.mrb[92].mxu1  ;;  %v4065_v9 = vadd.f32 %v9434_v59, %v6027_v12 }
 0x554   : > { %6552 = vmatmul.mubr.bf16.gmra.mrb[168].mxu0 %v9365_v17  ;;  %v6138_v28 = vpop.f32.mrb[93].mxu1 }
 0x555   : > { %v6139_v43 = vadd.f32 %v6138_v28, %v6137_v6  ;;  %6555 = vmatprep.mubr.bf16.mxu0 %v9917_v37  ;;  %v6140_v33 = vpop.f32.mrb[94].mxu1  ;;  %v4068_v31 = vadd.f32 %v9434_v59, %v6030_v8 }
 0x556   : > { %v6141_v18 = vpop.f32.mrb[95].mxu1 }
 0x557   : > { %v9543_v58 = vadd.f32 %v6139_v43, %v4065_v9  ;;  %v6031_v50 = vpop.f32.mrb[64].mxu0  ;;  %v6142_v22 = vadd.f32 %v6141_v18, %v6140_v33 }
 0x558   : > { %v6032_v36 = vpop.f32.mrb[65].mxu0 }
 0x559   : > { %v9545_v60 = vadd.f32 %v6142_v22, %v4068_v31  ;;  %v6033_v1 = vadd.f32 %v6032_v36, %v6031_v50  ;;  %v6034_v51 = vpop.f32.mrb[66].mxu0 }
 0x55a   : > { %v6035_v17 = vpop.f32.mrb[67].mxu0 }
 0x55b   : > { %v6036_v4 = vadd.f32 %v6035_v17, %v6034_v51  ;;  %v6143_v19 = vpop.f32.mrb[96].mxu1  ;;  %v4073_v21 = vadd.f32 %v9434_v59, %v6033_v1 }
 0x55c   : > { %6556 = vmatmul.mubr.bf16.gmra.mrb[172].mxu0 %v3941_v48  ;;  %v6144_v37 = vpop.f32.mrb[97].mxu1 }
 0x55d   : > { %v6145_v29 = vadd.f32 %v6144_v37, %v6143_v19  ;;  %v6146_v11 = vpop.f32.mrb[98].mxu1  ;;  %v4076_v46 = vadd.f32 %v9434_v59, %v6036_v4 }
 0x55e   : > { %v6147_v49 = vpop.f32.mrb[99].mxu1 }
 0x55f   : > { %v9552_v32 = vadd.f32 %v6145_v29, %v4073_v21  ;;  %v6037_v13 = vpop.f32.mrb[68].mxu0  ;;  %v6148_v41 = vadd.f32 %v6147_v49, %v6146_v11 }
 0x560   : > { %v6038_v34 = vpop.f32.mrb[69].mxu0 }
 0x561   : > { %v9554_v7 = vadd.f32 %v6148_v41, %v4076_v46  ;;  %v6039_v2 = vadd.f32 %v6038_v34, %v6037_v13  ;;  %v6040_v20 = vpop.f32.mrb[70].mxu0 }
 0x562   : > { %v6041_v14 = vpop.f32.mrb[71].mxu0 }
 0x563   : > { %v6042_v0 = vadd.f32 %v6041_v14, %v6040_v20  ;;  %v6149_v40 = vpop.f32.mrb[100].mxu1  ;;  %v4081_v55 = vadd.f32 %v9434_v59, %v6039_v2 }
 0x564   : > { %v6150_v48 = vpop.f32.mrb[101].mxu1 }
 0x565   : > { %v6151_v27 = vadd.f32 %v6150_v48, %v6149_v40  ;;  %v6152_v10 = vpop.f32.mrb[102].mxu1  ;;  %v4084_v45 = vadd.f32 %v9434_v59, %v6042_v0 }
 0x566   : > { %v6153_v12 = vpop.f32.mrb[103].mxu1 }
 0x567   : > { %v9558_v25 = vadd.f32 %v6151_v27, %v4081_v55  ;;  %v6043_v8 = vpop.f32.mrb[72].mxu0  ;;  %v6154_v6 = vadd.f32 %v6153_v12, %v6152_v10 }
 0x568   : > { %v6044_v28 = vpop.f32.mrb[73].mxu0 }
 0x569   : > { %v9560_v9 = vadd.f32 %v6154_v6, %v4084_v45  ;;  %v6045_v43 = vadd.f32 %v6044_v28, %v6043_v8  ;;  %v6046_v33 = vpop.f32.mrb[74].mxu0 }
 0x56a   : > { %v6047_v18 = vpop.f32.mrb[75].mxu0 }
 0x56b   : > { %v6048_v31 = vadd.f32 %v6047_v18, %v6046_v33  ;;  %v6155_v50 = vpop.f32.mrb[104].mxu1  ;;  %v4089_v36 = vadd.f32 %v9434_v59, %v6045_v43 }
 0x56c   : > { %v6156_v22 = vpop.f32.mrb[105].mxu1 }
 0x56d   : > { %v6157_v1 = vadd.f32 %v6156_v22, %v6155_v50  ;;  %v6158_v51 = vpop.f32.mrb[106].mxu1  ;;  %v4092_v4 = vadd.f32 %v9434_v59, %v6048_v31 }
 0x56e   : > { %v6159_v17 = vpop.f32.mrb[107].mxu1 }
 0x56f   : > { %v9564_v19 = vadd.f32 %v6157_v1, %v4089_v36  ;;  %v6049_v37 = vpop.f32.mrb[76].mxu0  ;;  %v6160_v21 = vadd.f32 %v6159_v17, %v6158_v51 }
 0x570   : > { %v6050_v29 = vpop.f32.mrb[77].mxu0 }
 0x571   : > { %v9566_v11 = vadd.f32 %v6160_v21, %v4092_v4  ;;  %v6051_v49 = vadd.f32 %v6050_v29, %v6049_v37  ;;  %v6052_v46 = vpop.f32.mrb[78].mxu0 }
 0x572   : > { %v6053_v13 = vpop.f32.mrb[79].mxu0 }
 0x573   : > { %v6054_v41 = vadd.f32 %v6053_v13, %v6052_v46  ;;  %v6161_v34 = vpop.f32.mrb[108].mxu1  ;;  %v4097_v20 = vadd.f32 %v9434_v59, %v6051_v49 }
 0x574   : > { %v6162_v2 = vpop.f32.mrb[109].mxu1 }
 0x575   : > { %v6163_v14 = vadd.f32 %v6162_v2, %v6161_v34  ;;  %v6164_v0 = vpop.f32.mrb[110].mxu1  ;;  %v4100_v48 = vadd.f32 %v9434_v59, %v6054_v41 }
 0x576   : > { %v6165_v40 = vpop.f32.mrb[111].mxu1 }
 0x577   : > { %v9570_v55 = vadd.f32 %v6163_v14, %v4097_v20  ;;  %v6166_v27 = vadd.f32 %v6165_v40, %v6164_v0  ;;  %v6183_v10 = vpop.f32.mrb[80].mxu0 }
 0x578   : > { %v6184_v12 = vpop.f32.mrb[81].mxu0 }
 0x579   : > { %v9572_v45 = vadd.f32 %v6166_v27, %v4100_v48  ;;  %v6185_v8 = vadd.f32 %v6184_v12, %v6183_v10  ;;  %v6186_v6 = vpop.f32.mrb[82].mxu0 }
 0x57a   : > { %v6187_v28 = vpop.f32.mrb[83].mxu0 }
 0x57b   : > { %v4299_v43 = vadd.f32 %v6185_v8, %v9441_v47  ;;  %v6188_v33 = vadd.f32 %v6187_v28, %v6186_v6  ;;  %v6295_v18 = vpop.f32.mrb[112].mxu1 }
 0x57c   : > { %v6296_v31 = vpop.f32.mrb[113].mxu1 }
 0x57d   : > { %v4302_v50 = vadd.f32 %v6188_v33, %v9444_v53  ;;  %v6297_v22 = vadd.f32 %v6296_v31, %v6295_v18  ;;  %v6298_v36 = vpop.f32.mrb[114].mxu1 }
 0x57e   : > { %v6299_v59 = vpop.f32.mrb[115].mxu1 }
 0x57f   : > { %v6189_v1 = vpop.f32.mrb[84].mxu0  ;;  %v6300_v51 = vadd.f32 %v6299_v59, %v6298_v36  ;;  %v9576_v17 = vadd.f32 %v6297_v22, %v4299_v43 }
 0x580   : > { %v6190_v4 = vpop.f32.mrb[85].mxu0 }
 0x581   : > { %v6191_v37 = vadd.f32 %v6190_v4, %v6189_v1  ;;  %v6192_v21 = vpop.f32.mrb[86].mxu0  ;;  %v9578_v29 = vadd.f32 %v6300_v51, %v4302_v50 }
 0x582   : > { %v6193_v49 = vpop.f32.mrb[87].mxu0 }
 0x583   : > { %v4307_v47 = vadd.f32 %v6191_v37, %v9451_v3  ;;  %v6194_v46 = vadd.f32 %v6193_v49, %v6192_v21  ;;  %v6301_v13 = vpop.f32.mrb[116].mxu1 }
 0x584   : > { %v6302_v41 = vpop.f32.mrb[117].mxu1 }
 0x585   : > { %v4310_v53 = vadd.f32 %v6194_v46, %v9454_v26  ;;  %v6303_v34 = vadd.f32 %v6302_v41, %v6301_v13  ;;  %v6304_v2 = vpop.f32.mrb[118].mxu1 }
 0x586   : > { %v6305_v20 = vpop.f32.mrb[119].mxu1 }
 0x587   : > { %v6195_v14 = vpop.f32.mrb[88].mxu0  ;;  %v6306_v0 = vadd.f32 %v6305_v20, %v6304_v2  ;;  %v9582_v40 = vadd.f32 %v6303_v34, %v4307_v47 }
 0x588   : > { %v6196_v48 = vpop.f32.mrb[89].mxu0 }
 0x589   : > { %v6197_v27 = vadd.f32 %v6196_v48, %v6195_v14  ;;  %v6198_v10 = vpop.f32.mrb[90].mxu0  ;;  %v9584_v12 = vadd.f32 %v6306_v0, %v4310_v53 }
 0x58a   : > { %v6199_v8 = vpop.f32.mrb[91].mxu0 }
 0x58b   : > { %v4315_v3 = vadd.f32 %v6197_v27, %v9464_v23  ;;  %v6200_v6 = vadd.f32 %v6199_v8, %v6198_v10  ;;  %v6307_v28 = vpop.f32.mrb[120].mxu1 }
 0x58c   : > { %v6308_v43 = vpop.f32.mrb[121].mxu1 }
 0x58d   : > { %v4318_v26 = vadd.f32 %v6200_v6, %v9467_v54  ;;  %v6309_v33 = vadd.f32 %v6308_v43, %v6307_v28  ;;  %v6310_v18 = vpop.f32.mrb[122].mxu1 }
 0x58e   : > { %v6311_v31 = vpop.f32.mrb[123].mxu1 }
 0x58f   : > { %v6201_v50 = vpop.f32.mrb[92].mxu0  ;;  %v6312_v22 = vadd.f32 %v6311_v31, %v6310_v18  ;;  %v9588_v36 = vadd.f32 %v6309_v33, %v4315_v3 }
 0x590   : > { %v6202_v59 = vpop.f32.mrb[93].mxu0 }
 0x591   : > { %v6203_v1 = vadd.f32 %v6202_v59, %v6201_v50  ;;  %v6204_v51 = vpop.f32.mrb[94].mxu0  ;;  %v9590_v4 = vadd.f32 %v6312_v22, %v4318_v26 }
 0x592   : > { %v6205_v37 = vpop.f32.mrb[95].mxu0 }
 0x593   : > { %v4323_v23 = vadd.f32 %v6203_v1, %v9476_v61  ;;  %v6206_v21 = vadd.f32 %v6205_v37, %v6204_v51  ;;  %v6313_v49 = vpop.f32.mrb[124].mxu1 }
 0x594   : > { %v6314_v47 = vpop.f32.mrb[125].mxu1 }
 0x595   : > { %v4326_v54 = vadd.f32 %v6206_v21, %v9479_v56  ;;  %v6315_v46 = vadd.f32 %v6314_v47, %v6313_v49  ;;  %v6316_v13 = vpop.f32.mrb[126].mxu1 }
 0x596   : > { %v6317_v41 = vpop.f32.mrb[127].mxu1 }
 0x597   : > { %v6207_v53 = vpop.f32.mrb[96].mxu0  ;;  %v6318_v34 = vadd.f32 %v6317_v41, %v6316_v13  ;;  %v9594_v2 = vadd.f32 %v6315_v46, %v4323_v23 }
 0x598   : > { %v6208_v20 = vpop.f32.mrb[97].mxu0 }
 0x599   : > { %v6209_v14 = vadd.f32 %v6208_v20, %v6207_v53  ;;  %v6210_v0 = vpop.f32.mrb[98].mxu0  ;;  %v9596_v48 = vadd.f32 %v6318_v34, %v4326_v54 }
 0x59a   : > { %v6211_v27 = vpop.f32.mrb[99].mxu0 }
 0x59b   : > { %v4331_v61 = vadd.f32 %v6209_v14, %v9487_v62  ;;  %v6212_v10 = vadd.f32 %v6211_v27, %v6210_v0  ;;  %v6319_v8 = vpop.f32.mrb[128].mxu1 }
 0x59c   : > { %v6320_v3 = vpop.f32.mrb[129].mxu1 }
 0x59d   : > { %v4334_v56 = vadd.f32 %v6212_v10, %v9489_v63  ;;  %v6321_v6 = vadd.f32 %v6320_v3, %v6319_v8  ;;  %v6322_v28 = vpop.f32.mrb[130].mxu1 }
 0x59e   : > { %v6323_v43 = vpop.f32.mrb[131].mxu1 }
 0x59f   : > { %v6213_v26 = vpop.f32.mrb[100].mxu0  ;;  %v6324_v33 = vadd.f32 %v6323_v43, %v6322_v28  ;;  %v9600_v18 = vadd.f32 %v6321_v6, %v4331_v61 }
 0x5a0   : > { %v6214_v31 = vpop.f32.mrb[101].mxu0 }
 0x5a1   : > { %v6215_v50 = vadd.f32 %v6214_v31, %v6213_v26  ;;  %v6216_v22 = vpop.f32.mrb[102].mxu0  ;;  %v9602_v59 = vadd.f32 %v6324_v33, %v4334_v56 }
 0x5a2   : > { %v6217_v1 = vpop.f32.mrb[103].mxu0 }
 0x5a3   : > { %v4339_v62 = vadd.f32 %v6215_v50, %v9495_v5  ;;  %v6218_v51 = vadd.f32 %v6217_v1, %v6216_v22  ;;  %v6325_v37 = vpop.f32.mrb[132].mxu1 }
 0x5a4   : > { %v6326_v23 = vpop.f32.mrb[133].mxu1 }
 0x5a5   : > { %v4342_v63 = vadd.f32 %v6218_v51, %v9497_v24  ;;  %v6327_v21 = vadd.f32 %v6326_v23, %v6325_v37  ;;  %v6328_v49 = vpop.f32.mrb[134].mxu1 }
 0x5a6   : > { %v6329_v47 = vpop.f32.mrb[135].mxu1 }
 0x5a7   : > { %v6219_v54 = vpop.f32.mrb[104].mxu0  ;;  %v6330_v46 = vadd.f32 %v6329_v47, %v6328_v49  ;;  %v9606_v13 = vadd.f32 %v6327_v21, %v4339_v62 }
 0x5a8   : > { %v6220_v41 = vpop.f32.mrb[105].mxu0 }
 0x5a9   : > { %v6221_v53 = vadd.f32 %v6220_v41, %v6219_v54  ;;  %v6222_v34 = vpop.f32.mrb[106].mxu0  ;;  %v9608_v20 = vadd.f32 %v6330_v46, %v4342_v63 }
 0x5aa   : > { %v6223_v14 = vpop.f32.mrb[107].mxu0 }
 0x5ab   : > { %v4347_v5 = vadd.f32 %v6221_v53, %v9503_v39  ;;  %v6224_v0 = vadd.f32 %v6223_v14, %v6222_v34  ;;  %v6331_v27 = vpop.f32.mrb[136].mxu1 }
 0x5ac   : > { %v6332_v61 = vpop.f32.mrb[137].mxu1 }
 0x5ad   : > { %v4350_v24 = vadd.f32 %v6224_v0, %v9505_v35  ;;  %v6333_v10 = vadd.f32 %v6332_v61, %v6331_v27  ;;  %v6334_v8 = vpop.f32.mrb[138].mxu1 }
 0x5ae   : > { %v6335_v3 = vpop.f32.mrb[139].mxu1 }
 0x5af   : > { %v6225_v56 = vpop.f32.mrb[108].mxu0  ;;  %v6336_v6 = vadd.f32 %v6335_v3, %v6334_v8  ;;  %v9612_v28 = vadd.f32 %v6333_v10, %v4347_v5 }
 0x5b0   : > { %v6226_v43 = vpop.f32.mrb[109].mxu0 }
 0x5b1   : > { %v6227_v26 = vadd.f32 %v6226_v43, %v6225_v56  ;;  %v6228_v33 = vpop.f32.mrb[110].mxu0  ;;  %v9614_v31 = vadd.f32 %v6336_v6, %v4350_v24 }
 0x5b2   : > { %v6229_v50 = vpop.f32.mrb[111].mxu0 }
 0x5b3   : > { %v4355_v39 = vadd.f32 %v6227_v26, %v9511_v30  ;;  %v6230_v22 = vadd.f32 %v6229_v50, %v6228_v33  ;;  %v6337_v1 = vpop.f32.mrb[140].mxu1 }
 0x5b4   : > { %v6338_v62 = vpop.f32.mrb[141].mxu1 }
 0x5b5   : > { %v4358_v35 = vadd.f32 %v6230_v22, %v9513_v38  ;;  %v6339_v51 = vadd.f32 %v6338_v62, %v6337_v1  ;;  %v6340_v37 = vpop.f32.mrb[142].mxu1 }
 0x5b6   : > { %v6341_v23 = vpop.f32.mrb[143].mxu1 }
 0x5b7   : > { %v6231_v63 = vpop.f32.mrb[112].mxu0  ;;  %v6342_v21 = vadd.f32 %v6341_v23, %v6340_v37  ;;  %v9618_v49 = vadd.f32 %v6339_v51, %v4355_v39 }
 0x5b8   : > { %v6232_v47 = vpop.f32.mrb[113].mxu0 }
 0x5b9   : > { %v6233_v54 = vadd.f32 %v6232_v47, %v6231_v63  ;;  %v6234_v46 = vpop.f32.mrb[114].mxu0  ;;  %v9620_v41 = vadd.f32 %v6342_v21, %v4358_v35 }
 0x5ba   : > { %v6235_v53 = vpop.f32.mrb[115].mxu0 }
 0x5bb   : > { %v4363_v30 = vadd.f32 %v6233_v54, %v9519_v57  ;;  %v6236_v34 = vadd.f32 %v6235_v53, %v6234_v46  ;;  %v6343_v14 = vpop.f32.mrb[144].mxu1 }
 0x5bc   : > { %v6344_v5 = vpop.f32.mrb[145].mxu1 }
 0x5bd   : > { %v4366_v38 = vadd.f32 %v6236_v34, %v9521_v52  ;;  %v6345_v0 = vadd.f32 %v6344_v5, %v6343_v14  ;;  %v6346_v27 = vpop.f32.mrb[146].mxu1 }
 0x5be   : > { %v6347_v61 = vpop.f32.mrb[147].mxu1 }
 0x5bf   : > { %v6237_v24 = vpop.f32.mrb[116].mxu0  ;;  %v6348_v10 = vadd.f32 %v6347_v61, %v6346_v27  ;;  %v9624_v8 = vadd.f32 %v6345_v0, %v4363_v30 }
 0x5c0   : > { %v6238_v3 = vpop.f32.mrb[117].mxu0 }
 0x5c1   : > { %v6239_v56 = vadd.f32 %v6238_v3, %v6237_v24  ;;  %v6240_v6 = vpop.f32.mrb[118].mxu0  ;;  %v9626_v43 = vadd.f32 %v6348_v10, %v4366_v38 }
 0x5c2   : > { %v6241_v26 = vpop.f32.mrb[119].mxu0 }
 0x5c3   : > { %v4371_v57 = vadd.f32 %v6239_v56, %v9527_v16  ;;  %v6242_v33 = vadd.f32 %v6241_v26, %v6240_v6  ;;  %v6349_v50 = vpop.f32.mrb[148].mxu1 }
 0x5c4   : > { %v6350_v39 = vpop.f32.mrb[149].mxu1 }
 0x5c5   : > { %v4374_v52 = vadd.f32 %v6242_v33, %v9529_v42  ;;  %v6351_v22 = vadd.f32 %v6350_v39, %v6349_v50  ;;  %v6352_v1 = vpop.f32.mrb[150].mxu1 }
 0x5c6   : > { %v6353_v62 = vpop.f32.mrb[151].mxu1 }
 0x5c7   : > { %v6243_v35 = vpop.f32.mrb[120].mxu0  ;;  %v6354_v51 = vadd.f32 %v6353_v62, %v6352_v1  ;;  %v9630_v37 = vadd.f32 %v6351_v22, %v4371_v57 }
 0x5c8   : > { %v6244_v23 = vpop.f32.mrb[121].mxu0 }
 0x5c9   : > { %v6245_v63 = vadd.f32 %v6244_v23, %v6243_v35  ;;  %v6246_v21 = vpop.f32.mrb[122].mxu0  ;;  %v9632_v47 = vadd.f32 %v6354_v51, %v4374_v52 }
 0x5ca   : > { %v6247_v54 = vpop.f32.mrb[123].mxu0 }
 0x5cb   : > { %v4379_v16 = vadd.f32 %v6245_v63, %v9535_v44  ;;  %v6248_v46 = vadd.f32 %v6247_v54, %v6246_v21  ;;  %v6355_v53 = vpop.f32.mrb[152].mxu1 }
 0x5cc   : > { %v6356_v30 = vpop.f32.mrb[153].mxu1 }
 0x5cd   : > { %v4382_v42 = vadd.f32 %v6248_v46, %v9537_v15  ;;  %v6357_v34 = vadd.f32 %v6356_v30, %v6355_v53  ;;  %v6358_v14 = vpop.f32.mrb[154].mxu1 }
 0x5ce   : > { %v6359_v5 = vpop.f32.mrb[155].mxu1 }
 0x5cf   : > { %v6249_v38 = vpop.f32.mrb[124].mxu0  ;;  %v6360_v0 = vadd.f32 %v6359_v5, %v6358_v14  ;;  %v9636_v27 = vadd.f32 %v6357_v34, %v4379_v16 }
 0x5d0   : > { %v6250_v61 = vpop.f32.mrb[125].mxu0 }
 0x5d1   : > { %v6251_v24 = vadd.f32 %v6250_v61, %v6249_v38  ;;  %v6252_v10 = vpop.f32.mrb[126].mxu0  ;;  %v9638_v3 = vadd.f32 %v6360_v0, %v4382_v42 }
 0x5d2   : > { %v6253_v56 = vpop.f32.mrb[127].mxu0 }
 0x5d3   : > { %v4387_v44 = vadd.f32 %v6251_v24, %v9543_v58  ;;  %v6254_v6 = vadd.f32 %v6253_v56, %v6252_v10  ;;  %v6361_v26 = vpop.f32.mrb[156].mxu1 }
 0x5d4   : > { %v6362_v57 = vpop.f32.mrb[157].mxu1 }
 0x5d5   : > { %v4390_v15 = vadd.f32 %v6254_v6, %v9545_v60  ;;  %v6363_v33 = vadd.f32 %v6362_v57, %v6361_v26  ;;  %v6364_v50 = vpop.f32.mrb[158].mxu1 }
 0x5d6   : > { %v6365_v39 = vpop.f32.mrb[159].mxu1 }
 0x5d7   : > { %v6255_v52 = vpop.f32.mrb[128].mxu0  ;;  %v6366_v22 = vadd.f32 %v6365_v39, %v6364_v50  ;;  %v9642_v1 = vadd.f32 %v6363_v33, %v4387_v44 }
 0x5d8   : > { %v6256_v62 = vpop.f32.mrb[129].mxu0 }
 0x5d9   : > { %v6257_v35 = vadd.f32 %v6256_v62, %v6255_v52  ;;  %v6258_v51 = vpop.f32.mrb[130].mxu0  ;;  %v9644_v23 = vadd.f32 %v6366_v22, %v4390_v15 }
 0x5da   : > { %v6259_v63 = vpop.f32.mrb[131].mxu0 }
 0x5db   : > { %v4395_v58 = vadd.f32 %v6257_v35, %v9552_v32  ;;  %v6260_v21 = vadd.f32 %v6259_v63, %v6258_v51  ;;  %v6367_v54 = vpop.f32.mrb[160].mxu1 }
 0x5dc   : > { %v6368_v16 = vpop.f32.mrb[161].mxu1 }
 0x5dd   : > { %v4398_v60 = vadd.f32 %v6260_v21, %v9554_v7  ;;  %v6369_v46 = vadd.f32 %v6368_v16, %v6367_v54  ;;  %v6370_v53 = vpop.f32.mrb[162].mxu1 }
 0x5de   : > { %v6371_v30 = vpop.f32.mrb[163].mxu1 }
 0x5df   : > { %v6261_v42 = vpop.f32.mrb[132].mxu0  ;;  %v6372_v34 = vadd.f32 %v6371_v30, %v6370_v53  ;;  %v9648_v14 = vadd.f32 %v6369_v46, %v4395_v58 }
 0x5e0   : > { %v6262_v5 = vpop.f32.mrb[133].mxu0 }
 0x5e1   : > { %v6263_v38 = vadd.f32 %v6262_v5, %v6261_v42  ;;  %v6264_v0 = vpop.f32.mrb[134].mxu0  ;;  %v9650_v61 = vadd.f32 %v6372_v34, %v4398_v60 }
 0x5e2   : > { %v6265_v24 = vpop.f32.mrb[135].mxu0 }
 0x5e3   : > { %v4403_v32 = vadd.f32 %v6263_v38, %v9558_v25  ;;  %v6266_v10 = vadd.f32 %v6265_v24, %v6264_v0  ;;  %v6373_v56 = vpop.f32.mrb[164].mxu1 }
 0x5e4   : > { %v6374_v44 = vpop.f32.mrb[165].mxu1 }
 0x5e5   : > { %v4406_v7 = vadd.f32 %v6266_v10, %v9560_v9  ;;  %v6375_v6 = vadd.f32 %v6374_v44, %v6373_v56  ;;  %v6376_v26 = vpop.f32.mrb[166].mxu1 }
 0x5e6   : > { %v6377_v57 = vpop.f32.mrb[167].mxu1 }
 0x5e7   : > { %v6267_v15 = vpop.f32.mrb[136].mxu0  ;;  %v6378_v33 = vadd.f32 %v6377_v57, %v6376_v26  ;;  %v9654_v50 = vadd.f32 %v6375_v6, %v4403_v32 }
 0x5e8   : > { %v6268_v39 = vpop.f32.mrb[137].mxu0 }
 0x5e9   : > { %v6269_v52 = vadd.f32 %v6268_v39, %v6267_v15  ;;  %v6270_v22 = vpop.f32.mrb[138].mxu0  ;;  %v9656_v62 = vadd.f32 %v6378_v33, %v4406_v7 }
 0x5ea   : > { %v6271_v35 = vpop.f32.mrb[139].mxu0 }
 0x5eb   : > { %v4411_v25 = vadd.f32 %v6269_v52, %v9564_v19  ;;  %v6272_v51 = vadd.f32 %v6271_v35, %v6270_v22  ;;  %v6379_v63 = vpop.f32.mrb[168].mxu1 }
 0x5ec   : > { %v6380_v58 = vpop.f32.mrb[169].mxu1 }
 0x5ed   : > { %v4414_v9 = vadd.f32 %v6272_v51, %v9566_v11  ;;  %v6381_v21 = vadd.f32 %v6380_v58, %v6379_v63  ;;  %v6382_v54 = vpop.f32.mrb[170].mxu1 }
 0x5ee   : > { %v6383_v16 = vpop.f32.mrb[171].mxu1 }
 0x5ef   : > { %v6273_v60 = vpop.f32.mrb[140].mxu0  ;;  %v6384_v46 = vadd.f32 %v6383_v16, %v6382_v54  ;;  %v9660_v53 = vadd.f32 %v6381_v21, %v4411_v25 }
 0x5f0   : > { %v6274_v30 = vpop.f32.mrb[141].mxu0 }
 0x5f1   : > { %v6275_v42 = vadd.f32 %v6274_v30, %v6273_v60  ;;  %v6276_v34 = vpop.f32.mrb[142].mxu0  ;;  %v9662_v5 = vadd.f32 %v6384_v46, %v4414_v9 }
 0x5f2   : > { %v6277_v38 = vpop.f32.mrb[143].mxu0 }
 0x5f3   : > { %v4419_v19 = vadd.f32 %v6275_v42, %v9570_v55  ;;  %v6278_v0 = vadd.f32 %v6277_v38, %v6276_v34  ;;  %v6385_v24 = vpop.f32.mrb[172].mxu1 }
 0x5f4   : > { %v6386_v32 = vpop.f32.mrb[173].mxu1 }
 0x5f5   : > { %v4422_v11 = vadd.f32 %v6278_v0, %v9572_v45  ;;  %v6387_v10 = vadd.f32 %v6386_v32, %v6385_v24  ;;  %v6388_v56 = vpop.f32.mrb[174].mxu1 }
 0x5f6   : > { %v6389_v44 = vpop.f32.mrb[175].mxu1 }
 0x5f7   : > { %v6390_v7 = vadd.f32 %v6389_v44, %v6388_v56  ;;  %v6529_v6 = vpop.f32.mrb[144].mxu0  ;;  %v9666_v26 = vadd.f32 %v6387_v10, %v4419_v19 }
 0x5f8   : > { %v4629_v57 = vadd.f32 %v6529_v6, %v9582_v40  ;;  %v4620_v15 = vpop.f32.mrb[145].mxu0 }
 0x5f9   : > { %v4621_v33 = vadd.f32 %v4620_v15, %v9576_v17  ;;  %v6530_v39 = vpop.f32.mrb[146].mxu0  ;;  %v9670_v55 = vadd.f32 %v6390_v7, %v4422_v11 }
 0x5fa   : > { %v4749_v52 = vmax.f32 %v4629_v57, 0.0  ;;  %v4632_v22 = vadd.f32 %v6530_v39, %v9584_v12  ;;  %v4623_v45 = vpop.f32.mrb[147].mxu0 }
 0x5fb   : > { %v4747_v35 = vmax.f32 %v4621_v33, 0.0  ;;  %v4624_v25 = vadd.f32 %v4623_v45, %v9578_v29 }
 0x5fc   : > { %4781 = vst [vmem:[%s9676_s10 + $0x10] sm:$0xff] %v4749_v52  ;;  %v4750_v17 = vmax.f32 %v4632_v22, 0.0 }
 0x5fd   : > { %4779 = vst [vmem:[%s9676_s10] sm:$0xff] %v4747_v35  ;;  %v4748_v40 = vmax.f32 %v4624_v25, 0.0 }
 0x5fe   : > { %4782 = vst [vmem:[%s9676_s10 + $0x18] sm:$0xff] %v4750_v17 }
 0x5ff   : > { %4780 = vst [vmem:[%s9676_s10 + $0x8] sm:$0xff] %v4748_v40  ;;  %v6533_v12 = vpop.f32.mrb[148].mxu0 }
 0x600   : > { %v4645_v29 = vadd.f32 %v6533_v12, %v9594_v2  ;;  %v4636_v51 = vpop.f32.mrb[149].mxu0 }
 0x601   : > { %v4637_v63 = vadd.f32 %v4636_v51, %v9588_v36  ;;  %v6534_v58 = vpop.f32.mrb[150].mxu0 }
 0x602   : > { %v4753_v9 = vmax.f32 %v4645_v29, 0.0  ;;  %v4648_v21 = vadd.f32 %v6534_v58, %v9596_v48  ;;  %v4639_v54 = vpop.f32.mrb[151].mxu0 }
 0x603   : > { %v4751_v16 = vmax.f32 %v4637_v63, 0.0  ;;  %v4640_v60 = vadd.f32 %v4639_v54, %v9590_v4 }
 0x604   : > { %4785 = vst [vmem:[%s9676_s10 + $0x30] sm:$0xff] %v4753_v9  ;;  %v4754_v46 = vmax.f32 %v4648_v21, 0.0 }
 0x605   : > { %4783 = vst [vmem:[%s9676_s10 + $0x20] sm:$0xff] %v4751_v16  ;;  %v4752_v30 = vmax.f32 %v4640_v60, 0.0 }
 0x606   : > { %4786 = vst [vmem:[%s9676_s10 + $0x38] sm:$0xff] %v4754_v46 }
 0x607   : > { %4784 = vst [vmem:[%s9676_s10 + $0x28] sm:$0xff] %v4752_v30  ;;  %v6537_v2 = vpop.f32.mrb[152].mxu0 }
 0x608   : > { %v4661_v36 = vadd.f32 %v6537_v2, %v9606_v13  ;;  %v4652_v42 = vpop.f32.mrb[153].mxu0 }
 0x609   : > { %v4653_v48 = vadd.f32 %v4652_v42, %v9600_v18  ;;  %v6538_v34 = vpop.f32.mrb[154].mxu0 }
 0x60a   : > { %v4757_v38 = vmax.f32 %v4661_v36, 0.0  ;;  %v4664_v4 = vadd.f32 %v6538_v34, %v9608_v20  ;;  %v4655_v19 = vpop.f32.mrb[155].mxu0 }
 0x60b   : > { %v4755_v0 = vmax.f32 %v4653_v48, 0.0  ;;  %v4656_v24 = vadd.f32 %v4655_v19, %v9602_v59 }
 0x60c   : > { %4789 = vst [vmem:[%s9676_s10 + $0x50] sm:$0xff] %v4757_v38  ;;  %v4758_v32 = vmax.f32 %v4664_v4, 0.0 }
 0x60d   : > { %4787 = vst [vmem:[%s9676_s10 + $0x40] sm:$0xff] %v4755_v0  ;;  %v4756_v11 = vmax.f32 %v4656_v24, 0.0 }
 0x60e   : > { %4790 = vst [vmem:[%s9676_s10 + $0x58] sm:$0xff] %v4758_v32 }
 0x60f   : > { %4788 = vst [vmem:[%s9676_s10 + $0x48] sm:$0xff] %v4756_v11  ;;  %v6541_v13 = vpop.f32.mrb[156].mxu0 }
 0x610   : > { %v4677_v18 = vadd.f32 %v6541_v13, %v9618_v49  ;;  %v4668_v10 = vpop.f32.mrb[157].mxu0 }
 0x611   : > { %v4669_v20 = vadd.f32 %v4668_v10, %v9612_v28  ;;  %v6542_v56 = vpop.f32.mrb[158].mxu0 }
 0x612   : > { %v4761_v44 = vmax.f32 %v4677_v18, 0.0  ;;  %v4680_v59 = vadd.f32 %v6542_v56, %v9620_v41  ;;  %v4671_v7 = vpop.f32.mrb[159].mxu0 }
 0x613   : > { %v4759_v6 = vmax.f32 %v4669_v20, 0.0  ;;  %v4672_v57 = vadd.f32 %v4671_v7, %v9614_v31 }
 0x614   : > { %4793 = vst [vmem:[%s9676_s10 + $0x70] sm:$0xff] %v4761_v44  ;;  %v4762_v15 = vmax.f32 %v4680_v59, 0.0 }
 0x615   : > { %4791 = vst [vmem:[%s9676_s10 + $0x60] sm:$0xff] %v4759_v6  ;;  %v4760_v33 = vmax.f32 %v4672_v57, 0.0 }
 0x616   : > { %4794 = vst [vmem:[%s9676_s10 + $0x78] sm:$0xff] %v4762_v15 }
 0x617   : > { %4792 = vst [vmem:[%s9676_s10 + $0x68] sm:$0xff] %v4760_v33  ;;  %v6545_v49 = vpop.f32.mrb[160].mxu0 }
 0x618   : > { %v4693_v28 = vadd.f32 %v6545_v49, %v9630_v37  ;;  %v4684_v39 = vpop.f32.mrb[161].mxu0 }
 0x619   : > { %v4685_v41 = vadd.f32 %v4684_v39, %v9624_v8  ;;  %v6546_v52 = vpop.f32.mrb[162].mxu0 }
 0x61a   : > { %v4765_v22 = vmax.f32 %v4693_v28, 0.0  ;;  %v4696_v31 = vadd.f32 %v6546_v52, %v9632_v47  ;;  %v4687_v45 = vpop.f32.mrb[163].mxu0 }
 0x61b   : > { %v4763_v35 = vmax.f32 %v4685_v41, 0.0  ;;  %v4688_v25 = vadd.f32 %v4687_v45, %v9626_v43 }
 0x61c   : > { %4797 = vst [vmem:[%s9676_s10 + $0x90] sm:$0xff] %v4765_v22  ;;  %v4766_v17 = vmax.f32 %v4696_v31, 0.0 }
 0x61d   : > { %4795 = vst [vmem:[%s9676_s10 + $0x80] sm:$0xff] %v4763_v35  ;;  %v4764_v40 = vmax.f32 %v4688_v25, 0.0 }
 0x61e   : > { %4798 = vst [vmem:[%s9676_s10 + $0x98] sm:$0xff] %v4766_v17 }
 0x61f   : > { %4796 = vst [vmem:[%s9676_s10 + $0x88] sm:$0xff] %v4764_v40  ;;  %v6549_v37 = vpop.f32.mrb[164].mxu0 }
 0x620   : > { %v4709_v8 = vadd.f32 %v6549_v37, %v9642_v1  ;;  %v4700_v12 = vpop.f32.mrb[165].mxu0 }
 0x621   : > { %v4701_v47 = vadd.f32 %v4700_v12, %v9636_v27  ;;  %v6550_v29 = vpop.f32.mrb[166].mxu0 }
 0x622   : > { %v4769_v51 = vmax.f32 %v4709_v8, 0.0  ;;  %v4712_v43 = vadd.f32 %v6550_v29, %v9644_v23  ;;  %v4703_v63 = vpop.f32.mrb[167].mxu0 }
 0x623   : > { %v4767_v58 = vmax.f32 %v4701_v47, 0.0  ;;  %v4704_v9 = vadd.f32 %v4703_v63, %v9638_v3 }
 0x624   : > { %4801 = vst [vmem:[%s9676_s10 + $0xb0] sm:$0xff] %v4769_v51  ;;  %v4770_v21 = vmax.f32 %v4712_v43, 0.0 }
 0x625   : > { %4799 = vst [vmem:[%s9676_s10 + $0xa0] sm:$0xff] %v4767_v58  ;;  %v4768_v54 = vmax.f32 %v4704_v9, 0.0 }
 0x626   : > { %4802 = vst [vmem:[%s9676_s10 + $0xb8] sm:$0xff] %v4770_v21 }
 0x627   : > { %4800 = vst [vmem:[%s9676_s10 + $0xa8] sm:$0xff] %v4768_v54  ;;  %v6553_v1 = vpop.f32.mrb[168].mxu0 }
 0x628   : > { %v4725_v27 = vadd.f32 %v6553_v1, %v9654_v50  ;;  %v4716_v16 = vpop.f32.mrb[169].mxu0 }
 0x629   : > { %v4717_v23 = vadd.f32 %v4716_v16, %v9648_v14  ;;  %v6554_v60 = vpop.f32.mrb[170].mxu0 }
 0x62a   : > { %v4773_v46 = vmax.f32 %v4725_v27, 0.0  ;;  %v4728_v3 = vadd.f32 %v6554_v60, %v9656_v62  ;;  %v4719_v30 = vpop.f32.mrb[171].mxu0 }
 0x62b   : > { %v4771_v2 = vmax.f32 %v4717_v23, 0.0  ;;  %v4720_v36 = vadd.f32 %v4719_v30, %v9650_v61 }
 0x62c   : > { %4805 = vst [vmem:[%s9676_s10 + $0xd0] sm:$0xff] %v4773_v46  ;;  %v4774_v42 = vmax.f32 %v4728_v3, 0.0 }
 0x62d   : > { %4803 = vst [vmem:[%s9676_s10 + $0xc0] sm:$0xff] %v4771_v2  ;;  %v4772_v48 = vmax.f32 %v4720_v36, 0.0 }
 0x62e   : > { %4806 = vst [vmem:[%s9676_s10 + $0xd8] sm:$0xff] %v4774_v42 }
 0x62f   : > { %4804 = vst [vmem:[%s9676_s10 + $0xc8] sm:$0xff] %v4772_v48  ;;  %v6557_v50 = vpop.f32.mrb[172].mxu0 }
 0x630   : > { %v4741_v14 = vadd.f32 %v6557_v50, %v9666_v26  ;;  %v4732_v34 = vpop.f32.mrb[173].mxu0 }
 0x631   : > { %v4733_v62 = vadd.f32 %v4732_v34, %v9660_v53  ;;  %v6558_v38 = vpop.f32.mrb[174].mxu0 }
 0x632   : > { %v4777_v61 = vmax.f32 %v4741_v14, 0.0  ;;  %v4744_v4 = vadd.f32 %v6558_v38, %v9670_v55  ;;  %v4735_v19 = vpop.f32.mrb[175].mxu0 }
 0x633   : > { %v4775_v0 = vmax.f32 %v4733_v62, 0.0  ;;  %v4736_v24 = vadd.f32 %v4735_v19, %v9662_v5 }
 0x634   : > { %4809 = vst [vmem:[%s9676_s10 + $0xf0] sm:$0xff] %v4777_v61  ;;  %v4778_v32 = vmax.f32 %v4744_v4, 0.0 }
 0x635   : > { %4807 = vst [vmem:[%s9676_s10 + $0xe0] sm:$0xff] %v4775_v0  ;;  %v4776_v53 = vmax.f32 %v4736_v24, 0.0 }
 0x636   : > { %4810 = vst [vmem:[%s9676_s10 + $0xf8] sm:$0xff] %v4778_v32 }
 0x637   : > { %4808 = vst [vmem:[%s9676_s10 + $0xe8] sm:$0xff] %v4776_v53 }
 0x638   : > { %6970 = shalt.err (!%p6967_p7)
}
 0x639   : > { %s6971_s9 = scalar_lea.hbm %s9740_s23, 4096  ;;  %s6975_s4 = scalar_lea.hbm %s9792_s3, 8192 }
 0x63a   : > { %p6972_p9 = scmp.ne.s32.totalorder %s9740_s23, %s6971_s9  ;;  %p6976_p5 = scmp.lt.u32.totalorder %s9740_s23, %s9792_s3 }
 0x63b   : > { %p6977_p11 = scmp.lt.u32.totalorder %s6975_s4, %s6971_s9  ;;  %p6979_p4 = scmp.lt.u32.totalorder %s6971_s9, %s9740_s23 }
 0x63c   : > { %p6973_p2 = pnand %p6972_p9, %p7150_p12 }
 0x63d   : > { %p6978_p1 = por %p6977_p11, %p6976_p5 }
 0x63e   : > { %p6974_p0 = pneg %p6973_p2 }
 0x63f   : > { %p6980_p6 = por %p6979_p4, %p6978_p1 }
 0x641   : > { %p6981_p8 = pnand %p6980_p6, %p6974_p0 }
 0x643   : > { %6984 = shalt.err (!%p6981_p8)
}
 0x644   : > { %s7037_s5 = smov 128   ;;  %s7038_s10 = smov 8  }
 0x645   : > { %6581 = dma.vmem_to_hbm [thread:$0]  (%p7150_p12), %s9742_s27, 4096, %s9740_s23, %s4812_s16, %s7037_s5, %s7037_s5, %s7038_s10  }
 0x646 PF: > { %s4840_s11 = sand.u32 1, %s7015_s12   ;;  %p9918_p10 = scmp.ne.s32.totalorder %s9836_s19, 0 }
 0x647   : > { %p9919_p13 = scmp.ge.s32.totalorder %s7027_s15, 2  ;;  %s4841_s28 = scalar_lea.sflag [#allocation5], %s4840_s11 }
 0x649   : > { %p6592_p3 = pnand %p9919_p13, %p9918_p10 }
 0x64b   : > { %7010 = dma.done.wait (!%p6592_p3), %s4841_s28, 4096  }
 0x64c   : > { %7012 = vsyncadd (!%p6592_p3), %s4841_s28, 4294963200  ;;  %p17_p7 = scmp.ge.s32.totalorder %s7115_s24, 4   ;;  %s9920_s12 = smov %s7019_s13 }
 0x64d   : > { %s9921_s13 = smov %s7023_s14  ;;  %s9922_s14 = smov %s7146_s17 }
 0x64e   : > { %s9923_s15 = smov %s7115_s24  ;;  %19 = sbr.rel (!%p17_p7) target bundleno = 6 (0x6), region = 83 }
 0x655   :  { %4846 = vsyncpa [#allocation4], 1 }
 0x656   :  { %4848 = vsyncpa [#allocation4 + $0x1], 1 }
 0x657   :  { %4849 = vsyncpa [#allocation7], 1 }
 0x658   :  { %4850 = vsyncpa [#allocation5], 1 }
 0x659   :  { %4852 = vsyncpa [#allocation5 + $0x1], 1 }

</bundles_post_ra>
